<compile_context>
chip_gen: v5e
topology: v5e:2x2
jax: 0.10.0
libtpu: 0.0.40
codegen_flags: <defaults>
</compile_context>

<pallas_src>
import functools
import math

import jax
import jax.numpy as jnp
from jax import lax
from jax.experimental import pallas as pl
from jax.experimental.pallas import tpu as pltpu


# ------------------------------ utilities ------------------------------------


def _round_up(v, m):
    return -(-v // m) * m


def _pad2(a, rows, cols):
    r, c = a.shape
    return jnp.pad(a, ((0, rows - r), (0, cols - c)))


def _tile_and_pad(n, target):
    """Node-axis tile size and padded node count (tile always divides padded)."""
    tile = min(target, _round_up(n, 128))
    return tile, _round_up(n, tile)


_COMPILER_PARAMS = dict(vmem_limit_bytes=32 * 1024 * 1024)  # headroom on v7x


# ----------------------- kernel 1: XW = x @ W + b -----------------------------


def _xw_kernel(x_ref, w_ref, b_ref, xw_ref):
    xw = jnp.dot(x_ref[...], w_ref[...],
                 preferred_element_type=jnp.float32) + b_ref[...]
    xw_ref[...] = xw.astype(xw_ref.dtype)


# ------------ kernel 2: z = leaky_relu(G @ XW); h = norm(proj(z)) -------------


def _branch_kernel(xw_ref, g_ref, w1_ref, b1_ref, w2_ref, b2_ref,
                   z_ref, h_ref, acc_ref):
    """Grid = (branch, row tile i, reduction tile k); k innermost."""
    k = pl.program_id(2)
    mm_dtype = g_ref.dtype

    @pl.when(k == 0)
    def _init():
        acc_ref[...] = jnp.zeros_like(acc_ref)

    acc_ref[...] += jnp.dot(g_ref[...], xw_ref[...],
                            preferred_element_type=jnp.float32)

    @pl.when(k == pl.num_programs(2) - 1)
    def _finalize():
        z = acc_ref[...]
        z = jnp.where(z > 0, z, 0.25 * z)                     # leaky_relu(0.25)
        z_ref[...] = z.astype(z_ref.dtype)

        hh = jnp.dot(z.astype(mm_dtype), w1_ref[...],
                     preferred_element_type=jnp.float32) + b1_ref[...]
        hh = jnp.where(hh > 0, hh, jnp.exp(hh) - 1.0)         # ELU (f32, EUP)
        h = jnp.dot(hh.astype(mm_dtype), w2_ref[...],
                    preferred_element_type=jnp.float32) + b2_ref[...]
        # F.normalize(h, p=2, dim=1) fused here: row tile is already resident.
        ss = jnp.sum(h * h, axis=1, keepdims=True)
        h = h * lax.rsqrt(jnp.maximum(ss, 1e-24))
        h_ref[...] = h.astype(h_ref.dtype)


def branches_forward(x1, g1, x2, g2, w_hg1, b_hg1, w_hg2, b_hg2,
                     w1, b1, w2, b2, *, use_bf16=True, tile=256):
    """Both CL_HGCN branches. Returns (z1, z2, h1_norm_pad, h2_norm_pad)."""
    n, in_ft = x1.shape
    hid = w_hg1.shape[1]
    proj = w1.shape[1]

    inp = _round_up(in_ft, 128)
    hidp = _round_up(hid, 128)
    projp = _round_up(proj, 128)
    tm, np_rows = _tile_and_pad(n, tile)
    tk = tm

    mm_dtype = jnp.bfloat16 if use_bf16 else jnp.float32
    h_dtype = mm_dtype

    # Zero-padded, lane-dense operands; branch axis stacked in front.
    x_s = jnp.stack([_pad2(x1, np_rows, inp),
                     _pad2(x2, np_rows, inp)]).astype(mm_dtype)
    g_s = jnp.stack([_pad2(g1, np_rows, np_rows),
                     _pad2(g2, np_rows, np_rows)]).astype(mm_dtype)
    w_s = jnp.stack([_pad2(w_hg1, inp, hidp),
                     _pad2(w_hg2, inp, hidp)]).astype(mm_dtype)
    b_s = jnp.stack([jnp.pad(b_hg1, (0, hidp - hid)).reshape(1, hidp),
                     jnp.pad(b_hg2, (0, hidp - hid)).reshape(1, hidp)]
                    ).astype(jnp.float32)

    # --- XW = x @ W + b (hoisted out of the G-reduction grid) ----------------
    xw = pl.pallas_call(
        _xw_kernel,
        out_shape=jax.ShapeDtypeStruct((2, np_rows, hidp), mm_dtype),
        grid_spec=pltpu.PrefetchScalarGridSpec(
            num_scalar_prefetch=0,
            grid=(2, np_rows // tm),
            in_specs=[
                pl.BlockSpec((None, tm, inp), lambda b, i: (b, i, 0)),
                pl.BlockSpec((None, inp, hidp), lambda b, i: (b, 0, 0)),
                pl.BlockSpec((None, 1, hidp), lambda b, i: (b, 0, 0)),
            ],
            out_specs=pl.BlockSpec((None, tm, hidp), lambda b, i: (b, i, 0)),
        ),
        compiler_params=pltpu.CompilerParams(
            dimension_semantics=("parallel", "parallel"), **_COMPILER_PARAMS),
    )(x_s, w_s, b_s)

    w1_p = _pad2(w1, hidp, projp).astype(mm_dtype)
    b1_p = jnp.pad(b1, (0, projp - proj)).reshape(1, projp).astype(jnp.float32)
    w2_p = _pad2(w2, projp, hidp).astype(mm_dtype)
    b2_p = jnp.pad(b2, (0, hidp - hid)).reshape(1, hidp).astype(jnp.float32)

    # --- G reduction + leaky_relu + projection + normalize, both branches ----
    z_s, h_s = pl.pallas_call(
        _branch_kernel,
        out_shape=(jax.ShapeDtypeStruct((2, np_rows, hidp), jnp.float32),
                   jax.ShapeDtypeStruct((2, np_rows, hidp), h_dtype)),
        grid_spec=pltpu.PrefetchScalarGridSpec(
            num_scalar_prefetch=0,
            grid=(2, np_rows // tm, np_rows // tk),
            in_specs=[
                pl.BlockSpec((None, tk, hidp), lambda b, i, k: (b, k, 0)),  # XW
                pl.BlockSpec((None, tm, tk), lambda b, i, k: (b, i, k)),    # G
                pl.BlockSpec((hidp, projp), lambda b, i, k: (0, 0)),        # fc1 W
                pl.BlockSpec((1, projp), lambda b, i, k: (0, 0)),           # fc1 b
                pl.BlockSpec((projp, hidp), lambda b, i, k: (0, 0)),        # fc2 W
                pl.BlockSpec((1, hidp), lambda b, i, k: (0, 0)),            # fc2 b
            ],
            out_specs=(pl.BlockSpec((None, tm, hidp), lambda b, i, k: (b, i, 0)),
                       pl.BlockSpec((None, tm, hidp), lambda b, i, k: (b, i, 0))),
            scratch_shapes=[pltpu.VMEM((tm, hidp), jnp.float32)],
        ),
        compiler_params=pltpu.CompilerParams(
            dimension_semantics=("parallel", "parallel", "arbitrary"),
            **_COMPILER_PARAMS),
    )(xw, g_s, w1_p, b1_p, w2_p, b2_p)

    z1 = z_s[0, :n, :hid]
    z2 = z_s[1, :n, :hid]
    return z1, z2, h_s[0], h_s[1]


# ------------------------- contrastive loss kernel ----------------------------


def _sim_loss_kernel(q1_ref, q2_ref, k1_ref, k2_ref, out_ref,
                     den1_ref, den2_ref, acc_ref,
                     *, tau, alpha, n_valid, tq, tkl):
    """alpha*sim(h1,h2)+(1-alpha)*sim(h2,h1); grid = (query tile, key tile)."""
    i = pl.program_id(0)
    j = pl.program_id(1)
    ni = pl.num_programs(0)
    nj = pl.num_programs(1)
    inv_tau = 1.0 / tau
    c = math.exp(inv_tau)          # diag of any refl-sim matrix (unit-norm rows)

    @pl.when(jnp.logical_and(i == 0, j == 0))
    def _init_global():
        den2_ref[...] = jnp.zeros_like(den2_ref)
        acc_ref[0] = jnp.float32(0.0)      # sum_i log(denom1_i)
        acc_ref[1] = jnp.float32(0.0)      # sum_i <z1_i, z2_i> / tau

    @pl.when(j == 0)
    def _init_rows():
        den1_ref[...] = jnp.zeros_like(den1_ref)

    # Padding masks (N was zero-padded up to a tile multiple).
    row_valid = (i * tq + lax.broadcasted_iota(jnp.int32, (tq, 1), 0)) < n_valid
    col_valid = (j * tkl + lax.broadcasted_iota(jnp.int32, (1, tkl), 1)) < n_valid
    mask = row_valid.astype(jnp.float32) * col_valid.astype(jnp.float32)

    q1 = q1_ref[...]
    q2 = q2_ref[...]

    def _sim(a, b):    # exp(a @ b.T / tau), masked, no explicit transpose
        s = lax.dot_general(a, b, (((1,), (1,)), ((), ())),
                            preferred_element_type=jnp.float32)
        return jnp.exp(s * inv_tau) * mask

    # s12 first, then s11, then s22: at most one exp'd (tq, tkl) tile live.
    s12 = _sim(q1, k2_ref[...])
    row_acc = jnp.sum(s12, axis=1, keepdims=True)     # -> denom1 (query rows i)
    col_acc = jnp.sum(s12, axis=0, keepdims=True)     # -> denom2 (key cols j)
    s11 = _sim(q1, k1_ref[...])
    row_acc = row_acc + jnp.sum(s11, axis=1, keepdims=True)
    s22 = _sim(q2, k2_ref[...])
    col_acc = col_acc + jnp.sum(s22, axis=0, keepdims=True)

    den1_ref[...] += row_acc
    den2_ref[j] = den2_ref[j] + col_acc

    @pl.when(j == 0)
    def _diag():       # log diag(s12) = <z1_i, z2_i>/tau, shared by both terms
        d = jnp.sum(q1.astype(jnp.float32) * q2.astype(jnp.float32),
                    axis=1, keepdims=True)
        acc_ref[1] += jnp.sum(jnp.where(row_valid, d, 0.0)) * inv_tau

    @pl.when(j == nj - 1)
    def _rows_done():  # per-query-row denominators for sim(h1, h2)
        d1 = den1_ref[...] - c
        acc_ref[0] += jnp.sum(jnp.log(jnp.where(row_valid, d1, 1.0)))

    @pl.when(jnp.logical_and(i == ni - 1, j == nj - 1))
    def _final():
        den2 = den2_ref[...]                                    # (nj, 1, tkl)
        gcol = (lax.broadcasted_iota(jnp.int32, den2.shape, 0) * tkl
                + lax.broadcasted_iota(jnp.int32, den2.shape, 2))
        term2 = jnp.sum(jnp.log(jnp.where(gcol < n_valid, den2 - c, 1.0)))
        term1 = acc_ref[0] - acc_ref[1]
        term2 = term2 - acc_ref[1]
        out_ref[0, 0] = alpha * term1 + (1.0 - alpha) * term2


def sim_loss(h1, h2, n_valid, tau, alpha, *, tile=256):
    np_rows, d = h1.shape
    tq = math.gcd(min(tile, np_rows), np_rows)   # divides np_rows; >= 128
    tkl = tq
    nj = np_rows // tkl
    kern = functools.partial(_sim_loss_kernel, tau=float(tau),
                             alpha=float(alpha), n_valid=int(n_valid),
                             tq=tq, tkl=tkl)
    out = pl.pallas_call(
        kern,
        out_shape=jax.ShapeDtypeStruct((1, 1), jnp.float32),
        grid_spec=pltpu.PrefetchScalarGridSpec(
            num_scalar_prefetch=0,
            grid=(np_rows // tq, nj),
            in_specs=[
                pl.BlockSpec((tq, d), lambda i, j: (i, 0)),    # h1 query tile
                pl.BlockSpec((tq, d), lambda i, j: (i, 0)),    # h2 query tile
                pl.BlockSpec((tkl, d), lambda i, j: (j, 0)),   # h1 key tile
                pl.BlockSpec((tkl, d), lambda i, j: (j, 0)),   # h2 key tile
            ],
            out_specs=pl.BlockSpec((1, 1), lambda i, j: (0, 0),
                                   memory_space=pltpu.MemorySpace.SMEM),
            scratch_shapes=[
                pltpu.VMEM((tq, 1), jnp.float32),        # denom1 row accumulator
                pltpu.VMEM((nj, 1, tkl), jnp.float32),   # denom2 col accumulator
                pltpu.SMEM((2,), jnp.float32),           # scalar partial sums
            ],
        ),
        # Note: query-tile axis kept "arbitrary" (carried denom2/scalar state);
        # a partial-then-reduce variant could make it "parallel" on v7x.
        compiler_params=pltpu.CompilerParams(
            dimension_semantics=("arbitrary", "arbitrary"), **_COMPILER_PARAMS),
    )(h1, h2, h1, h2)
    return out[0, 0]


# ------------------------------- full forward ---------------------------------


def cl_hgcn_forward(params, x1, adj1, x2, adj2,
                    tau=0.5, alpha=0.5, use_bf16=True, tile=256):
    """Equivalent of CL_HGCN.forward: returns (z1, z2, loss)."""
    n = x1.shape[0]
    z1, z2, h1, h2 = branches_forward(
        x1, adj1, x2, adj2,
        params["hgcn1_w"], params["hgcn1_b"],
        params["hgcn2_w"], params["hgcn2_b"],
        params["fc1_w"], params["fc1_b"], params["fc2_w"], params["fc2_b"],
        use_bf16=use_bf16, tile=tile)
    loss = sim_loss(h1, h2, n, tau, alpha, tile=tile)
    return z1, z2, loss


# ---------------------- pure-JAX reference (for checking) ---------------------


def _reference(params, x1, adj1, x2, adj2, tau=0.5, alpha=0.5,
               mm_dtype=jnp.float32):
    def mm(a, b):
        return jnp.dot(a.astype(mm_dtype), b.astype(mm_dtype),
                       preferred_element_type=jnp.float32)

    def hgcn(x, g, w, b):
        z = mm(g, mm(x, w) + b)
        return jnp.where(z > 0, z, 0.25 * z)

    def proj(z):
        h = mm(z, params["fc1_w"]) + params["fc1_b"]
        h = jnp.where(h > 0, h, jnp.exp(h) - 1.0)
        return mm(h, params["fc2_w"]) + params["fc2_b"]

    def normalize(z):
        n = jnp.sqrt(jnp.sum(z * z, axis=1, keepdims=True))
        return z / jnp.maximum(n, 1e-12)

    def sim(a, b):
        za, zb = normalize(a), normalize(b)
        refl = jnp.exp(mm(za, za.T) / tau)
        betw = jnp.exp(mm(za, zb.T) / tau)
        per = -jnp.log(jnp.diag(betw) /
                       (refl.sum(1) + betw.sum(1) - jnp.diag(refl)))
        return per.sum()

    z1 = hgcn(x1, adj1, params["hgcn1_w"], params["hgcn1_b"])
    z2 = hgcn(x2, adj2, params["hgcn2_w"], params["hgcn2_b"])
    h1, h2 = proj(z1), proj(z2)
    loss = alpha * sim(h1, h2) + (1.0 - alpha) * sim(h2, h1)
    return z1, z2, loss


# ----------------------------------- main -------------------------------------


if __name__ == "__main__":
    # N=500 deliberately NOT a multiple of the tile: exercises the node-axis
    # padding + masking path. Feature dims are padded to 128 multiples.
    N, IN, HID, PROJ = 500, 96, 32, 16
    TAU, ALPHA = 0.5, 0.5

    key = jax.random.PRNGKey(0)
    ks = jax.random.split(key, 12)

    stdv_h = 1.0 / math.sqrt(HID)
    stdv_fc1 = 1.0 / math.sqrt(HID)    # torch Linear bound ~ 1/sqrt(fan_in)
    stdv_fc2 = 1.0 / math.sqrt(PROJ)

    params = {
        "hgcn1_w": jax.random.uniform(ks[0], (IN, HID), jnp.float32, -stdv_h, stdv_h),
        "hgcn1_b": jax.random.uniform(ks[1], (HID,), jnp.float32, -stdv_h, stdv_h),
        "hgcn2_w": jax.random.uniform(ks[2], (IN, HID), jnp.float32, -stdv_h, stdv_h),
        "hgcn2_b": jax.random.uniform(ks[3], (HID,), jnp.float32, -stdv_h, stdv_h),
        # fc1: hid -> proj, fc2: proj -> hid (stored as [in, out] for x @ W)
        "fc1_w": jax.random.uniform(ks[4], (HID, PROJ), jnp.float32, -stdv_fc1, stdv_fc1),
        "fc1_b": jax.random.uniform(ks[5], (PROJ,), jnp.float32, -stdv_fc1, stdv_fc1),
        "fc2_w": jax.random.uniform(ks[6], (PROJ, HID), jnp.float32, -stdv_fc2, stdv_fc2),
        "fc2_b": jax.random.uniform(ks[7], (HID,), jnp.float32, -stdv_fc2, stdv_fc2),
    }

    x1 = jax.random.normal(ks[8], (N, IN), jnp.float32)
    x2 = jax.random.normal(ks[9], (N, IN), jnp.float32)
    adj1 = jax.random.uniform(ks[10], (N, N), jnp.float32)
    adj2 = jax.random.uniform(ks[11], (N, N), jnp.float32)

    # --- f32 MXU path: strict check against the f32 reference ---------------
    fwd_f32 = jax.jit(functools.partial(cl_hgcn_forward,
                                        tau=TAU, alpha=ALPHA, use_bf16=False))
    z1, z2, loss = fwd_f32(params, x1, adj1, x2, adj2)
    jax.block_until_ready((z1, z2, loss))

    rz1, rz2, rloss = _reference(params, x1, adj1, x2, adj2, TAU, ALPHA)
    assert jnp.allclose(z1, rz1, atol=2e-3, rtol=2e-3), "z1 mismatch (f32)"
    assert jnp.allclose(z2, rz2, atol=2e-3, rtol=2e-3), "z2 mismatch (f32)"
    assert jnp.allclose(loss, rloss, atol=1e-1, rtol=1e-3), "loss mismatch (f32)"

    # --- bf16 MXU path (default, f32 accumulate): check vs bf16 reference ----
    fwd_bf16 = jax.jit(functools.partial(cl_hgcn_forward,
                                         tau=TAU, alpha=ALPHA, use_bf16=True))
    z1b, z2b, lossb = fwd_bf16(params, x1, adj1, x2, adj2)
    jax.block_until_ready((z1b, z2b, lossb))

    bz1, bz2, bloss = _reference(params, x1, adj1, x2, adj2, TAU, ALPHA,
                                 mm_dtype=jnp.bfloat16)
    assert jnp.allclose(z1b, bz1, atol=1e-2, rtol=1e-2), "z1 mismatch (bf16)"
    assert jnp.allclose(z2b, bz2, atol=1e-2, rtol=1e-2), "z2 mismatch (bf16)"
    assert jnp.allclose(lossb, bloss, atol=1.0, rtol=1e-2), "loss mismatch (bf16)"

    print("KERNEL_OK")
</pallas_src>

<mosaic_0001>
module attributes {stable_mosaic.version = 11 : i64} {
  func.func @_xw_kernel(%arg0: i32, %arg1: i32, %arg2: memref<1x256x128xf32, #tpu.memory_space<vmem>>, %arg3: memref<1x128x128xf32, #tpu.memory_space<vmem>>, %arg4: memref<1x1x128xf32, #tpu.memory_space<vmem>>, %arg5: memref<1x256x128xf32, #tpu.memory_space<vmem>>) attributes {dimension_semantics = [#tpu.dimension_semantics<parallel>, #tpu.dimension_semantics<parallel>], iteration_bounds = array<i64: 2, 2>, scalar_prefetch = 0 : i64, scratch_operands = 0 : i64, tpu.core_type = #tpu.core_type<tc>, window_params = [{transform_indices = @transform_0, window_bounds = array<i64: 1, 256, 128>}, {transform_indices = @transform_1, window_bounds = array<i64: 1, 128, 128>}, {transform_indices = @transform_2, window_bounds = array<i64: 1, 1, 128>}, {transform_indices = @transform_3, window_bounds = array<i64: 1, 256, 128>}]} {
    %c0 = arith.constant 0 : index
    %c0_0 = arith.constant 0 : index
    %c0_1 = arith.constant 0 : index
    %0 = vector.load %arg2[%c0, %c0_0, %c0_1] : memref<1x256x128xf32, #tpu.memory_space<vmem>>, vector<1x256x128xf32>
    %1 = vector.shape_cast %0 : vector<1x256x128xf32> to vector<256x128xf32>
    %c0_2 = arith.constant 0 : index
    %c0_3 = arith.constant 0 : index
    %c0_4 = arith.constant 0 : index
    %2 = vector.load %arg3[%c0_2, %c0_3, %c0_4] : memref<1x128x128xf32, #tpu.memory_space<vmem>>, vector<1x128x128xf32>
    %3 = vector.shape_cast %2 : vector<1x128x128xf32> to vector<128x128xf32>
    %cst = arith.constant dense<0.000000e+00> : vector<256x128xf32>
    %4 = tpu.matmul %1, %3, %cst {dimension_numbers = #tpu.dot_dimension_numbers<[1], [0], [0], [1], [0, 0, 1, 1], [], []>} : vector<256x128xf32>, vector<128x128xf32>, vector<256x128xf32> -> vector<256x128xf32>
    %c0_5 = arith.constant 0 : index
    %c0_6 = arith.constant 0 : index
    %c0_7 = arith.constant 0 : index
    %5 = vector.load %arg4[%c0_5, %c0_6, %c0_7] : memref<1x1x128xf32, #tpu.memory_space<vmem>>, vector<1x1x128xf32>
    %6 = vector.shape_cast %5 : vector<1x1x128xf32> to vector<1x128xf32>
    %7 = vector.broadcast %6 : vector<1x128xf32> to vector<256x128xf32>
    %8 = arith.addf %4, %7 : vector<256x128xf32>
    %c0_8 = arith.constant 0 : index
    %c0_9 = arith.constant 0 : index
    %c0_10 = arith.constant 0 : index
    %9 = vector.load %arg5[%c0_8, %c0_9, %c0_10] : memref<1x256x128xf32, #tpu.memory_space<vmem>>, vector<1x256x128xf32>
    %10 = vector.shape_cast %9 : vector<1x256x128xf32> to vector<256x128xf32>
    %11 = vector.shape_cast %8 : vector<256x128xf32> to vector<1x256x128xf32>
    tpu.vector_store %arg5[%c0_8, %c0_9, %c0_10], %11 {strides = array<i32>} : memref<1x256x128xf32, #tpu.memory_space<vmem>>, vector<1x256x128xf32>,
    return
  }
  func.func @transform_0(%arg0: i32, %arg1: i32) -> (i32, i32, i32) {
    %c0_i32 = arith.constant 0 : i32
    %c0_i32_0 = arith.constant 0 : i32
    return %arg0, %arg1, %c0_i32 : i32, i32, i32
  }
  func.func @transform_1(%arg0: i32, %arg1: i32) -> (i32, i32, i32) {
    %c0_i32 = arith.constant 0 : i32
    %c0_i32_0 = arith.constant 0 : i32
    %c0_i32_1 = arith.constant 0 : i32
    return %arg0, %c0_i32, %c0_i32_0 : i32, i32, i32
  }
  func.func @transform_2(%arg0: i32, %arg1: i32) -> (i32, i32, i32) {
    %c0_i32 = arith.constant 0 : i32
    %c0_i32_0 = arith.constant 0 : i32
    %c0_i32_1 = arith.constant 0 : i32
    return %arg0, %c0_i32, %c0_i32_0 : i32, i32, i32
  }
  func.func @transform_3(%arg0: i32, %arg1: i32) -> (i32, i32, i32) {
    %c0_i32 = arith.constant 0 : i32
    %c0_i32_0 = arith.constant 0 : i32
    return %arg0, %arg1, %c0_i32 : i32, i32, i32
  }
}

module attributes {stable_mosaic.version = 11 : i64} {
  func.func @_branch_kernel(%arg0: i32, %arg1: i32, %arg2: i32, %arg3: memref<1x256x128xf32, #tpu.memory_space<vmem>>, %arg4: memref<1x256x256xf32, #tpu.memory_space<vmem>>, %arg5: memref<128x128xf32, #tpu.memory_space<vmem>>, %arg6: memref<1x128xf32, #tpu.memory_space<vmem>>, %arg7: memref<128x128xf32, #tpu.memory_space<vmem>>, %arg8: memref<1x128xf32, #tpu.memory_space<vmem>>, %arg9: memref<1x256x128xf32, #tpu.memory_space<vmem>>, %arg10: memref<1x256x128xf32, #tpu.memory_space<vmem>>, %arg11: memref<256x128xf32, #tpu.memory_space<vmem>>) attributes {dimension_semantics = [#tpu.dimension_semantics<parallel>, #tpu.dimension_semantics<parallel>, #tpu.dimension_semantics<arbitrary>], iteration_bounds = array<i64: 2, 2, 2>, scalar_prefetch = 0 : i64, scratch_operands = 1 : i64, tpu.core_type = #tpu.core_type<tc>, window_params = [{transform_indices = @transform_0, window_bounds = array<i64: 1, 256, 128>}, {transform_indices = @transform_1, window_bounds = array<i64: 1, 256, 256>}, {pipeline_mode = #tpu.pipeline_mode<synchronous>, transform_indices = @transform_2, window_bounds = array<i64: 128, 128>}, {pipeline_mode = #tpu.pipeline_mode<synchronous>, transform_indices = @transform_3, window_bounds = array<i64: 1, 128>}, {pipeline_mode = #tpu.pipeline_mode<synchronous>, transform_indices = @transform_4, window_bounds = array<i64: 128, 128>}, {pipeline_mode = #tpu.pipeline_mode<synchronous>, transform_indices = @transform_5, window_bounds = array<i64: 1, 128>}, {transform_indices = @transform_6, window_bounds = array<i64: 1, 256, 128>}, {transform_indices = @transform_7, window_bounds = array<i64: 1, 256, 128>}]} {
    %c0_i32 = arith.constant 0 : i32
    %0 = arith.cmpi eq, %arg2, %c0_i32 : i32
    %1 = arith.extui %0 : i1 to i32
    %c0_i32_0 = arith.constant 0 : i32
    %2 = arith.cmpi ne, %1, %c0_i32_0 : i32
    scf.if %2 {
      %cst_11 = arith.constant 0.000000e+00 : f32
      %14 = vector.broadcast %cst_11 : f32 to vector<256x128xf32>
      %c0_12 = arith.constant 0 : index
      %c0_13 = arith.constant 0 : index
      %15 = vector.load %arg11[%c0_12, %c0_13] : memref<256x128xf32, #tpu.memory_space<vmem>>, vector<256x128xf32>
      tpu.vector_store %arg11[%c0_12, %c0_13], %14 {strides = array<i32>} : memref<256x128xf32, #tpu.memory_space<vmem>>, vector<256x128xf32>,
    } else {
    }
    %c0 = arith.constant 0 : index
    %c0_1 = arith.constant 0 : index
    %3 = vector.load %arg11[%c0, %c0_1] : memref<256x128xf32, #tpu.memory_space<vmem>>, vector<256x128xf32>
    %c0_2 = arith.constant 0 : index
    %c0_3 = arith.constant 0 : index
    %c0_4 = arith.constant 0 : index
    %4 = vector.load %arg4[%c0_2, %c0_3, %c0_4] : memref<1x256x256xf32, #tpu.memory_space<vmem>>, vector<1x256x256xf32>
    %5 = vector.shape_cast %4 : vector<1x256x256xf32> to vector<256x256xf32>
    %c0_5 = arith.constant 0 : index
    %c0_6 = arith.constant 0 : index
    %c0_7 = arith.constant 0 : index
    %6 = vector.load %arg3[%c0_5, %c0_6, %c0_7] : memref<1x256x128xf32, #tpu.memory_space<vmem>>, vector<1x256x128xf32>
    %7 = vector.shape_cast %6 : vector<1x256x128xf32> to vector<256x128xf32>
    %cst = arith.constant dense<0.000000e+00> : vector<256x128xf32>
    %8 = tpu.matmul %5, %7, %cst {dimension_numbers = #tpu.dot_dimension_numbers<[1], [0], [0], [1], [0, 0, 1, 1], [], []>} : vector<256x256xf32>, vector<256x128xf32>, vector<256x128xf32> -> vector<256x128xf32>
    %9 = arith.addf %3, %8 : vector<256x128xf32>
    %c0_8 = arith.constant 0 : index
    %c0_9 = arith.constant 0 : index
    %10 = vector.load %arg11[%c0_8, %c0_9] : memref<256x128xf32, #tpu.memory_space<vmem>>, vector<256x128xf32>
    tpu.vector_store %arg11[%c0_8, %c0_9], %9 {strides = array<i32>} : memref<256x128xf32, #tpu.memory_space<vmem>>, vector<256x128xf32>,
    %c1_i32 = arith.constant 1 : i32
    %11 = arith.cmpi eq, %arg2, %c1_i32 : i32
    %12 = arith.extui %11 : i1 to i32
    %c0_i32_10 = arith.constant 0 : i32
    %13 = arith.cmpi ne, %12, %c0_i32_10 : i32
    scf.if %13 {
      %c0_11 = arith.constant 0 : index
      %c0_12 = arith.constant 0 : index
      %14 = vector.load %arg11[%c0_11, %c0_12] : memref<256x128xf32, #tpu.memory_space<vmem>>, vector<256x128xf32>
      %cst_13 = arith.constant 0.000000e+00 : f32
      %15 = vector.broadcast %cst_13 : f32 to vector<256x128xf32>
      %16 = arith.cmpf ogt, %14, %15 : vector<256x128xf32>
      %cst_14 = arith.constant 2.500000e-01 : f32
      %17 = vector.broadcast %cst_14 : f32 to vector<256x128xf32>
      %18 = arith.mulf %17, %14 : vector<256x128xf32>
      %19 = arith.select %16, %14, %18 : vector<256x128xi1>, vector<256x128xf32>
      %c0_15 = arith.constant 0 : index
      %c0_16 = arith.constant 0 : index
      %c0_17 = arith.constant 0 : index
      %20 = vector.load %arg9[%c0_15, %c0_16, %c0_17] : memref<1x256x128xf32, #tpu.memory_space<vmem>>, vector<1x256x128xf32>
      %21 = vector.shape_cast %20 : vector<1x256x128xf32> to vector<256x128xf32>
      %22 = vector.shape_cast %19 : vector<256x128xf32> to vector<1x256x128xf32>
      tpu.vector_store %arg9[%c0_15, %c0_16, %c0_17], %22 {strides = array<i32>} : memref<1x256x128xf32, #tpu.memory_space<vmem>>, vector<1x256x128xf32>,
      %c0_18 = arith.constant 0 : index
      %c0_19 = arith.constant 0 : index
      %23 = vector.load %arg5[%c0_18, %c0_19] : memref<128x128xf32, #tpu.memory_space<vmem>>, vector<128x128xf32>
      %cst_20 = arith.constant dense<0.000000e+00> : vector<256x128xf32>
      %24 = tpu.matmul %19, %23, %cst_20 {dimension_numbers = #tpu.dot_dimension_numbers<[1], [0], [0], [1], [0, 0, 1, 1], [], []>} : vector<256x128xf32>, vector<128x128xf32>, vector<256x128xf32> -> vector<256x128xf32>
      %c0_21 = arith.constant 0 : index
      %c0_22 = arith.constant 0 : index
      %25 = vector.load %arg6[%c0_21, %c0_22] : memref<1x128xf32, #tpu.memory_space<vmem>>, vector<1x128xf32>
      %26 = vector.broadcast %25 : vector<1x128xf32> to vector<256x128xf32>
      %27 = arith.addf %24, %26 : vector<256x128xf32>
      %cst_23 = arith.constant 0.000000e+00 : f32
      %28 = vector.broadcast %cst_23 : f32 to vector<256x128xf32>
      %29 = arith.cmpf ogt, %27, %28 : vector<256x128xf32>
      %30 = math.exp %27 : vector<256x128xf32>
      %cst_24 = arith.constant 1.000000e+00 : f32
      %31 = vector.broadcast %cst_24 : f32 to vector<256x128xf32>
      %32 = arith.subf %30, %31 : vector<256x128xf32>
      %33 = arith.select %29, %27, %32 : vector<256x128xi1>, vector<256x128xf32>
      %c0_25 = arith.constant 0 : index
      %c0_26 = arith.constant 0 : index
      %34 = vector.load %arg7[%c0_25, %c0_26] : memref<128x128xf32, #tpu.memory_space<vmem>>, vector<128x128xf32>
      %cst_27 = arith.constant dense<0.000000e+00> : vector<256x128xf32>
      %35 = tpu.matmul %33, %34, %cst_27 {dimension_numbers = #tpu.dot_dimension_numbers<[1], [0], [0], [1], [0, 0, 1, 1], [], []>} : vector<256x128xf32>, vector<128x128xf32>, vector<256x128xf32> -> vector<256x128xf32>
      %c0_28 = arith.constant 0 : index
      %c0_29 = arith.constant 0 : index
      %36 = vector.load %arg8[%c0_28, %c0_29] : memref<1x128xf32, #tpu.memory_space<vmem>>, vector<1x128xf32>
      %37 = vector.broadcast %36 : vector<1x128xf32> to vector<256x128xf32>
      %38 = arith.addf %35, %37 : vector<256x128xf32>
      %39 = arith.mulf %38, %38 : vector<256x128xf32>
      %cst_30 = arith.constant dense<0.000000e+00> : vector<256xf32>
      %40 = vector.multi_reduction <add>, %39, %cst_30 [1] : vector<256x128xf32> to vector<256xf32>
      %41 = vector.shape_cast %40 : vector<256xf32> to vector<256x1xf32>
      %cst_31 = arith.constant 1.000000e-24 : f32
      %42 = vector.broadcast %cst_31 : f32 to vector<256x1xf32>
      %43 = arith.maximumf %41, %42 : vector<256x1xf32>
      %44 = math.rsqrt %43 : vector<256x1xf32>
      %45 = vector.broadcast %44 : vector<256x1xf32> to vector<256x128xf32>
      %46 = arith.mulf %38, %45 : vector<256x128xf32>
      %c0_32 = arith.constant 0 : index
      %c0_33 = arith.constant 0 : index
      %c0_34 = arith.constant 0 : index
      %47 = vector.load %arg10[%c0_32, %c0_33, %c0_34] : memref<1x256x128xf32, #tpu.memory_space<vmem>>, vector<1x256x128xf32>
      %48 = vector.shape_cast %47 : vector<1x256x128xf32> to vector<256x128xf32>
      %49 = vector.shape_cast %46 : vector<256x128xf32> to vector<1x256x128xf32>
      tpu.vector_store %arg10[%c0_32, %c0_33, %c0_34], %49 {strides = array<i32>} : memref<1x256x128xf32, #tpu.memory_space<vmem>>, vector<1x256x128xf32>,
    } else {
    }
    return
  }
  func.func @transform_0(%arg0: i32, %arg1: i32, %arg2: i32) -> (i32, i32, i32) {
    %c0_i32 = arith.constant 0 : i32
    %c0_i32_0 = arith.constant 0 : i32
    return %arg0, %arg2, %c0_i32 : i32, i32, i32
  }
  func.func @transform_1(%arg0: i32, %arg1: i32, %arg2: i32) -> (i32, i32, i32) {
    %c0_i32 = arith.constant 0 : i32
    return %arg0, %arg1, %arg2 : i32, i32, i32
  }
  func.func @transform_2(%arg0: i32, %arg1: i32, %arg2: i32) -> (i32, i32) {
    %c0_i32 = arith.constant 0 : i32
    %c0_i32_0 = arith.constant 0 : i32
    %c0_i32_1 = arith.constant 0 : i32
    return %c0_i32, %c0_i32_0 : i32, i32
  }
  func.func @transform_3(%arg0: i32, %arg1: i32, %arg2: i32) -> (i32, i32) {
    %c0_i32 = arith.constant 0 : i32
    %c0_i32_0 = arith.constant 0 : i32
    %c0_i32_1 = arith.constant 0 : i32
    return %c0_i32, %c0_i32_0 : i32, i32
  }
  func.func @transform_4(%arg0: i32, %arg1: i32, %arg2: i32) -> (i32, i32) {
    %c0_i32 = arith.constant 0 : i32
    %c0_i32_0 = arith.constant 0 : i32
    %c0_i32_1 = arith.constant 0 : i32
    return %c0_i32, %c0_i32_0 : i32, i32
  }
  func.func @transform_5(%arg0: i32, %arg1: i32, %arg2: i32) -> (i32, i32) {
    %c0_i32 = arith.constant 0 : i32
    %c0_i32_0 = arith.constant 0 : i32
    %c0_i32_1 = arith.constant 0 : i32
    return %c0_i32, %c0_i32_0 : i32, i32
  }
  func.func @transform_6(%arg0: i32, %arg1: i32, %arg2: i32) -> (i32, i32, i32) {
    %c0_i32 = arith.constant 0 : i32
    %c0_i32_0 = arith.constant 0 : i32
    return %arg0, %arg1, %c0_i32 : i32, i32, i32
  }
  func.func @transform_7(%arg0: i32, %arg1: i32, %arg2: i32) -> (i32, i32, i32) {
    %c0_i32 = arith.constant 0 : i32
    %c0_i32_0 = arith.constant 0 : i32
    return %arg0, %arg1, %c0_i32 : i32, i32, i32
  }
}

module attributes {stable_mosaic.version = 11 : i64} {
  func.func @_sim_loss_kernel(%arg0: i32, %arg1: i32, %arg2: memref<256x128xf32, #tpu.memory_space<vmem>>, %arg3: memref<256x128xf32, #tpu.memory_space<vmem>>, %arg4: memref<256x128xf32, #tpu.memory_space<vmem>>, %arg5: memref<256x128xf32, #tpu.memory_space<vmem>>, %arg6: memref<1x1xf32, #tpu.memory_space<smem>>, %arg7: memref<256x1xf32, #tpu.memory_space<vmem>>, %arg8: memref<2x1x256xf32, #tpu.memory_space<vmem>>, %arg9: memref<2xf32, #tpu.memory_space<smem>>) attributes {dimension_semantics = [#tpu.dimension_semantics<arbitrary>, #tpu.dimension_semantics<arbitrary>], iteration_bounds = array<i64: 2, 2>, scalar_prefetch = 0 : i64, scratch_operands = 3 : i64, tpu.core_type = #tpu.core_type<tc>, window_params = [{transform_indices = @transform_0, window_bounds = array<i64: 256, 128>}, {transform_indices = @transform_1, window_bounds = array<i64: 256, 128>}, {transform_indices = @transform_2, window_bounds = array<i64: 256, 128>}, {transform_indices = @transform_3, window_bounds = array<i64: 256, 128>}, {transform_indices = @transform_4, window_bounds = array<i64: 1, 1>}]} {
    %c0_i32 = arith.constant 0 : i32
    %0 = arith.cmpi eq, %arg0, %c0_i32 : i32
    %c0_i32_0 = arith.constant 0 : i32
    %1 = arith.cmpi eq, %arg1, %c0_i32_0 : i32
    %2 = arith.andi %0, %1 : i1
    %3 = arith.extui %2 : i1 to i32
    %c0_i32_1 = arith.constant 0 : i32
    %4 = arith.cmpi ne, %3, %c0_i32_1 : i32
    scf.if %4 {
      %cst_38 = arith.constant 0.000000e+00 : f32
      %79 = vector.broadcast %cst_38 : f32 to vector<2x1x256xf32>
      %c0_39 = arith.constant 0 : index
      %c0_40 = arith.constant 0 : index
      %c0_41 = arith.constant 0 : index
      %80 = vector.load %arg8[%c0_39, %c0_40, %c0_41] : memref<2x1x256xf32, #tpu.memory_space<vmem>>, vector<2x1x256xf32>
      tpu.vector_store %arg8[%c0_39, %c0_40, %c0_41], %79 {strides = array<i32>} : memref<2x1x256xf32, #tpu.memory_space<vmem>>, vector<2x1x256xf32>,
      %cst_42 = arith.constant 0.000000e+00 : f32
      %c0_43 = arith.constant 0 : index
      %81 = memref.load %arg9[%c0_43] : memref<2xf32, #tpu.memory_space<smem>>
      memref.store %cst_42, %arg9[%c0_43] : memref<2xf32, #tpu.memory_space<smem>>
      %cst_44 = arith.constant 0.000000e+00 : f32
      %c1 = arith.constant 1 : index
      %82 = memref.load %arg9[%c1] : memref<2xf32, #tpu.memory_space<smem>>
      memref.store %cst_44, %arg9[%c1] : memref<2xf32, #tpu.memory_space<smem>>
    } else {
    }
    %c0_i32_2 = arith.constant 0 : i32
    %5 = arith.cmpi eq, %arg1, %c0_i32_2 : i32
    %6 = arith.extui %5 : i1 to i32
    %c0_i32_3 = arith.constant 0 : i32
    %7 = arith.cmpi ne, %6, %c0_i32_3 : i32
    scf.if %7 {
      %cst_38 = arith.constant 0.000000e+00 : f32
      %79 = vector.broadcast %cst_38 : f32 to vector<256x1xf32>
      %c0_39 = arith.constant 0 : index
      %c0_40 = arith.constant 0 : index
      %80 = vector.load %arg7[%c0_39, %c0_40] : memref<256x1xf32, #tpu.memory_space<vmem>>, vector<256x1xf32>
      tpu.vector_store %arg7[%c0_39, %c0_40], %79 {strides = array<i32>} : memref<256x1xf32, #tpu.memory_space<vmem>>, vector<256x1xf32>,
    } else {
    }
    %c256_i32 = arith.constant 256 : i32
    %8 = arith.muli %arg0, %c256_i32 : i32
    %9 = tpu.iota {dimensions = array<i32: 0>} : vector<256x1xi32>
    %10 = vector.broadcast %8 : i32 to vector<256x1xi32>
    %11 = arith.addi %10, %9 : vector<256x1xi32>
    %c500_i32 = arith.constant 500 : i32
    %12 = vector.broadcast %c500_i32 : i32 to vector<256x1xi32>
    %13 = arith.cmpi slt, %11, %12 : vector<256x1xi32>
    %c256_i32_4 = arith.constant 256 : i32
    %14 = arith.muli %arg1, %c256_i32_4 : i32
    %15 = tpu.iota {dimensions = array<i32: 1>} : vector<1x256xi32>
    %16 = vector.broadcast %14 : i32 to vector<1x256xi32>
    %17 = arith.addi %16, %15 : vector<1x256xi32>
    %c500_i32_5 = arith.constant 500 : i32
    %18 = vector.broadcast %c500_i32_5 : i32 to vector<1x256xi32>
    %19 = arith.cmpi slt, %17, %18 : vector<1x256xi32>
    %20 = arith.extui %13 : vector<256x1xi1> to vector<256x1xi32>
    %21 = arith.sitofp %20 : vector<256x1xi32> to vector<256x1xf32>
    %22 = arith.extui %19 : vector<1x256xi1> to vector<1x256xi32>
    %23 = arith.sitofp %22 : vector<1x256xi32> to vector<1x256xf32>
    %24 = vector.broadcast %21 : vector<256x1xf32> to vector<256x256xf32>
    %25 = vector.broadcast %23 : vector<1x256xf32> to vector<256x256xf32>
    %26 = arith.mulf %24, %25 : vector<256x256xf32>
    %c0 = arith.constant 0 : index
    %c0_6 = arith.constant 0 : index
    %27 = vector.load %arg2[%c0, %c0_6] : memref<256x128xf32, #tpu.memory_space<vmem>>, vector<256x128xf32>
    %c0_7 = arith.constant 0 : index
    %c0_8 = arith.constant 0 : index
    %28 = vector.load %arg3[%c0_7, %c0_8] : memref<256x128xf32, #tpu.memory_space<vmem>>, vector<256x128xf32>
    %c0_9 = arith.constant 0 : index
    %c0_10 = arith.constant 0 : index
    %29 = vector.load %arg5[%c0_9, %c0_10] : memref<256x128xf32, #tpu.memory_space<vmem>>, vector<256x128xf32>
    %cst = arith.constant dense<0.000000e+00> : vector<256x256xf32>
    %30 = tpu.matmul %27, %29, %cst {dimension_numbers = #tpu.dot_dimension_numbers<[1], [1], [0], [0], [0, 0, 1, 0], [], []>} : vector<256x128xf32>, vector<256x128xf32>, vector<256x256xf32> -> vector<256x256xf32>
    %cst_11 = arith.constant 2.000000e+00 : f32
    %31 = vector.broadcast %cst_11 : f32 to vector<256x256xf32>
    %32 = arith.mulf %30, %31 : vector<256x256xf32>
    %33 = math.exp %32 : vector<256x256xf32>
    %34 = arith.mulf %33, %26 : vector<256x256xf32>
    %cst_12 = arith.constant dense<0.000000e+00> : vector<256xf32>
    %35 = vector.multi_reduction <add>, %34, %cst_12 [1] : vector<256x256xf32> to vector<256xf32>
    %36 = vector.shape_cast %35 : vector<256xf32> to vector<256x1xf32>
    %cst_13 = arith.constant dense<0.000000e+00> : vector<256xf32>
    %37 = vector.multi_reduction <add>, %34, %cst_13 [0] : vector<256x256xf32> to vector<256xf32>
    %38 = vector.shape_cast %37 : vector<256xf32> to vector<1x256xf32>
    %c0_14 = arith.constant 0 : index
    %c0_15 = arith.constant 0 : index
    %39 = vector.load %arg4[%c0_14, %c0_15] : memref<256x128xf32, #tpu.memory_space<vmem>>, vector<256x128xf32>
    %cst_16 = arith.constant dense<0.000000e+00> : vector<256x256xf32>
    %40 = tpu.matmul %27, %39, %cst_16 {dimension_numbers = #tpu.dot_dimension_numbers<[1], [1], [0], [0], [0, 0, 1, 0], [], []>} : vector<256x128xf32>, vector<256x128xf32>, vector<256x256xf32> -> vector<256x256xf32>
    %cst_17 = arith.constant 2.000000e+00 : f32
    %41 = vector.broadcast %cst_17 : f32 to vector<256x256xf32>
    %42 = arith.mulf %40, %41 : vector<256x256xf32>
    %43 = math.exp %42 : vector<256x256xf32>
    %44 = arith.mulf %43, %26 : vector<256x256xf32>
    %cst_18 = arith.constant dense<0.000000e+00> : vector<256xf32>
    %45 = vector.multi_reduction <add>, %44, %cst_18 [1] : vector<256x256xf32> to vector<256xf32>
    %46 = vector.shape_cast %45 : vector<256xf32> to vector<256x1xf32>
    %47 = arith.addf %36, %46 : vector<256x1xf32>
    %c0_19 = arith.constant 0 : index
    %c0_20 = arith.constant 0 : index
    %48 = vector.load %arg5[%c0_19, %c0_20] : memref<256x128xf32, #tpu.memory_space<vmem>>, vector<256x128xf32>
    %cst_21 = arith.constant dense<0.000000e+00> : vector<256x256xf32>
    %49 = tpu.matmul %28, %48, %cst_21 {dimension_numbers = #tpu.dot_dimension_numbers<[1], [1], [0], [0], [0, 0, 1, 0], [], []>} : vector<256x128xf32>, vector<256x128xf32>, vector<256x256xf32> -> vector<256x256xf32>
    %cst_22 = arith.constant 2.000000e+00 : f32
    %50 = vector.broadcast %cst_22 : f32 to vector<256x256xf32>
    %51 = arith.mulf %49, %50 : vector<256x256xf32>
    %52 = math.exp %51 : vector<256x256xf32>
    %53 = arith.mulf %52, %26 : vector<256x256xf32>
    %cst_23 = arith.constant dense<0.000000e+00> : vector<256xf32>
    %54 = vector.multi_reduction <add>, %53, %cst_23 [0] : vector<256x256xf32> to vector<256xf32>
    %55 = vector.shape_cast %54 : vector<256xf32> to vector<1x256xf32>
    %56 = arith.addf %38, %55 : vector<1x256xf32>
    %c0_24 = arith.constant 0 : index
    %c0_25 = arith.constant 0 : index
    %57 = vector.load %arg7[%c0_24, %c0_25] : memref<256x1xf32, #tpu.memory_space<vmem>>, vector<256x1xf32>
    %58 = arith.addf %57, %47 : vector<256x1xf32>
    %c0_26 = arith.constant 0 : index
    %c0_27 = arith.constant 0 : index
    %59 = vector.load %arg7[%c0_26, %c0_27] : memref<256x1xf32, #tpu.memory_space<vmem>>, vector<256x1xf32>
    tpu.vector_store %arg7[%c0_26, %c0_27], %58 {strides = array<i32>} : memref<256x1xf32, #tpu.memory_space<vmem>>, vector<256x1xf32>,
    %60 = arith.index_cast %arg1 : i32 to index
    %c0_28 = arith.constant 0 : index
    %c0_29 = arith.constant 0 : index
    %61 = vector.load %arg8[%60, %c0_28, %c0_29] : memref<2x1x256xf32, #tpu.memory_space<vmem>>, vector<1x1x256xf32>
    %62 = vector.shape_cast %61 : vector<1x1x256xf32> to vector<1x256xf32>
    %63 = arith.addf %62, %56 : vector<1x256xf32>
    %64 = arith.index_cast %arg1 : i32 to index
    %c0_30 = arith.constant 0 : index
    %c0_31 = arith.constant 0 : index
    %65 = vector.load %arg8[%64, %c0_30, %c0_31] : memref<2x1x256xf32, #tpu.memory_space<vmem>>, vector<1x1x256xf32>
    %66 = vector.shape_cast %65 : vector<1x1x256xf32> to vector<1x256xf32>
    %67 = vector.shape_cast %63 : vector<1x256xf32> to vector<1x1x256xf32>
    tpu.vector_store %arg8[%64, %c0_30, %c0_31], %67 {strides = array<i32>} : memref<2x1x256xf32, #tpu.memory_space<vmem>>, vector<1x1x256xf32>,
    %c0_i32_32 = arith.constant 0 : i32
    %68 = arith.cmpi eq, %arg1, %c0_i32_32 : i32
    %69 = arith.extui %68 : i1 to i32
    %c0_i32_33 = arith.constant 0 : i32
    %70 = arith.cmpi ne, %69, %c0_i32_33 : i32
    scf.if %70 {
      %79 = arith.mulf %27, %28 : vector<256x128xf32>
      %cst_38 = arith.constant dense<0.000000e+00> : vector<256xf32>
      %80 = vector.multi_reduction <add>, %79, %cst_38 [1] : vector<256x128xf32> to vector<256xf32>
      %81 = vector.shape_cast %80 : vector<256xf32> to vector<256x1xf32>
      %c1 = arith.constant 1 : index
      %82 = memref.load %arg9[%c1] : memref<2xf32, #tpu.memory_space<smem>>
      %cst_39 = arith.constant 0.000000e+00 : f32
      %83 = vector.broadcast %cst_39 : f32 to vector<256x1xf32>
      %84 = arith.select %13, %81, %83 : vector<256x1xi1>, vector<256x1xf32>
      %85 = vector.shape_cast %84 : vector<256x1xf32> to vector<1x256x1xf32>
      %cst_40 = arith.constant dense<0.000000e+00> : vector<1xf32>
      %86 = vector.multi_reduction <add>, %85, %cst_40 [1, 2] : vector<1x256x1xf32> to vector<1xf32>
      %87 = vector.shape_cast %86 : vector<1xf32> to vector<1x1x1xf32>
      %88 = vector.extract %87[0, 0, 0] : f32 from vector<1x1x1xf32>
      %cst_41 = arith.constant 2.000000e+00 : f32
      %89 = arith.mulf %88, %cst_41 : f32
      %90 = arith.addf %82, %89 : f32
      %c1_42 = arith.constant 1 : index
      %91 = memref.load %arg9[%c1_42] : memref<2xf32, #tpu.memory_space<smem>>
      memref.store %90, %arg9[%c1_42] : memref<2xf32, #tpu.memory_space<smem>>
    } else {
    }
    %c1_i32 = arith.constant 1 : i32
    %71 = arith.cmpi eq, %arg1, %c1_i32 : i32
    %72 = arith.extui %71 : i1 to i32
    %c0_i32_34 = arith.constant 0 : i32
    %73 = arith.cmpi ne, %72, %c0_i32_34 : i32
    scf.if %73 {
      %c0_38 = arith.constant 0 : index
      %c0_39 = arith.constant 0 : index
      %79 = vector.load %arg7[%c0_38, %c0_39] : memref<256x1xf32, #tpu.memory_space<vmem>>, vector<256x1xf32>
      %cst_40 = arith.constant 7.3890562 : f32
      %80 = vector.broadcast %cst_40 : f32 to vector<256x1xf32>
      %81 = arith.subf %79, %80 : vector<256x1xf32>
      %c0_41 = arith.constant 0 : index
      %82 = memref.load %arg9[%c0_41] : memref<2xf32, #tpu.memory_space<smem>>
      %cst_42 = arith.constant 1.000000e+00 : f32
      %83 = vector.broadcast %cst_42 : f32 to vector<256x1xf32>
      %84 = arith.select %13, %81, %83 : vector<256x1xi1>, vector<256x1xf32>
      %85 = math.log %84 : vector<256x1xf32>
      %86 = vector.shape_cast %85 : vector<256x1xf32> to vector<1x256x1xf32>
      %cst_43 = arith.constant dense<0.000000e+00> : vector<1xf32>
      %87 = vector.multi_reduction <add>, %86, %cst_43 [1, 2] : vector<1x256x1xf32> to vector<1xf32>
      %88 = vector.shape_cast %87 : vector<1xf32> to vector<1x1x1xf32>
      %89 = vector.extract %88[0, 0, 0] : f32 from vector<1x1x1xf32>
      %90 = arith.addf %82, %89 : f32
      %c0_44 = arith.constant 0 : index
      %91 = memref.load %arg9[%c0_44] : memref<2xf32, #tpu.memory_space<smem>>
      memref.store %90, %arg9[%c0_44] : memref<2xf32, #tpu.memory_space<smem>>
    } else {
    }
    %c1_i32_35 = arith.constant 1 : i32
    %74 = arith.cmpi eq, %arg0, %c1_i32_35 : i32
    %c1_i32_36 = arith.constant 1 : i32
    %75 = arith.cmpi eq, %arg1, %c1_i32_36 : i32
    %76 = arith.andi %74, %75 : i1
    %77 = arith.extui %76 : i1 to i32
    %c0_i32_37 = arith.constant 0 : i32
    %78 = arith.cmpi ne, %77, %c0_i32_37 : i32
    scf.if %78 {
      %c0_38 = arith.constant 0 : index
      %c0_39 = arith.constant 0 : index
      %c0_40 = arith.constant 0 : index
      %79 = vector.load %arg8[%c0_38, %c0_39, %c0_40] : memref<2x1x256xf32, #tpu.memory_space<vmem>>, vector<2x1x256xf32>
      %80 = tpu.iota {dimensions = array<i32: 0>} : vector<2x1x256xi32>
      %c256_i32_41 = arith.constant 256 : i32
      %81 = vector.broadcast %c256_i32_41 : i32 to vector<2x1x256xi32>
      %82 = arith.muli %80, %81 : vector<2x1x256xi32>
      %83 = tpu.iota {dimensions = array<i32: 2>} : vector<2x1x256xi32>
      %84 = arith.addi %82, %83 : vector<2x1x256xi32>
      %c500_i32_42 = arith.constant 500 : i32
      %85 = vector.broadcast %c500_i32_42 : i32 to vector<2x1x256xi32>
      %86 = arith.cmpi slt, %84, %85 : vector<2x1x256xi32>
      %cst_43 = arith.constant 7.3890562 : f32
      %87 = vector.broadcast %cst_43 : f32 to vector<2x1x256xf32>
      %88 = arith.subf %79, %87 : vector<2x1x256xf32>
      %cst_44 = arith.constant 1.000000e+00 : f32
      %89 = vector.broadcast %cst_44 : f32 to vector<2x1x256xf32>
      %90 = arith.select %86, %88, %89 : vector<2x1x256xi1>, vector<2x1x256xf32>
      %91 = math.log %90 : vector<2x1x256xf32>
      %92 = vector.shape_cast %91 : vector<2x1x256xf32> to vector<1x2x1x256xf32>
      %cst_45 = arith.constant dense<0.000000e+00> : vector<1xf32>
      %93 = vector.multi_reduction <add>, %92, %cst_45 [1, 2, 3] : vector<1x2x1x256xf32> to vector<1xf32>
      %94 = vector.shape_cast %93 : vector<1xf32> to vector<1x1x1x1xf32>
      %95 = vector.extract %94[0, 0, 0, 0] : f32 from vector<1x1x1x1xf32>
      %c0_46 = arith.constant 0 : index
      %96 = memref.load %arg9[%c0_46] : memref<2xf32, #tpu.memory_space<smem>>
      %c1 = arith.constant 1 : index
      %97 = memref.load %arg9[%c1] : memref<2xf32, #tpu.memory_space<smem>>
      %98 = arith.subf %96, %97 : f32
      %c1_47 = arith.constant 1 : index
      %99 = memref.load %arg9[%c1_47] : memref<2xf32, #tpu.memory_space<smem>>
      %100 = arith.subf %95, %99 : f32
      %cst_48 = arith.constant 5.000000e-01 : f32
      %101 = arith.mulf %cst_48, %98 : f32
      %cst_49 = arith.constant 5.000000e-01 : f32
      %102 = arith.mulf %cst_49, %100 : f32
      %103 = arith.addf %101, %102 : f32
      %c0_50 = arith.constant 0 : index
      %c0_51 = arith.constant 0 : index
      %104 = memref.load %arg6[%c0_50, %c0_51] : memref<1x1xf32, #tpu.memory_space<smem>>
      memref.store %103, %arg6[%c0_50, %c0_51] : memref<1x1xf32, #tpu.memory_space<smem>>
    } else {
    }
    return
  }
  func.func @transform_0(%arg0: i32, %arg1: i32) -> (i32, i32) {
    %c0_i32 = arith.constant 0 : i32
    %c0_i32_0 = arith.constant 0 : i32
    return %arg0, %c0_i32 : i32, i32
  }
  func.func @transform_1(%arg0: i32, %arg1: i32) -> (i32, i32) {
    %c0_i32 = arith.constant 0 : i32
    %c0_i32_0 = arith.constant 0 : i32
    return %arg0, %c0_i32 : i32, i32
  }
  func.func @transform_2(%arg0: i32, %arg1: i32) -> (i32, i32) {
    %c0_i32 = arith.constant 0 : i32
    %c0_i32_0 = arith.constant 0 : i32
    return %arg1, %c0_i32 : i32, i32
  }
  func.func @transform_3(%arg0: i32, %arg1: i32) -> (i32, i32) {
    %c0_i32 = arith.constant 0 : i32
    %c0_i32_0 = arith.constant 0 : i32
    return %arg1, %c0_i32 : i32, i32
  }
  func.func @transform_4(%arg0: i32, %arg1: i32) -> (i32, i32) {
    %c0_i32 = arith.constant 0 : i32
    %c0_i32_0 = arith.constant 0 : i32
    %c0_i32_1 = arith.constant 0 : i32
    return %c0_i32, %c0_i32_0 : i32, i32
  }
}

</mosaic_0001>

<bundles_post_ra>
// kernel: cl_hgcn_forward.3
= control target key start
LH: loop header
LB: loop body
LE: loop exit
PB: predicated region body
PF: predicated region fallthrough
CT: control target
= control target key end

     0   :  { %s717_s12 = smov 0   ;;  %s719_s13 = smov 0   ;;  %s914_s0 = inlined_call_operand.vmem [shape: f32[2,512,128], index: 0, kind: input, shape index: {}]   ;;  %s915_s1 = inlined_call_operand.vmem [shape: f32[2,128,128], index: 1, kind: input, shape index: {}]   ;;  %s916_s2 = inlined_call_operand.vmem [shape: f32[2,1,128], index: 2, kind: input, shape index: {}]   ;;  %s917_s3 = inlined_call_operand.vmem [shape: f32[2,512,128], index: 3, kind: output, shape index: {}]  }
   0x1   :  { %s721_s14 = smov 0   ;;  %s723_s15 = smov 0  }
   0x2   :  { %s725_s16 = smov 0  }
   0x3 LB: > { %s22_s17 = sadd.s32 1, %s687_s14  ;;  %s25_s18 = sadd.s32 1, %s691_s15  ;;  %s695_s16 = sphi %s725_s16, %s13_s16   ;;  %s691_s15 = sphi %s723_s15, %s921_s15   ;;  %s687_s14 = sphi %s721_s14, %s920_s14   ;;  %s683_s13 = sphi %s719_s13, %s919_s13   ;;  %s679_s12 = sphi %s717_s12, %s918_s12  }
   0x4   : > { %p23_p0 = scmp.ge.s32.totalorder %s22_s17, 2  ;;  %p556_p1 = scmp.ge.s32.totalorder %s695_s16, 1 }
   0x5   : > { %p176_p2 = scmp.lt.s32.totalorder %s695_s16, 5 }
   0x6   : > { %s923_s17 = smov (%p23_p0, %s22_s17), 0  ;;  %s925_s18 = smov (!%p23_p0, %s25_s18), %s691_s15 }
   0x7   : > { %p177_p3 = pnand %p556_p1, %p176_p2  ;;  %p27_p4 = scmp.ge.s32.totalorder %s925_s18, 2 }
   0x8   : > { %p217_p5 = scmp.lt.s32.totalorder (!%p177_p3), %s683_s13, 1  ;;  %s557_s26 = sshll.u32 (!%p177_p3), %s679_s12, 5 }
   0x9   : > { %s927_s18 = smov (%p27_p4, %s925_s18), 0  ;;  %180 = sbr.rel (%p177_p3) target bundleno = 241 (0xf1), region = 32 }
   0xa   : > { %p219_p6 = scmp.lt.s32.totalorder (!%p177_p3), %s557_s26, 63 }
   0xe   : > { %s929_s13 = smov (!%p217_p5, %s683_s13), 1  ;;  %s931_s26 = smov (!%p219_p6, %s557_s26), 63 }
   0xf   : > { %s567_s19 = sshll.u32 %s929_s13, 7  ;;  %s233_s25 = scalar_lea.vmem %s916_s2, %s929_s13 }
  0x10   : > { %s755_s22 = scalar_lea.vmem %s915_s1, %s567_s19  ;;  %s558_s27 = sshll.u32 %s929_s13, 6  ;;  %v826_v48 = vld [vmem:[%s233_s25] ss:$0 sm:$0xff] }
  0x11   : > { %v291_v0 = vld [vmem:[%s755_s22 + $0x78] sm:$0xff]  ;;  %v290_v1 = vld [vmem:[%s755_s22 + $0x70] sm:$0xff]  ;;  %v289_v2 = vld [vmem:[%s755_s22 + $0x68] sm:$0xff]  ;;  %s774_s28 = sadd.s32 %s558_s27, %s931_s26 }
  0x12   : > { %569 = vmatpush.msra.mxu2 %v291_v0  ;;  %570 = vmatpush.msra.mxu3 %v291_v0  ;;  %v288_v3 = vld [vmem:[%s755_s22 + $0x60] sm:$0xff]  ;;  %v287_v4 = vld [vmem:[%s755_s22 + $0x58] sm:$0xff]  ;;  %v286_v5 = vld [vmem:[%s755_s22 + $0x50] sm:$0xff]  ;;  %s559_s29 = sshll.u32 %s774_s28, 3 }
  0x13   : > { %296 = vmatpush.msra.mxu0 %v291_v0  ;;  %568 = vmatpush.msra.mxu1 %v291_v0  ;;  %v285_v6 = vld [vmem:[%s755_s22 + $0x48] sm:$0xff]  ;;  %v284_v7 = vld [vmem:[%s755_s22 + $0x40] sm:$0xff]  ;;  %v283_v8 = vld [vmem:[%s755_s22 + $0x38] sm:$0xff]  ;;  %s785_s5 = scalar_lea.vmem %s914_s0, %s559_s29  ;;  %s833_s10 = scalar_lea.vmem %s917_s3, %s559_s29 }
  0x14   : > { %572 = vmatpush.msra.mxu2 %v290_v1  ;;  %573 = vmatpush.msra.mxu3 %v290_v1  ;;  %v282_v9 = vld [vmem:[%s755_s22 + $0x30] sm:$0xff]  ;;  %v281_v10 = vld [vmem:[%s755_s22 + $0x28] sm:$0xff]  ;;  %v280_v11 = vld [vmem:[%s755_s22 + $0x20] sm:$0xff] }
  0x15   : > { %297 = vmatpush.msra.mxu0 %v290_v1  ;;  %571 = vmatpush.msra.mxu1 %v290_v1  ;;  %v279_v12 = vld [vmem:[%s755_s22 + $0x18] sm:$0xff]  ;;  %v278_v13 = vld [vmem:[%s755_s22 + $0x10] sm:$0xff]  ;;  %v277_v14 = vld [vmem:[%s755_s22 + $0x8] sm:$0xff] }
  0x16   : > { %575 = vmatpush.msra.mxu2 %v289_v2  ;;  %576 = vmatpush.msra.mxu3 %v289_v2  ;;  %v276_v15 = vld [vmem:[%s755_s22] sm:$0xff]  ;;  %v261_v20 = vld [vmem:[%s785_s5 + $0x88] sm:$0xff]  ;;  %v262_v24 = vld [vmem:[%s785_s5 + $0x90] sm:$0xff] }
  0x17   : > { %298 = vmatpush.msra.mxu0 %v289_v2  ;;  %574 = vmatpush.msra.mxu1 %v289_v2  ;;  %v260_v16 = vld [vmem:[%s785_s5 + $0x80] sm:$0xff]  ;;  %v269_v21 = vld [vmem:[%s785_s5 + $0xc8] sm:$0xff]  ;;  %v270_v25 = vld [vmem:[%s785_s5 + $0xd0] sm:$0xff] }
  0x18   : > { %578 = vmatpush.msra.mxu2 %v288_v3  ;;  %579 = vmatpush.msra.mxu3 %v288_v3  ;;  %v268_v17 = vld [vmem:[%s785_s5 + $0xc0] sm:$0xff]  ;;  %v245_v22 = vld [vmem:[%s785_s5 + $0x8] sm:$0xff]  ;;  %v246_v26 = vld [vmem:[%s785_s5 + $0x10] sm:$0xff] }
  0x19   : > { %299 = vmatpush.msra.mxu0 %v288_v3  ;;  %577 = vmatpush.msra.mxu1 %v288_v3  ;;  %v244_v18 = vld [vmem:[%s785_s5] sm:$0xff]  ;;  %v253_v23 = vld [vmem:[%s785_s5 + $0x48] sm:$0xff]  ;;  %v254_v27 = vld [vmem:[%s785_s5 + $0x50] sm:$0xff] }
  0x1a   : > { %581 = vmatpush.msra.mxu2 %v287_v4  ;;  %582 = vmatpush.msra.mxu3 %v287_v4  ;;  %v252_v19 = vld [vmem:[%s785_s5 + $0x40] sm:$0xff]  ;;  %v263_v28 = vld [vmem:[%s785_s5 + $0x98] sm:$0xff]  ;;  %v265_v36 = vld [vmem:[%s785_s5 + $0xa8] sm:$0xff] }
  0x1b   : > { %300 = vmatpush.msra.mxu0 %v287_v4  ;;  %580 = vmatpush.msra.mxu1 %v287_v4  ;;  %v271_v29 = vld [vmem:[%s785_s5 + $0xd8] sm:$0xff]  ;;  %v264_v32 = vld [vmem:[%s785_s5 + $0xa0] sm:$0xff]  ;;  %v273_v37 = vld [vmem:[%s785_s5 + $0xe8] sm:$0xff] }
  0x1c   : > { %584 = vmatpush.msra.mxu2 %v286_v5  ;;  %585 = vmatpush.msra.mxu3 %v286_v5  ;;  %v247_v30 = vld [vmem:[%s785_s5 + $0x18] sm:$0xff]  ;;  %v272_v33 = vld [vmem:[%s785_s5 + $0xe0] sm:$0xff]  ;;  %v249_v38 = vld [vmem:[%s785_s5 + $0x28] sm:$0xff] }
  0x1d   : > { %301 = vmatpush.msra.mxu0 %v286_v5  ;;  %583 = vmatpush.msra.mxu1 %v286_v5  ;;  %v255_v31 = vld [vmem:[%s785_s5 + $0x58] sm:$0xff]  ;;  %v248_v34 = vld [vmem:[%s785_s5 + $0x20] sm:$0xff]  ;;  %v257_v39 = vld [vmem:[%s785_s5 + $0x68] sm:$0xff] }
  0x1e   : > { %587 = vmatpush.msra.mxu2 %v285_v6  ;;  %588 = vmatpush.msra.mxu3 %v285_v6  ;;  %v256_v35 = vld [vmem:[%s785_s5 + $0x60] sm:$0xff]  ;;  %v266_v40 = vld [vmem:[%s785_s5 + $0xb0] sm:$0xff]  ;;  %v267_v44 = vld [vmem:[%s785_s5 + $0xb8] sm:$0xff] }
  0x1f   : > { %302 = vmatpush.msra.mxu0 %v285_v6  ;;  %586 = vmatpush.msra.mxu1 %v285_v6  ;;  %v274_v41 = vld [vmem:[%s785_s5 + $0xf0] sm:$0xff]  ;;  %v275_v45 = vld [vmem:[%s785_s5 + $0xf8] sm:$0xff] }
  0x20   : > { %590 = vmatpush.msra.mxu2 %v284_v7  ;;  %591 = vmatpush.msra.mxu3 %v284_v7  ;;  %v250_v42 = vld [vmem:[%s785_s5 + $0x30] sm:$0xff]  ;;  %v251_v46 = vld [vmem:[%s785_s5 + $0x38] sm:$0xff] }
  0x21   : > { %303 = vmatpush.msra.mxu0 %v284_v7  ;;  %589 = vmatpush.msra.mxu1 %v284_v7  ;;  %v258_v43 = vld [vmem:[%s785_s5 + $0x70] sm:$0xff]  ;;  %v259_v47 = vld [vmem:[%s785_s5 + $0x78] sm:$0xff] }
  0x22   : > { %593 = vmatpush.msra.mxu2 %v283_v8  ;;  %594 = vmatpush.msra.mxu3 %v283_v8 }
  0x23   : > { %304 = vmatpush.msra.mxu0 %v283_v8  ;;  %592 = vmatpush.msra.mxu1 %v283_v8 }
  0x24   : > { %596 = vmatpush.msra.mxu2 %v282_v9  ;;  %597 = vmatpush.msra.mxu3 %v282_v9 }
  0x25   : > { %305 = vmatpush.msra.mxu0 %v282_v9  ;;  %595 = vmatpush.msra.mxu1 %v282_v9 }
  0x26   : > { %599 = vmatpush.msra.mxu2 %v281_v10  ;;  %600 = vmatpush.msra.mxu3 %v281_v10 }
  0x27   : > { %306 = vmatpush.msra.mxu0 %v281_v10  ;;  %598 = vmatpush.msra.mxu1 %v281_v10 }
  0x28   : > { %602 = vmatpush.msra.mxu2 %v280_v11  ;;  %603 = vmatpush.msra.mxu3 %v280_v11 }
  0x29   : > { %307 = vmatpush.msra.mxu0 %v280_v11  ;;  %601 = vmatpush.msra.mxu1 %v280_v11 }
  0x2a   : > { %605 = vmatpush.msra.mxu2 %v279_v12  ;;  %606 = vmatpush.msra.mxu3 %v279_v12 }
  0x2b   : > { %308 = vmatpush.msra.mxu0 %v279_v12  ;;  %604 = vmatpush.msra.mxu1 %v279_v12 }
  0x2c   : > { %608 = vmatpush.msra.mxu2 %v278_v13  ;;  %609 = vmatpush.msra.mxu3 %v278_v13 }
  0x2d   : > { %309 = vmatpush.msra.mxu0 %v278_v13  ;;  %607 = vmatpush.msra.mxu1 %v278_v13 }
  0x2e   : > { %611 = vmatpush.msra.mxu2 %v277_v14  ;;  %612 = vmatpush.msra.mxu3 %v277_v14 }
  0x2f   : > { %310 = vmatpush.msra.mxu0 %v277_v14  ;;  %610 = vmatpush.msra.mxu1 %v277_v14 }
  0x30   : > { %614 = vmatpush.msra.mxu2 %v276_v15  ;;  %615 = vmatpush.msra.mxu3 %v276_v15 }
  0x31   : > { %360 = vmatmul.f32.vlgmr.msra.gmra.mxu2 %v260_v16  ;;  %384 = vmatmul.f32.vlgmr.msra.gmra.mxu3 %v268_v17 }
  0x32   : > { %311 = vmatpush.msra.mxu0 %v276_v15  ;;  %613 = vmatpush.msra.mxu1 %v276_v15 }
  0x33   : > { %312 = vmatmul.f32.vlgmr.msra.gmra.mxu0 %v244_v18  ;;  %336 = vmatmul.f32.vlgmr.msra.gmra.mxu1 %v252_v19 }
  0x39   : > { %363 = vmatmul.f32.gmra.mxu2 %v261_v20  ;;  %387 = vmatmul.f32.gmra.mxu3 %v269_v21 }
  0x3b   : > { %315 = vmatmul.f32.gmra.mxu0 %v245_v22  ;;  %339 = vmatmul.f32.gmra.mxu1 %v253_v23 }
  0x41   : > { %366 = vmatmul.f32.gmra.mxu2 %v262_v24  ;;  %390 = vmatmul.f32.gmra.mxu3 %v270_v25 }
  0x43   : > { %318 = vmatmul.f32.gmra.mxu0 %v246_v26  ;;  %342 = vmatmul.f32.gmra.mxu1 %v254_v27 }
  0x49   : > { %369 = vmatmul.f32.gmra.mxu2 %v263_v28  ;;  %393 = vmatmul.f32.gmra.mxu3 %v271_v29 }
  0x4b   : > { %321 = vmatmul.f32.gmra.mxu0 %v247_v30  ;;  %345 = vmatmul.f32.gmra.mxu1 %v255_v31 }
  0x51   : > { %372 = vmatmul.f32.gmra.mxu2 %v264_v32  ;;  %396 = vmatmul.f32.gmra.mxu3 %v272_v33 }
  0x53   : > { %324 = vmatmul.f32.gmra.mxu0 %v248_v34  ;;  %348 = vmatmul.f32.gmra.mxu1 %v256_v35 }
  0x59   : > { %375 = vmatmul.f32.gmra.mxu2 %v265_v36  ;;  %399 = vmatmul.f32.gmra.mxu3 %v273_v37 }
  0x5b   : > { %327 = vmatmul.f32.gmra.mxu0 %v249_v38  ;;  %351 = vmatmul.f32.gmra.mxu1 %v257_v39 }
  0x61   : > { %378 = vmatmul.f32.gmra.mxu2 %v266_v40  ;;  %402 = vmatmul.f32.gmra.mxu3 %v274_v41 }
  0x63   : > { %330 = vmatmul.f32.gmra.mxu0 %v250_v42  ;;  %354 = vmatmul.f32.gmra.mxu1 %v258_v43 }
  0x69   : > { %381 = vmatmul.f32.gmra.mxu2 %v267_v44  ;;  %405 = vmatmul.f32.gmra.mxu3 %v275_v45 }
  0x6b   : > { %333 = vmatmul.f32.gmra.mxu0 %v251_v46  ;;  %357 = vmatmul.f32.gmra.mxu1 %v259_v47 }
  0xb0   : > { %v313_v49 = vpop.f32.mrf.mxu0  ;;  %v337_v50 = vpop.f32.mrf.mxu1 }
  0xb1   : > { %v314_v51 = vadd.f32 %v826_v48, %v313_v49  ;;  %v338_v52 = vadd.f32 %v826_v48, %v337_v50 }
  0xb3   : > { %409 = vst [vmem:[%s833_s10] sm:$0xff] %v314_v51 }
  0xb4   : > { %417 = vst [vmem:[%s833_s10 + $0x40] sm:$0xff] %v338_v52  ;;  %v361_v53 = vpop.f32.mrf.mxu2  ;;  %v385_v54 = vpop.f32.mrf.mxu3 }
  0xb5   : > { %v362_v55 = vadd.f32 %v826_v48, %v361_v53  ;;  %v386_v56 = vadd.f32 %v826_v48, %v385_v54 }
  0xb7   : > { %425 = vst [vmem:[%s833_s10 + $0x80] sm:$0xff] %v362_v55 }
  0xb8   : > { %433 = vst [vmem:[%s833_s10 + $0xc0] sm:$0xff] %v386_v56  ;;  %v316_v57 = vpop.f32.mrf.mxu0  ;;  %v340_v58 = vpop.f32.mrf.mxu1 }
  0xb9   : > { %v317_v59 = vadd.f32 %v826_v48, %v316_v57  ;;  %v341_v60 = vadd.f32 %v826_v48, %v340_v58 }
  0xbb   : > { %410 = vst [vmem:[%s833_s10 + $0x8] sm:$0xff] %v317_v59 }
  0xbc   : > { %418 = vst [vmem:[%s833_s10 + $0x48] sm:$0xff] %v341_v60  ;;  %v364_v61 = vpop.f32.mrf.mxu2  ;;  %v388_v62 = vpop.f32.mrf.mxu3 }
  0xbd   : > { %v365_v63 = vadd.f32 %v826_v48, %v364_v61  ;;  %v389_v0 = vadd.f32 %v826_v48, %v388_v62 }
  0xbf   : > { %426 = vst [vmem:[%s833_s10 + $0x88] sm:$0xff] %v365_v63 }
  0xc0   : > { %434 = vst [vmem:[%s833_s10 + $0xc8] sm:$0xff] %v389_v0  ;;  %v319_v1 = vpop.f32.mrf.mxu0  ;;  %v343_v2 = vpop.f32.mrf.mxu1 }
  0xc1   : > { %v320_v3 = vadd.f32 %v826_v48, %v319_v1  ;;  %v344_v4 = vadd.f32 %v826_v48, %v343_v2 }
  0xc3   : > { %411 = vst [vmem:[%s833_s10 + $0x10] sm:$0xff] %v320_v3 }
  0xc4   : > { %419 = vst [vmem:[%s833_s10 + $0x50] sm:$0xff] %v344_v4  ;;  %v367_v5 = vpop.f32.mrf.mxu2  ;;  %v391_v6 = vpop.f32.mrf.mxu3 }
  0xc5   : > { %v368_v7 = vadd.f32 %v826_v48, %v367_v5  ;;  %v392_v8 = vadd.f32 %v826_v48, %v391_v6 }
  0xc7   : > { %427 = vst [vmem:[%s833_s10 + $0x90] sm:$0xff] %v368_v7 }
  0xc8   : > { %435 = vst [vmem:[%s833_s10 + $0xd0] sm:$0xff] %v392_v8  ;;  %v322_v9 = vpop.f32.mrf.mxu0  ;;  %v346_v10 = vpop.f32.mrf.mxu1 }
  0xc9   : > { %v323_v11 = vadd.f32 %v826_v48, %v322_v9  ;;  %v347_v12 = vadd.f32 %v826_v48, %v346_v10 }
  0xcb   : > { %412 = vst [vmem:[%s833_s10 + $0x18] sm:$0xff] %v323_v11 }
  0xcc   : > { %420 = vst [vmem:[%s833_s10 + $0x58] sm:$0xff] %v347_v12  ;;  %v370_v13 = vpop.f32.mrf.mxu2  ;;  %v394_v14 = vpop.f32.mrf.mxu3 }
  0xcd   : > { %v371_v15 = vadd.f32 %v826_v48, %v370_v13  ;;  %v395_v16 = vadd.f32 %v826_v48, %v394_v14 }
  0xcf   : > { %428 = vst [vmem:[%s833_s10 + $0x98] sm:$0xff] %v371_v15 }
  0xd0   : > { %436 = vst [vmem:[%s833_s10 + $0xd8] sm:$0xff] %v395_v16  ;;  %v325_v17 = vpop.f32.mrf.mxu0  ;;  %v349_v18 = vpop.f32.mrf.mxu1 }
  0xd1   : > { %v326_v19 = vadd.f32 %v826_v48, %v325_v17  ;;  %v350_v20 = vadd.f32 %v826_v48, %v349_v18 }
  0xd3   : > { %413 = vst [vmem:[%s833_s10 + $0x20] sm:$0xff] %v326_v19 }
  0xd4   : > { %421 = vst [vmem:[%s833_s10 + $0x60] sm:$0xff] %v350_v20  ;;  %v373_v21 = vpop.f32.mrf.mxu2  ;;  %v397_v22 = vpop.f32.mrf.mxu3 }
  0xd5   : > { %v374_v23 = vadd.f32 %v826_v48, %v373_v21  ;;  %v398_v24 = vadd.f32 %v826_v48, %v397_v22 }
  0xd7   : > { %429 = vst [vmem:[%s833_s10 + $0xa0] sm:$0xff] %v374_v23 }
  0xd8   : > { %437 = vst [vmem:[%s833_s10 + $0xe0] sm:$0xff] %v398_v24  ;;  %v328_v25 = vpop.f32.mrf.mxu0  ;;  %v352_v26 = vpop.f32.mrf.mxu1 }
  0xd9   : > { %v329_v27 = vadd.f32 %v826_v48, %v328_v25  ;;  %v353_v28 = vadd.f32 %v826_v48, %v352_v26 }
  0xdb   : > { %414 = vst [vmem:[%s833_s10 + $0x28] sm:$0xff] %v329_v27 }
  0xdc   : > { %422 = vst [vmem:[%s833_s10 + $0x68] sm:$0xff] %v353_v28  ;;  %v376_v29 = vpop.f32.mrf.mxu2  ;;  %v400_v30 = vpop.f32.mrf.mxu3 }
  0xdd   : > { %v377_v31 = vadd.f32 %v826_v48, %v376_v29  ;;  %v401_v32 = vadd.f32 %v826_v48, %v400_v30 }
  0xdf   : > { %430 = vst [vmem:[%s833_s10 + $0xa8] sm:$0xff] %v377_v31 }
  0xe0   : > { %438 = vst [vmem:[%s833_s10 + $0xe8] sm:$0xff] %v401_v32  ;;  %v331_v33 = vpop.f32.mrf.mxu0  ;;  %v355_v34 = vpop.f32.mrf.mxu1 }
  0xe1   : > { %v332_v35 = vadd.f32 %v826_v48, %v331_v33  ;;  %v356_v36 = vadd.f32 %v826_v48, %v355_v34 }
  0xe3   : > { %415 = vst [vmem:[%s833_s10 + $0x30] sm:$0xff] %v332_v35 }
  0xe4   : > { %423 = vst [vmem:[%s833_s10 + $0x70] sm:$0xff] %v356_v36  ;;  %v379_v37 = vpop.f32.mrf.mxu2  ;;  %v403_v38 = vpop.f32.mrf.mxu3 }
  0xe5   : > { %v380_v39 = vadd.f32 %v826_v48, %v379_v37  ;;  %v404_v40 = vadd.f32 %v826_v48, %v403_v38 }
  0xe7   : > { %431 = vst [vmem:[%s833_s10 + $0xb0] sm:$0xff] %v380_v39 }
  0xe8   : > { %439 = vst [vmem:[%s833_s10 + $0xf0] sm:$0xff] %v404_v40  ;;  %v334_v41 = vpop.f32.mrf.mxu0  ;;  %v358_v42 = vpop.f32.mrf.mxu1 }
  0xe9   : > { %v335_v43 = vadd.f32 %v826_v48, %v334_v41  ;;  %v359_v44 = vadd.f32 %v826_v48, %v358_v42 }
  0xeb   : > { %416 = vst [vmem:[%s833_s10 + $0x38] sm:$0xff] %v335_v43 }
  0xec   : > { %424 = vst [vmem:[%s833_s10 + $0x78] sm:$0xff] %v359_v44  ;;  %v382_v45 = vpop.f32.mrf.mxu2  ;;  %v406_v46 = vpop.f32.mrf.mxu3 }
  0xed   : > { %v383_v47 = vadd.f32 %v826_v48, %v382_v45  ;;  %v407_v49 = vadd.f32 %v826_v48, %v406_v46 }
  0xef   : > { %432 = vst [vmem:[%s833_s10 + $0xb8] sm:$0xff] %v383_v47 }
  0xf0   : > { %440 = vst [vmem:[%s833_s10 + $0xf8] sm:$0xff] %v407_v49 }
  0xf1 PF: > { %s13_s16 = sadd.s32 1, %s695_s16   ;;  %s918_s12 = smov %s687_s14 }
  0xf2   : > { %p10_p7 = scmp.ge.s32.totalorder %s13_s16, 6   ;;  %s919_s13 = smov %s691_s15 }
  0xf3   : > { %s920_s14 = smov %s923_s17  ;;  %s921_s15 = smov %s927_s18 }
  0xf4   :  { %12 = sbr.rel (!%p10_p7) target bundleno = 3 (0x3), region = 68 }

// kernel: cl_hgcn_forward.4
= control target key start
LH: loop header
LB: loop body
LE: loop exit
PB: predicated region body
PF: predicated region fallthrough
CT: control target
= control target key end

     0   :  { %s3616_s0 = inlined_call_operand.vmem [shape: f32[2,512,128], index: 0, kind: input, shape index: {}]   ;;  %s3617_s1 = inlined_call_operand.vmem [shape: f32[2,512,512], index: 1, kind: input, shape index: {}]   ;;  %s3618_s2 = inlined_call_operand.vmem [shape: f32[128,128], index: 2, kind: input, shape index: {}]   ;;  %s3619_s3 = inlined_call_operand.vmem [shape: f32[1,128], index: 3, kind: input, shape index: {}]   ;;  %s3620_s4 = inlined_call_operand.vmem [shape: f32[128,128], index: 4, kind: input, shape index: {}]   ;;  %s3621_s5 = inlined_call_operand.vmem [shape: f32[1,128], index: 5, kind: input, shape index: {}]   ;;  %s3622_s6 = inlined_call_operand.vmem [shape: f32[2,512,128], index: 6, kind: output, shape index: {0}]   ;;  %s3623_s7 = inlined_call_operand.vmem [shape: f32[2,512,128], index: 7, kind: output, shape index: {1}]  }
   0x1   :  { %3628 = sst [smem:[#allocation8_spill]] %s3617_s1 }
   0x2   :  { %s2689_s24 = smov 0   ;;  %s2691_s25 = smov 0  }
   0x3   :  { %s2693_s26 = smov 0   ;;  %s2695_s27 = smov 0  }
   0x4   :  { %s2697_s28 = smov 0   ;;  %s2699_s29 = smov 0  }
   0x5   :  { %s2701_s30 = smov 0   ;;  %s2703_s8 = smov 0  }
   0x6   :  { %s2705_s9 = smov 0  }
   0x7 LB: > { %3629 = sst [smem:[#allocation4_spill]] %s2642_s8  ;;  %s30_s10 = sadd.s32 1, %s2634_s29  ;;  %s2646_s9 = sphi %s2705_s9, %s18_s9   ;;  %s2642_s8 = sphi %s2703_s8, %s3638_s8   ;;  %s2638_s30 = sphi %s2701_s30, %s3644_s30   ;;  %s2634_s29 = sphi %s2699_s29, %s3643_s29   ;;  %s2630_s28 = sphi %s2697_s28, %s3635_s28   ;;  %s2626_s27 = sphi %s2695_s27, %s3642_s27   ;;  %s2622_s26 = sphi %s2693_s26, %s3641_s26   ;;  %s2618_s25 = sphi %s2691_s25, %s3640_s25   ;;  %s2614_s24 = sphi %s2689_s24, %s3639_s24  }
   0x8   : > { %p31_p0 = scmp.ge.s32.totalorder %s30_s10, 2  ;;  %s33_s11 = sadd.s32 1, %s2638_s30 }
   0x9   : > { %p83_p1 = scmp.ne.s32.totalorder %s2618_s25, %s2614_s24  ;;  %p84_p2 = scmp.eq.s32.totalorder %s2646_s9, 0 }
   0xa   : > { %s3646_s11 = smov (!%p31_p0, %s33_s11), %s2638_s30  ;;  %s37_s12 = sadd.s32 1, %s2642_s8 }
   0xb   : > { %p35_p3 = scmp.ge.s32.totalorder %s3646_s11, 2  ;;  %p2741_p4 = por %p84_p2, %p83_p1 }
   0xc   : > { %s3652_s10 = smov (%p31_p0, %s30_s10), 0  ;;  %s76_s19 = sadd.s32 1, %s2618_s25 }
   0xd   : > { %s3648_s11 = smov (%p35_p3, %s3646_s11), 0  ;;  %s3650_s12 = smov (!%p35_p3, %s37_s12), %s2642_s8 }
   0xe   : > { %3631 = sst [smem:[#allocation5_spill]] %s3648_s11  ;;  %p39_p5 = scmp.ge.s32.totalorder %s3650_s12, 2 }
   0xf   : > { %3632 = sst [smem:[#allocation6_spill]] %s3652_s10  ;;  %s70_s14 = ssub.s32 %s2638_s30, %s3648_s11 }
  0x10   : > { %s3654_s12 = smov (%p39_p5, %s3650_s12), 0  ;;  %s72_s15 = ssub.s32 %s2634_s29, %s3652_s10 }
  0x11   : > { %3633 = sst [smem:[#allocation7_spill]] %s3654_s12  ;;  %s69_s16 = ssub.s32 %s2642_s8, %s3654_s12 }
  0x12   : > { %s71_s17 = sor.u32 %s70_s14, %s69_s16  ;;  %p2254_p7 = scmp.ge.s32.totalorder %s2646_s9, 8 }
  0x13   : > { %s73_s18 = sor.u32 %s72_s15, %s71_s17 }
  0x14   : > { %p74_p6 = scmp.eq.s32.totalorder %s73_s18, 0  ;;  %261 = sbr.rel (%p2254_p7) target bundleno = 100 (0x64), region = 32 }
  0x16   : > { %s2760_s20 = scalar_select %p74_p6, %s2618_s25, %s76_s19  }
  0x19   : > { %277 = sbr.rel (!%p2741_p4) target bundleno = 100 (0x64), region = 40  ;;  %s279_s21 = sand.u32 (%p2741_p4), 1, %s2618_s25  }
  0x1a   : > { %s2257_s22 = sshll.u32 (%p2741_p4), %s2634_s29, 1  ;;  %s2308_s23 = sshll.u32 (%p2741_p4), %s2638_s30, 7 }
  0x1b   : > { %s2255_s12 = sshll.u32 (%p2741_p4), %s279_s21, 9  ;;  %s285_s14 = sadd.s32 (%p2741_p4), %s2308_s23, %s2257_s22 }
  0x1c   : > { %s2259_s15 = sshll.u32 (%p2741_p4), %s2642_s8, 8  ;;  %s3634_s1 = sld [smem:[#allocation8_spill]] (%p2741_p4) }
  0x1d   : > { %s287_s16 = sadd.s32 (%p2741_p4), %s2259_s15, %s285_s14  ;;  %s2777_s13 = scalar_lea.vmem (%p2741_p4), [#allocation3], %s2255_s12 }
  0x1e   : > { %s2260_s17 = sshll.u32 %s287_s16, 3 }
  0x22   : > { %s2772_s11 = scalar_lea.vmem %s3634_s1, %s2260_s17 }
  0x23   : > { %v302_v0 = vld [vmem:[%s2772_s11] sm:$0xff]  ;;  %v304_v1 = vld [vmem:[%s2772_s11 + $0x8] sm:$0xff] }
  0x24   : > { %v306_v2 = vld [vmem:[%s2772_s11 + $0x20] sm:$0xff]  ;;  %303 = vst [vmem:[%s2777_s13] sm:$0xff] %v302_v0  ;;  %v308_v3 = vld [vmem:[%s2772_s11 + $0x28] sm:$0xff] }
  0x25   : > { %305 = vst [vmem:[%s2777_s13 + $0x8] sm:$0xff] %v304_v1  ;;  %v310_v4 = vld [vmem:[%s2772_s11 + $0x40] sm:$0xff]  ;;  %v312_v5 = vld [vmem:[%s2772_s11 + $0x48] sm:$0xff] }
  0x26   : > { %307 = vst [vmem:[%s2777_s13 + $0x10] sm:$0xff] %v306_v2  ;;  %v314_v6 = vld [vmem:[%s2772_s11 + $0x60] sm:$0xff]  ;;  %v316_v7 = vld [vmem:[%s2772_s11 + $0x68] sm:$0xff] }
  0x27   : > { %309 = vst [vmem:[%s2777_s13 + $0x18] sm:$0xff] %v308_v3  ;;  %v318_v8 = vld [vmem:[%s2772_s11 + $0x80] sm:$0xff]  ;;  %v320_v9 = vld [vmem:[%s2772_s11 + $0x88] sm:$0xff] }
  0x28   : > { %311 = vst [vmem:[%s2777_s13 + $0x20] sm:$0xff] %v310_v4  ;;  %v322_v10 = vld [vmem:[%s2772_s11 + $0xa0] sm:$0xff]  ;;  %v324_v11 = vld [vmem:[%s2772_s11 + $0xa8] sm:$0xff] }
  0x29   : > { %313 = vst [vmem:[%s2777_s13 + $0x28] sm:$0xff] %v312_v5  ;;  %v326_v12 = vld [vmem:[%s2772_s11 + $0xc0] sm:$0xff]  ;;  %v328_v13 = vld [vmem:[%s2772_s11 + $0xc8] sm:$0xff] }
  0x2a   : > { %315 = vst [vmem:[%s2777_s13 + $0x30] sm:$0xff] %v314_v6  ;;  %v330_v14 = vld [vmem:[%s2772_s11 + $0xe0] sm:$0xff]  ;;  %v332_v15 = vld [vmem:[%s2772_s11 + $0xe8] sm:$0xff] }
  0x2b   : > { %317 = vst [vmem:[%s2777_s13 + $0x38] sm:$0xff] %v316_v7  ;;  %v334_v16 = vld [vmem:[%s2772_s11 + $0x100] sm:$0xff]  ;;  %v336_v17 = vld [vmem:[%s2772_s11 + $0x108] sm:$0xff] }
  0x2c   : > { %319 = vst [vmem:[%s2777_s13 + $0x40] sm:$0xff] %v318_v8  ;;  %v338_v18 = vld [vmem:[%s2772_s11 + $0x120] sm:$0xff]  ;;  %v340_v19 = vld [vmem:[%s2772_s11 + $0x128] sm:$0xff] }
  0x2d   : > { %321 = vst [vmem:[%s2777_s13 + $0x48] sm:$0xff] %v320_v9  ;;  %v342_v20 = vld [vmem:[%s2772_s11 + $0x140] sm:$0xff]  ;;  %v344_v21 = vld [vmem:[%s2772_s11 + $0x148] sm:$0xff] }
  0x2e   : > { %323 = vst [vmem:[%s2777_s13 + $0x50] sm:$0xff] %v322_v10  ;;  %v346_v22 = vld [vmem:[%s2772_s11 + $0x160] sm:$0xff]  ;;  %v348_v23 = vld [vmem:[%s2772_s11 + $0x168] sm:$0xff] }
  0x2f   : > { %325 = vst [vmem:[%s2777_s13 + $0x58] sm:$0xff] %v324_v11  ;;  %v350_v24 = vld [vmem:[%s2772_s11 + $0x180] sm:$0xff]  ;;  %v352_v25 = vld [vmem:[%s2772_s11 + $0x188] sm:$0xff] }
  0x30   : > { %327 = vst [vmem:[%s2777_s13 + $0x60] sm:$0xff] %v326_v12  ;;  %v354_v26 = vld [vmem:[%s2772_s11 + $0x1a0] sm:$0xff]  ;;  %v356_v27 = vld [vmem:[%s2772_s11 + $0x1a8] sm:$0xff] }
  0x31   : > { %329 = vst [vmem:[%s2777_s13 + $0x68] sm:$0xff] %v328_v13  ;;  %v358_v28 = vld [vmem:[%s2772_s11 + $0x1c0] sm:$0xff]  ;;  %v360_v29 = vld [vmem:[%s2772_s11 + $0x1c8] sm:$0xff] }
  0x32   : > { %331 = vst [vmem:[%s2777_s13 + $0x70] sm:$0xff] %v330_v14  ;;  %v362_v30 = vld [vmem:[%s2772_s11 + $0x1e0] sm:$0xff]  ;;  %v364_v31 = vld [vmem:[%s2772_s11 + $0x1e8] sm:$0xff] }
  0x33   : > { %333 = vst [vmem:[%s2777_s13 + $0x78] sm:$0xff] %v332_v15  ;;  %v366_v32 = vld [vmem:[%s2772_s11 + $0x200] sm:$0xff]  ;;  %v368_v33 = vld [vmem:[%s2772_s11 + $0x208] sm:$0xff] }
  0x34   : > { %335 = vst [vmem:[%s2777_s13 + $0x80] sm:$0xff] %v334_v16  ;;  %v370_v34 = vld [vmem:[%s2772_s11 + $0x220] sm:$0xff]  ;;  %v372_v35 = vld [vmem:[%s2772_s11 + $0x228] sm:$0xff] }
  0x35   : > { %337 = vst [vmem:[%s2777_s13 + $0x88] sm:$0xff] %v336_v17  ;;  %v374_v36 = vld [vmem:[%s2772_s11 + $0x240] sm:$0xff]  ;;  %v376_v37 = vld [vmem:[%s2772_s11 + $0x248] sm:$0xff] }
  0x36   : > { %339 = vst [vmem:[%s2777_s13 + $0x90] sm:$0xff] %v338_v18  ;;  %v378_v38 = vld [vmem:[%s2772_s11 + $0x260] sm:$0xff]  ;;  %v380_v39 = vld [vmem:[%s2772_s11 + $0x268] sm:$0xff] }
  0x37   : > { %341 = vst [vmem:[%s2777_s13 + $0x98] sm:$0xff] %v340_v19  ;;  %v382_v40 = vld [vmem:[%s2772_s11 + $0x280] sm:$0xff]  ;;  %v384_v41 = vld [vmem:[%s2772_s11 + $0x288] sm:$0xff] }
  0x38   : > { %343 = vst [vmem:[%s2777_s13 + $0xa0] sm:$0xff] %v342_v20  ;;  %v386_v42 = vld [vmem:[%s2772_s11 + $0x2a0] sm:$0xff]  ;;  %v388_v43 = vld [vmem:[%s2772_s11 + $0x2a8] sm:$0xff] }
  0x39   : > { %345 = vst [vmem:[%s2777_s13 + $0xa8] sm:$0xff] %v344_v21  ;;  %v390_v44 = vld [vmem:[%s2772_s11 + $0x2c0] sm:$0xff]  ;;  %v392_v45 = vld [vmem:[%s2772_s11 + $0x2c8] sm:$0xff] }
  0x3a   : > { %347 = vst [vmem:[%s2777_s13 + $0xb0] sm:$0xff] %v346_v22  ;;  %v394_v46 = vld [vmem:[%s2772_s11 + $0x2e0] sm:$0xff]  ;;  %v396_v47 = vld [vmem:[%s2772_s11 + $0x2e8] sm:$0xff] }
  0x3b   : > { %349 = vst [vmem:[%s2777_s13 + $0xb8] sm:$0xff] %v348_v23  ;;  %v398_v48 = vld [vmem:[%s2772_s11 + $0x300] sm:$0xff]  ;;  %v400_v49 = vld [vmem:[%s2772_s11 + $0x308] sm:$0xff] }
  0x3c   : > { %351 = vst [vmem:[%s2777_s13 + $0xc0] sm:$0xff] %v350_v24  ;;  %v402_v50 = vld [vmem:[%s2772_s11 + $0x320] sm:$0xff]  ;;  %v404_v51 = vld [vmem:[%s2772_s11 + $0x328] sm:$0xff] }
  0x3d   : > { %353 = vst [vmem:[%s2777_s13 + $0xc8] sm:$0xff] %v352_v25  ;;  %v406_v52 = vld [vmem:[%s2772_s11 + $0x340] sm:$0xff]  ;;  %v408_v53 = vld [vmem:[%s2772_s11 + $0x348] sm:$0xff] }
  0x3e   : > { %355 = vst [vmem:[%s2777_s13 + $0xd0] sm:$0xff] %v354_v26  ;;  %v410_v54 = vld [vmem:[%s2772_s11 + $0x360] sm:$0xff]  ;;  %v412_v55 = vld [vmem:[%s2772_s11 + $0x368] sm:$0xff] }
  0x3f   : > { %357 = vst [vmem:[%s2777_s13 + $0xd8] sm:$0xff] %v356_v27  ;;  %v414_v56 = vld [vmem:[%s2772_s11 + $0x380] sm:$0xff]  ;;  %v416_v57 = vld [vmem:[%s2772_s11 + $0x388] sm:$0xff] }
  0x40   : > { %359 = vst [vmem:[%s2777_s13 + $0xe0] sm:$0xff] %v358_v28  ;;  %v418_v58 = vld [vmem:[%s2772_s11 + $0x3a0] sm:$0xff]  ;;  %v420_v59 = vld [vmem:[%s2772_s11 + $0x3a8] sm:$0xff] }
  0x41   : > { %361 = vst [vmem:[%s2777_s13 + $0xe8] sm:$0xff] %v360_v29  ;;  %v422_v60 = vld [vmem:[%s2772_s11 + $0x3c0] sm:$0xff]  ;;  %v424_v61 = vld [vmem:[%s2772_s11 + $0x3c8] sm:$0xff] }
  0x42   : > { %363 = vst [vmem:[%s2777_s13 + $0xf0] sm:$0xff] %v362_v30  ;;  %v426_v62 = vld [vmem:[%s2772_s11 + $0x3e0] sm:$0xff]  ;;  %v428_v63 = vld [vmem:[%s2772_s11 + $0x3e8] sm:$0xff] }
  0x43   : > { %365 = vst [vmem:[%s2777_s13 + $0xf8] sm:$0xff] %v364_v31 }
  0x44   : > { %367 = vst [vmem:[%s2777_s13 + $0x100] sm:$0xff] %v366_v32 }
  0x45   : > { %369 = vst [vmem:[%s2777_s13 + $0x108] sm:$0xff] %v368_v33 }
  0x46   : > { %371 = vst [vmem:[%s2777_s13 + $0x110] sm:$0xff] %v370_v34 }
  0x47   : > { %373 = vst [vmem:[%s2777_s13 + $0x118] sm:$0xff] %v372_v35 }
  0x48   : > { %375 = vst [vmem:[%s2777_s13 + $0x120] sm:$0xff] %v374_v36 }
  0x49   : > { %377 = vst [vmem:[%s2777_s13 + $0x128] sm:$0xff] %v376_v37 }
  0x4a   : > { %379 = vst [vmem:[%s2777_s13 + $0x130] sm:$0xff] %v378_v38 }
  0x4b   : > { %381 = vst [vmem:[%s2777_s13 + $0x138] sm:$0xff] %v380_v39 }
  0x4c   : > { %383 = vst [vmem:[%s2777_s13 + $0x140] sm:$0xff] %v382_v40 }
  0x4d   : > { %385 = vst [vmem:[%s2777_s13 + $0x148] sm:$0xff] %v384_v41 }
  0x4e   : > { %387 = vst [vmem:[%s2777_s13 + $0x150] sm:$0xff] %v386_v42 }
  0x4f   : > { %389 = vst [vmem:[%s2777_s13 + $0x158] sm:$0xff] %v388_v43 }
  0x50   : > { %391 = vst [vmem:[%s2777_s13 + $0x160] sm:$0xff] %v390_v44 }
  0x51   : > { %393 = vst [vmem:[%s2777_s13 + $0x168] sm:$0xff] %v392_v45 }
  0x52   : > { %395 = vst [vmem:[%s2777_s13 + $0x170] sm:$0xff] %v394_v46 }
  0x53   : > { %397 = vst [vmem:[%s2777_s13 + $0x178] sm:$0xff] %v396_v47 }
  0x54   : > { %399 = vst [vmem:[%s2777_s13 + $0x180] sm:$0xff] %v398_v48 }
  0x55   : > { %401 = vst [vmem:[%s2777_s13 + $0x188] sm:$0xff] %v400_v49 }
  0x56   : > { %403 = vst [vmem:[%s2777_s13 + $0x190] sm:$0xff] %v402_v50 }
  0x57   : > { %405 = vst [vmem:[%s2777_s13 + $0x198] sm:$0xff] %v404_v51 }
  0x58   : > { %407 = vst [vmem:[%s2777_s13 + $0x1a0] sm:$0xff] %v406_v52 }
  0x59   : > { %409 = vst [vmem:[%s2777_s13 + $0x1a8] sm:$0xff] %v408_v53 }
  0x5a   : > { %411 = vst [vmem:[%s2777_s13 + $0x1b0] sm:$0xff] %v410_v54 }
  0x5b   : > { %413 = vst [vmem:[%s2777_s13 + $0x1b8] sm:$0xff] %v412_v55 }
  0x5c   : > { %415 = vst [vmem:[%s2777_s13 + $0x1c0] sm:$0xff] %v414_v56 }
  0x5d   : > { %417 = vst [vmem:[%s2777_s13 + $0x1c8] sm:$0xff] %v416_v57 }
  0x5e   : > { %419 = vst [vmem:[%s2777_s13 + $0x1d0] sm:$0xff] %v418_v58 }
  0x5f   : > { %421 = vst [vmem:[%s2777_s13 + $0x1d8] sm:$0xff] %v420_v59 }
  0x60   : > { %423 = vst [vmem:[%s2777_s13 + $0x1e0] sm:$0xff] %v422_v60 }
  0x61   : > { %425 = vst [vmem:[%s2777_s13 + $0x1e8] sm:$0xff] %v424_v61 }
  0x62   : > { %427 = vst [vmem:[%s2777_s13 + $0x1f0] sm:$0xff] %v426_v62 }
  0x63   : > { %429 = vst [vmem:[%s2777_s13 + $0x1f8] sm:$0xff] %v428_v63 }
  0x64 PF: > { %p2261_p8 = scmp.ge.s32.totalorder %s2646_s9, 1  ;;  %p434_p9 = scmp.lt.s32.totalorder %s2646_s9, 9 }
  0x66   : > { %p435_p10 = pnand %p2261_p8, %p434_p9 }
  0x67   : > { %s441_s12 = sand.u32 (!%p435_p10), 1, %s2614_s24   ;;  %s2263_s21 = sshll.u32 (!%p435_p10), %s2622_s26, 5 }
  0x68   : > { %438 = sbr.rel (%p435_p10) target bundleno = 1016 (0x3f8), region = 63  ;;  %s2262_s22 = sshll.u32 (!%p435_p10), %s441_s12, 9 }
  0x69   : > { %p495_p11 = scmp.lt.s32.totalorder (!%p435_p10), %s2630_s28, 1  ;;  %p497_p12 = scmp.lt.s32.totalorder (!%p435_p10), %s2263_s21, 63 }
  0x6a   : > { %s2266_s23 = sshll.u32 (!%p435_p10), %s2626_s27, 5  ;;  %p2272_p0 = scmp.ne.s32.totalorder (!%p435_p10), %s2622_s26, 0 }
  0x6b   : > { %p509_p13 = scmp.lt.s32.totalorder (!%p435_p10), %s2266_s23, 63 }
  0x6d   : > { %s3656_s28 = smov (!%p495_p11, %s2630_s28), 1  ;;  %s3658_s21 = smov (!%p497_p12, %s2263_s21), 63 }
  0x6e   : > { %s2264_s11 = sshll.u32 %s3656_s28, 6  ;;  %s3660_s23 = smov (!%p509_p13, %s2266_s23), 63 }
  0x6f   : > { %s500_s14 = sadd.s32 %s2264_s11, %s3658_s21  ;;  %s512_s19 = sadd.s32 %s2264_s11, %s3660_s23 }
  0x70   : > { %s2265_s15 = sshll.u32 %s500_s14, 3  ;;  %s2268_s13 = sshll.u32 %s512_s19, 3 }
  0x71   : > { %s2914_s18 = scalar_lea.vmem %s3616_s0, %s2265_s15  ;;  %s2919_s12 = scalar_lea.vmem %s3622_s6, %s2268_s13 }
  0x72   : > { %s2924_s27 = scalar_lea.vmem %s3623_s7, %s2268_s13  ;;  %s2926_s28 = scalar_lea.vmem [#allocation3], %s2262_s22 }
  0x73   : > { %529 = sbr.rel (%p2272_p0) target bundleno = 153 (0x99), region = 71 }
  0x78   : > { %v2648_v0 = vmov 0.0  }
  0x79   : > { %530 = vst [vmem:[#allocation2 + $0xb0] sm:$0xff] %v2648_v0 }
  0x7a   : > { %531 = vst [vmem:[#allocation2] sm:$0xff] %v2648_v0 }
  0x7b   : > { %532 = vst [vmem:[#allocation2 + $0xd8] sm:$0xff] %v2648_v0 }
  0x7c   : > { %533 = vst [vmem:[#allocation2 + $0x18] sm:$0xff] %v2648_v0 }
  0x7d   : > { %534 = vst [vmem:[#allocation2 + $0x50] sm:$0xff] %v2648_v0 }
  0x7e   : > { %535 = vst [vmem:[#allocation2 + $0x68] sm:$0xff] %v2648_v0 }
  0x7f   : > { %536 = vst [vmem:[#allocation2 + $0x30] sm:$0xff] %v2648_v0 }
  0x80   : > { %537 = vst [vmem:[#allocation2 + $0x48] sm:$0xff] %v2648_v0 }
  0x81   : > { %538 = vst [vmem:[#allocation2 + $0x80] sm:$0xff] %v2648_v0 }
  0x82   : > { %539 = vst [vmem:[#allocation2 + $0x88] sm:$0xff] %v2648_v0 }
  0x83   : > { %540 = vst [vmem:[#allocation2 + $0xe8] sm:$0xff] %v2648_v0 }
  0x84   : > { %541 = vst [vmem:[#allocation2 + $0xb8] sm:$0xff] %v2648_v0 }
  0x85   : > { %542 = vst [vmem:[#allocation2 + $0x60] sm:$0xff] %v2648_v0 }
  0x86   : > { %543 = vst [vmem:[#allocation2 + $0xf0] sm:$0xff] %v2648_v0 }
  0x87   : > { %544 = vst [vmem:[#allocation2 + $0x8] sm:$0xff] %v2648_v0 }
  0x88   : > { %545 = vst [vmem:[#allocation2 + $0x78] sm:$0xff] %v2648_v0 }
  0x89   : > { %546 = vst [vmem:[#allocation2 + $0x38] sm:$0xff] %v2648_v0 }
  0x8a   : > { %547 = vst [vmem:[#allocation2 + $0x58] sm:$0xff] %v2648_v0 }
  0x8b   : > { %548 = vst [vmem:[#allocation2 + $0x40] sm:$0xff] %v2648_v0 }
  0x8c   : > { %549 = vst [vmem:[#allocation2 + $0xc8] sm:$0xff] %v2648_v0 }
  0x8d   : > { %550 = vst [vmem:[#allocation2 + $0xe0] sm:$0xff] %v2648_v0 }
  0x8e   : > { %551 = vst [vmem:[#allocation2 + $0x90] sm:$0xff] %v2648_v0 }
  0x8f   : > { %552 = vst [vmem:[#allocation2 + $0x70] sm:$0xff] %v2648_v0 }
  0x90   : > { %553 = vst [vmem:[#allocation2 + $0xc0] sm:$0xff] %v2648_v0 }
  0x91   : > { %554 = vst [vmem:[#allocation2 + $0xa8] sm:$0xff] %v2648_v0 }
  0x92   : > { %555 = vst [vmem:[#allocation2 + $0xd0] sm:$0xff] %v2648_v0 }
  0x93   : > { %556 = vst [vmem:[#allocation2 + $0x10] sm:$0xff] %v2648_v0 }
  0x94   : > { %557 = vst [vmem:[#allocation2 + $0x28] sm:$0xff] %v2648_v0 }
  0x95   : > { %558 = vst [vmem:[#allocation2 + $0xa0] sm:$0xff] %v2648_v0 }
  0x96   : > { %559 = vst [vmem:[#allocation2 + $0xf8] sm:$0xff] %v2648_v0 }
  0x97   : > { %560 = vst [vmem:[#allocation2 + $0x20] sm:$0xff] %v2648_v0 }
  0x98   : > { %561 = vst [vmem:[#allocation2 + $0x98] sm:$0xff] %v2648_v0 }
  0x99 PF: > { %v673_v1 = vld [vmem:[%s2914_s18 + $0x78] sm:$0xff]  ;;  %v672_v3 = vld [vmem:[%s2914_s18 + $0x70] sm:$0xff]  ;;  %v671_v5 = vld [vmem:[%s2914_s18 + $0x68] sm:$0xff]  ;;  %p2273_p1 = scmp.ne.s32.totalorder %s2622_s26, 1 }
  0x9a   : > { %v689_v2 = vld [vmem:[%s2914_s18 + $0xf8] sm:$0xff]  ;;  %2309 = vmatpush.msra.mxu2 %v673_v1  ;;  %v688_v4 = vld [vmem:[%s2914_s18 + $0xf0] sm:$0xff]  ;;  %v687_v6 = vld [vmem:[%s2914_s18 + $0xe8] sm:$0xff]  ;;  %690 = vmatpush.msra.mxu0 %v673_v1 }
  0x9b   : > { %2325 = vmatpush.msra.mxu3 %v689_v2  ;;  %803 = vmatpush.msra.mxu1 %v689_v2  ;;  %v670_v7 = vld [vmem:[%s2914_s18 + $0x60] sm:$0xff]  ;;  %v669_v9 = vld [vmem:[%s2914_s18 + $0x58] sm:$0xff]  ;;  %v668_v11 = vld [vmem:[%s2914_s18 + $0x50] sm:$0xff] }
  0x9c   : > { %2310 = vmatpush.msra.mxu2 %v672_v3  ;;  %v686_v8 = vld [vmem:[%s2914_s18 + $0xe0] sm:$0xff]  ;;  %691 = vmatpush.msra.mxu0 %v672_v3  ;;  %v685_v10 = vld [vmem:[%s2914_s18 + $0xd8] sm:$0xff]  ;;  %v684_v12 = vld [vmem:[%s2914_s18 + $0xd0] sm:$0xff] }
  0x9d   : > { %2326 = vmatpush.msra.mxu3 %v688_v4  ;;  %804 = vmatpush.msra.mxu1 %v688_v4  ;;  %v667_v13 = vld [vmem:[%s2914_s18 + $0x48] sm:$0xff]  ;;  %v666_v15 = vld [vmem:[%s2914_s18 + $0x40] sm:$0xff]  ;;  %v665_v17 = vld [vmem:[%s2914_s18 + $0x38] sm:$0xff] }
  0x9e   : > { %2311 = vmatpush.msra.mxu2 %v671_v5  ;;  %692 = vmatpush.msra.mxu0 %v671_v5  ;;  %v683_v14 = vld [vmem:[%s2914_s18 + $0xc8] sm:$0xff]  ;;  %v682_v16 = vld [vmem:[%s2914_s18 + $0xc0] sm:$0xff]  ;;  %v681_v18 = vld [vmem:[%s2914_s18 + $0xb8] sm:$0xff] }
  0x9f   : > { %2327 = vmatpush.msra.mxu3 %v687_v6  ;;  %805 = vmatpush.msra.mxu1 %v687_v6  ;;  %v664_v19 = vld [vmem:[%s2914_s18 + $0x30] sm:$0xff]  ;;  %v663_v21 = vld [vmem:[%s2914_s18 + $0x28] sm:$0xff]  ;;  %v662_v23 = vld [vmem:[%s2914_s18 + $0x20] sm:$0xff] }
  0xa0   : > { %2312 = vmatpush.msra.mxu2 %v670_v7  ;;  %693 = vmatpush.msra.mxu0 %v670_v7  ;;  %v680_v20 = vld [vmem:[%s2914_s18 + $0xb0] sm:$0xff]  ;;  %v679_v22 = vld [vmem:[%s2914_s18 + $0xa8] sm:$0xff]  ;;  %v678_v24 = vld [vmem:[%s2914_s18 + $0xa0] sm:$0xff] }
  0xa1   : > { %2328 = vmatpush.msra.mxu3 %v686_v8  ;;  %806 = vmatpush.msra.mxu1 %v686_v8  ;;  %v661_v25 = vld [vmem:[%s2914_s18 + $0x18] sm:$0xff]  ;;  %v660_v27 = vld [vmem:[%s2914_s18 + $0x10] sm:$0xff]  ;;  %v659_v29 = vld [vmem:[%s2914_s18 + $0x8] sm:$0xff] }
  0xa2   : > { %2313 = vmatpush.msra.mxu2 %v669_v9  ;;  %694 = vmatpush.msra.mxu0 %v669_v9  ;;  %v677_v26 = vld [vmem:[%s2914_s18 + $0x98] sm:$0xff]  ;;  %v676_v28 = vld [vmem:[%s2914_s18 + $0x90] sm:$0xff]  ;;  %v675_v30 = vld [vmem:[%s2914_s18 + $0x88] sm:$0xff] }
  0xa3   : > { %2329 = vmatpush.msra.mxu3 %v685_v10  ;;  %807 = vmatpush.msra.mxu1 %v685_v10  ;;  %v658_v31 = vld [vmem:[%s2914_s18] sm:$0xff]  ;;  %v627_v34 = vld [vmem:[%s2926_s28 + $0x108] sm:$0xff]  ;;  %v628_v37 = vld [vmem:[%s2926_s28 + $0x110] sm:$0xff] }
  0xa4   : > { %2314 = vmatpush.msra.mxu2 %v668_v11  ;;  %695 = vmatpush.msra.mxu0 %v668_v11  ;;  %v674_v32 = vld [vmem:[%s2914_s18 + $0x80] sm:$0xff]  ;;  %v595_v36 = vld [vmem:[%s2926_s28 + $0x8] sm:$0xff]  ;;  %v629_v38 = vld [vmem:[%s2926_s28 + $0x118] sm:$0xff] }
  0xa5   : > { %2330 = vmatpush.msra.mxu3 %v684_v12  ;;  %808 = vmatpush.msra.mxu1 %v684_v12  ;;  %v626_v33 = vld [vmem:[%s2926_s28 + $0x100] sm:$0xff]  ;;  %v596_v39 = vld [vmem:[%s2926_s28 + $0x10] sm:$0xff]  ;;  %v597_v40 = vld [vmem:[%s2926_s28 + $0x18] sm:$0xff] }
  0xa6   : > { %2315 = vmatpush.msra.mxu2 %v667_v13  ;;  %696 = vmatpush.msra.mxu0 %v667_v13  ;;  %v594_v35 = vld [vmem:[%s2926_s28] sm:$0xff]  ;;  %v631_v42 = vld [vmem:[%s2926_s28 + $0x128] sm:$0xff]  ;;  %v632_v45 = vld [vmem:[%s2926_s28 + $0x130] sm:$0xff] }
  0xa7   : > { %2331 = vmatpush.msra.mxu3 %v683_v14  ;;  %809 = vmatpush.msra.mxu1 %v683_v14  ;;  %v630_v41 = vld [vmem:[%s2926_s28 + $0x120] sm:$0xff]  ;;  %v599_v44 = vld [vmem:[%s2926_s28 + $0x28] sm:$0xff]  ;;  %v633_v46 = vld [vmem:[%s2926_s28 + $0x138] sm:$0xff] }
  0xa8   : > { %2316 = vmatpush.msra.mxu2 %v666_v15  ;;  %697 = vmatpush.msra.mxu0 %v666_v15  ;;  %v598_v43 = vld [vmem:[%s2926_s28 + $0x20] sm:$0xff]  ;;  %v600_v47 = vld [vmem:[%s2926_s28 + $0x30] sm:$0xff]  ;;  %v601_v48 = vld [vmem:[%s2926_s28 + $0x38] sm:$0xff] }
  0xa9   : > { %2332 = vmatpush.msra.mxu3 %v682_v16  ;;  %810 = vmatpush.msra.mxu1 %v682_v16  ;;  %v634_v49 = vld [vmem:[%s2926_s28 + $0x140] sm:$0xff]  ;;  %v635_v50 = vld [vmem:[%s2926_s28 + $0x148] sm:$0xff]  ;;  %v636_v53 = vld [vmem:[%s2926_s28 + $0x150] sm:$0xff] }
  0xaa   : > { %2317 = vmatpush.msra.mxu2 %v665_v17  ;;  %698 = vmatpush.msra.mxu0 %v665_v17  ;;  %v602_v51 = vld [vmem:[%s2926_s28 + $0x40] sm:$0xff]  ;;  %v603_v52 = vld [vmem:[%s2926_s28 + $0x48] sm:$0xff]  ;;  %v637_v54 = vld [vmem:[%s2926_s28 + $0x158] sm:$0xff] }
  0xab   : > { %2333 = vmatpush.msra.mxu3 %v681_v18  ;;  %811 = vmatpush.msra.mxu1 %v681_v18  ;;  %v604_v55 = vld [vmem:[%s2926_s28 + $0x50] sm:$0xff]  ;;  %v605_v56 = vld [vmem:[%s2926_s28 + $0x58] sm:$0xff]  ;;  %v638_v57 = vld [vmem:[%s2926_s28 + $0x160] sm:$0xff] }
  0xac   : > { %2318 = vmatpush.msra.mxu2 %v664_v19  ;;  %699 = vmatpush.msra.mxu0 %v664_v19  ;;  %v639_v58 = vld [vmem:[%s2926_s28 + $0x168] sm:$0xff]  ;;  %v606_v59 = vld [vmem:[%s2926_s28 + $0x60] sm:$0xff]  ;;  %v640_v61 = vld [vmem:[%s2926_s28 + $0x170] sm:$0xff] }
  0xad   : > { %2334 = vmatpush.msra.mxu3 %v680_v20  ;;  %812 = vmatpush.msra.mxu1 %v680_v20  ;;  %v607_v60 = vld [vmem:[%s2926_s28 + $0x68] sm:$0xff]  ;;  %v641_v62 = vld [vmem:[%s2926_s28 + $0x178] sm:$0xff]  ;;  %v608_v63 = vld [vmem:[%s2926_s28 + $0x70] sm:$0xff] }
  0xae   : > { %2319 = vmatpush.msra.mxu2 %v663_v21  ;;  %700 = vmatpush.msra.mxu0 %v663_v21  ;;  %v609_v0 = vld [vmem:[%s2926_s28 + $0x78] sm:$0xff]  ;;  %v642_v1 = vld [vmem:[%s2926_s28 + $0x180] sm:$0xff]  ;;  %v643_v2 = vld [vmem:[%s2926_s28 + $0x188] sm:$0xff] }
  0xaf   : > { %2335 = vmatpush.msra.mxu3 %v679_v22  ;;  %813 = vmatpush.msra.mxu1 %v679_v22  ;;  %v610_v3 = vld [vmem:[%s2926_s28 + $0x80] sm:$0xff]  ;;  %v611_v4 = vld [vmem:[%s2926_s28 + $0x88] sm:$0xff]  ;;  %v644_v5 = vld [vmem:[%s2926_s28 + $0x190] sm:$0xff] }
  0xb0   : > { %2320 = vmatpush.msra.mxu2 %v662_v23  ;;  %701 = vmatpush.msra.mxu0 %v662_v23  ;;  %v645_v6 = vld [vmem:[%s2926_s28 + $0x198] sm:$0xff]  ;;  %v612_v7 = vld [vmem:[%s2926_s28 + $0x90] sm:$0xff]  ;;  %v646_v9 = vld [vmem:[%s2926_s28 + $0x1a0] sm:$0xff] }
  0xb1   : > { %2336 = vmatpush.msra.mxu3 %v678_v24  ;;  %814 = vmatpush.msra.mxu1 %v678_v24  ;;  %v613_v8 = vld [vmem:[%s2926_s28 + $0x98] sm:$0xff]  ;;  %v647_v10 = vld [vmem:[%s2926_s28 + $0x1a8] sm:$0xff]  ;;  %v614_v11 = vld [vmem:[%s2926_s28 + $0xa0] sm:$0xff] }
  0xb2   : > { %2321 = vmatpush.msra.mxu2 %v661_v25  ;;  %702 = vmatpush.msra.mxu0 %v661_v25  ;;  %v615_v12 = vld [vmem:[%s2926_s28 + $0xa8] sm:$0xff]  ;;  %v648_v13 = vld [vmem:[%s2926_s28 + $0x1b0] sm:$0xff]  ;;  %v649_v14 = vld [vmem:[%s2926_s28 + $0x1b8] sm:$0xff] }
  0xb3   : > { %2337 = vmatpush.msra.mxu3 %v677_v26  ;;  %815 = vmatpush.msra.mxu1 %v677_v26  ;;  %v616_v15 = vld [vmem:[%s2926_s28 + $0xb0] sm:$0xff]  ;;  %v617_v16 = vld [vmem:[%s2926_s28 + $0xb8] sm:$0xff]  ;;  %v650_v17 = vld [vmem:[%s2926_s28 + $0x1c0] sm:$0xff] }
  0xb4   : > { %2322 = vmatpush.msra.mxu2 %v660_v27  ;;  %703 = vmatpush.msra.mxu0 %v660_v27  ;;  %v651_v18 = vld [vmem:[%s2926_s28 + $0x1c8] sm:$0xff]  ;;  %v618_v19 = vld [vmem:[%s2926_s28 + $0xc0] sm:$0xff]  ;;  %v652_v21 = vld [vmem:[%s2926_s28 + $0x1d0] sm:$0xff] }
  0xb5   : > { %2338 = vmatpush.msra.mxu3 %v676_v28  ;;  %816 = vmatpush.msra.mxu1 %v676_v28  ;;  %v619_v20 = vld [vmem:[%s2926_s28 + $0xc8] sm:$0xff]  ;;  %v653_v22 = vld [vmem:[%s2926_s28 + $0x1d8] sm:$0xff]  ;;  %v620_v23 = vld [vmem:[%s2926_s28 + $0xd0] sm:$0xff] }
  0xb6   : > { %2323 = vmatpush.msra.mxu2 %v659_v29  ;;  %704 = vmatpush.msra.mxu0 %v659_v29  ;;  %v621_v24 = vld [vmem:[%s2926_s28 + $0xd8] sm:$0xff]  ;;  %v654_v25 = vld [vmem:[%s2926_s28 + $0x1e0] sm:$0xff]  ;;  %v655_v26 = vld [vmem:[%s2926_s28 + $0x1e8] sm:$0xff] }
  0xb7   : > { %2339 = vmatpush.msra.mxu3 %v675_v30  ;;  %817 = vmatpush.msra.mxu1 %v675_v30  ;;  %v622_v27 = vld [vmem:[%s2926_s28 + $0xe0] sm:$0xff]  ;;  %v623_v28 = vld [vmem:[%s2926_s28 + $0xe8] sm:$0xff]  ;;  %v656_v29 = vld [vmem:[%s2926_s28 + $0x1f0] sm:$0xff] }
  0xb8   : > { %2324 = vmatpush.msra.mxu2 %v658_v31  ;;  %705 = vmatpush.msra.mxu0 %v658_v31  ;;  %v657_v30 = vld [vmem:[%s2926_s28 + $0x1f8] sm:$0xff]  ;;  %v624_v31 = vld [vmem:[%s2926_s28 + $0xf0] sm:$0xff] }
  0xb9   : > { %2340 = vmatpush.msra.mxu3 %v674_v32  ;;  %754 = vmatmul.f32.vlgmr.msra.gmra.mxu2 %v626_v33 }
  0xba   : > { %867 = vmatmul.f32.vlgmr.msra.gmra.mxu3 %v627_v34  ;;  %818 = vmatpush.msra.mxu1 %v674_v32  ;;  %v625_v32 = vld [vmem:[%s2926_s28 + $0xf8] sm:$0xff]  ;;  %v562_v34 = vld [vmem:[#allocation2 + $0xb0] sm:$0xff] }
  0xbb   : > { %706 = vmatmul.f32.vlgmr.msra.gmra.mxu0 %v594_v35  ;;  %819 = vmatmul.f32.vlgmr.msra.gmra.mxu1 %v595_v36 }
  0xc1   : > { %757 = vmatmul.f32.gmra.mxu2 %v628_v37 }
  0xc2   : > { %870 = vmatmul.f32.gmra.mxu3 %v629_v38 }
  0xc3   : > { %709 = vmatmul.f32.gmra.mxu0 %v596_v39  ;;  %822 = vmatmul.f32.gmra.mxu1 %v597_v40  ;;  %v578_v39 = vld [vmem:[#allocation2 + $0x38] sm:$0xff] }
  0xc9   : > { %760 = vmatmul.f32.gmra.mxu2 %v630_v41 }
  0xca   : > { %873 = vmatmul.f32.gmra.mxu3 %v631_v42 }
  0xcb   : > { %712 = vmatmul.f32.gmra.mxu0 %v598_v43  ;;  %825 = vmatmul.f32.gmra.mxu1 %v599_v44  ;;  %v563_v44 = vld [vmem:[#allocation2] sm:$0xff] }
  0xd1   : > { %763 = vmatmul.f32.gmra.mxu2 %v632_v45 }
  0xd2   : > { %876 = vmatmul.f32.gmra.mxu3 %v633_v46 }
  0xd3   : > { %715 = vmatmul.f32.gmra.mxu0 %v600_v47  ;;  %828 = vmatmul.f32.gmra.mxu1 %v601_v48 }
  0xd9   : > { %766 = vmatmul.f32.gmra.mxu2 %v634_v49  ;;  %v579_v49 = vld [vmem:[#allocation2 + $0x58] sm:$0xff] }
  0xda   : > { %879 = vmatmul.f32.gmra.mxu3 %v635_v50 }
  0xdb   : > { %718 = vmatmul.f32.gmra.mxu0 %v602_v51  ;;  %831 = vmatmul.f32.gmra.mxu1 %v603_v52 }
  0xe1   : > { %769 = vmatmul.f32.gmra.mxu2 %v636_v53 }
  0xe2   : > { %882 = vmatmul.f32.gmra.mxu3 %v637_v54  ;;  %v564_v54 = vld [vmem:[#allocation2 + $0xd8] sm:$0xff] }
  0xe3   : > { %721 = vmatmul.f32.gmra.mxu0 %v604_v55  ;;  %834 = vmatmul.f32.gmra.mxu1 %v605_v56 }
  0xe9   : > { %772 = vmatmul.f32.gmra.mxu2 %v638_v57 }
  0xea   : > { %885 = vmatmul.f32.gmra.mxu3 %v639_v58 }
  0xeb   : > { %724 = vmatmul.f32.gmra.mxu0 %v606_v59  ;;  %837 = vmatmul.f32.gmra.mxu1 %v607_v60  ;;  %v580_v59 = vld [vmem:[#allocation2 + $0x40] sm:$0xff] }
  0xf1   : > { %775 = vmatmul.f32.gmra.mxu2 %v640_v61 }
  0xf2   : > { %888 = vmatmul.f32.gmra.mxu3 %v641_v62 }
  0xf3   : > { %727 = vmatmul.f32.gmra.mxu0 %v608_v63  ;;  %840 = vmatmul.f32.gmra.mxu1 %v609_v0  ;;  %v565_v0 = vld [vmem:[#allocation2 + $0x18] sm:$0xff] }
  0xf9   : > { %778 = vmatmul.f32.gmra.mxu2 %v642_v1 }
  0xfa   : > { %891 = vmatmul.f32.gmra.mxu3 %v643_v2 }
  0xfb   : > { %730 = vmatmul.f32.gmra.mxu0 %v610_v3  ;;  %843 = vmatmul.f32.gmra.mxu1 %v611_v4 }
 0x101   : > { %781 = vmatmul.f32.gmra.mxu2 %v644_v5  ;;  %v581_v5 = vld [vmem:[#allocation2 + $0xc8] sm:$0xff] }
 0x102   : > { %894 = vmatmul.f32.gmra.mxu3 %v645_v6 }
 0x103   : > { %733 = vmatmul.f32.gmra.mxu0 %v612_v7  ;;  %846 = vmatmul.f32.gmra.mxu1 %v613_v8 }
 0x109   : > { %784 = vmatmul.f32.gmra.mxu2 %v646_v9 }
 0x10a   : > { %897 = vmatmul.f32.gmra.mxu3 %v647_v10  ;;  %v566_v10 = vld [vmem:[#allocation2 + $0x50] sm:$0xff] }
 0x10b   : > { %736 = vmatmul.f32.gmra.mxu0 %v614_v11  ;;  %849 = vmatmul.f32.gmra.mxu1 %v615_v12 }
 0x111   : > { %787 = vmatmul.f32.gmra.mxu2 %v648_v13 }
 0x112   : > { %900 = vmatmul.f32.gmra.mxu3 %v649_v14 }
 0x113   : > { %739 = vmatmul.f32.gmra.mxu0 %v616_v15  ;;  %852 = vmatmul.f32.gmra.mxu1 %v617_v16  ;;  %v582_v15 = vld [vmem:[#allocation2 + $0xe0] sm:$0xff] }
 0x119   : > { %790 = vmatmul.f32.gmra.mxu2 %v650_v17 }
 0x11a   : > { %903 = vmatmul.f32.gmra.mxu3 %v651_v18 }
 0x11b   : > { %742 = vmatmul.f32.gmra.mxu0 %v618_v19  ;;  %855 = vmatmul.f32.gmra.mxu1 %v619_v20  ;;  %v567_v20 = vld [vmem:[#allocation2 + $0x68] sm:$0xff] }
 0x121   : > { %793 = vmatmul.f32.gmra.mxu2 %v652_v21 }
 0x122   : > { %906 = vmatmul.f32.gmra.mxu3 %v653_v22 }
 0x123   : > { %745 = vmatmul.f32.gmra.mxu0 %v620_v23  ;;  %858 = vmatmul.f32.gmra.mxu1 %v621_v24 }
 0x129   : > { %796 = vmatmul.f32.gmra.mxu2 %v654_v25  ;;  %v583_v25 = vld [vmem:[#allocation2 + $0x90] sm:$0xff] }
 0x12a   : > { %909 = vmatmul.f32.gmra.mxu3 %v655_v26 }
 0x12b   : > { %748 = vmatmul.f32.gmra.mxu0 %v622_v27  ;;  %861 = vmatmul.f32.gmra.mxu1 %v623_v28 }
 0x131   : > { %799 = vmatmul.f32.gmra.mxu2 %v656_v29 }
 0x132   : > { %912 = vmatmul.f32.gmra.mxu3 %v657_v30  ;;  %v568_v30 = vld [vmem:[#allocation2 + $0x30] sm:$0xff] }
 0x133   : > { %751 = vmatmul.f32.gmra.mxu0 %v624_v31  ;;  %864 = vmatmul.f32.gmra.mxu1 %v625_v32 }
 0x138   : > { %v707_v33 = vpop.f32.mrf.mxu0  ;;  %v820_v35 = vpop.f32.mrf.mxu1 }
 0x139   : > { %v821_v36 = vadd.f32 %v820_v35, %v707_v33  ;;  %v584_v35 = vld [vmem:[#allocation2 + $0x70] sm:$0xff] }
 0x13b   : > { %v916_v37 = vadd.f32 %v821_v36, %v562_v34 }
 0x13c   : > { %v755_v38 = vpop.f32.mrf.mxu2 }
 0x13d   : > { %v868_v40 = vpop.f32.mrf.mxu3  ;;  %948 = vst [vmem:[#allocation2 + $0xb0] sm:$0xff] %v916_v37 }
 0x13e   : > { %v869_v41 = vadd.f32 %v868_v40, %v755_v38  ;;  %v569_v40 = vld [vmem:[#allocation2 + $0x48] sm:$0xff] }
 0x140   : > { %v932_v42 = vadd.f32 %v869_v41, %v578_v39  ;;  %v710_v43 = vpop.f32.mrf.mxu0  ;;  %v823_v45 = vpop.f32.mrf.mxu1 }
 0x141   : > { %v824_v46 = vadd.f32 %v823_v45, %v710_v43  ;;  %v585_v45 = vld [vmem:[#allocation2 + $0xc0] sm:$0xff] }
 0x142   : > { %964 = vst [vmem:[#allocation2 + $0x38] sm:$0xff] %v932_v42 }
 0x143   : > { %v917_v47 = vadd.f32 %v824_v46, %v563_v44 }
 0x144   : > { %v758_v48 = vpop.f32.mrf.mxu2 }
 0x145   : > { %v871_v50 = vpop.f32.mrf.mxu3  ;;  %949 = vst [vmem:[#allocation2] sm:$0xff] %v917_v47 }
 0x146   : > { %v872_v51 = vadd.f32 %v871_v50, %v758_v48  ;;  %v570_v50 = vld [vmem:[#allocation2 + $0x80] sm:$0xff] }
 0x148   : > { %v933_v52 = vadd.f32 %v872_v51, %v579_v49  ;;  %v713_v53 = vpop.f32.mrf.mxu0  ;;  %v826_v55 = vpop.f32.mrf.mxu1 }
 0x149   : > { %v827_v56 = vadd.f32 %v826_v55, %v713_v53  ;;  %v586_v55 = vld [vmem:[#allocation2 + $0xa8] sm:$0xff] }
 0x14a   : > { %965 = vst [vmem:[#allocation2 + $0x58] sm:$0xff] %v933_v52 }
 0x14b   : > { %v918_v57 = vadd.f32 %v827_v56, %v564_v54 }
 0x14c   : > { %v761_v58 = vpop.f32.mrf.mxu2 }
 0x14d   : > { %v874_v60 = vpop.f32.mrf.mxu3  ;;  %950 = vst [vmem:[#allocation2 + $0xd8] sm:$0xff] %v918_v57 }
 0x14e   : > { %v875_v61 = vadd.f32 %v874_v60, %v761_v58  ;;  %v571_v60 = vld [vmem:[#allocation2 + $0x88] sm:$0xff] }
 0x150   : > { %v934_v62 = vadd.f32 %v875_v61, %v580_v59  ;;  %v716_v63 = vpop.f32.mrf.mxu0  ;;  %v829_v1 = vpop.f32.mrf.mxu1 }
 0x151   : > { %v830_v2 = vadd.f32 %v829_v1, %v716_v63  ;;  %v587_v1 = vld [vmem:[#allocation2 + $0xd0] sm:$0xff] }
 0x152   : > { %966 = vst [vmem:[#allocation2 + $0x40] sm:$0xff] %v934_v62 }
 0x153   : > { %v919_v3 = vadd.f32 %v830_v2, %v565_v0 }
 0x154   : > { %v764_v4 = vpop.f32.mrf.mxu2 }
 0x155   : > { %v877_v6 = vpop.f32.mrf.mxu3  ;;  %951 = vst [vmem:[#allocation2 + $0x18] sm:$0xff] %v919_v3 }
 0x156   : > { %v878_v7 = vadd.f32 %v877_v6, %v764_v4  ;;  %v572_v6 = vld [vmem:[#allocation2 + $0xe8] sm:$0xff] }
 0x158   : > { %v935_v8 = vadd.f32 %v878_v7, %v581_v5  ;;  %v719_v9 = vpop.f32.mrf.mxu0  ;;  %v832_v11 = vpop.f32.mrf.mxu1 }
 0x159   : > { %v833_v12 = vadd.f32 %v832_v11, %v719_v9  ;;  %v588_v11 = vld [vmem:[#allocation2 + $0x10] sm:$0xff] }
 0x15a   : > { %967 = vst [vmem:[#allocation2 + $0xc8] sm:$0xff] %v935_v8 }
 0x15b   : > { %v920_v13 = vadd.f32 %v833_v12, %v566_v10 }
 0x15c   : > { %v767_v14 = vpop.f32.mrf.mxu2 }
 0x15d   : > { %v880_v16 = vpop.f32.mrf.mxu3  ;;  %952 = vst [vmem:[#allocation2 + $0x50] sm:$0xff] %v920_v13 }
 0x15e   : > { %v881_v17 = vadd.f32 %v880_v16, %v767_v14  ;;  %v573_v16 = vld [vmem:[#allocation2 + $0xb8] sm:$0xff] }
 0x160   : > { %v936_v18 = vadd.f32 %v881_v17, %v582_v15  ;;  %v722_v19 = vpop.f32.mrf.mxu0  ;;  %v835_v21 = vpop.f32.mrf.mxu1 }
 0x161   : > { %v836_v22 = vadd.f32 %v835_v21, %v722_v19  ;;  %v589_v21 = vld [vmem:[#allocation2 + $0x28] sm:$0xff] }
 0x162   : > { %968 = vst [vmem:[#allocation2 + $0xe0] sm:$0xff] %v936_v18 }
 0x163   : > { %v921_v23 = vadd.f32 %v836_v22, %v567_v20 }
 0x164   : > { %v770_v24 = vpop.f32.mrf.mxu2 }
 0x165   : > { %v883_v26 = vpop.f32.mrf.mxu3  ;;  %953 = vst [vmem:[#allocation2 + $0x68] sm:$0xff] %v921_v23 }
 0x166   : > { %v884_v27 = vadd.f32 %v883_v26, %v770_v24  ;;  %v574_v26 = vld [vmem:[#allocation2 + $0x60] sm:$0xff] }
 0x168   : > { %v937_v28 = vadd.f32 %v884_v27, %v583_v25  ;;  %v725_v29 = vpop.f32.mrf.mxu0  ;;  %v838_v31 = vpop.f32.mrf.mxu1 }
 0x169   : > { %v839_v32 = vadd.f32 %v838_v31, %v725_v29  ;;  %v590_v31 = vld [vmem:[#allocation2 + $0xa0] sm:$0xff] }
 0x16a   : > { %969 = vst [vmem:[#allocation2 + $0x90] sm:$0xff] %v937_v28 }
 0x16b   : > { %v922_v33 = vadd.f32 %v839_v32, %v568_v30 }
 0x16c   : > { %v773_v34 = vpop.f32.mrf.mxu2 }
 0x16d   : > { %v886_v36 = vpop.f32.mrf.mxu3  ;;  %954 = vst [vmem:[#allocation2 + $0x30] sm:$0xff] %v922_v33 }
 0x16e   : > { %v887_v37 = vadd.f32 %v886_v36, %v773_v34  ;;  %v575_v36 = vld [vmem:[#allocation2 + $0xf0] sm:$0xff] }
 0x170   : > { %v938_v38 = vadd.f32 %v887_v37, %v584_v35  ;;  %v728_v39 = vpop.f32.mrf.mxu0  ;;  %v841_v41 = vpop.f32.mrf.mxu1 }
 0x171   : > { %v842_v42 = vadd.f32 %v841_v41, %v728_v39  ;;  %v591_v41 = vld [vmem:[#allocation2 + $0xf8] sm:$0xff] }
 0x172   : > { %970 = vst [vmem:[#allocation2 + $0x70] sm:$0xff] %v938_v38 }
 0x173   : > { %v923_v43 = vadd.f32 %v842_v42, %v569_v40 }
 0x174   : > { %v776_v44 = vpop.f32.mrf.mxu2 }
 0x175   : > { %v889_v46 = vpop.f32.mrf.mxu3  ;;  %955 = vst [vmem:[#allocation2 + $0x48] sm:$0xff] %v923_v43 }
 0x176   : > { %v890_v47 = vadd.f32 %v889_v46, %v776_v44  ;;  %v576_v46 = vld [vmem:[#allocation2 + $0x8] sm:$0xff] }
 0x178   : > { %v939_v48 = vadd.f32 %v890_v47, %v585_v45  ;;  %v731_v49 = vpop.f32.mrf.mxu0  ;;  %v844_v51 = vpop.f32.mrf.mxu1 }
 0x179   : > { %v845_v52 = vadd.f32 %v844_v51, %v731_v49  ;;  %v592_v51 = vld [vmem:[#allocation2 + $0x20] sm:$0xff] }
 0x17a   : > { %971 = vst [vmem:[#allocation2 + $0xc0] sm:$0xff] %v939_v48 }
 0x17b   : > { %v924_v53 = vadd.f32 %v845_v52, %v570_v50 }
 0x17c   : > { %v779_v54 = vpop.f32.mrf.mxu2 }
 0x17d   : > { %v892_v56 = vpop.f32.mrf.mxu3  ;;  %956 = vst [vmem:[#allocation2 + $0x80] sm:$0xff] %v924_v53 }
 0x17e   : > { %v893_v57 = vadd.f32 %v892_v56, %v779_v54  ;;  %v577_v56 = vld [vmem:[#allocation2 + $0x78] sm:$0xff] }
 0x180   : > { %v940_v58 = vadd.f32 %v893_v57, %v586_v55  ;;  %v734_v59 = vpop.f32.mrf.mxu0  ;;  %v847_v61 = vpop.f32.mrf.mxu1 }
 0x181   : > { %v848_v62 = vadd.f32 %v847_v61, %v734_v59  ;;  %v593_v61 = vld [vmem:[#allocation2 + $0x98] sm:$0xff] }
 0x182   : > { %972 = vst [vmem:[#allocation2 + $0xa8] sm:$0xff] %v940_v58 }
 0x183   : > { %v925_v63 = vadd.f32 %v848_v62, %v571_v60 }
 0x184   : > { %v782_v0 = vpop.f32.mrf.mxu2 }
 0x185   : > { %v895_v2 = vpop.f32.mrf.mxu3  ;;  %957 = vst [vmem:[#allocation2 + $0x88] sm:$0xff] %v925_v63 }
 0x186   : > { %v896_v3 = vadd.f32 %v895_v2, %v782_v0 }
 0x188   : > { %v941_v4 = vadd.f32 %v896_v3, %v587_v1  ;;  %v737_v5 = vpop.f32.mrf.mxu0  ;;  %v850_v7 = vpop.f32.mrf.mxu1 }
 0x189   : > { %v851_v8 = vadd.f32 %v850_v7, %v737_v5 }
 0x18a   : > { %973 = vst [vmem:[#allocation2 + $0xd0] sm:$0xff] %v941_v4 }
 0x18b   : > { %v926_v9 = vadd.f32 %v851_v8, %v572_v6 }
 0x18c   : > { %v785_v10 = vpop.f32.mrf.mxu2 }
 0x18d   : > { %v898_v12 = vpop.f32.mrf.mxu3  ;;  %958 = vst [vmem:[#allocation2 + $0xe8] sm:$0xff] %v926_v9 }
 0x18e   : > { %v899_v13 = vadd.f32 %v898_v12, %v785_v10 }
 0x190   : > { %v942_v14 = vadd.f32 %v899_v13, %v588_v11  ;;  %v740_v15 = vpop.f32.mrf.mxu0  ;;  %v853_v17 = vpop.f32.mrf.mxu1 }
 0x191   : > { %v854_v18 = vadd.f32 %v853_v17, %v740_v15 }
 0x192   : > { %974 = vst [vmem:[#allocation2 + $0x10] sm:$0xff] %v942_v14 }
 0x193   : > { %v927_v19 = vadd.f32 %v854_v18, %v573_v16 }
 0x194   : > { %v788_v20 = vpop.f32.mrf.mxu2 }
 0x195   : > { %v901_v22 = vpop.f32.mrf.mxu3  ;;  %959 = vst [vmem:[#allocation2 + $0xb8] sm:$0xff] %v927_v19 }
 0x196   : > { %v902_v23 = vadd.f32 %v901_v22, %v788_v20 }
 0x198   : > { %v943_v24 = vadd.f32 %v902_v23, %v589_v21  ;;  %v743_v25 = vpop.f32.mrf.mxu0  ;;  %v856_v27 = vpop.f32.mrf.mxu1 }
 0x199   : > { %v857_v28 = vadd.f32 %v856_v27, %v743_v25 }
 0x19a   : > { %975 = vst [vmem:[#allocation2 + $0x28] sm:$0xff] %v943_v24 }
 0x19b   : > { %v928_v29 = vadd.f32 %v857_v28, %v574_v26 }
 0x19c   : > { %v791_v30 = vpop.f32.mrf.mxu2 }
 0x19d   : > { %v904_v32 = vpop.f32.mrf.mxu3  ;;  %960 = vst [vmem:[#allocation2 + $0x60] sm:$0xff] %v928_v29 }
 0x19e   : > { %v905_v33 = vadd.f32 %v904_v32, %v791_v30 }
 0x1a0   : > { %v944_v34 = vadd.f32 %v905_v33, %v590_v31  ;;  %v746_v35 = vpop.f32.mrf.mxu0  ;;  %v859_v37 = vpop.f32.mrf.mxu1 }
 0x1a1   : > { %v860_v38 = vadd.f32 %v859_v37, %v746_v35 }
 0x1a2   : > { %976 = vst [vmem:[#allocation2 + $0xa0] sm:$0xff] %v944_v34 }
 0x1a3   : > { %v929_v39 = vadd.f32 %v860_v38, %v575_v36 }
 0x1a4   : > { %v794_v40 = vpop.f32.mrf.mxu2 }
 0x1a5   : > { %v907_v42 = vpop.f32.mrf.mxu3  ;;  %961 = vst [vmem:[#allocation2 + $0xf0] sm:$0xff] %v929_v39 }
 0x1a6   : > { %v908_v43 = vadd.f32 %v907_v42, %v794_v40 }
 0x1a8   : > { %v945_v44 = vadd.f32 %v908_v43, %v591_v41  ;;  %v749_v45 = vpop.f32.mrf.mxu0  ;;  %v862_v47 = vpop.f32.mrf.mxu1 }
 0x1a9   : > { %v863_v48 = vadd.f32 %v862_v47, %v749_v45 }
 0x1aa   : > { %977 = vst [vmem:[#allocation2 + $0xf8] sm:$0xff] %v945_v44 }
 0x1ab   : > { %v930_v49 = vadd.f32 %v863_v48, %v576_v46 }
 0x1ac   : > { %v797_v50 = vpop.f32.mrf.mxu2 }
 0x1ad   : > { %v910_v52 = vpop.f32.mrf.mxu3  ;;  %962 = vst [vmem:[#allocation2 + $0x8] sm:$0xff] %v930_v49 }
 0x1ae   : > { %v911_v53 = vadd.f32 %v910_v52, %v797_v50 }
 0x1b0   : > { %v946_v54 = vadd.f32 %v911_v53, %v592_v51  ;;  %v752_v55 = vpop.f32.mrf.mxu0  ;;  %v865_v57 = vpop.f32.mrf.mxu1 }
 0x1b1   : > { %v866_v58 = vadd.f32 %v865_v57, %v752_v55 }
 0x1b2   : > { %978 = vst [vmem:[#allocation2 + $0x20] sm:$0xff] %v946_v54 }
 0x1b3   : > { %v931_v59 = vadd.f32 %v866_v58, %v577_v56 }
 0x1b4   : > { %v800_v60 = vpop.f32.mrf.mxu2 }
 0x1b5   : > { %v913_v62 = vpop.f32.mrf.mxu3  ;;  %963 = vst [vmem:[#allocation2 + $0x78] sm:$0xff] %v931_v59 }
 0x1b6   : > { %v914_v63 = vadd.f32 %v913_v62, %v800_v60  ;;  %983 = sbr.rel (%p2273_p1) target bundleno = 1016 (0x3f8), region = 75 }
 0x1b8   : > { %v947_v0 = vadd.f32 %v914_v63, %v593_v61 }
 0x1ba   : > { %979 = vst [vmem:[#allocation2 + $0x98] sm:$0xff] %v947_v0 }
 0x1bb   : > { %v1159_v1 = vld [vmem:[%s3618_s2 + $0x78] sm:$0xff]  ;;  %v1158_v2 = vld [vmem:[%s3618_s2 + $0x70] sm:$0xff]  ;;  %v1157_v3 = vld [vmem:[%s3618_s2 + $0x68] sm:$0xff] }
 0x1bc   : > { %1164 = vmatpush.msra.mxu0 %v1159_v1  ;;  %2341 = vmatpush.msra.mxu2 %v1159_v1  ;;  %v1156_v4 = vld [vmem:[%s3618_s2 + $0x60] sm:$0xff]  ;;  %v1155_v5 = vld [vmem:[%s3618_s2 + $0x58] sm:$0xff]  ;;  %v984_v6 = vld [vmem:[#allocation2 + $0xb0] sm:$0xff] }
 0x1bd   : > { %v1000_v7 = vld [vmem:[#allocation2 + $0x38] sm:$0xff]  ;;  %vm1016_vm0 = vcmp.gt.f32.partialorder %v984_v6, 0.0  ;;  %v1048_v8 = vmul.f32 0.25, %v984_v6  ;;  %v985_v10 = vld [vmem:[#allocation2] sm:$0xff]  ;;  %v1154_v14 = vld [vmem:[%s3618_s2 + $0x50] sm:$0xff] }
 0x1be   : > { %1165 = vmatpush.msra.mxu0 %v1158_v2  ;;  %2342 = vmatpush.msra.mxu2 %v1158_v2  ;;  %vm1032_vm1 = vcmp.gt.f32.partialorder %v1000_v7, 0.0  ;;  %v1064_v9 = vmul.f32 0.25, %v1000_v7  ;;  %v1001_v11 = vld [vmem:[#allocation2 + $0x58] sm:$0xff]  ;;  %vm1017_vm2 = vcmp.gt.f32.partialorder %v985_v10, 0.0  ;;  %v1049_v12 = vmul.f32 0.25, %v985_v10  ;;  %v1153_v19 = vld [vmem:[%s3618_s2 + $0x48] sm:$0xff] }
 0x1bf   : > { %v1065_v13 = vmul.f32 0.25, %v1001_v11  ;;  %v3044_v15 = vsel %vm1016_vm0, %v984_v6, %v1048_v8  ;;  %vm1033_vm3 = vcmp.gt.f32.partialorder %v1001_v11, 0.0  ;;  %v986_v16 = vld [vmem:[#allocation2 + $0xd8] sm:$0xff]  ;;  %v1152_v22 = vld [vmem:[%s3618_s2 + $0x40] sm:$0xff]  ;;  %v1150_v28 = vld [vmem:[%s3618_s2 + $0x30] sm:$0xff] }
 0x1c0   : > { %1166 = vmatpush.msra.mxu0 %v1157_v3  ;;  %2343 = vmatpush.msra.mxu2 %v1157_v3  ;;  %1112 = vst [vmem:[%s2919_s12] sm:$0xff] %v3044_v15  ;;  %v3049_v17 = vsel %vm1032_vm1, %v1000_v7, %v1064_v9  ;;  %vm1018_vm4 = vcmp.gt.f32.partialorder %v986_v16, 0.0  ;;  %v1050_v18 = vmul.f32 0.25, %v986_v16  ;;  %v3056_v20 = vsel %vm1017_vm2, %v985_v10, %v1049_v12  ;;  %v1002_v24 = vld [vmem:[#allocation2 + $0x40] sm:$0xff]  ;;  %v1151_v26 = vld [vmem:[%s3618_s2 + $0x38] sm:$0xff]  ;;  %v1149_v31 = vld [vmem:[%s3618_s2 + $0x28] sm:$0xff] }
 0x1c1   : > { %1128 = vst [vmem:[%s2919_s12 + $0x80] sm:$0xff] %v3049_v17  ;;  %v3060_v21 = vsel %vm1033_vm3, %v1001_v11, %v1065_v13  ;;  %v1066_v25 = vmul.f32 0.25, %v1002_v24  ;;  %vm1034_vm5 = vcmp.gt.f32.partialorder %v1002_v24, 0.0  ;;  %v987_v29 = vld [vmem:[#allocation2 + $0x18] sm:$0xff]  ;;  %v1148_v33 = vld [vmem:[%s3618_s2 + $0x20] sm:$0xff]  ;;  %v1003_v34 = vld [vmem:[#allocation2 + $0xc8] sm:$0xff] }
 0x1c2   : > { %1167 = vmatpush.msra.mxu0 %v1156_v4  ;;  %2344 = vmatpush.msra.mxu2 %v1156_v4  ;;  %1113 = vst [vmem:[%s2919_s12 + $0x8] sm:$0xff] %v3056_v20  ;;  %v3067_v23 = vsel %vm1018_vm4, %v986_v16, %v1050_v18  ;;  %vm1019_vm6 = vcmp.gt.f32.partialorder %v987_v29, 0.0  ;;  %v1051_v30 = vmul.f32 0.25, %v987_v29  ;;  %v1067_v35 = vmul.f32 0.25, %v1003_v34  ;;  %v1147_v36 = vld [vmem:[%s3618_s2 + $0x18] sm:$0xff]  ;;  %v1146_v38 = vld [vmem:[%s3618_s2 + $0x10] sm:$0xff] }
 0x1c3   : > { %1129 = vst [vmem:[%s2919_s12 + $0x88] sm:$0xff] %v3060_v21  ;;  %v3074_v27 = vsel %vm1034_vm5, %v1002_v24, %v1066_v25  ;;  %vm1035_vm7 = vcmp.gt.f32.partialorder %v1003_v34, 0.0  ;;  %v988_v39 = vld [vmem:[#allocation2 + $0x50] sm:$0xff]  ;;  %v1145_v41 = vld [vmem:[%s3618_s2 + $0x8] sm:$0xff]  ;;  %v1144_v43 = vld [vmem:[%s3618_s2] sm:$0xff] }
 0x1c4   : > { %1168 = vmatpush.msra.mxu0 %v1155_v5  ;;  %2345 = vmatpush.msra.mxu2 %v1155_v5  ;;  %1114 = vst [vmem:[%s2919_s12 + $0x10] sm:$0xff] %v3067_v23  ;;  %v3084_v32 = vsel %vm1019_vm6, %v987_v29, %v1051_v30  ;;  %v1099_v37 = vsel %vm1035_vm7, %v1003_v34, %v1067_v35  ;;  %vm1020_vm8 = vcmp.gt.f32.partialorder %v988_v39, 0.0  ;;  %v1052_v40 = vmul.f32 0.25, %v988_v39  ;;  %v1004_v44 = vld [vmem:[#allocation2 + $0xe0] sm:$0xff]  ;;  %v989_v47 = vld [vmem:[#allocation2 + $0x68] sm:$0xff]  ;;  %v1005_v50 = vld [vmem:[#allocation2 + $0x90] sm:$0xff] }
 0x1c5   : > { %1130 = vst [vmem:[%s2919_s12 + $0x90] sm:$0xff] %v3074_v27  ;;  %v1068_v45 = vmul.f32 0.25, %v1004_v44  ;;  %vm1036_vm9 = vcmp.gt.f32.partialorder %v1004_v44, 0.0  ;;  %vm1021_vm10 = vcmp.gt.f32.partialorder %v989_v47, 0.0  ;;  %v1053_v48 = vmul.f32 0.25, %v989_v47  ;;  %v990_v53 = vld [vmem:[#allocation2 + $0x30] sm:$0xff] }
 0x1c6   : > { %1169 = vmatpush.msra.mxu0 %v1154_v14  ;;  %2346 = vmatpush.msra.mxu2 %v1154_v14  ;;  %1115 = vst [vmem:[%s2919_s12 + $0x18] sm:$0xff] %v3084_v32  ;;  %v1084_v42 = vsel %vm1020_vm8, %v988_v39, %v1052_v40  ;;  %v1069_v51 = vmul.f32 0.25, %v1005_v50  ;;  %vm1037_vm11 = vcmp.gt.f32.partialorder %v1005_v50, 0.0  ;;  %vm1022_vm12 = vcmp.gt.f32.partialorder %v990_v53, 0.0  ;;  %v1006_v56 = vld [vmem:[#allocation2 + $0x70] sm:$0xff]  ;;  %v991_v59 = vld [vmem:[#allocation2 + $0x48] sm:$0xff] }
 0x1c7   : > { %1131 = vst [vmem:[%s2919_s12 + $0x98] sm:$0xff] %v1099_v37  ;;  %v1100_v46 = vsel %vm1036_vm9, %v1004_v44, %v1068_v45  ;;  %v1085_v49 = vsel %vm1021_vm10, %v989_v47, %v1053_v48  ;;  %v1054_v54 = vmul.f32 0.25, %v990_v53  ;;  %v1070_v57 = vmul.f32 0.25, %v1006_v56  ;;  %v1007_v62 = vld [vmem:[#allocation2 + $0xc0] sm:$0xff]  ;;  %v1008_v4 = vld [vmem:[#allocation2 + $0xa8] sm:$0xff]  ;;  %v1009_v10 = vld [vmem:[#allocation2 + $0xd0] sm:$0xff] }
 0x1c8   : > { %1170 = vmatpush.msra.mxu0 %v1153_v19  ;;  %2347 = vmatpush.msra.mxu2 %v1153_v19  ;;  %1116 = vst [vmem:[%s2919_s12 + $0x20] sm:$0xff] %v1084_v42  ;;  %v1101_v52 = vsel %vm1037_vm11, %v1005_v50, %v1069_v51  ;;  %vm1038_vm13 = vcmp.gt.f32.partialorder %v1006_v56, 0.0  ;;  %vm1023_vm14 = vcmp.gt.f32.partialorder %v991_v59, 0.0  ;;  %v1055_v60 = vmul.f32 0.25, %v991_v59  ;;  %v992_v1 = vld [vmem:[#allocation2 + $0x80] sm:$0xff]  ;;  %v993_v7 = vld [vmem:[#allocation2 + $0x88] sm:$0xff] }
 0x1c9   : > { %1132 = vst [vmem:[%s2919_s12 + $0xa0] sm:$0xff] %v1100_v46  ;;  %v1086_v55 = vsel %vm1022_vm12, %v990_v53, %v1054_v54  ;;  %v1102_v58 = vsel %vm1038_vm13, %v1006_v56, %v1070_v57  ;;  %v1071_v63 = vmul.f32 0.25, %v1007_v62  ;;  %vm1039_vm15 = vcmp.gt.f32.partialorder %v1007_v62, 0.0  ;;  %v994_v13 = vld [vmem:[#allocation2 + $0xe8] sm:$0xff]  ;;  %v1010_v16 = vld [vmem:[#allocation2 + $0x10] sm:$0xff]  ;;  %v995_v19 = vld [vmem:[#allocation2 + $0xb8] sm:$0xff] }
 0x1ca   : > { %1171 = vmatpush.msra.mxu0 %v1152_v22  ;;  %2348 = vmatpush.msra.mxu2 %v1152_v22  ;;  %1117 = vst [vmem:[%s2919_s12 + $0x28] sm:$0xff] %v1085_v49  ;;  %v1087_v61 = vsel %vm1023_vm14, %v991_v59, %v1055_v60  ;;  %vm1024_vm0 = vcmp.gt.f32.partialorder %v992_v1, 0.0  ;;  %v1056_v2 = vmul.f32 0.25, %v992_v1  ;;  %v1072_v5 = vmul.f32 0.25, %v1008_v4  ;;  %v1011_v22 = vld [vmem:[#allocation2 + $0x28] sm:$0xff]  ;;  %v996_v25 = vld [vmem:[#allocation2 + $0x60] sm:$0xff] }
 0x1cb   : > { %1133 = vst [vmem:[%s2919_s12 + $0xa8] sm:$0xff] %v1101_v52  ;;  %v1103_v0 = vsel %vm1039_vm15, %v1007_v62, %v1071_v63  ;;  %vm1040_vm1 = vcmp.gt.f32.partialorder %v1008_v4, 0.0  ;;  %vm1025_vm2 = vcmp.gt.f32.partialorder %v993_v7, 0.0  ;;  %v1057_v8 = vmul.f32 0.25, %v993_v7  ;;  %v1013_v34 = vld [vmem:[#allocation2 + $0xf8] sm:$0xff]  ;;  %v998_v39 = vld [vmem:[#allocation2 + $0x8] sm:$0xff] }
 0x1cc   : > { %1172 = vmatpush.msra.mxu0 %v1151_v26  ;;  %2349 = vmatpush.msra.mxu2 %v1151_v26  ;;  %1118 = vst [vmem:[%s2919_s12 + $0x30] sm:$0xff] %v1086_v55  ;;  %v1088_v3 = vsel %vm1024_vm0, %v992_v1, %v1056_v2  ;;  %v1104_v6 = vsel %vm1040_vm1, %v1008_v4, %v1072_v5  ;;  %v1073_v11 = vmul.f32 0.25, %v1009_v10  ;;  %vm1041_vm3 = vcmp.gt.f32.partialorder %v1009_v10, 0.0  ;;  %v1450_v45 = vld [vmem:[%s3620_s4 + $0x68] sm:$0xff]  ;;  %v999_v47 = vld [vmem:[#allocation2 + $0x78] sm:$0xff]  ;;  %v1447_v50 = vld [vmem:[%s3620_s4 + $0x50] sm:$0xff] }
 0x1cd   : > { %1134 = vst [vmem:[%s2919_s12 + $0xb0] sm:$0xff] %v1102_v58  ;;  %v1089_v9 = vsel %vm1025_vm2, %v993_v7, %v1057_v8  ;;  %vm1026_vm4 = vcmp.gt.f32.partialorder %v994_v13, 0.0  ;;  %v1058_v14 = vmul.f32 0.25, %v994_v13  ;;  %vm1042_vm5 = vcmp.gt.f32.partialorder %v1010_v16, 0.0  ;;  %v1448_v48 = vld [vmem:[%s3620_s4 + $0x58] sm:$0xff]  ;;  %v1445_v56 = vld [vmem:[%s3620_s4 + $0x40] sm:$0xff] }
 0x1ce   : > { %1173 = vmatpush.msra.mxu0 %v1150_v28  ;;  %2350 = vmatpush.msra.mxu2 %v1150_v28  ;;  %1119 = vst [vmem:[%s2919_s12 + $0x38] sm:$0xff] %v1087_v61  ;;  %v1105_v12 = vsel %vm1041_vm3, %v1009_v10, %v1073_v11  ;;  %vm1027_vm6 = vcmp.gt.f32.partialorder %v995_v19, 0.0  ;;  %vm1043_vm7 = vcmp.gt.f32.partialorder %v1011_v22, 0.0  ;;  %vm1028_vm8 = vcmp.gt.f32.partialorder %v996_v25, 0.0  ;;  %v1012_v28 = vld [vmem:[#allocation2 + $0xa0] sm:$0xff]  ;;  %v1444_v57 = vld [vmem:[%s3620_s4 + $0x38] sm:$0xff] }
 0x1cf   : > { %1135 = vst [vmem:[%s2919_s12 + $0xb8] sm:$0xff] %v1103_v0  ;;  %v1060_v26 = vmul.f32 0.25, %v996_v25  ;;  %v1076_v29 = vmul.f32 0.25, %v1012_v28  ;;  %vm1044_vm9 = vcmp.gt.f32.partialorder %v1012_v28, 0.0  ;;  %v1077_v35 = vmul.f32 0.25, %v1013_v34  ;;  %v1442_v59 = vld [vmem:[%s3620_s4 + $0x28] sm:$0xff] }
 0x1d0   : > { %1174 = vmatpush.msra.mxu0 %v1149_v31  ;;  %2351 = vmatpush.msra.mxu2 %v1149_v31  ;;  %1120 = vst [vmem:[%s2919_s12 + $0x40] sm:$0xff] %v1088_v3  ;;  %v997_v31 = vld [vmem:[#allocation2 + $0xf0] sm:$0xff]  ;;  %vm1045_vm11 = vcmp.gt.f32.partialorder %v1013_v34, 0.0  ;;  %vm1030_vm12 = vcmp.gt.f32.partialorder %v998_v39, 0.0  ;;  %v1062_v40 = vmul.f32 0.25, %v998_v39  ;;  %vm1031_vm14 = vcmp.gt.f32.partialorder %v999_v47, 0.0 }
 0x1d1   : > { %1136 = vst [vmem:[%s2919_s12 + $0xc0] sm:$0xff] %v1104_v6  ;;  %v3137_v30 = vsel %vm1044_vm9, %v1012_v28, %v1076_v29  ;;  %vm1029_vm10 = vcmp.gt.f32.partialorder %v997_v31, 0.0  ;;  %v1441_v60 = vld [vmem:[%s3620_s4 + $0x20] sm:$0xff]  ;;  %v1439_v62 = vld [vmem:[%s3620_s4 + $0x10] sm:$0xff]  ;;  %v1438_v63 = vld [vmem:[%s3620_s4 + $0x8] sm:$0xff] }
 0x1d2   : > { %1175 = vmatpush.msra.mxu0 %v1148_v33  ;;  %2352 = vmatpush.msra.mxu2 %v1148_v33  ;;  %1121 = vst [vmem:[%s2919_s12 + $0x48] sm:$0xff] %v1089_v9  ;;  %v3214_v1 = vld [vmem:[%s3619_s3] ss:$0 sm:$0xff] }
 0x1d3   : > { %1137 = vst [vmem:[%s2919_s12 + $0xc8] sm:$0xff] %v1105_v12 }
 0x1d4   : > { %1176 = vmatpush.msra.mxu0 %v1147_v36  ;;  %2353 = vmatpush.msra.mxu2 %v1147_v36  ;;  %1140 = vst [vmem:[%s2919_s12 + $0xe0] sm:$0xff] %v3137_v30  ;;  %v3145_v36 = vsel %vm1045_vm11, %v1013_v34, %v1077_v35 }
 0x1d5   : > { %1141 = vst [vmem:[%s2919_s12 + $0xe8] sm:$0xff] %v3145_v36 }
 0x1d6   : > { %1177 = vmatpush.msra.mxu0 %v1146_v38  ;;  %2354 = vmatpush.msra.mxu2 %v1146_v38  ;;  %v1451_v38 = vld [vmem:[%s3620_s4 + $0x70] sm:$0xff] }
 0x1d8   : > { %1178 = vmatpush.msra.mxu0 %v1145_v41  ;;  %2355 = vmatpush.msra.mxu2 %v1145_v41  ;;  %v3155_v41 = vsel %vm1030_vm12, %v998_v39, %v1062_v40 }
 0x1d9   : > { %1126 = vst [vmem:[%s2919_s12 + $0x70] sm:$0xff] %v3155_v41 }
 0x1da   : > { %1179 = vmatpush.msra.mxu0 %v1144_v43  ;;  %2356 = vmatpush.msra.mxu2 %v1144_v43 }
 0x1db   : > { %1180 = vmatmul.f32.vlgmr.msra.gmra.mxu0 %v3044_v15  ;;  %1228 = vmatmul.f32.vlgmr.msra.gmra.mxu2 %v3049_v17  ;;  %v1090_v15 = vsel %vm1026_vm4, %v994_v13, %v1058_v14  ;;  %v1074_v17 = vmul.f32 0.25, %v1010_v16 }
 0x1dc   : > { %1122 = vst [vmem:[%s2919_s12 + $0x50] sm:$0xff] %v1090_v15 }
 0x1dd   : > { %v1106_v18 = vsel %vm1042_vm5, %v1010_v16, %v1074_v17 }
 0x1de   : > { %1138 = vst [vmem:[%s2919_s12 + $0xd0] sm:$0xff] %v1106_v18 }
 0x1e3   : > { %1183 = vmatmul.f32.gmra.mxu0 %v3056_v20  ;;  %1231 = vmatmul.f32.gmra.mxu2 %v3060_v21  ;;  %v1059_v20 = vmul.f32 0.25, %v995_v19 }
 0x1e5   : > { %v3125_v21 = vsel %vm1027_vm6, %v995_v19, %v1059_v20 }
 0x1e6   : > { %1123 = vst [vmem:[%s2919_s12 + $0x58] sm:$0xff] %v3125_v21 }
 0x1eb   : > { %1186 = vmatmul.f32.gmra.mxu0 %v3067_v23  ;;  %1234 = vmatmul.f32.gmra.mxu2 %v3074_v27  ;;  %v1075_v23 = vmul.f32 0.25, %v1011_v22  ;;  %v3133_v27 = vsel %vm1028_vm8, %v996_v25, %v1060_v26 }
 0x1ec   : > { %1124 = vst [vmem:[%s2919_s12 + $0x60] sm:$0xff] %v3133_v27 }
 0x1ed   : > { %v3129_v24 = vsel %vm1043_vm7, %v1011_v22, %v1075_v23 }
 0x1ee   : > { %1139 = vst [vmem:[%s2919_s12 + $0xd8] sm:$0xff] %v3129_v24 }
 0x1f3   : > { %1189 = vmatmul.f32.gmra.mxu0 %v3084_v32  ;;  %1237 = vmatmul.f32.gmra.mxu2 %v1099_v37  ;;  %v1061_v32 = vmul.f32 0.25, %v997_v31  ;;  %v1452_v37 = vld [vmem:[%s3620_s4 + $0x78] sm:$0xff] }
 0x1f4   : > { %1457 = vmatpush.msra.mxu1 %v1452_v37  ;;  %2357 = vmatpush.msra.mxu3 %v1452_v37 }
 0x1f5   : > { %v3141_v33 = vsel %vm1029_vm10, %v997_v31, %v1061_v32 }
 0x1f6   : > { %1125 = vst [vmem:[%s2919_s12 + $0x68] sm:$0xff] %v3141_v33  ;;  %1458 = vmatpush.msra.mxu1 %v1451_v38  ;;  %2358 = vmatpush.msra.mxu3 %v1451_v38 }
 0x1f8   : > { %1459 = vmatpush.msra.mxu1 %v1450_v45  ;;  %2359 = vmatpush.msra.mxu3 %v1450_v45 }
 0x1fb   : > { %1192 = vmatmul.f32.gmra.mxu0 %v1084_v42  ;;  %1240 = vmatmul.f32.gmra.mxu2 %v1100_v46  ;;  %v1014_v42 = vld [vmem:[#allocation2 + $0x20] sm:$0xff] }
 0x1fc   : > { %v1078_v43 = vmul.f32 0.25, %v1014_v42  ;;  %vm1046_vm13 = vcmp.gt.f32.partialorder %v1014_v42, 0.0  ;;  %v1449_v46 = vld [vmem:[%s3620_s4 + $0x60] sm:$0xff] }
 0x1fd   : > { %1460 = vmatpush.msra.mxu1 %v1449_v46  ;;  %2360 = vmatpush.msra.mxu3 %v1449_v46 }
 0x1fe   : > { %v1110_v44 = vsel %vm1046_vm13, %v1014_v42, %v1078_v43 }
 0x1ff   : > { %1142 = vst [vmem:[%s2919_s12 + $0xf0] sm:$0xff] %v1110_v44  ;;  %1461 = vmatpush.msra.mxu1 %v1448_v48  ;;  %2361 = vmatpush.msra.mxu3 %v1448_v48 }
 0x201   : > { %1462 = vmatpush.msra.mxu1 %v1447_v50  ;;  %2362 = vmatpush.msra.mxu3 %v1447_v50 }
 0x203   : > { %1195 = vmatmul.f32.gmra.mxu0 %v1085_v49  ;;  %1243 = vmatmul.f32.gmra.mxu2 %v1101_v52  ;;  %v1063_v49 = vmul.f32 0.25, %v999_v47  ;;  %v1015_v52 = vld [vmem:[#allocation2 + $0x98] sm:$0xff] }
 0x204   : > { %v1079_v53 = vmul.f32 0.25, %v1015_v52  ;;  %vm1047_vm15 = vcmp.gt.f32.partialorder %v1015_v52, 0.0 }
 0x205   : > { %v1095_v51 = vsel %vm1031_vm14, %v999_v47, %v1063_v49 }
 0x206   : > { %1127 = vst [vmem:[%s2919_s12 + $0x78] sm:$0xff] %v1095_v51  ;;  %v1111_v54 = vsel %vm1047_vm15, %v1015_v52, %v1079_v53 }
 0x207   : > { %1143 = vst [vmem:[%s2919_s12 + $0xf8] sm:$0xff] %v1111_v54 }
 0x20b   : > { %1198 = vmatmul.f32.gmra.mxu0 %v1086_v55  ;;  %1246 = vmatmul.f32.gmra.mxu2 %v1102_v58  ;;  %v1446_v55 = vld [vmem:[%s3620_s4 + $0x48] sm:$0xff]  ;;  %v1443_v58 = vld [vmem:[%s3620_s4 + $0x30] sm:$0xff] }
 0x20c   : > { %1463 = vmatpush.msra.mxu1 %v1446_v55  ;;  %2363 = vmatpush.msra.mxu3 %v1446_v55 }
 0x20e   : > { %1464 = vmatpush.msra.mxu1 %v1445_v56  ;;  %2364 = vmatpush.msra.mxu3 %v1445_v56 }
 0x210   : > { %1465 = vmatpush.msra.mxu1 %v1444_v57  ;;  %2365 = vmatpush.msra.mxu3 %v1444_v57 }
 0x212   : > { %1466 = vmatpush.msra.mxu1 %v1443_v58  ;;  %2366 = vmatpush.msra.mxu3 %v1443_v58 }
 0x213   : > { %1201 = vmatmul.f32.gmra.mxu0 %v1087_v61  ;;  %1249 = vmatmul.f32.gmra.mxu2 %v1103_v0  ;;  %v1440_v61 = vld [vmem:[%s3620_s4 + $0x18] sm:$0xff]  ;;  %v1437_v0 = vld [vmem:[%s3620_s4] sm:$0xff] }
 0x214   : > { %1467 = vmatpush.msra.mxu1 %v1442_v59  ;;  %2367 = vmatpush.msra.mxu3 %v1442_v59 }
 0x216   : > { %1468 = vmatpush.msra.mxu1 %v1441_v60  ;;  %2368 = vmatpush.msra.mxu3 %v1441_v60 }
 0x218   : > { %1469 = vmatpush.msra.mxu1 %v1440_v61  ;;  %2369 = vmatpush.msra.mxu3 %v1440_v61 }
 0x21a   : > { %1470 = vmatpush.msra.mxu1 %v1439_v62  ;;  %2370 = vmatpush.msra.mxu3 %v1439_v62 }
 0x21b   : > { %1204 = vmatmul.f32.gmra.mxu0 %v1088_v3  ;;  %1252 = vmatmul.f32.gmra.mxu2 %v1104_v6 }
 0x21c   : > { %1471 = vmatpush.msra.mxu1 %v1438_v63  ;;  %2371 = vmatpush.msra.mxu3 %v1438_v63 }
 0x21e   : > { %1472 = vmatpush.msra.mxu1 %v1437_v0  ;;  %2372 = vmatpush.msra.mxu3 %v1437_v0 }
 0x223   : > { %1207 = vmatmul.f32.gmra.mxu0 %v1089_v9  ;;  %1255 = vmatmul.f32.gmra.mxu2 %v1105_v12 }
 0x22b   : > { %1210 = vmatmul.f32.gmra.mxu0 %v1090_v15  ;;  %1258 = vmatmul.f32.gmra.mxu2 %v1106_v18 }
 0x233   : > { %1213 = vmatmul.f32.gmra.mxu0 %v3125_v21  ;;  %1261 = vmatmul.f32.gmra.mxu2 %v3129_v24 }
 0x23b   : > { %1216 = vmatmul.f32.gmra.mxu0 %v3133_v27  ;;  %1264 = vmatmul.f32.gmra.mxu2 %v3137_v30 }
 0x243   : > { %1219 = vmatmul.f32.gmra.mxu0 %v3141_v33  ;;  %1267 = vmatmul.f32.gmra.mxu2 %v3145_v36 }
 0x24b   : > { %1222 = vmatmul.f32.gmra.mxu0 %v3155_v41  ;;  %1270 = vmatmul.f32.gmra.mxu2 %v1110_v44 }
 0x253   : > { %1225 = vmatmul.f32.gmra.mxu0 %v1095_v51  ;;  %1273 = vmatmul.f32.gmra.mxu2 %v1111_v54 }
 0x258   : > { %v1181_v2 = vpop.f32.mrf.mxu0 }
 0x259   : > { %v1182_v3 = vadd.f32 %v3214_v1, %v1181_v2 }
 0x25b   : > { %v1309_v4 = vmul.f32 1.442695, %v1182_v3  ;;  %vm1277_vm0 = vcmp.gt.f32.partialorder %v1182_v3, 0.0 }
 0x25d   : > { %2448 = vpow2.f32 %v1309_v4 }
 0x25e   : > { %v1229_v5 = vpop.f32.mrf.mxu2 }
 0x25f   : > { %v1230_v6 = vadd.f32 %v3214_v1, %v1229_v5 }
 0x260   : > { %v1184_v7 = vpop.f32.mrf.mxu0 }
 0x261   : > { %v1341_v8 = vmul.f32 1.442695, %v1230_v6  ;;  %v1185_v9 = vadd.f32 %v3214_v1, %v1184_v7  ;;  %vm1293_vm1 = vcmp.gt.f32.partialorder %v1230_v6, 0.0 }
 0x263   : > { %v2449_v10 = vpop.eup %2448  ;;  %2450 = vpow2.f32 %v1341_v8  ;;  %v1311_v11 = vmul.f32 1.442695, %v1185_v9  ;;  %vm1278_vm2 = vcmp.gt.f32.partialorder %v1185_v9, 0.0 }
 0x264   : > { %v2274_v12 = vadd.f32 -1.0, %v2449_v10 }
 0x265   : > { %2452 = vpow2.f32 %v1311_v11 }
 0x266   : > { %v1232_v13 = vpop.f32.mrf.mxu2  ;;  %v1405_v14 = vsel %vm1277_vm0, %v1182_v3, %v2274_v12 }
 0x267   : > { %v1233_v15 = vadd.f32 %v3214_v1, %v1232_v13  ;;  %1473 = vmatmul.f32.vlgmr.msra.gmra.mxu1 %v1405_v14 }
 0x268   : > { %v1187_v16 = vpop.f32.mrf.mxu0 }
 0x269   : > { %v2451_v17 = vpop.eup %2450  ;;  %v1343_v18 = vmul.f32 1.442695, %v1233_v15  ;;  %v1188_v19 = vadd.f32 %v3214_v1, %v1187_v16  ;;  %vm1294_vm3 = vcmp.gt.f32.partialorder %v1233_v15, 0.0 }
 0x26a   : > { %v2290_v20 = vadd.f32 -1.0, %v2451_v17 }
 0x26b   : > { %v2453_v21 = vpop.eup %2452  ;;  %2454 = vpow2.f32 %v1343_v18  ;;  %v1313_v22 = vmul.f32 1.442695, %v1188_v19  ;;  %vm1279_vm4 = vcmp.gt.f32.partialorder %v1188_v19, 0.0 }
 0x26c   : > { %v1421_v23 = vsel %vm1293_vm1, %v1230_v6, %v2290_v20  ;;  %v2275_v24 = vadd.f32 -1.0, %v2453_v21 }
 0x26d   : > { %2456 = vpow2.f32 %v1313_v22  ;;  %1521 = vmatmul.f32.vlgmr.msra.gmra.mxu3 %v1421_v23 }
 0x26e   : > { %v1235_v25 = vpop.f32.mrf.mxu2  ;;  %v1406_v26 = vsel %vm1278_vm2, %v1185_v9, %v2275_v24 }
 0x26f   : > { %v1236_v27 = vadd.f32 %v3214_v1, %v1235_v25  ;;  %1476 = vmatmul.f32.gmra.mxu1 %v1406_v26 }
 0x270   : > { %v1190_v28 = vpop.f32.mrf.mxu0 }
 0x271   : > { %v2455_v29 = vpop.eup %2454  ;;  %v1345_v30 = vmul.f32 1.442695, %v1236_v27  ;;  %v1191_v31 = vadd.f32 %v3214_v1, %v1190_v28  ;;  %vm1295_vm5 = vcmp.gt.f32.partialorder %v1236_v27, 0.0 }
 0x272   : > { %v2291_v32 = vadd.f32 -1.0, %v2455_v29 }
 0x273   : > { %v2457_v33 = vpop.eup %2456  ;;  %2458 = vpow2.f32 %v1345_v30  ;;  %v1315_v34 = vmul.f32 1.442695, %v1191_v31  ;;  %vm1280_vm6 = vcmp.gt.f32.partialorder %v1191_v31, 0.0 }
 0x274   : > { %v1422_v35 = vsel %vm1294_vm3, %v1233_v15, %v2291_v32  ;;  %v2276_v36 = vadd.f32 -1.0, %v2457_v33 }
 0x275   : > { %2460 = vpow2.f32 %v1315_v34  ;;  %1524 = vmatmul.f32.gmra.mxu3 %v1422_v35 }
 0x276   : > { %v1238_v37 = vpop.f32.mrf.mxu2  ;;  %v1407_v38 = vsel %vm1279_vm4, %v1188_v19, %v2276_v36 }
 0x277   : > { %v1239_v39 = vadd.f32 %v3214_v1, %v1238_v37  ;;  %1479 = vmatmul.f32.gmra.mxu1 %v1407_v38 }
 0x278   : > { %v1193_v40 = vpop.f32.mrf.mxu0 }
 0x279   : > { %v2459_v41 = vpop.eup %2458  ;;  %v1347_v42 = vmul.f32 1.442695, %v1239_v39  ;;  %v1194_v43 = vadd.f32 %v3214_v1, %v1193_v40  ;;  %vm1296_vm7 = vcmp.gt.f32.partialorder %v1239_v39, 0.0 }
 0x27a   : > { %v2292_v44 = vadd.f32 -1.0, %v2459_v41 }
 0x27b   : > { %v2461_v45 = vpop.eup %2460  ;;  %2462 = vpow2.f32 %v1347_v42  ;;  %v1317_v46 = vmul.f32 1.442695, %v1194_v43  ;;  %vm1281_vm8 = vcmp.gt.f32.partialorder %v1194_v43, 0.0 }
 0x27c   : > { %v1423_v47 = vsel %vm1295_vm5, %v1236_v27, %v2292_v44  ;;  %v2277_v48 = vadd.f32 -1.0, %v2461_v45 }
 0x27d   : > { %2464 = vpow2.f32 %v1317_v46  ;;  %1527 = vmatmul.f32.gmra.mxu3 %v1423_v47 }
 0x27e   : > { %v1241_v49 = vpop.f32.mrf.mxu2  ;;  %v1408_v50 = vsel %vm1280_vm6, %v1191_v31, %v2277_v48 }
 0x27f   : > { %v1242_v51 = vadd.f32 %v3214_v1, %v1241_v49  ;;  %1482 = vmatmul.f32.gmra.mxu1 %v1408_v50 }
 0x280   : > { %v1196_v52 = vpop.f32.mrf.mxu0 }
 0x281   : > { %v2463_v53 = vpop.eup %2462  ;;  %v1349_v54 = vmul.f32 1.442695, %v1242_v51  ;;  %v1197_v55 = vadd.f32 %v3214_v1, %v1196_v52  ;;  %vm1297_vm9 = vcmp.gt.f32.partialorder %v1242_v51, 0.0 }
 0x282   : > { %v2293_v56 = vadd.f32 -1.0, %v2463_v53 }
 0x283   : > { %v2465_v57 = vpop.eup %2464  ;;  %2466 = vpow2.f32 %v1349_v54  ;;  %v1319_v58 = vmul.f32 1.442695, %v1197_v55  ;;  %vm1282_vm10 = vcmp.gt.f32.partialorder %v1197_v55, 0.0 }
 0x284   : > { %v1424_v59 = vsel %vm1296_vm7, %v1239_v39, %v2293_v56  ;;  %v2278_v60 = vadd.f32 -1.0, %v2465_v57 }
 0x285   : > { %2468 = vpow2.f32 %v1319_v58  ;;  %1530 = vmatmul.f32.gmra.mxu3 %v1424_v59 }
 0x286   : > { %v1244_v61 = vpop.f32.mrf.mxu2  ;;  %v1409_v62 = vsel %vm1281_vm8, %v1194_v43, %v2278_v60 }
 0x287   : > { %v1245_v63 = vadd.f32 %v3214_v1, %v1244_v61  ;;  %1485 = vmatmul.f32.gmra.mxu1 %v1409_v62 }
 0x288   : > { %v1199_v0 = vpop.f32.mrf.mxu0 }
 0x289   : > { %v2467_v2 = vpop.eup %2466  ;;  %v1351_v3 = vmul.f32 1.442695, %v1245_v63  ;;  %v1200_v4 = vadd.f32 %v3214_v1, %v1199_v0  ;;  %vm1298_vm11 = vcmp.gt.f32.partialorder %v1245_v63, 0.0 }
 0x28a   : > { %v2294_v5 = vadd.f32 -1.0, %v2467_v2 }
 0x28b   : > { %v2469_v6 = vpop.eup %2468  ;;  %2470 = vpow2.f32 %v1351_v3  ;;  %v1321_v7 = vmul.f32 1.442695, %v1200_v4  ;;  %vm1283_vm12 = vcmp.gt.f32.partialorder %v1200_v4, 0.0 }
 0x28c   : > { %v1425_v8 = vsel %vm1297_vm9, %v1242_v51, %v2294_v5  ;;  %v2279_v9 = vadd.f32 -1.0, %v2469_v6 }
 0x28d   : > { %2472 = vpow2.f32 %v1321_v7  ;;  %1533 = vmatmul.f32.gmra.mxu3 %v1425_v8 }
 0x28e   : > { %v1247_v10 = vpop.f32.mrf.mxu2  ;;  %v1410_v11 = vsel %vm1282_vm10, %v1197_v55, %v2279_v9 }
 0x28f   : > { %v1248_v12 = vadd.f32 %v3214_v1, %v1247_v10  ;;  %1488 = vmatmul.f32.gmra.mxu1 %v1410_v11 }
 0x290   : > { %v1202_v13 = vpop.f32.mrf.mxu0 }
 0x291   : > { %v2471_v14 = vpop.eup %2470  ;;  %v1353_v15 = vmul.f32 1.442695, %v1248_v12  ;;  %v1203_v16 = vadd.f32 %v3214_v1, %v1202_v13  ;;  %vm1299_vm13 = vcmp.gt.f32.partialorder %v1248_v12, 0.0 }
 0x292   : > { %v2295_v17 = vadd.f32 -1.0, %v2471_v14 }
 0x293   : > { %v2473_v18 = vpop.eup %2472  ;;  %2474 = vpow2.f32 %v1353_v15  ;;  %v1323_v19 = vmul.f32 1.442695, %v1203_v16  ;;  %vm1284_vm14 = vcmp.gt.f32.partialorder %v1203_v16, 0.0 }
 0x294   : > { %v1426_v20 = vsel %vm1298_vm11, %v1245_v63, %v2295_v17  ;;  %v2280_v21 = vadd.f32 -1.0, %v2473_v18 }
 0x295   : > { %2476 = vpow2.f32 %v1323_v19  ;;  %1536 = vmatmul.f32.gmra.mxu3 %v1426_v20 }
 0x296   : > { %v1250_v22 = vpop.f32.mrf.mxu2  ;;  %v1411_v23 = vsel %vm1283_vm12, %v1200_v4, %v2280_v21 }
 0x297   : > { %v1251_v24 = vadd.f32 %v3214_v1, %v1250_v22  ;;  %1491 = vmatmul.f32.gmra.mxu1 %v1411_v23 }
 0x298   : > { %v1205_v25 = vpop.f32.mrf.mxu0 }
 0x299   : > { %v2475_v26 = vpop.eup %2474  ;;  %v1355_v27 = vmul.f32 1.442695, %v1251_v24  ;;  %v1206_v28 = vadd.f32 %v3214_v1, %v1205_v25  ;;  %vm1300_vm15 = vcmp.gt.f32.partialorder %v1251_v24, 0.0 }
 0x29a   : > { %v2296_v29 = vadd.f32 -1.0, %v2475_v26 }
 0x29b   : > { %v2477_v30 = vpop.eup %2476  ;;  %2478 = vpow2.f32 %v1355_v27  ;;  %v1325_v31 = vmul.f32 1.442695, %v1206_v28  ;;  %vm1285_vm0 = vcmp.gt.f32.partialorder %v1206_v28, 0.0 }
 0x29c   : > { %v1427_v32 = vsel %vm1299_vm13, %v1248_v12, %v2296_v29  ;;  %v2281_v33 = vadd.f32 -1.0, %v2477_v30 }
 0x29d   : > { %2480 = vpow2.f32 %v1325_v31  ;;  %1539 = vmatmul.f32.gmra.mxu3 %v1427_v32 }
 0x29e   : > { %v1253_v34 = vpop.f32.mrf.mxu2  ;;  %v1412_v35 = vsel %vm1284_vm14, %v1203_v16, %v2281_v33 }
 0x29f   : > { %v1254_v36 = vadd.f32 %v3214_v1, %v1253_v34  ;;  %1494 = vmatmul.f32.gmra.mxu1 %v1412_v35 }
 0x2a0   : > { %v1208_v37 = vpop.f32.mrf.mxu0 }
 0x2a1   : > { %v2479_v38 = vpop.eup %2478  ;;  %v1357_v39 = vmul.f32 1.442695, %v1254_v36  ;;  %v1209_v40 = vadd.f32 %v3214_v1, %v1208_v37  ;;  %vm1301_vm1 = vcmp.gt.f32.partialorder %v1254_v36, 0.0 }
 0x2a2   : > { %v2297_v41 = vadd.f32 -1.0, %v2479_v38 }
 0x2a3   : > { %v2481_v42 = vpop.eup %2480  ;;  %2482 = vpow2.f32 %v1357_v39  ;;  %v1327_v43 = vmul.f32 1.442695, %v1209_v40  ;;  %vm1286_vm2 = vcmp.gt.f32.partialorder %v1209_v40, 0.0 }
 0x2a4   : > { %v1428_v44 = vsel %vm1300_vm15, %v1251_v24, %v2297_v41  ;;  %v2282_v45 = vadd.f32 -1.0, %v2481_v42 }
 0x2a5   : > { %2484 = vpow2.f32 %v1327_v43  ;;  %1542 = vmatmul.f32.gmra.mxu3 %v1428_v44 }
 0x2a6   : > { %v1256_v46 = vpop.f32.mrf.mxu2  ;;  %v1413_v47 = vsel %vm1285_vm0, %v1206_v28, %v2282_v45 }
 0x2a7   : > { %v1257_v48 = vadd.f32 %v3214_v1, %v1256_v46  ;;  %1497 = vmatmul.f32.gmra.mxu1 %v1413_v47 }
 0x2a8   : > { %v1211_v49 = vpop.f32.mrf.mxu0 }
 0x2a9   : > { %v2483_v50 = vpop.eup %2482  ;;  %v1359_v51 = vmul.f32 1.442695, %v1257_v48  ;;  %v1212_v52 = vadd.f32 %v3214_v1, %v1211_v49  ;;  %vm1302_vm3 = vcmp.gt.f32.partialorder %v1257_v48, 0.0 }
 0x2aa   : > { %v2298_v53 = vadd.f32 -1.0, %v2483_v50 }
 0x2ab   : > { %v2485_v54 = vpop.eup %2484  ;;  %2486 = vpow2.f32 %v1359_v51  ;;  %v1329_v55 = vmul.f32 1.442695, %v1212_v52  ;;  %vm1287_vm4 = vcmp.gt.f32.partialorder %v1212_v52, 0.0 }
 0x2ac   : > { %v1429_v56 = vsel %vm1301_vm1, %v1254_v36, %v2298_v53  ;;  %v2283_v57 = vadd.f32 -1.0, %v2485_v54 }
 0x2ad   : > { %2488 = vpow2.f32 %v1329_v55  ;;  %1545 = vmatmul.f32.gmra.mxu3 %v1429_v56 }
 0x2ae   : > { %v1259_v58 = vpop.f32.mrf.mxu2  ;;  %v1414_v59 = vsel %vm1286_vm2, %v1209_v40, %v2283_v57 }
 0x2af   : > { %v1260_v60 = vadd.f32 %v3214_v1, %v1259_v58  ;;  %1500 = vmatmul.f32.gmra.mxu1 %v1414_v59 }
 0x2b0   : > { %v1214_v61 = vpop.f32.mrf.mxu0 }
 0x2b1   : > { %v2487_v62 = vpop.eup %2486  ;;  %v1361_v63 = vmul.f32 1.442695, %v1260_v60  ;;  %v1215_v0 = vadd.f32 %v3214_v1, %v1214_v61  ;;  %vm1303_vm5 = vcmp.gt.f32.partialorder %v1260_v60, 0.0 }
 0x2b2   : > { %v2299_v2 = vadd.f32 -1.0, %v2487_v62 }
 0x2b3   : > { %v2489_v3 = vpop.eup %2488  ;;  %2490 = vpow2.f32 %v1361_v63  ;;  %v1331_v4 = vmul.f32 1.442695, %v1215_v0  ;;  %vm1288_vm6 = vcmp.gt.f32.partialorder %v1215_v0, 0.0 }
 0x2b4   : > { %v1430_v5 = vsel %vm1302_vm3, %v1257_v48, %v2299_v2  ;;  %v2284_v6 = vadd.f32 -1.0, %v2489_v3  ;;  %v3251_v3 = vld [vmem:[%s3621_s5] ss:$0 sm:$0xff] }
 0x2b5   : > { %2492 = vpow2.f32 %v1331_v4  ;;  %1548 = vmatmul.f32.gmra.mxu3 %v1430_v5 }
 0x2b6   : > { %v1262_v7 = vpop.f32.mrf.mxu2  ;;  %v1415_v8 = vsel %vm1287_vm4, %v1212_v52, %v2284_v6 }
 0x2b7   : > { %v1263_v9 = vadd.f32 %v3214_v1, %v1262_v7  ;;  %1503 = vmatmul.f32.gmra.mxu1 %v1415_v8 }
 0x2b8   : > { %v1217_v10 = vpop.f32.mrf.mxu0 }
 0x2b9   : > { %v2491_v11 = vpop.eup %2490  ;;  %v1363_v12 = vmul.f32 1.442695, %v1263_v9  ;;  %v1218_v13 = vadd.f32 %v3214_v1, %v1217_v10  ;;  %vm1304_vm7 = vcmp.gt.f32.partialorder %v1263_v9, 0.0 }
 0x2ba   : > { %v2300_v14 = vadd.f32 -1.0, %v2491_v11 }
 0x2bb   : > { %v2493_v15 = vpop.eup %2492  ;;  %2494 = vpow2.f32 %v1363_v12  ;;  %v1333_v16 = vmul.f32 1.442695, %v1218_v13  ;;  %vm1289_vm8 = vcmp.gt.f32.partialorder %v1218_v13, 0.0 }
 0x2bc   : > { %v1431_v17 = vsel %vm1303_vm5, %v1260_v60, %v2300_v14  ;;  %v2285_v18 = vadd.f32 -1.0, %v2493_v15 }
 0x2bd   : > { %2496 = vpow2.f32 %v1333_v16  ;;  %1551 = vmatmul.f32.gmra.mxu3 %v1431_v17 }
 0x2be   : > { %v1265_v19 = vpop.f32.mrf.mxu2  ;;  %v1416_v20 = vsel %vm1288_vm6, %v1215_v0, %v2285_v18 }
 0x2bf   : > { %v1266_v21 = vadd.f32 %v3214_v1, %v1265_v19  ;;  %1506 = vmatmul.f32.gmra.mxu1 %v1416_v20 }
 0x2c0   : > { %v1220_v22 = vpop.f32.mrf.mxu0 }
 0x2c1   : > { %v2495_v23 = vpop.eup %2494  ;;  %v1365_v24 = vmul.f32 1.442695, %v1266_v21  ;;  %v1221_v25 = vadd.f32 %v3214_v1, %v1220_v22  ;;  %vm1305_vm9 = vcmp.gt.f32.partialorder %v1266_v21, 0.0 }
 0x2c2   : > { %v2301_v26 = vadd.f32 -1.0, %v2495_v23 }
 0x2c3   : > { %v2497_v27 = vpop.eup %2496  ;;  %2498 = vpow2.f32 %v1365_v24  ;;  %v1335_v28 = vmul.f32 1.442695, %v1221_v25  ;;  %vm1290_vm10 = vcmp.gt.f32.partialorder %v1221_v25, 0.0 }
 0x2c4   : > { %v1432_v29 = vsel %vm1304_vm7, %v1263_v9, %v2301_v26  ;;  %v2286_v30 = vadd.f32 -1.0, %v2497_v27 }
 0x2c5   : > { %2500 = vpow2.f32 %v1335_v28  ;;  %1554 = vmatmul.f32.gmra.mxu3 %v1432_v29 }
 0x2c6   : > { %v1268_v31 = vpop.f32.mrf.mxu2  ;;  %v1417_v32 = vsel %vm1289_vm8, %v1218_v13, %v2286_v30 }
 0x2c7   : > { %v1269_v33 = vadd.f32 %v3214_v1, %v1268_v31  ;;  %1509 = vmatmul.f32.gmra.mxu1 %v1417_v32 }
 0x2c8   : > { %v1223_v34 = vpop.f32.mrf.mxu0 }
 0x2c9   : > { %v2499_v35 = vpop.eup %2498  ;;  %v1367_v36 = vmul.f32 1.442695, %v1269_v33  ;;  %v1224_v37 = vadd.f32 %v3214_v1, %v1223_v34  ;;  %vm1306_vm11 = vcmp.gt.f32.partialorder %v1269_v33, 0.0 }
 0x2ca   : > { %v2302_v38 = vadd.f32 -1.0, %v2499_v35 }
 0x2cb   : > { %v2501_v39 = vpop.eup %2500  ;;  %2502 = vpow2.f32 %v1367_v36  ;;  %v1337_v40 = vmul.f32 1.442695, %v1224_v37  ;;  %vm1291_vm12 = vcmp.gt.f32.partialorder %v1224_v37, 0.0 }
 0x2cc   : > { %v1433_v41 = vsel %vm1305_vm9, %v1266_v21, %v2302_v38  ;;  %v2287_v42 = vadd.f32 -1.0, %v2501_v39 }
 0x2cd   : > { %2504 = vpow2.f32 %v1337_v40  ;;  %1557 = vmatmul.f32.gmra.mxu3 %v1433_v41 }
 0x2ce   : > { %v1271_v43 = vpop.f32.mrf.mxu2  ;;  %v1418_v44 = vsel %vm1290_vm10, %v1221_v25, %v2287_v42 }
 0x2cf   : > { %v1272_v45 = vadd.f32 %v3214_v1, %v1271_v43  ;;  %1512 = vmatmul.f32.gmra.mxu1 %v1418_v44 }
 0x2d0   : > { %v1226_v46 = vpop.f32.mrf.mxu0 }
 0x2d1   : > { %v2503_v47 = vpop.eup %2502  ;;  %v1369_v48 = vmul.f32 1.442695, %v1272_v45  ;;  %v1227_v49 = vadd.f32 %v3214_v1, %v1226_v46  ;;  %vm1307_vm13 = vcmp.gt.f32.partialorder %v1272_v45, 0.0 }
 0x2d2   : > { %v2303_v50 = vadd.f32 -1.0, %v2503_v47 }
 0x2d3   : > { %v2505_v51 = vpop.eup %2504  ;;  %2506 = vpow2.f32 %v1369_v48  ;;  %v1339_v52 = vmul.f32 1.442695, %v1227_v49  ;;  %vm1292_vm14 = vcmp.gt.f32.partialorder %v1227_v49, 0.0 }
 0x2d4   : > { %v1434_v53 = vsel %vm1306_vm11, %v1269_v33, %v2303_v50  ;;  %v2288_v54 = vadd.f32 -1.0, %v2505_v51 }
 0x2d5   : > { %2508 = vpow2.f32 %v1339_v52  ;;  %1560 = vmatmul.f32.gmra.mxu3 %v1434_v53 }
 0x2d6   : > { %v1274_v55 = vpop.f32.mrf.mxu2  ;;  %v1419_v56 = vsel %vm1291_vm12, %v1224_v37, %v2288_v54 }
 0x2d7   : > { %v1275_v57 = vadd.f32 %v3214_v1, %v1274_v55  ;;  %1515 = vmatmul.f32.gmra.mxu1 %v1419_v56 }
 0x2d9   : > { %v2507_v58 = vpop.eup %2506  ;;  %v1371_v59 = vmul.f32 1.442695, %v1275_v57  ;;  %vm1308_vm15 = vcmp.gt.f32.partialorder %v1275_v57, 0.0 }
 0x2da   : > { %v2304_v60 = vadd.f32 -1.0, %v2507_v58 }
 0x2db   : > { %v2509_v61 = vpop.eup %2508  ;;  %2510 = vpow2.f32 %v1371_v59 }
 0x2dc   : > { %v1435_v62 = vsel %vm1307_vm13, %v1272_v45, %v2304_v60  ;;  %v2289_v63 = vadd.f32 -1.0, %v2509_v61 }
 0x2dd   : > { %1563 = vmatmul.f32.gmra.mxu3 %v1435_v62 }
 0x2de   : > { %v1420_v0 = vsel %vm1292_vm14, %v1227_v49, %v2289_v63 }
 0x2df   : > { %1518 = vmatmul.f32.gmra.mxu1 %v1420_v0 }
 0x2e1   : > { %v2511_v2 = vpop.eup %2510 }
 0x2e2   : > { %v2305_v1 = vadd.f32 -1.0, %v2511_v2 }
 0x2e4   : > { %v1474_v4 = vpop.f32.mrf.mxu1  ;;  %v1436_v5 = vsel %vm1308_vm15, %v1275_v57, %v2305_v1 }
 0x2e5   : > { %v3254_v6 = vadd.f32 %v3251_v3, %v1474_v4  ;;  %1566 = vmatmul.f32.gmra.mxu3 %v1436_v5 }
 0x2e7   : > { %v1570_v7 = vmul.f32 %v3254_v6, %v3254_v6 }
 0x2e9   : > { %1602 = vadd.xlane.f32.xlu0 %v1570_v7 }
 0x2ec   : > { %v1477_v8 = vpop.f32.mrf.mxu1 }
 0x2ed   : > { %v3259_v9 = vadd.f32 %v3251_v3, %v1477_v8 }
 0x2ef   : > { %v1571_v10 = vmul.f32 %v3259_v9, %v3259_v9 }
 0x2f0   : > { %v1522_v11 = vpop.f32.mrf.mxu3 }
 0x2f1   : > { %v3264_v12 = vadd.f32 %v3251_v3, %v1522_v11  ;;  %1604 = vadd.xlane.f32.xlu0 %v1571_v10 }
 0x2f3   : > { %v1586_v13 = vmul.f32 %v3264_v12, %v3264_v12 }
 0x2f4   : > { %v1480_v14 = vpop.f32.mrf.mxu1 }
 0x2f5   : > { %1634 = vadd.xlane.f32.xlu1 %v1586_v13  ;;  %v3269_v15 = vadd.f32 %v3251_v3, %v1480_v14 }
 0x2f7   : > { %v1572_v19 = vmul.f32 %v3269_v15, %v3269_v15 }
 0x2f8   : > { %v1525_v16 = vpop.f32.mrf.mxu3 }
 0x2f9   : > { %v3272_v17 = vadd.f32 %v3251_v3, %v1525_v16 }
 0x2fb   : > { %v1587_v18 = vmul.f32 %v3272_v17, %v3272_v17 }
 0x2fc   : > { %v1483_v20 = vpop.f32.mrf.mxu1 }
 0x2fd   : > { %1636 = vadd.xlane.f32.xlu2 %v1587_v18  ;;  %1606 = vadd.xlane.f32.xlu1 %v1572_v19  ;;  %v3279_v21 = vadd.f32 %v3251_v3, %v1483_v20 }
 0x2ff   : > { %v1573_v24 = vmul.f32 %v3279_v21, %v3279_v21 }
 0x300   : > { %v1528_v22 = vpop.f32.mrf.mxu3 }
 0x301   : > { %v3282_v23 = vadd.f32 %v3251_v3, %v1528_v22 }
 0x303   : > { %v1588_v25 = vmul.f32 %v3282_v23, %v3282_v23 }
 0x304   : > { %v1486_v26 = vpop.f32.mrf.mxu1 }
 0x305   : > { %v3289_v27 = vadd.f32 %v3251_v3, %v1486_v26  ;;  %1608 = vadd.xlane.f32.xlu1 %v1573_v24  ;;  %1638 = vadd.xlane.f32.xlu0 %v1588_v25 }
 0x307   : > { %v1574_v28 = vmul.f32 %v3289_v27, %v3289_v27 }
 0x308   : > { %v1531_v29 = vpop.f32.mrf.mxu3 }
 0x309   : > { %v3294_v30 = vadd.f32 %v3251_v3, %v1531_v29  ;;  %1610 = vadd.xlane.f32.xlu2 %v1574_v28 }
 0x30b   : > { %v1589_v31 = vmul.f32 %v3294_v30, %v3294_v30 }
 0x30c   : > { %v1489_v32 = vpop.f32.mrf.mxu1 }
 0x30d   : > { %v3299_v33 = vadd.f32 %v3251_v3, %v1489_v32  ;;  %1640 = vadd.xlane.f32.xlu1 %v1589_v31 }
 0x30f   : > { %v1575_v34 = vmul.f32 %v3299_v33, %v3299_v33 }
 0x310   : > { %v1534_v35 = vpop.f32.mrf.mxu3 }
 0x311   : > { %1612 = vadd.xlane.f32.xlu2 %v1575_v34  ;;  %v3304_v36 = vadd.f32 %v3251_v3, %v1534_v35 }
 0x313   : > { %v1590_v39 = vmul.f32 %v3304_v36, %v3304_v36 }
 0x314   : > { %v1492_v37 = vpop.f32.mrf.mxu1 }
 0x315   : > { %v3307_v38 = vadd.f32 %v3251_v3, %v1492_v37 }
 0x317   : > { %v1576_v40 = vmul.f32 %v3307_v38, %v3307_v38 }
 0x318   : > { %v1537_v41 = vpop.f32.mrf.mxu3 }
 0x319   : > { %1642 = vadd.xlane.f32.xlu2 %v1590_v39  ;;  %1614 = vadd.xlane.f32.xlu0 %v1576_v40  ;;  %v3314_v42 = vadd.f32 %v3251_v3, %v1537_v41 }
 0x31b   : > { %v1591_v46 = vmul.f32 %v3314_v42, %v3314_v42 }
 0x31c   : > { %v1495_v43 = vpop.f32.mrf.mxu1 }
 0x31d   : > { %v3317_v44 = vadd.f32 %v3251_v3, %v1495_v43 }
 0x31f   : > { %v1577_v45 = vmul.f32 %v3317_v44, %v3317_v44 }
 0x320   : > { %v1540_v47 = vpop.f32.mrf.mxu3 }
 0x321   : > { %1616 = vadd.xlane.f32.xlu1 %v1577_v45  ;;  %1644 = vadd.xlane.f32.xlu0 %v1591_v46  ;;  %v3324_v48 = vadd.f32 %v3251_v3, %v1540_v47 }
 0x323   : > { %v1592_v52 = vmul.f32 %v3324_v48, %v3324_v48 }
 0x324   : > { %v1498_v49 = vpop.f32.mrf.mxu1 }
 0x325   : > { %v3327_v50 = vadd.f32 %v3251_v3, %v1498_v49 }
 0x327   : > { %v1578_v51 = vmul.f32 %v3327_v50, %v3327_v50 }
 0x328   : > { %v1543_v53 = vpop.f32.mrf.mxu3 }
 0x329   : > { %1618 = vadd.xlane.f32.xlu2 %v1578_v51  ;;  %1646 = vadd.xlane.f32.xlu1 %v1592_v52  ;;  %v3334_v54 = vadd.f32 %v3251_v3, %v1543_v53 }
 0x32b   : > { %v1593_v57 = vmul.f32 %v3334_v54, %v3334_v54 }
 0x32c   : > { %v1501_v55 = vpop.f32.mrf.mxu1 }
 0x32d   : > { %v3337_v56 = vadd.f32 %v3251_v3, %v1501_v55 }
 0x32f   : > { %v1579_v58 = vmul.f32 %v3337_v56, %v3337_v56 }
 0x330   : > { %v1546_v59 = vpop.f32.mrf.mxu3 }
 0x331   : > { %1648 = vadd.xlane.f32.xlu2 %v1593_v57  ;;  %1620 = vadd.xlane.f32.xlu0 %v1579_v58  ;;  %v3344_v60 = vadd.f32 %v3251_v3, %v1546_v59 }
 0x333   : > { %v1594_v0 = vmul.f32 %v3344_v60, %v3344_v60 }
 0x334   : > { %v1504_v61 = vpop.f32.mrf.mxu1 }
 0x335   : > { %v3347_v62 = vadd.f32 %v3251_v3, %v1504_v61 }
 0x337   : > { %v1580_v63 = vmul.f32 %v3347_v62, %v3347_v62 }
 0x338   : > { %v1549_v2 = vpop.f32.mrf.mxu3 }
 0x339   : > { %1622 = vadd.xlane.f32.xlu1 %v1580_v63  ;;  %1650 = vadd.xlane.f32.xlu0 %v1594_v0  ;;  %v3354_v1 = vadd.f32 %v3251_v3, %v1549_v2 }
 0x33b   : > { %v1595_v8 = vmul.f32 %v3354_v1, %v3354_v1 }
 0x33c   : > { %v1507_v4 = vpop.f32.mrf.mxu1 }
 0x33d   : > { %v3357_v5 = vadd.f32 %v3251_v3, %v1507_v4 }
 0x33f   : > { %v1581_v7 = vmul.f32 %v3357_v5, %v3357_v5 }
 0x340   : > { %v1552_v10 = vpop.f32.mrf.mxu3 }
 0x341   : > { %1624 = vadd.xlane.f32.xlu2 %v1581_v7  ;;  %1652 = vadd.xlane.f32.xlu1 %v1595_v8  ;;  %v3364_v11 = vadd.f32 %v3251_v3, %v1552_v10 }
 0x343   : > { %v1596_v16 = vmul.f32 %v3364_v11, %v3364_v11 }
 0x344   : > { %v1510_v13 = vpop.f32.mrf.mxu1 }
 0x345   : > { %v3367_v14 = vadd.f32 %v3251_v3, %v1510_v13 }
 0x347   : > { %v1582_v18 = vmul.f32 %v3367_v14, %v3367_v14 }
 0x348   : > { %v1555_v19 = vpop.f32.mrf.mxu3 }
 0x349   : > { %1654 = vadd.xlane.f32.xlu2 %v1596_v16  ;;  %1626 = vadd.xlane.f32.xlu0 %v1582_v18  ;;  %v3374_v20 = vadd.f32 %v3251_v3, %v1555_v19 }
 0x34b   : > { %v1597_v26 = vmul.f32 %v3374_v20, %v3374_v20 }
 0x34c   : > { %v1513_v22 = vpop.f32.mrf.mxu1 }
 0x34d   : > { %v3377_v24 = vadd.f32 %v3251_v3, %v1513_v22 }
 0x34f   : > { %v1583_v25 = vmul.f32 %v3377_v24, %v3377_v24 }
 0x350   : > { %v1558_v28 = vpop.f32.mrf.mxu3 }
 0x351   : > { %1628 = vadd.xlane.f32.xlu1 %v1583_v25  ;;  %1656 = vadd.xlane.f32.xlu0 %v1597_v26  ;;  %v3384_v29 = vadd.f32 %v3251_v3, %v1558_v28 }
 0x353   : > { %v1598_v35 = vmul.f32 %v3384_v29, %v3384_v29 }
 0x354   : > { %v1516_v31 = vpop.f32.mrf.mxu1 }
 0x355   : > { %v3387_v32 = vadd.f32 %v3251_v3, %v1516_v31 }
 0x357   : > { %v1584_v34 = vmul.f32 %v3387_v32, %v3387_v32 }
 0x358   : > { %v1561_v37 = vpop.f32.mrf.mxu3 }
 0x359   : > { %1630 = vadd.xlane.f32.xlu2 %v1584_v34  ;;  %1658 = vadd.xlane.f32.xlu1 %v1598_v35  ;;  %v3394_v39 = vadd.f32 %v3251_v3, %v1561_v37 }
 0x35b   : > { %v1599_v46 = vmul.f32 %v3394_v39, %v3394_v39 }
 0x35c   : > { %v1519_v40 = vpop.f32.mrf.mxu1  ;;  %v1603_v41 = vpop.xlane.xlu0 %1602 }
 0x35d   : > { %v3397_v43 = vadd.f32 %v3251_v3, %v1519_v40  ;;  %v1666_v45 = vmax.f32 %v1603_v41, 1e-24 }
 0x35f   : > { %2512 = vrsqrt.f32 %v1666_v45  ;;  %v1585_v47 = vmul.f32 %v3397_v43, %v3397_v43  ;;  %vm1704_vm1 = vweird.f32 %v1666_v45 }
 0x360   : > { %v1564_v49 = vpop.f32.mrf.mxu3 }
 0x361   : > { %1660 = vadd.xlane.f32.xlu2 %v1599_v46  ;;  %1632 = vadd.xlane.f32.xlu0 %v1585_v47  ;;  %v3404_v51 = vadd.f32 %v3251_v3, %v1564_v49 }
 0x363   : > { %v1600_v58 = vmul.f32 %v3404_v51, %v3404_v51 }
 0x364   : > { %v1605_v52 = vpop.xlane.xlu0 %1604 }
 0x365   : > { %v2513_v53 = vpop.eup %2512  ;;  %v1667_v55 = vmax.f32 %v1605_v52, 1e-24 }
 0x366   : > { %v1699_v57 = vmul.f32 %v2513_v53, %v1666_v45  ;;  %vm1705_vm0 = vweird.f32 %v2513_v53 }
 0x367   : > { %2514 = vrsqrt.f32 %v1667_v55  ;;  %vm1706_vm2 = vmor %vm1704_vm1, %vm1705_vm0  ;;  %vm1714_vm4 = vweird.f32 %v1667_v55 }
 0x368   : > { %v1700_v59 = vmul.f32 %v2513_v53, %v1699_v57  ;;  %v1567_v61 = vpop.f32.mrf.mxu3  ;;  %v1635_v63 = vpop.xlane.xlu1 %1634 }
 0x369   : > { %v3409_v0 = vadd.f32 %v3251_v3, %v1567_v61  ;;  %v1682_v2 = vmax.f32 %v1635_v63, 1e-24  ;;  %1662 = vadd.xlane.f32.xlu0 %v1600_v58 }
 0x36a   : > { %v1701_v4 = vmul.f32 0.5, %v1700_v59 }
 0x36b   : > { %2516 = vrsqrt.f32 %v1682_v2  ;;  %v1601_v7 = vmul.f32 %v3409_v0, %v3409_v0  ;;  %vm1864_vm7 = vweird.f32 %v1682_v2 }
 0x36c   : > { %v1702_v8 = vsub.f32 1.5, %v1701_v4 }
 0x36d   : > { %v2515_v10 = vpop.eup %2514  ;;  %1664 = vadd.xlane.f32.xlu1 %v1601_v7 }
 0x36e   : > { %v1703_v13 = vmul.f32 %v2513_v53, %v1702_v8  ;;  %v1709_v16 = vmul.f32 %v2515_v10, %v1667_v55  ;;  %vm1715_vm3 = vweird.f32 %v2515_v10 }
 0x36f   : > { %vm1716_vm5 = vmor %vm1714_vm4, %vm1715_vm3 }
 0x370   : > { %v1707_v18 = vsel %vm1706_vm2, %v2513_v53, %v1703_v13  ;;  %v1710_v19 = vmul.f32 %v2515_v10, %v1709_v16  ;;  %v1637_v3 = vpop.xlane.xlu2 %1636  ;;  %v1607_v22 = vpop.xlane.xlu1 %1606 }
 0x371   : > { %v2517_v25 = vpop.eup %2516  ;;  %v2018_v26 = vmul.f32 %v1707_v18, %v3254_v6  ;;  %v1683_v28 = vmax.f32 %v1637_v3, 1e-24  ;;  %v1668_v31 = vmax.f32 %v1607_v22, 1e-24 }
 0x372   : > { %v1711_v34 = vmul.f32 0.5, %v1710_v19  ;;  %v1859_v35 = vmul.f32 %v2517_v25, %v1682_v2  ;;  %vm1865_vm6 = vweird.f32 %v2517_v25 }
 0x373   : > { %2050 = vst [vmem:[%s2924_s27] sm:$0xff] %v2018_v26  ;;  %2518 = vrsqrt.f32 %v1683_v28  ;;  %vm1866_vm8 = vmor %vm1864_vm7, %vm1865_vm6  ;;  %vm1874_vm11 = vweird.f32 %v1683_v28  ;;  %vm1724_vm13 = vweird.f32 %v1668_v31 }
 0x374   : > { %v1712_v37 = vsub.f32 1.5, %v1711_v34  ;;  %v1860_v40 = vmul.f32 %v2517_v25, %v1859_v35  ;;  %2520 = vrsqrt.f32 %v1668_v31 }
 0x376   : > { %v1713_v41 = vmul.f32 %v2515_v10, %v1712_v37  ;;  %v1861_v45 = vmul.f32 0.5, %v1860_v40 }
 0x378   : > { %v1717_v46 = vsel %vm1716_vm5, %v2515_v10, %v1713_v41  ;;  %v1862_v47 = vsub.f32 1.5, %v1861_v45  ;;  %v1609_v49 = vpop.xlane.xlu1 %1608  ;;  %v1639_v6 = vpop.xlane.xlu0 %1638 }
 0x379   : > { %v2519_v52 = vpop.eup %2518  ;;  %v2019_v53 = vmul.f32 %v1717_v46, %v3259_v9  ;;  %v3416_v57 = vmax.f32 %v1609_v49, 1e-24  ;;  %v3418_v58 = vmax.f32 %v1639_v6, 1e-24 }
 0x37a   : > { %v2521_v59 = vpop.eup %2520  ;;  %v1863_v61 = vmul.f32 %v2517_v25, %v1862_v47  ;;  %v1869_v55 = vmul.f32 %v2519_v52, %v1683_v28  ;;  %vm1875_vm9 = vweird.f32 %v2519_v52 }
 0x37b   : > { %2051 = vst [vmem:[%s2924_s27 + $0x8] sm:$0xff] %v2019_v53  ;;  %v1719_v63 = vmul.f32 %v2521_v59, %v1668_v31  ;;  %2522 = vrsqrt.f32 %v3416_v57  ;;  %vm1725_vm10 = vweird.f32 %v2521_v59  ;;  %vm1876_vm12 = vmor %vm1874_vm11, %vm1875_vm9  ;;  %vm1734_vm1 = vweird.f32 %v3416_v57 }
 0x37c   : > { %v1867_v4 = vsel %vm1866_vm8, %v2517_v25, %v1863_v61  ;;  %v1870_v7 = vmul.f32 %v2519_v52, %v1869_v55  ;;  %2524 = vrsqrt.f32 %v3418_v58  ;;  %v1611_v8 = vpop.xlane.xlu2 %1610  ;;  %vm1726_vm14 = vmor %vm1724_vm13, %vm1725_vm10  ;;  %vm1884_vm3 = vweird.f32 %v3418_v58 }
 0x37d   : > { %v2034_v9 = vmul.f32 %v1867_v4, %v3264_v12  ;;  %v1720_v10 = vmul.f32 %v2521_v59, %v1719_v63  ;;  %v3424_v13 = vmax.f32 %v1611_v8, 1e-24 }
 0x37e   : > { %v1871_v16 = vmul.f32 0.5, %v1870_v7 }
 0x37f   : > { %2066 = vst [vmem:[%s2924_s27 + $0x80] sm:$0xff] %v2034_v9  ;;  %v1721_v18 = vmul.f32 0.5, %v1720_v10  ;;  %2526 = vrsqrt.f32 %v3424_v13  ;;  %vm1744_vm4 = vweird.f32 %v3424_v13 }
 0x380   : > { %v1872_v2 = vsub.f32 1.5, %v1871_v16  ;;  %v1641_v19 = vpop.xlane.xlu1 %1640 }
 0x381   : > { %v2523_v3 = vpop.eup %2522  ;;  %v1722_v22 = vsub.f32 1.5, %v1721_v18  ;;  %v3428_v25 = vmax.f32 %v1641_v19, 1e-24 }
 0x382   : > { %v2525_v26 = vpop.eup %2524  ;;  %v1873_v34 = vmul.f32 %v2519_v52, %v1872_v2  ;;  %v1729_v12 = vmul.f32 %v2523_v3, %v3416_v57  ;;  %vm1735_vm15 = vweird.f32 %v2523_v3 }
 0x383   : > { %v1723_v35 = vmul.f32 %v2521_v59, %v1722_v22  ;;  %v1879_v37 = vmul.f32 %v2525_v26, %v3418_v58  ;;  %2528 = vrsqrt.f32 %v3428_v25  ;;  %vm1885_vm0 = vweird.f32 %v2525_v26  ;;  %vm1736_vm2 = vmor %vm1734_vm1, %vm1735_vm15 }
 0x384   : > { %v1877_v40 = vsel %vm1876_vm12, %v2519_v52, %v1873_v34  ;;  %v1730_v41 = vmul.f32 %v2523_v3, %v1729_v12  ;;  %v1613_v45 = vpop.xlane.xlu2 %1612  ;;  %vm1886_vm5 = vmor %vm1884_vm3, %vm1885_vm0  ;;  %vm1894_vm9 = vweird.f32 %v3428_v25 }
 0x385   : > { %v2527_v46 = vpop.eup %2526  ;;  %v2035_v47 = vmul.f32 %v1877_v40, %v3272_v17  ;;  %v1727_v49 = vsel %vm1726_vm14, %v2521_v59, %v1723_v35  ;;  %v1880_v28 = vmul.f32 %v2525_v26, %v1879_v37  ;;  %v3434_v6 = vmax.f32 %v1613_v45, 1e-24 }
 0x386   : > { %v2020_v53 = vmul.f32 %v1727_v49, %v3269_v15  ;;  %v1731_v61 = vmul.f32 0.5, %v1730_v41  ;;  %v1739_v31 = vmul.f32 %v2527_v46, %v3424_v13  ;;  %vm1745_vm6 = vweird.f32 %v2527_v46 }
 0x387   : > { %2067 = vst [vmem:[%s2924_s27 + $0x88] sm:$0xff] %v2035_v47  ;;  %v1881_v55 = vmul.f32 0.5, %v1880_v28  ;;  %2530 = vrsqrt.f32 %v3434_v6  ;;  %vm1746_vm7 = vmor %vm1744_vm4, %vm1745_vm6  ;;  %vm1754_vm12 = vweird.f32 %v3434_v6 }
 0x388   : > { %2052 = vst [vmem:[%s2924_s27 + $0x10] sm:$0xff] %v2020_v53  ;;  %v1732_v52 = vsub.f32 1.5, %v1731_v61  ;;  %v1740_v63 = vmul.f32 %v2527_v46, %v1739_v31 }
 0x389   : > { %v2529_v4 = vpop.eup %2528  ;;  %v1882_v7 = vsub.f32 1.5, %v1881_v55 }
 0x38a   : > { %v1733_v17 = vmul.f32 %v2523_v3, %v1732_v52  ;;  %v1741_v59 = vmul.f32 0.5, %v1740_v63  ;;  %v1889_v15 = vmul.f32 %v2529_v4, %v3428_v25  ;;  %vm1895_vm8 = vweird.f32 %v2529_v4 }
 0x38b   : > { %v1883_v8 = vmul.f32 %v2525_v26, %v1882_v7  ;;  %vm1896_vm10 = vmor %vm1894_vm9, %vm1895_vm8 }
 0x38c   : > { %v1737_v9 = vsel %vm1736_vm2, %v2523_v3, %v1733_v17  ;;  %v1742_v10 = vsub.f32 1.5, %v1741_v59  ;;  %v1890_v16 = vmul.f32 %v2529_v4, %v1889_v15  ;;  %v1643_v18 = vpop.xlane.xlu2 %1642  ;;  %v1615_v2 = vpop.xlane.xlu0 %1614 }
 0x38d   : > { %v2531_v19 = vpop.eup %2530  ;;  %v2021_v57 = vmul.f32 %v1737_v9, %v3279_v21  ;;  %v1887_v22 = vsel %vm1886_vm5, %v2525_v26, %v1883_v8  ;;  %v1686_v34 = vmax.f32 %v1643_v18, 1e-24  ;;  %v3446_v12 = vmax.f32 %v1615_v2, 1e-24 }
 0x38e   : > { %v2036_v58 = vmul.f32 %v1887_v22, %v3282_v23  ;;  %v1743_v35 = vmul.f32 %v2527_v46, %v1742_v10  ;;  %v1891_v3 = vmul.f32 0.5, %v1890_v16  ;;  %v1749_v37 = vmul.f32 %v2531_v19, %v3434_v6 }
 0x38f   : > { %2053 = vst [vmem:[%s2924_s27 + $0x18] sm:$0xff] %v2021_v57  ;;  %2532 = vrsqrt.f32 %v1686_v34  ;;  %vm1755_vm11 = vweird.f32 %v2531_v19  ;;  %vm1904_vm0 = vweird.f32 %v1686_v34  ;;  %vm1764_vm2 = vweird.f32 %v3446_v12 }
 0x390   : > { %2068 = vst [vmem:[%s2924_s27 + $0x90] sm:$0xff] %v2036_v58  ;;  %v1747_v40 = vsel %vm1746_vm7, %v2527_v46, %v1743_v35  ;;  %v1892_v21 = vsub.f32 1.5, %v1891_v3  ;;  %v1750_v26 = vmul.f32 %v2531_v19, %v1749_v37  ;;  %2534 = vrsqrt.f32 %v3446_v12  ;;  %vm1756_vm13 = vmor %vm1754_vm12, %vm1755_vm11 }
 0x391   : > { %v2022_v41 = vmul.f32 %v1747_v40, %v3289_v27 }
 0x392   : > { %v1893_v23 = vmul.f32 %v2529_v4, %v1892_v21  ;;  %v1751_v45 = vmul.f32 0.5, %v1750_v26 }
 0x393   : > { %2054 = vst [vmem:[%s2924_s27 + $0x20] sm:$0xff] %v2022_v41 }
 0x394   : > { %v1897_v47 = vsel %vm1896_vm10, %v2529_v4, %v1893_v23  ;;  %v1752_v13 = vsub.f32 1.5, %v1751_v45  ;;  %v1617_v49 = vpop.xlane.xlu1 %1616  ;;  %v1645_v28 = vpop.xlane.xlu0 %1644 }
 0x395   : > { %v2533_v53 = vpop.eup %2532  ;;  %v2037_v46 = vmul.f32 %v1897_v47, %v3294_v30  ;;  %v1673_v61 = vmax.f32 %v1617_v49, 1e-24  ;;  %v3459_v31 = vmax.f32 %v1645_v28, 1e-24 }
 0x396   : > { %v2535_v27 = vpop.eup %2534  ;;  %v1753_v55 = vmul.f32 %v2531_v19, %v1752_v13  ;;  %v1899_v25 = vmul.f32 %v2533_v53, %v1686_v34  ;;  %vm1905_vm14 = vweird.f32 %v2533_v53 }
 0x397   : > { %2069 = vst [vmem:[%s2924_s27 + $0x98] sm:$0xff] %v2037_v46  ;;  %v1759_v52 = vmul.f32 %v2535_v27, %v3446_v12  ;;  %2536 = vrsqrt.f32 %v1673_v61  ;;  %vm1765_vm15 = vweird.f32 %v2535_v27  ;;  %vm1906_vm1 = vmor %vm1904_vm0, %vm1905_vm14  ;;  %vm1774_vm6 = vweird.f32 %v1673_v61 }
 0x398   : > { %v1757_v63 = vsel %vm1756_vm13, %v2531_v19, %v1753_v55  ;;  %v1900_v4 = vmul.f32 %v2533_v53, %v1899_v25  ;;  %2538 = vrsqrt.f32 %v3459_v31  ;;  %vm1766_vm3 = vmor %vm1764_vm2, %vm1765_vm15  ;;  %vm1914_vm8 = vweird.f32 %v3459_v31 }
 0x399   : > { %v2023_v30 = vmul.f32 %v1757_v63, %v3299_v33  ;;  %v1760_v7 = vmul.f32 %v2535_v27, %v1759_v52 }
 0x39a   : > { %v1901_v17 = vmul.f32 0.5, %v1900_v4 }
 0x39b   : > { %2055 = vst [vmem:[%s2924_s27 + $0x28] sm:$0xff] %v2023_v30  ;;  %v1761_v59 = vmul.f32 0.5, %v1760_v7 }
 0x39c   : > { %v1902_v15 = vsub.f32 1.5, %v1901_v17  ;;  %v1619_v8 = vpop.xlane.xlu2 %1618  ;;  %v1647_v6 = vpop.xlane.xlu1 %1646 }
 0x39d   : > { %v2537_v9 = vpop.eup %2536  ;;  %v1762_v10 = vsub.f32 1.5, %v1761_v59  ;;  %v3467_v16 = vmax.f32 %v1619_v8, 1e-24  ;;  %v3469_v18 = vmax.f32 %v1647_v6, 1e-24 }
 0x39e   : > { %v2539_v2 = vpop.eup %2538  ;;  %v1903_v19 = vmul.f32 %v2533_v53, %v1902_v15  ;;  %v1769_v33 = vmul.f32 %v2537_v9, %v1673_v61  ;;  %vm1775_vm4 = vweird.f32 %v2537_v9 }
 0x39f   : > { %v1763_v57 = vmul.f32 %v2535_v27, %v1762_v10  ;;  %v1909_v22 = vmul.f32 %v2539_v2, %v3459_v31  ;;  %2540 = vrsqrt.f32 %v3467_v16  ;;  %vm1915_vm5 = vweird.f32 %v2539_v2  ;;  %vm1776_vm7 = vmor %vm1774_vm6, %vm1775_vm4 }
 0x3a0   : > { %v1907_v58 = vsel %vm1906_vm1, %v2533_v53, %v1903_v19  ;;  %v1770_v35 = vmul.f32 %v2537_v9, %v1769_v33  ;;  %2542 = vrsqrt.f32 %v3469_v18  ;;  %vm1916_vm9 = vmor %vm1914_vm8, %vm1915_vm5  ;;  %vm1784_vm12 = vweird.f32 %v3467_v16 }
 0x3a1   : > { %v2038_v3 = vmul.f32 %v1907_v58, %v3304_v36  ;;  %v1767_v37 = vsel %vm1766_vm3, %v2535_v27, %v1763_v57  ;;  %v1910_v34 = vmul.f32 %v2539_v2, %v1909_v22  ;;  %vm1924_vm14 = vweird.f32 %v3469_v18 }
 0x3a2   : > { %v2024_v40 = vmul.f32 %v1767_v37, %v3307_v38  ;;  %v1771_v21 = vmul.f32 0.5, %v1770_v35 }
 0x3a3   : > { %2070 = vst [vmem:[%s2924_s27 + $0xa0] sm:$0xff] %v2038_v3  ;;  %v1911_v26 = vmul.f32 0.5, %v1910_v34 }
 0x3a4   : > { %2056 = vst [vmem:[%s2924_s27 + $0x30] sm:$0xff] %v2024_v40  ;;  %v1772_v12 = vsub.f32 1.5, %v1771_v21  ;;  %v1649_v41 = vpop.xlane.xlu2 %1648  ;;  %v1621_v23 = vpop.xlane.xlu0 %1620 }
 0x3a5   : > { %v2541_v45 = vpop.eup %2540  ;;  %v1912_v47 = vsub.f32 1.5, %v1911_v26  ;;  %v3479_v13 = vmax.f32 %v1649_v41, 1e-24  ;;  %v3481_v49 = vmax.f32 %v1621_v23, 1e-24 }
 0x3a6   : > { %v2543_v36 = vpop.eup %2542  ;;  %v1773_v28 = vmul.f32 %v2537_v9, %v1772_v12  ;;  %v1779_v38 = vmul.f32 %v2541_v45, %v3467_v16  ;;  %vm1785_vm10 = vweird.f32 %v2541_v45 }
 0x3a7   : > { %v1913_v53 = vmul.f32 %v2539_v2, %v1912_v47  ;;  %v1919_v46 = vmul.f32 %v2543_v36, %v3469_v18  ;;  %2544 = vrsqrt.f32 %v3479_v13  ;;  %vm1925_vm11 = vweird.f32 %v2543_v36  ;;  %vm1786_vm13 = vmor %vm1784_vm12, %vm1785_vm10 }
 0x3a8   : > { %v1777_v27 = vsel %vm1776_vm7, %v2537_v9, %v1773_v28  ;;  %v1780_v55 = vmul.f32 %v2541_v45, %v1779_v38  ;;  %2546 = vrsqrt.f32 %v3481_v49  ;;  %vm1926_vm15 = vmor %vm1924_vm14, %vm1925_vm11  ;;  %vm1934_vm2 = vweird.f32 %v3479_v13 }
 0x3a9   : > { %v2025_v25 = vmul.f32 %v1777_v27, %v3317_v44  ;;  %v1917_v61 = vsel %vm1916_vm9, %v2539_v2, %v1913_v53  ;;  %v1920_v52 = vmul.f32 %v2543_v36, %v1919_v46  ;;  %vm1794_vm4 = vweird.f32 %v3481_v49 }
 0x3aa   : > { %v2039_v63 = vmul.f32 %v1917_v61, %v3314_v42  ;;  %v1781_v4 = vmul.f32 0.5, %v1780_v55 }
 0x3ab   : > { %2057 = vst [vmem:[%s2924_s27 + $0x38] sm:$0xff] %v2025_v25  ;;  %v1921_v30 = vmul.f32 0.5, %v1920_v52 }
 0x3ac   : > { %2071 = vst [vmem:[%s2924_s27 + $0xa8] sm:$0xff] %v2039_v63  ;;  %v1782_v31 = vsub.f32 1.5, %v1781_v4  ;;  %v1623_v7 = vpop.xlane.xlu1 %1622  ;;  %v1651_v17 = vpop.xlane.xlu0 %1650 }
 0x3ad   : > { %v2545_v59 = vpop.eup %2544  ;;  %v1922_v15 = vsub.f32 1.5, %v1921_v30  ;;  %v3492_v8 = vmax.f32 %v1623_v7, 1e-24  ;;  %v3494_v6 = vmax.f32 %v1651_v17, 1e-24 }
 0x3ae   : > { %v2547_v44 = vpop.eup %2546  ;;  %v1783_v9 = vmul.f32 %v2541_v45, %v1782_v31  ;;  %v1929_v42 = vmul.f32 %v2545_v59, %v3479_v13  ;;  %vm1935_vm0 = vweird.f32 %v2545_v59 }
 0x3af   : > { %v1923_v10 = vmul.f32 %v2543_v36, %v1922_v15  ;;  %v1789_v2 = vmul.f32 %v2547_v44, %v3481_v49  ;;  %2548 = vrsqrt.f32 %v3492_v8  ;;  %vm1795_vm1 = vweird.f32 %v2547_v44  ;;  %vm1936_vm3 = vmor %vm1934_vm2, %vm1935_vm0 }
 0x3b0   : > { %v1787_v19 = vsel %vm1786_vm13, %v2541_v45, %v1783_v9  ;;  %v1930_v33 = vmul.f32 %v2545_v59, %v1929_v42  ;;  %2550 = vrsqrt.f32 %v3494_v6  ;;  %vm1796_vm5 = vmor %vm1794_vm4, %vm1795_vm1  ;;  %vm1804_vm8 = vweird.f32 %v3492_v8 }
 0x3b1   : > { %v2026_v57 = vmul.f32 %v1787_v19, %v3327_v50  ;;  %v1927_v16 = vsel %vm1926_vm15, %v2543_v36, %v1923_v10  ;;  %v1790_v22 = vmul.f32 %v2547_v44, %v1789_v2  ;;  %vm1944_vm10 = vweird.f32 %v3494_v6 }
 0x3b2   : > { %v2040_v58 = vmul.f32 %v1927_v16, %v3324_v48  ;;  %v1931_v35 = vmul.f32 0.5, %v1930_v33 }
 0x3b3   : > { %2058 = vst [vmem:[%s2924_s27 + $0x40] sm:$0xff] %v2026_v57  ;;  %v1791_v3 = vmul.f32 0.5, %v1790_v22 }
 0x3b4   : > { %2072 = vst [vmem:[%s2924_s27 + $0xb0] sm:$0xff] %v2040_v58  ;;  %v1932_v18 = vsub.f32 1.5, %v1931_v35  ;;  %v1625_v37 = vpop.xlane.xlu2 %1624  ;;  %v1653_v34 = vpop.xlane.xlu1 %1652 }
 0x3b5   : > { %v2549_v40 = vpop.eup %2548  ;;  %v1792_v21 = vsub.f32 1.5, %v1791_v3  ;;  %v3506_v26 = vmax.f32 %v1625_v37, 1e-24  ;;  %v3508_v12 = vmax.f32 %v1653_v34, 1e-24 }
 0x3b6   : > { %v2551_v50 = vpop.eup %2550  ;;  %v1933_v41 = vmul.f32 %v2545_v59, %v1932_v18  ;;  %v1799_v48 = vmul.f32 %v2549_v40, %v3492_v8  ;;  %vm1805_vm6 = vweird.f32 %v2549_v40 }
 0x3b7   : > { %v1793_v23 = vmul.f32 %v2547_v44, %v1792_v21  ;;  %v1939_v45 = vmul.f32 %v2551_v50, %v3494_v6  ;;  %2552 = vrsqrt.f32 %v3506_v26  ;;  %vm1945_vm7 = vweird.f32 %v2551_v50  ;;  %vm1806_vm9 = vmor %vm1804_vm8, %vm1805_vm6 }
 0x3b8   : > { %v1937_v47 = vsel %vm1936_vm3, %v2545_v59, %v1933_v41  ;;  %v1800_v36 = vmul.f32 %v2549_v40, %v1799_v48  ;;  %2554 = vrsqrt.f32 %v3508_v12  ;;  %vm1946_vm11 = vmor %vm1944_vm10, %vm1945_vm7  ;;  %vm1814_vm14 = vweird.f32 %v3506_v26 }
 0x3b9   : > { %v2041_v28 = vmul.f32 %v1937_v47, %v3334_v54  ;;  %v1797_v13 = vsel %vm1796_vm5, %v2547_v44, %v1793_v23  ;;  %v1940_v38 = vmul.f32 %v2551_v50, %v1939_v45  ;;  %vm1954_vm0 = vweird.f32 %v3508_v12 }
 0x3ba   : > { %v2027_v53 = vmul.f32 %v1797_v13, %v3337_v56  ;;  %v1801_v46 = vmul.f32 0.5, %v1800_v36 }
 0x3bb   : > { %2073 = vst [vmem:[%s2924_s27 + $0xb8] sm:$0xff] %v2041_v28  ;;  %v1941_v27 = vmul.f32 0.5, %v1940_v38 }
 0x3bc   : > { %2059 = vst [vmem:[%s2924_s27 + $0x48] sm:$0xff] %v2027_v53  ;;  %v1802_v49 = vsub.f32 1.5, %v1801_v46  ;;  %v1655_v55 = vpop.xlane.xlu2 %1654  ;;  %v1627_v25 = vpop.xlane.xlu0 %1626 }
 0x3bd   : > { %v2553_v61 = vpop.eup %2552  ;;  %v1942_v52 = vsub.f32 1.5, %v1941_v27  ;;  %v3520_v63 = vmax.f32 %v1655_v55, 1e-24  ;;  %v3522_v4 = vmax.f32 %v1627_v25, 1e-24 }
 0x3be   : > { %v2555_v54 = vpop.eup %2554  ;;  %v1803_v30 = vmul.f32 %v2549_v40, %v1802_v49  ;;  %v1809_v56 = vmul.f32 %v2553_v61, %v3506_v26  ;;  %vm1815_vm12 = vweird.f32 %v2553_v61 }
 0x3bf   : > { %v1943_v31 = vmul.f32 %v2551_v50, %v1942_v52  ;;  %v1949_v7 = vmul.f32 %v2555_v54, %v3508_v12  ;;  %2556 = vrsqrt.f32 %v3520_v63  ;;  %vm1955_vm13 = vweird.f32 %v2555_v54  ;;  %vm1816_vm15 = vmor %vm1814_vm14, %vm1815_vm12 }
 0x3c0   : > { %v1807_v17 = vsel %vm1806_vm9, %v2549_v40, %v1803_v30  ;;  %v1810_v59 = vmul.f32 %v2553_v61, %v1809_v56  ;;  %2558 = vrsqrt.f32 %v3522_v4  ;;  %vm1956_vm1 = vmor %vm1954_vm0, %vm1955_vm13  ;;  %vm1964_vm4 = vweird.f32 %v3520_v63 }
 0x3c1   : > { %v2028_v15 = vmul.f32 %v1807_v17, %v3347_v62  ;;  %v1947_v8 = vsel %vm1946_vm11, %v2551_v50, %v1943_v31  ;;  %v1950_v44 = vmul.f32 %v2555_v54, %v1949_v7  ;;  %vm1824_vm6 = vweird.f32 %v3522_v4 }
 0x3c2   : > { %v2042_v9 = vmul.f32 %v1947_v8, %v3344_v60  ;;  %v1811_v42 = vmul.f32 0.5, %v1810_v59 }
 0x3c3   : > { %2060 = vst [vmem:[%s2924_s27 + $0x50] sm:$0xff] %v2028_v15  ;;  %v1951_v10 = vmul.f32 0.5, %v1950_v44 }
 0x3c4   : > { %2074 = vst [vmem:[%s2924_s27 + $0xc0] sm:$0xff] %v2042_v9  ;;  %v1812_v6 = vsub.f32 1.5, %v1811_v42  ;;  %v1629_v2 = vpop.xlane.xlu1 %1628  ;;  %v1657_v19 = vpop.xlane.xlu0 %1656 }
 0x3c5   : > { %v2557_v33 = vpop.eup %2556  ;;  %v1952_v57 = vsub.f32 1.5, %v1951_v10  ;;  %v3534_v16 = vmax.f32 %v1629_v2, 1e-24  ;;  %v3536_v22 = vmax.f32 %v1657_v19, 1e-24 }
 0x3c6   : > { %v2559_v62 = vpop.eup %2558  ;;  %v1813_v58 = vmul.f32 %v2553_v61, %v1812_v6  ;;  %v1959_v60 = vmul.f32 %v2557_v33, %v3520_v63  ;;  %vm1965_vm2 = vweird.f32 %v2557_v33 }
 0x3c7   : > { %v1953_v35 = vmul.f32 %v2555_v54, %v1952_v57  ;;  %v1819_v3 = vmul.f32 %v2559_v62, %v3522_v4  ;;  %2560 = vrsqrt.f32 %v3534_v16  ;;  %vm1825_vm3 = vweird.f32 %v2559_v62  ;;  %vm1966_vm5 = vmor %vm1964_vm4, %vm1965_vm2 }
 0x3c8   : > { %v1817_v18 = vsel %vm1816_vm15, %v2553_v61, %v1813_v58  ;;  %v1960_v37 = vmul.f32 %v2557_v33, %v1959_v60  ;;  %2562 = vrsqrt.f32 %v3536_v22  ;;  %vm1826_vm7 = vmor %vm1824_vm6, %vm1825_vm3  ;;  %vm1834_vm10 = vweird.f32 %v3534_v16 }
 0x3c9   : > { %v2029_v34 = vmul.f32 %v1817_v18, %v3357_v5  ;;  %v1957_v40 = vsel %vm1956_vm1, %v2555_v54, %v1953_v35  ;;  %v1820_v21 = vmul.f32 %v2559_v62, %v1819_v3  ;;  %vm1974_vm12 = vweird.f32 %v3536_v22 }
 0x3ca   : > { %v2043_v26 = vmul.f32 %v1957_v40, %v3354_v1  ;;  %v1961_v50 = vmul.f32 0.5, %v1960_v37 }
 0x3cb   : > { %2061 = vst [vmem:[%s2924_s27 + $0x58] sm:$0xff] %v2029_v34  ;;  %v1821_v41 = vmul.f32 0.5, %v1820_v21 }
 0x3cc   : > { %2075 = vst [vmem:[%s2924_s27 + $0xc8] sm:$0xff] %v2043_v26  ;;  %v1962_v12 = vsub.f32 1.5, %v1961_v50  ;;  %v1631_v48 = vpop.xlane.xlu2 %1630  ;;  %v1659_v23 = vpop.xlane.xlu1 %1658 }
 0x3cd   : > { %v2561_v45 = vpop.eup %2560  ;;  %v1822_v47 = vsub.f32 1.5, %v1821_v41  ;;  %v3548_v36 = vmax.f32 %v1631_v48, 1e-24  ;;  %v3550_v28 = vmax.f32 %v1659_v23, 1e-24 }
 0x3ce   : > { %v2563_v5 = vpop.eup %2562  ;;  %v1963_v13 = vmul.f32 %v2557_v33, %v1962_v12  ;;  %v1829_v1 = vmul.f32 %v2561_v45, %v3534_v16  ;;  %vm1835_vm8 = vweird.f32 %v2561_v45 }
 0x3cf   : > { %v1823_v38 = vmul.f32 %v2559_v62, %v1822_v47  ;;  %v1969_v53 = vmul.f32 %v2563_v5, %v3536_v22  ;;  %2564 = vrsqrt.f32 %v3548_v36  ;;  %vm1975_vm9 = vweird.f32 %v2563_v5  ;;  %vm1836_vm11 = vmor %vm1834_vm10, %vm1835_vm8 }
 0x3d0   : > { %v1967_v46 = vsel %vm1966_vm5, %v2557_v33, %v1963_v13  ;;  %v1830_v27 = vmul.f32 %v2561_v45, %v1829_v1  ;;  %2566 = vrsqrt.f32 %v3550_v28  ;;  %vm1976_vm13 = vmor %vm1974_vm12, %vm1975_vm9  ;;  %vm1844_vm0 = vweird.f32 %v3548_v36 }
 0x3d1   : > { %v2044_v49 = vmul.f32 %v1967_v46, %v3364_v11  ;;  %v1827_v55 = vsel %vm1826_vm7, %v2559_v62, %v1823_v38  ;;  %v1970_v25 = vmul.f32 %v2563_v5, %v1969_v53  ;;  %vm1984_vm2 = vweird.f32 %v3550_v28 }
 0x3d2   : > { %v2030_v61 = vmul.f32 %v1827_v55, %v3367_v14  ;;  %v1831_v52 = vmul.f32 0.5, %v1830_v27 }
 0x3d3   : > { %2076 = vst [vmem:[%s2924_s27 + $0xd0] sm:$0xff] %v2044_v49  ;;  %v1971_v63 = vmul.f32 0.5, %v1970_v25 }
 0x3d4   : > { %2062 = vst [vmem:[%s2924_s27 + $0x60] sm:$0xff] %v2030_v61  ;;  %v1832_v4 = vsub.f32 1.5, %v1831_v52  ;;  %v1661_v54 = vpop.xlane.xlu2 %1660  ;;  %v1633_v30 = vpop.xlane.xlu0 %1632 }
 0x3d5   : > { %v2565_v56 = vpop.eup %2564  ;;  %v1972_v31 = vsub.f32 1.5, %v1971_v63  ;;  %v1695_v7 = vmax.f32 %v1661_v54, 1e-24  ;;  %v3562_v17 = vmax.f32 %v1633_v30, 1e-24 }
 0x3d6   : > { %v2567_v59 = vpop.eup %2566  ;;  %v1833_v11 = vmul.f32 %v2561_v45, %v1832_v4  ;;  %v1839_v14 = vmul.f32 %v2565_v56, %v3548_v36  ;;  %vm1845_vm14 = vweird.f32 %v2565_v56 }
 0x3d7   : > { %v1973_v15 = vmul.f32 %v2563_v5, %v1972_v31  ;;  %v1979_v8 = vmul.f32 %v2567_v59, %v3550_v28  ;;  %2568 = vrsqrt.f32 %v1695_v7  ;;  %vm1985_vm15 = vweird.f32 %v2567_v59  ;;  %vm1846_vm1 = vmor %vm1844_vm0, %vm1845_vm14 }
 0x3d8   : > { %v1837_v44 = vsel %vm1836_vm11, %v2561_v45, %v1833_v11  ;;  %v1840_v9 = vmul.f32 %v2565_v56, %v1839_v14  ;;  %2570 = vrsqrt.f32 %v3562_v17  ;;  %vm1986_vm3 = vmor %vm1984_vm2, %vm1985_vm15  ;;  %vm1994_vm6 = vweird.f32 %v1695_v7 }
 0x3d9   : > { %v2031_v42 = vmul.f32 %v1837_v44, %v3377_v24  ;;  %v1977_v10 = vsel %vm1976_vm13, %v2563_v5, %v1973_v15  ;;  %v1980_v6 = vmul.f32 %v2567_v59, %v1979_v8  ;;  %vm1854_vm8 = vweird.f32 %v3562_v17 }
 0x3da   : > { %v2045_v2 = vmul.f32 %v1977_v10, %v3374_v20  ;;  %v1841_v19 = vmul.f32 0.5, %v1840_v9 }
 0x3db   : > { %2063 = vst [vmem:[%s2924_s27 + $0x68] sm:$0xff] %v2031_v42  ;;  %v1981_v33 = vmul.f32 0.5, %v1980_v6 }
 0x3dc   : > { %2077 = vst [vmem:[%s2924_s27 + $0xd8] sm:$0xff] %v2045_v2  ;;  %v1842_v57 = vsub.f32 1.5, %v1841_v19  ;;  %v1663_v16 = vpop.xlane.xlu0 %1662 }
 0x3dd   : > { %v2569_v22 = vpop.eup %2568  ;;  %v1982_v62 = vsub.f32 1.5, %v1981_v33  ;;  %v1696_v58 = vmax.f32 %v1663_v16, 1e-24 }
 0x3de   : > { %v2571_v60 = vpop.eup %2570  ;;  %v1843_v35 = vmul.f32 %v2565_v56, %v1842_v57  ;;  %v1989_v24 = vmul.f32 %v2569_v22, %v1695_v7  ;;  %vm1995_vm4 = vweird.f32 %v2569_v22 }
 0x3df   : > { %v1983_v3 = vmul.f32 %v2567_v59, %v1982_v62  ;;  %v1849_v20 = vmul.f32 %v2571_v60, %v3562_v17  ;;  %2572 = vrsqrt.f32 %v1696_v58  ;;  %vm1855_vm5 = vweird.f32 %v2571_v60  ;;  %vm1996_vm7 = vmor %vm1994_vm6, %vm1995_vm4 }
 0x3e0   : > { %v1847_v18 = vsel %vm1846_vm1, %v2565_v56, %v1843_v35  ;;  %v1990_v37 = vmul.f32 %v2569_v22, %v1989_v24  ;;  %v1665_v34 = vpop.xlane.xlu1 %1664  ;;  %vm1856_vm9 = vmor %vm1854_vm8, %vm1855_vm5  ;;  %vm2004_vm11 = vweird.f32 %v1696_v58 }
 0x3e1   : > { %v2032_v40 = vmul.f32 %v1847_v18, %v3387_v32  ;;  %v1987_v21 = vsel %vm1986_vm3, %v2567_v59, %v1983_v3  ;;  %v1850_v26 = vmul.f32 %v2571_v60, %v1849_v20  ;;  %v1697_v50 = vmax.f32 %v1665_v34, 1e-24 }
 0x3e2   : > { %v2046_v41 = vmul.f32 %v1987_v21, %v3384_v29  ;;  %v1991_v12 = vmul.f32 0.5, %v1990_v37 }
 0x3e3   : > { %2064 = vst [vmem:[%s2924_s27 + $0x70] sm:$0xff] %v2032_v40  ;;  %v1851_v48 = vmul.f32 0.5, %v1850_v26  ;;  %2574 = vrsqrt.f32 %v1697_v50  ;;  %vm2014_vm14 = vweird.f32 %v1697_v50 }
 0x3e4   : > { %2078 = vst [vmem:[%s2924_s27 + $0xe0] sm:$0xff] %v2046_v41  ;;  %v1992_v23 = vsub.f32 1.5, %v1991_v12 }
 0x3e5   : > { %v2573_v45 = vpop.eup %2572  ;;  %v1852_v47 = vsub.f32 1.5, %v1851_v48 }
 0x3e6   : > { %v1993_v36 = vmul.f32 %v2569_v22, %v1992_v23  ;;  %v1999_v32 = vmul.f32 %v2573_v45, %v1696_v58  ;;  %vm2005_vm10 = vweird.f32 %v2573_v45 }
 0x3e7   : > { %v1853_v28 = vmul.f32 %v2571_v60, %v1852_v47  ;;  %vm2006_vm12 = vmor %vm2004_vm11, %vm2005_vm10 }
 0x3e8   : > { %v1997_v29 = vsel %vm1996_vm7, %v2569_v22, %v1993_v36  ;;  %v2000_v5 = vmul.f32 %v2573_v45, %v1999_v32 }
 0x3e9   : > { %v2575_v13 = vpop.eup %2574  ;;  %v2047_v1 = vmul.f32 %v1997_v29, %v3394_v39  ;;  %v1857_v38 = vsel %vm1856_vm9, %v2571_v60, %v1853_v28 }
 0x3ea   : > { %v2033_v53 = vmul.f32 %v1857_v38, %v3397_v43  ;;  %v2001_v46 = vmul.f32 0.5, %v2000_v5  ;;  %v2009_v27 = vmul.f32 %v2575_v13, %v1697_v50  ;;  %vm2015_vm13 = vweird.f32 %v2575_v13 }
 0x3eb   : > { %2079 = vst [vmem:[%s2924_s27 + $0xe8] sm:$0xff] %v2047_v1  ;;  %vm2016_vm15 = vmor %vm2014_vm14, %vm2015_vm13 }
 0x3ec   : > { %2065 = vst [vmem:[%s2924_s27 + $0x78] sm:$0xff] %v2033_v53  ;;  %v2002_v49 = vsub.f32 1.5, %v2001_v46  ;;  %v2010_v55 = vmul.f32 %v2575_v13, %v2009_v27 }
 0x3ee   : > { %v2003_v25 = vmul.f32 %v2573_v45, %v2002_v49  ;;  %v2011_v61 = vmul.f32 0.5, %v2010_v55 }
 0x3f0   : > { %v2007_v52 = vsel %vm2006_vm12, %v2573_v45, %v2003_v25  ;;  %v2012_v63 = vsub.f32 1.5, %v2011_v61 }
 0x3f1   : > { %v2048_v39 = vmul.f32 %v2007_v52, %v3404_v51 }
 0x3f2   : > { %v2013_v4 = vmul.f32 %v2575_v13, %v2012_v63 }
 0x3f3   : > { %2080 = vst [vmem:[%s2924_s27 + $0xf0] sm:$0xff] %v2048_v39 }
 0x3f4   : > { %v2017_v43 = vsel %vm2016_vm15, %v2575_v13, %v2013_v4 }
 0x3f5   : > { %v2049_v54 = vmul.f32 %v2017_v43, %v3409_v0 }
 0x3f7   : > { %2081 = vst [vmem:[%s2924_s27 + $0xf8] sm:$0xff] %v2049_v54 }
 0x3f8 PF: > { %s18_s9 = sadd.s32 1, %s2646_s9   ;;  %s3635_s28 = sld [smem:[#allocation4_spill]] }
 0x3f9   : > { %p15_p2 = scmp.ge.s32.totalorder %s18_s9, 10   ;;  %s3636_s12 = sld [smem:[#allocation6_spill]] }
 0x3fa   : > { %s3637_s1 = sld [smem:[#allocation5_spill]]  ;;  %s3639_s24 = smov %s2618_s25 }
 0x3fb   : > { %s3638_s8 = sld [smem:[#allocation7_spill]]  ;;  %s3640_s25 = smov %s2760_s20 }
 0x3fc   : > { %s3641_s26 = smov %s2634_s29  ;;  %s3642_s27 = smov %s2638_s30 }
 0x3fd   :  { %17 = sbr.rel (!%p15_p2) target bundleno = 7 (0x7), region = 125 }
 0x3ff   : > { %s3643_s29 = smov %s3636_s12 }
 0x400   : > { %s3644_s30 = smov %s3637_s1 }

// kernel: cl_hgcn_forward.5
= control target key start
LH: loop header
LB: loop body
LE: loop exit
PB: predicated region body
PF: predicated region fallthrough
CT: control target
= control target key end

     0   :  { %9 = vsyncpa [#allocation6], 0  ;;  %s3970_s15 = smov 0   ;;  %s3972_s16 = smov 0   ;;  %s5934_s0 = inlined_call_operand.vmem [shape: f32[512,128], index: 0, kind: input, shape index: {}, may-alias: {0,2}]   ;;  %s5935_s1 = inlined_call_operand.vmem [shape: f32[512,128], index: 1, kind: input, shape index: {}, may-alias: {1,3}]   ;;  %s5936_s2 = inlined_call_operand.vmem [shape: f32[512,128], index: 2, kind: input, shape index: {}, may-alias: {0,2}]   ;;  %s5937_s3 = inlined_call_operand.vmem [shape: f32[512,128], index: 3, kind: input, shape index: {}, may-alias: {1,3}]   ;;  %s5938_s4 = inlined_call_operand.hbm [shape: f32[1,1], index: 4, kind: output, shape index: {}]  }
   0x1   :  { %s3974_s17 = smov 0   ;;  %s3976_s18 = smov 0  }
   0x2   :  { %s3978_s19 = smov 0  }
   0x3 LB: > { %s3223_s20 = sadd.s32 4294967295, %s3938_s19   ;;  %s24_s21 = sadd.s32 1, %s3930_s17  ;;  %s3938_s19 = sphi %s3978_s19, %s15_s19   ;;  %s3934_s18 = sphi %s3976_s18, %s6550_s18   ;;  %s3930_s17 = sphi %s3974_s17, %s6549_s17   ;;  %s3926_s16 = sphi %s3972_s16, %s6548_s16   ;;  %s3922_s15 = sphi %s3970_s15, %s6547_s15  }
   0x4   : > { %p25_p0 = scmp.ge.s32.totalorder %s24_s21, 2  ;;  %s27_s22 = sadd.s32 1, %s3934_s18 }
   0x5   : > { %p3226_p1 = scmp.ge.s32.totalorder %s3938_s19, 1  ;;  %p204_p2 = scmp.lt.s32.totalorder %s3938_s19, 5 }
   0x6   : > { %s6552_s21 = smov (%p25_p0, %s24_s21), 0  ;;  %s6554_s22 = smov (!%p25_p0, %s27_s22), %s3934_s18 }
   0x7   : > { %p205_p3 = pnand %p3226_p1, %p204_p2  ;;  %p29_p4 = scmp.ge.s32.totalorder %s6554_s22, 2 }
   0x9   : > { %s6556_s22 = smov (%p29_p4, %s6554_s22), 0  ;;  %208 = sbr.rel (%p205_p3) target bundleno = 1656 (0x678), region = 36 }
   0xe   : > { %s3227_s23 = sshll.u32 %s3926_s16, 5  ;;  %s3231_s24 = sshll.u32 %s3922_s15, 5 }
   0xf   : > { %p241_p5 = scmp.lt.s32.totalorder %s3227_s23, 63  ;;  %p253_p6 = scmp.lt.s32.totalorder %s3231_s24, 63 }
  0x10   : > { %p264_p7 = scmp.eq.s32.totalorder %s3926_s16, 0  ;;  %p265_p8 = scmp.eq.s32.totalorder %s3922_s15, 0 }
  0x11   : > { %s6558_s23 = smov (!%p241_p5, %s3227_s23), 63  ;;  %s6560_s24 = smov (!%p253_p6, %s3231_s24), 63 }
  0x12   : > { %s3228_s25 = sshll.u32 %s6558_s23, 3  ;;  %p266_p9 = pnand %p265_p8, %p264_p7 }
  0x13   : > { %s4012_s28 = scalar_lea.vmem %s5934_s0, %s3228_s25  ;;  %s4017_s5 = scalar_lea.vmem %s5935_s1, %s3228_s25 }
  0x14   : > { %s3232_s6 = sshll.u32 %s6560_s24, 3  ;;  %269 = sbr.rel (%p266_p9) target bundleno = 30 (0x1e), region = 40 }
  0x15   : > { %s4022_s9 = scalar_lea.vmem %s5936_s2, %s3232_s6  ;;  %s4027_s12 = scalar_lea.vmem %s5937_s3, %s3232_s6 }
  0x16   : > { %s3940_s13 = smov (!%p266_p9), 0.0  }
  0x17   : > { %277 = sst [smem:[#allocation4]] (!%p266_p9), %s3940_s13 }
  0x18   : > { %279 = sst [smem:[#allocation4 + $0x1]] (!%p266_p9), %s3940_s13 }
  0x19   : > { %v270_v0 = vlaneseq  ;;  %v3941_v1 = vmov 0.0  }
  0x1b   : > { %vm272_vm0 = vcmp.lt.s32.totalorder %v270_v0, 256 }
  0x1c   : > { %274 = vst.msk [vmem:[#allocation3] sm:$0x3] %vm272_vm0, %v3941_v1 }
  0x1d   : > { %275 = vst.msk [vmem:[#allocation3 + $0x2] sm:$0x3] %vm272_vm0, %v3941_v1 }
  0x1e PF: > { %p3235_p10 = scmp.ne.s32.totalorder %s3922_s15, 0 }
  0x20   : > { %282 = sbr.rel (%p3235_p10) target bundleno = 70 (0x46), region = 44 }
  0x25   : > { %vm283_vm1 = vcmask 7168   ;;  %v3942_v2 = vmov 0.0  }
  0x26   : > { %284 = vst.msk [vmem:[#allocation2] sm:$0xff] %vm283_vm1, %v3942_v2 }
  0x27   : > { %285 = vst.msk [vmem:[#allocation2 + $0x8] sm:$0xff] %vm283_vm1, %v3942_v2 }
  0x28   : > { %286 = vst.msk [vmem:[#allocation2 + $0x10] sm:$0xff] %vm283_vm1, %v3942_v2 }
  0x29   : > { %287 = vst.msk [vmem:[#allocation2 + $0x18] sm:$0xff] %vm283_vm1, %v3942_v2 }
  0x2a   : > { %288 = vst.msk [vmem:[#allocation2 + $0x20] sm:$0xff] %vm283_vm1, %v3942_v2 }
  0x2b   : > { %289 = vst.msk [vmem:[#allocation2 + $0x28] sm:$0xff] %vm283_vm1, %v3942_v2 }
  0x2c   : > { %290 = vst.msk [vmem:[#allocation2 + $0x30] sm:$0xff] %vm283_vm1, %v3942_v2 }
  0x2d   : > { %291 = vst.msk [vmem:[#allocation2 + $0x38] sm:$0xff] %vm283_vm1, %v3942_v2 }
  0x2e   : > { %292 = vst.msk [vmem:[#allocation2 + $0x40] sm:$0xff] %vm283_vm1, %v3942_v2 }
  0x2f   : > { %293 = vst.msk [vmem:[#allocation2 + $0x48] sm:$0xff] %vm283_vm1, %v3942_v2 }
  0x30   : > { %294 = vst.msk [vmem:[#allocation2 + $0x50] sm:$0xff] %vm283_vm1, %v3942_v2 }
  0x31   : > { %295 = vst.msk [vmem:[#allocation2 + $0x58] sm:$0xff] %vm283_vm1, %v3942_v2 }
  0x32   : > { %296 = vst.msk [vmem:[#allocation2 + $0x60] sm:$0xff] %vm283_vm1, %v3942_v2 }
  0x33   : > { %297 = vst.msk [vmem:[#allocation2 + $0x68] sm:$0xff] %vm283_vm1, %v3942_v2 }
  0x34   : > { %298 = vst.msk [vmem:[#allocation2 + $0x70] sm:$0xff] %vm283_vm1, %v3942_v2 }
  0x35   : > { %299 = vst.msk [vmem:[#allocation2 + $0x78] sm:$0xff] %vm283_vm1, %v3942_v2 }
  0x36   : > { %300 = vst.msk [vmem:[#allocation2 + $0x80] sm:$0xff] %vm283_vm1, %v3942_v2 }
  0x37   : > { %301 = vst.msk [vmem:[#allocation2 + $0x88] sm:$0xff] %vm283_vm1, %v3942_v2 }
  0x38   : > { %302 = vst.msk [vmem:[#allocation2 + $0x90] sm:$0xff] %vm283_vm1, %v3942_v2 }
  0x39   : > { %303 = vst.msk [vmem:[#allocation2 + $0x98] sm:$0xff] %vm283_vm1, %v3942_v2 }
  0x3a   : > { %304 = vst.msk [vmem:[#allocation2 + $0xa0] sm:$0xff] %vm283_vm1, %v3942_v2 }
  0x3b   : > { %305 = vst.msk [vmem:[#allocation2 + $0xa8] sm:$0xff] %vm283_vm1, %v3942_v2 }
  0x3c   : > { %306 = vst.msk [vmem:[#allocation2 + $0xb0] sm:$0xff] %vm283_vm1, %v3942_v2 }
  0x3d   : > { %307 = vst.msk [vmem:[#allocation2 + $0xb8] sm:$0xff] %vm283_vm1, %v3942_v2 }
  0x3e   : > { %308 = vst.msk [vmem:[#allocation2 + $0xc0] sm:$0xff] %vm283_vm1, %v3942_v2 }
  0x3f   : > { %309 = vst.msk [vmem:[#allocation2 + $0xc8] sm:$0xff] %vm283_vm1, %v3942_v2 }
  0x40   : > { %310 = vst.msk [vmem:[#allocation2 + $0xd0] sm:$0xff] %vm283_vm1, %v3942_v2 }
  0x41   : > { %311 = vst.msk [vmem:[#allocation2 + $0xd8] sm:$0xff] %vm283_vm1, %v3942_v2 }
  0x42   : > { %312 = vst.msk [vmem:[#allocation2 + $0xe0] sm:$0xff] %vm283_vm1, %v3942_v2 }
  0x43   : > { %313 = vst.msk [vmem:[#allocation2 + $0xe8] sm:$0xff] %vm283_vm1, %v3942_v2 }
  0x44   : > { %314 = vst.msk [vmem:[#allocation2 + $0xf0] sm:$0xff] %vm283_vm1, %v3942_v2 }
  0x45   : > { %315 = vst.msk [vmem:[#allocation2 + $0xf8] sm:$0xff] %vm283_vm1, %v3942_v2 }
  0x46 PF: > { %v4065_v3 = vld [vmem:[%s4027_s12 + $0x78] sm:$0xff]  ;;  %v4075_v5 = vld [vmem:[%s4027_s12 + $0x70] sm:$0xff]  ;;  %v4085_v7 = vld [vmem:[%s4027_s12 + $0x68] sm:$0xff]  ;;  %s3237_s14 = sshll.u32 %s3922_s15, 8  ;;  %s3236_s23 = sshll.u32 %s3926_s16, 8 }
  0x47   : > { %v4068_v4 = vld [vmem:[%s4027_s12 + $0xf8] sm:$0xff]  ;;  %652 = vmatpush.xpose.msra.mxu0 %v4065_v3  ;;  %3315 = vmatpush.xpose.msra.mxu2 %v4065_v3  ;;  %v4078_v6 = vld [vmem:[%s4027_s12 + $0xf0] sm:$0xff]  ;;  %v4088_v8 = vld [vmem:[%s4027_s12 + $0xe8] sm:$0xff]  ;;  %s3272_s24 = sshll.u32 %s3922_s15, 1  ;;  %s3274_s26 = sld [smem:[#allocation4 + $0x1]] (!%p3235_p10) }
  0x48   : > { %765 = vmatpush.xpose.msra.mxu1 %v4068_v4  ;;  %3331 = vmatpush.xpose.msra.mxu3 %v4068_v4  ;;  %v4095_v9 = vld [vmem:[%s4027_s12 + $0x60] sm:$0xff]  ;;  %v4105_v11 = vld [vmem:[%s4027_s12 + $0x58] sm:$0xff]  ;;  %v4115_v13 = vld [vmem:[%s4027_s12 + $0x50] sm:$0xff]  ;;  %s2602_s25 = scalar_lea.vmem [#allocation3], %s3272_s24 }
  0x49   : > { %v4098_v10 = vld [vmem:[%s4027_s12 + $0xe0] sm:$0xff]  ;;  %v4108_v12 = vld [vmem:[%s4027_s12 + $0xd8] sm:$0xff]  ;;  %v4118_v14 = vld [vmem:[%s4027_s12 + $0xd0] sm:$0xff] }
  0x4a   : > { %v4125_v15 = vld [vmem:[%s4027_s12 + $0x48] sm:$0xff]  ;;  %v4135_v17 = vld [vmem:[%s4027_s12 + $0x40] sm:$0xff]  ;;  %v4145_v19 = vld [vmem:[%s4027_s12 + $0x38] sm:$0xff] }
  0x4b   : > { %653 = vmatpush.xpose.msra.mxu0 %v4075_v5  ;;  %3316 = vmatpush.xpose.msra.mxu2 %v4075_v5  ;;  %v4128_v16 = vld [vmem:[%s4027_s12 + $0xc8] sm:$0xff]  ;;  %v4138_v18 = vld [vmem:[%s4027_s12 + $0xc0] sm:$0xff]  ;;  %v4148_v20 = vld [vmem:[%s4027_s12 + $0xb8] sm:$0xff] }
  0x4c   : > { %766 = vmatpush.xpose.msra.mxu1 %v4078_v6  ;;  %3332 = vmatpush.xpose.msra.mxu3 %v4078_v6  ;;  %v4155_v21 = vld [vmem:[%s4027_s12 + $0x30] sm:$0xff]  ;;  %v4165_v23 = vld [vmem:[%s4027_s12 + $0x28] sm:$0xff]  ;;  %v4175_v25 = vld [vmem:[%s4027_s12 + $0x20] sm:$0xff] }
  0x4d   : > { %v4158_v22 = vld [vmem:[%s4027_s12 + $0xb0] sm:$0xff]  ;;  %v4168_v24 = vld [vmem:[%s4027_s12 + $0xa8] sm:$0xff]  ;;  %v4178_v26 = vld [vmem:[%s4027_s12 + $0xa0] sm:$0xff] }
  0x4e   : > { %v4185_v27 = vld [vmem:[%s4027_s12 + $0x18] sm:$0xff]  ;;  %v4195_v29 = vld [vmem:[%s4027_s12 + $0x10] sm:$0xff]  ;;  %v4205_v31 = vld [vmem:[%s4027_s12 + $0x8] sm:$0xff] }
  0x4f   : > { %654 = vmatpush.xpose.msra.mxu0 %v4085_v7  ;;  %3317 = vmatpush.xpose.msra.mxu2 %v4085_v7  ;;  %v4188_v28 = vld [vmem:[%s4027_s12 + $0x98] sm:$0xff]  ;;  %v4198_v30 = vld [vmem:[%s4027_s12 + $0x90] sm:$0xff]  ;;  %v4208_v32 = vld [vmem:[%s4027_s12 + $0x88] sm:$0xff] }
  0x50   : > { %767 = vmatpush.xpose.msra.mxu1 %v4088_v8  ;;  %3333 = vmatpush.xpose.msra.mxu3 %v4088_v8  ;;  %v4215_v33 = vld [vmem:[%s4027_s12] sm:$0xff]  ;;  %v1319_v35 = vld [vmem:[%s4022_s9 + $0x78] sm:$0xff]  ;;  %v1318_v39 = vld [vmem:[%s4022_s9 + $0x70] sm:$0xff] }
  0x51   : > { %v4218_v34 = vld [vmem:[%s4027_s12 + $0x80] sm:$0xff]  ;;  %v1335_v36 = vld [vmem:[%s4022_s9 + $0xf8] sm:$0xff]  ;;  %v1334_v40 = vld [vmem:[%s4022_s9 + $0xf0] sm:$0xff] }
  0x52   : > { %v4225_v37 = vld [vmem:[%s4012_s28] sm:$0xff]  ;;  %v1317_v41 = vld [vmem:[%s4022_s9 + $0x68] sm:$0xff]  ;;  %v1315_v47 = vld [vmem:[%s4022_s9 + $0x58] sm:$0xff] }
  0x53   : > { %655 = vmatpush.xpose.msra.mxu0 %v4095_v9  ;;  %3318 = vmatpush.xpose.msra.mxu2 %v4095_v9  ;;  %6164 = vst [vmem:[#allocation8_spill] sm:$0xff] %v4225_v37  ;;  %v4228_v38 = vld [vmem:[%s4012_s28 + $0x80] sm:$0xff]  ;;  %v1333_v42 = vld [vmem:[%s4022_s9 + $0xe8] sm:$0xff]  ;;  %v1331_v48 = vld [vmem:[%s4022_s9 + $0xd8] sm:$0xff] }
  0x54   : > { %768 = vmatpush.xpose.msra.mxu1 %v4098_v10  ;;  %3334 = vmatpush.xpose.msra.mxu3 %v4098_v10  ;;  %6165 = vst [vmem:[#allocation9_spill] sm:$0xff] %v4228_v38  ;;  %v4243_v43 = vld [vmem:[%s4012_s28 + $0x8] sm:$0xff]  ;;  %v1316_v45 = vld [vmem:[%s4022_s9 + $0x60] sm:$0xff]  ;;  %v4261_v49 = vld [vmem:[%s4012_s28 + $0x10] sm:$0xff] }
  0x55   : > { %6166 = vst [vmem:[#allocation10_spill] sm:$0xff] %v4243_v43  ;;  %v4246_v44 = vld [vmem:[%s4012_s28 + $0x88] sm:$0xff]  ;;  %v1332_v46 = vld [vmem:[%s4022_s9 + $0xe0] sm:$0xff]  ;;  %v4264_v50 = vld [vmem:[%s4012_s28 + $0x90] sm:$0xff] }
  0x56   : > { %6167 = vst [vmem:[#allocation11_spill] sm:$0xff] %v4246_v44  ;;  %v1314_v51 = vld [vmem:[%s4022_s9 + $0x50] sm:$0xff]  ;;  %v1313_v53 = vld [vmem:[%s4022_s9 + $0x48] sm:$0xff]  ;;  %v4279_v55 = vld [vmem:[%s4012_s28 + $0x18] sm:$0xff] }
  0x57   : > { %656 = vmatpush.xpose.msra.mxu0 %v4105_v11  ;;  %3319 = vmatpush.xpose.msra.mxu2 %v4105_v11  ;;  %6168 = vst [vmem:[#allocation12_spill] sm:$0xff] %v4261_v49  ;;  %v1330_v52 = vld [vmem:[%s4022_s9 + $0xd0] sm:$0xff]  ;;  %v1329_v54 = vld [vmem:[%s4022_s9 + $0xc8] sm:$0xff]  ;;  %v4282_v56 = vld [vmem:[%s4012_s28 + $0x98] sm:$0xff] }
  0x58   : > { %769 = vmatpush.xpose.msra.mxu1 %v4108_v12  ;;  %3335 = vmatpush.xpose.msra.mxu3 %v4108_v12  ;;  %6169 = vst [vmem:[#allocation13_spill] sm:$0xff] %v4264_v50  ;;  %v1312_v57 = vld [vmem:[%s4022_s9 + $0x40] sm:$0xff]  ;;  %v1311_v61 = vld [vmem:[%s4022_s9 + $0x38] sm:$0xff]  ;;  %v4311_v63 = vld [vmem:[%s4012_s28 + $0x28] sm:$0xff] }
  0x59   : > { %6170 = vst [vmem:[#allocation14_spill] sm:$0xff] %v4279_v55  ;;  %v1328_v58 = vld [vmem:[%s4022_s9 + $0xc0] sm:$0xff]  ;;  %v1327_v62 = vld [vmem:[%s4022_s9 + $0xb8] sm:$0xff]  ;;  %v4314_v0 = vld [vmem:[%s4012_s28 + $0xa8] sm:$0xff] }
  0x5a   : > { %6171 = vst [vmem:[#allocation15_spill] sm:$0xff] %v4282_v56  ;;  %v4295_v59 = vld [vmem:[%s4012_s28 + $0x20] sm:$0xff]  ;;  %v1310_v1 = vld [vmem:[%s4022_s9 + $0x30] sm:$0xff] }
  0x5b   : > { %657 = vmatpush.xpose.msra.mxu0 %v4115_v13  ;;  %3320 = vmatpush.xpose.msra.mxu2 %v4115_v13  ;;  %6172 = vst [vmem:[#allocation16_spill] sm:$0xff] %v4295_v59  ;;  %v4298_v60 = vld [vmem:[%s4012_s28 + $0xa0] sm:$0xff]  ;;  %v1326_v2 = vld [vmem:[%s4022_s9 + $0xb0] sm:$0xff] }
  0x5c   : > { %770 = vmatpush.xpose.msra.mxu1 %v4118_v14  ;;  %3336 = vmatpush.xpose.msra.mxu3 %v4118_v14  ;;  %6173 = vst [vmem:[#allocation17_spill] sm:$0xff] %v4298_v60 }
  0x5d   : > { %6174 = vst [vmem:[#allocation18_spill] sm:$0xff] %v4311_v63 }
  0x5e   : > { %6175 = vst [vmem:[#allocation19_spill] sm:$0xff] %v4314_v0 }
  0x5f   : > { %658 = vmatpush.xpose.msra.mxu0 %v4125_v15  ;;  %3321 = vmatpush.xpose.msra.mxu2 %v4125_v15 }
  0x60   : > { %771 = vmatpush.xpose.msra.mxu1 %v4128_v16  ;;  %3337 = vmatpush.xpose.msra.mxu3 %v4128_v16 }
  0x63   : > { %659 = vmatpush.xpose.msra.mxu0 %v4135_v17  ;;  %3322 = vmatpush.xpose.msra.mxu2 %v4135_v17 }
  0x64   : > { %772 = vmatpush.xpose.msra.mxu1 %v4138_v18  ;;  %3338 = vmatpush.xpose.msra.mxu3 %v4138_v18 }
  0x67   : > { %660 = vmatpush.xpose.msra.mxu0 %v4145_v19  ;;  %3323 = vmatpush.xpose.msra.mxu2 %v4145_v19 }
  0x68   : > { %773 = vmatpush.xpose.msra.mxu1 %v4148_v20  ;;  %3339 = vmatpush.xpose.msra.mxu3 %v4148_v20 }
  0x6b   : > { %661 = vmatpush.xpose.msra.mxu0 %v4155_v21  ;;  %3324 = vmatpush.xpose.msra.mxu2 %v4155_v21 }
  0x6c   : > { %774 = vmatpush.xpose.msra.mxu1 %v4158_v22  ;;  %3340 = vmatpush.xpose.msra.mxu3 %v4158_v22 }
  0x6f   : > { %662 = vmatpush.xpose.msra.mxu0 %v4165_v23  ;;  %3325 = vmatpush.xpose.msra.mxu2 %v4165_v23 }
  0x70   : > { %775 = vmatpush.xpose.msra.mxu1 %v4168_v24  ;;  %3341 = vmatpush.xpose.msra.mxu3 %v4168_v24 }
  0x73   : > { %663 = vmatpush.xpose.msra.mxu0 %v4175_v25  ;;  %3326 = vmatpush.xpose.msra.mxu2 %v4175_v25 }
  0x74   : > { %776 = vmatpush.xpose.msra.mxu1 %v4178_v26  ;;  %3342 = vmatpush.xpose.msra.mxu3 %v4178_v26 }
  0x77   : > { %664 = vmatpush.xpose.msra.mxu0 %v4185_v27  ;;  %3327 = vmatpush.xpose.msra.mxu2 %v4185_v27 }
  0x78   : > { %777 = vmatpush.xpose.msra.mxu1 %v4188_v28  ;;  %3343 = vmatpush.xpose.msra.mxu3 %v4188_v28 }
  0x7b   : > { %665 = vmatpush.xpose.msra.mxu0 %v4195_v29  ;;  %3328 = vmatpush.xpose.msra.mxu2 %v4195_v29 }
  0x7c   : > { %778 = vmatpush.xpose.msra.mxu1 %v4198_v30  ;;  %3344 = vmatpush.xpose.msra.mxu3 %v4198_v30 }
  0x7f   : > { %666 = vmatpush.xpose.msra.mxu0 %v4205_v31  ;;  %3329 = vmatpush.xpose.msra.mxu2 %v4205_v31 }
  0x80   : > { %779 = vmatpush.xpose.msra.mxu1 %v4208_v32  ;;  %3345 = vmatpush.xpose.msra.mxu3 %v4208_v32 }
  0x83   : > { %667 = vmatpush.xpose.msra.mxu0 %v4215_v33  ;;  %3330 = vmatpush.xpose.msra.mxu2 %v4215_v33 }
  0x84   : > { %780 = vmatpush.xpose.msra.mxu1 %v4218_v34  ;;  %3346 = vmatpush.xpose.msra.mxu3 %v4218_v34 }
  0x86   : > { %668 = vmatmul.f32.vlgmr.msra.gmra.mxu0 %v4225_v37  ;;  %716 = vmatmul.f32.vlgmr.msra.gmra.mxu2 %v4228_v38 }
  0x87   : > { %1336 = vmatpush.xpose.msrb.mxu2 %v1319_v35  ;;  %781 = vmatmul.f32.vlgmr.msra.gmra.mxu1 %v4225_v37  ;;  %v4441_v35 = vld [vmem:[%s4012_s28 + $0x78] sm:$0xff] }
  0x88   : > { %1449 = vmatpush.xpose.msrb.mxu3 %v1335_v36  ;;  %1946 = vmatpush.xpose.msrb.mxu0 %v4065_v3  ;;  %v4327_v3 = vld [vmem:[%s4012_s28 + $0x30] sm:$0xff]  ;;  %6194 = vst [vmem:[#allocation38_spill] sm:$0xff] %v4441_v35  ;;  %v4444_v36 = vld [vmem:[%s4012_s28 + $0xf8] sm:$0xff] }
  0x89   : > { %829 = vmatmul.f32.vlgmr.msra.gmra.mxu3 %v4228_v38  ;;  %2059 = vmatpush.xpose.msrb.mxu1 %v4068_v4  ;;  %6176 = vst [vmem:[#allocation20_spill] sm:$0xff] %v4327_v3  ;;  %v4330_v4 = vld [vmem:[%s4012_s28 + $0xb0] sm:$0xff] }
  0x8a   : > { %6177 = vst [vmem:[#allocation21_spill] sm:$0xff] %v4330_v4 }
  0x8b   : > { %1337 = vmatpush.xpose.msrb.mxu2 %v1318_v39  ;;  %6195 = vst [vmem:[#allocation39_spill] sm:$0xff] %v4444_v36  ;;  %v419_v39 = vstv %s3237_s14 }
  0x8c   : > { %1450 = vmatpush.xpose.msrb.mxu3 %v1334_v40  ;;  %1947 = vmatpush.xpose.msrb.mxu0 %v4075_v5  ;;  %v1309_v5 = vld [vmem:[%s4022_s9 + $0x28] sm:$0xff]  ;;  %v4449_v40 = vstv %s3236_s23 }
  0x8d   : > { %2060 = vmatpush.xpose.msrb.mxu1 %v4078_v6  ;;  %v1325_v6 = vld [vmem:[%s4022_s9 + $0xa8] sm:$0xff] }
  0x8e   : > { %671 = vmatmul.f32.gmra.mxu0 %v4243_v43  ;;  %719 = vmatmul.f32.gmra.mxu2 %v4246_v44 }
  0x8f   : > { %1338 = vmatpush.xpose.msrb.mxu2 %v1317_v41  ;;  %784 = vmatmul.f32.gmra.mxu1 %v4243_v43 }
  0x90   : > { %1451 = vmatpush.xpose.msrb.mxu3 %v1333_v42  ;;  %1948 = vmatpush.xpose.msrb.mxu0 %v4085_v7  ;;  %v4343_v7 = vld [vmem:[%s4012_s28 + $0x38] sm:$0xff] }
  0x91   : > { %832 = vmatmul.f32.gmra.mxu3 %v4246_v44  ;;  %2061 = vmatpush.xpose.msrb.mxu1 %v4088_v8  ;;  %6178 = vst [vmem:[#allocation22_spill] sm:$0xff] %v4343_v7  ;;  %v4346_v8 = vld [vmem:[%s4012_s28 + $0xb8] sm:$0xff] }
  0x92   : > { %6179 = vst [vmem:[#allocation23_spill] sm:$0xff] %v4346_v8 }
  0x93   : > { %1339 = vmatpush.xpose.msrb.mxu2 %v1316_v45 }
  0x94   : > { %1452 = vmatpush.xpose.msrb.mxu3 %v1332_v46  ;;  %1949 = vmatpush.xpose.msrb.mxu0 %v4095_v9  ;;  %v1308_v9 = vld [vmem:[%s4022_s9 + $0x20] sm:$0xff] }
  0x95   : > { %2062 = vmatpush.xpose.msrb.mxu1 %v4098_v10  ;;  %v1324_v10 = vld [vmem:[%s4022_s9 + $0xa0] sm:$0xff] }
  0x96   : > { %674 = vmatmul.f32.gmra.mxu0 %v4261_v49  ;;  %722 = vmatmul.f32.gmra.mxu2 %v4264_v50 }
  0x97   : > { %1340 = vmatpush.xpose.msrb.mxu2 %v1315_v47  ;;  %787 = vmatmul.f32.gmra.mxu1 %v4261_v49 }
  0x98   : > { %1453 = vmatpush.xpose.msrb.mxu3 %v1331_v48  ;;  %1950 = vmatpush.xpose.msrb.mxu0 %v4105_v11  ;;  %v4359_v11 = vld [vmem:[%s4012_s28 + $0x40] sm:$0xff] }
  0x99   : > { %835 = vmatmul.f32.gmra.mxu3 %v4264_v50  ;;  %2063 = vmatpush.xpose.msrb.mxu1 %v4108_v12  ;;  %6180 = vst [vmem:[#allocation24_spill] sm:$0xff] %v4359_v11  ;;  %v4362_v12 = vld [vmem:[%s4012_s28 + $0xc0] sm:$0xff] }
  0x9a   : > { %6181 = vst [vmem:[#allocation25_spill] sm:$0xff] %v4362_v12  ;;  %v4624_v50 = vld [vmem:[%s4017_s5 + $0x20] sm:$0xff] }
  0x9b   : > { %1341 = vmatpush.xpose.msrb.mxu2 %v1314_v51  ;;  %v4464_v51 = vld [vmem:[%s4017_s5] sm:$0xff]  ;;  %6218 = vst [vmem:[#allocation61_spill] sm:$0xff] %v4624_v50 }
  0x9c   : > { %1454 = vmatpush.xpose.msrb.mxu3 %v1330_v52  ;;  %1951 = vmatpush.xpose.msrb.mxu0 %v4115_v13  ;;  %v1307_v13 = vld [vmem:[%s4022_s9 + $0x18] sm:$0xff]  ;;  %6198 = vst [vmem:[#allocation42_spill] sm:$0xff] %v4464_v51 }
  0x9d   : > { %2064 = vmatpush.xpose.msrb.mxu1 %v4118_v14  ;;  %v1323_v14 = vld [vmem:[%s4022_s9 + $0x98] sm:$0xff] }
  0x9e   : > { %677 = vmatmul.f32.gmra.mxu0 %v4279_v55  ;;  %725 = vmatmul.f32.gmra.mxu2 %v4282_v56 }
  0x9f   : > { %1342 = vmatpush.xpose.msrb.mxu2 %v1313_v53  ;;  %790 = vmatmul.f32.gmra.mxu1 %v4279_v55 }
  0xa0   : > { %1455 = vmatpush.xpose.msrb.mxu3 %v1329_v54  ;;  %1952 = vmatpush.xpose.msrb.mxu0 %v4125_v15  ;;  %v4373_v15 = vld [vmem:[%s4012_s28 + $0x48] sm:$0xff] }
  0xa1   : > { %838 = vmatmul.f32.gmra.mxu3 %v4282_v56  ;;  %2065 = vmatpush.xpose.msrb.mxu1 %v4128_v16  ;;  %6182 = vst [vmem:[#allocation26_spill] sm:$0xff] %v4373_v15  ;;  %v4376_v16 = vld [vmem:[%s4012_s28 + $0xc8] sm:$0xff] }
  0xa2   : > { %6183 = vst [vmem:[#allocation27_spill] sm:$0xff] %v4376_v16 }
  0xa3   : > { %1343 = vmatpush.xpose.msrb.mxu2 %v1312_v57 }
  0xa4   : > { %1456 = vmatpush.xpose.msrb.mxu3 %v1328_v58  ;;  %1953 = vmatpush.xpose.msrb.mxu0 %v4135_v17  ;;  %v1306_v17 = vld [vmem:[%s4022_s9 + $0x10] sm:$0xff] }
  0xa5   : > { %2066 = vmatpush.xpose.msrb.mxu1 %v4138_v18  ;;  %v1322_v18 = vld [vmem:[%s4022_s9 + $0x90] sm:$0xff] }
  0xa6   : > { %680 = vmatmul.f32.gmra.mxu0 %v4295_v59  ;;  %728 = vmatmul.f32.gmra.mxu2 %v4298_v60 }
  0xa7   : > { %793 = vmatmul.f32.gmra.mxu1 %v4295_v59  ;;  %1344 = vmatpush.xpose.msrb.mxu2 %v1311_v61 }
  0xa8   : > { %1457 = vmatpush.xpose.msrb.mxu3 %v1327_v62  ;;  %1954 = vmatpush.xpose.msrb.mxu0 %v4145_v19  ;;  %v4385_v19 = vld [vmem:[%s4012_s28 + $0x50] sm:$0xff] }
  0xa9   : > { %841 = vmatmul.f32.gmra.mxu3 %v4298_v60  ;;  %2067 = vmatpush.xpose.msrb.mxu1 %v4148_v20  ;;  %6184 = vst [vmem:[#allocation28_spill] sm:$0xff] %v4385_v19  ;;  %v4388_v20 = vld [vmem:[%s4012_s28 + $0xd0] sm:$0xff] }
  0xaa   : > { %6185 = vst [vmem:[#allocation29_spill] sm:$0xff] %v4388_v20 }
  0xab   : > { %1345 = vmatpush.xpose.msrb.mxu2 %v1310_v1 }
  0xac   : > { %1955 = vmatpush.xpose.msrb.mxu0 %v4155_v21  ;;  %1458 = vmatpush.xpose.msrb.mxu3 %v1326_v2  ;;  %v1305_v21 = vld [vmem:[%s4022_s9 + $0x8] sm:$0xff] }
  0xad   : > { %2068 = vmatpush.xpose.msrb.mxu1 %v4158_v22  ;;  %v1321_v22 = vld [vmem:[%s4022_s9 + $0x88] sm:$0xff] }
  0xae   : > { %683 = vmatmul.f32.gmra.mxu0 %v4311_v63  ;;  %731 = vmatmul.f32.gmra.mxu2 %v4314_v0 }
  0xaf   : > { %796 = vmatmul.f32.gmra.mxu1 %v4311_v63  ;;  %1346 = vmatpush.xpose.msrb.mxu2 %v1309_v5  ;;  %v5940_v5 = vmov 0.0  }
  0xb0   : > { %1956 = vmatpush.xpose.msrb.mxu0 %v4165_v23  ;;  %1459 = vmatpush.xpose.msrb.mxu3 %v1325_v6  ;;  %v4397_v23 = vld [vmem:[%s4012_s28 + $0x58] sm:$0xff] }
  0xb1   : > { %844 = vmatmul.f32.gmra.mxu3 %v4314_v0  ;;  %2069 = vmatpush.xpose.msrb.mxu1 %v4168_v24  ;;  %6186 = vst [vmem:[#allocation30_spill] sm:$0xff] %v4397_v23  ;;  %v4400_v24 = vld [vmem:[%s4012_s28 + $0xd8] sm:$0xff] }
  0xb2   : > { %6187 = vst [vmem:[#allocation31_spill] sm:$0xff] %v4400_v24 }
  0xb3   : > { %1347 = vmatpush.xpose.msrb.mxu2 %v1308_v9 }
  0xb4   : > { %1957 = vmatpush.xpose.msrb.mxu0 %v4175_v25  ;;  %1460 = vmatpush.xpose.msrb.mxu3 %v1324_v10  ;;  %v1304_v25 = vld [vmem:[%s4022_s9] sm:$0xff] }
  0xb5   : > { %2070 = vmatpush.xpose.msrb.mxu1 %v4178_v26  ;;  %v1320_v26 = vld [vmem:[%s4022_s9 + $0x80] sm:$0xff] }
  0xb6   : > { %686 = vmatmul.f32.gmra.mxu0 %v4327_v3  ;;  %734 = vmatmul.f32.gmra.mxu2 %v4330_v4 }
  0xb7   : > { %799 = vmatmul.f32.gmra.mxu1 %v4327_v3  ;;  %1348 = vmatpush.xpose.msrb.mxu2 %v1307_v13 }
  0xb8   : > { %1958 = vmatpush.xpose.msrb.mxu0 %v4185_v27  ;;  %1461 = vmatpush.xpose.msrb.mxu3 %v1323_v14  ;;  %v4409_v27 = vld [vmem:[%s4012_s28 + $0x60] sm:$0xff] }
  0xb9   : > { %847 = vmatmul.f32.gmra.mxu3 %v4330_v4  ;;  %2071 = vmatpush.xpose.msrb.mxu1 %v4188_v28  ;;  %6188 = vst [vmem:[#allocation32_spill] sm:$0xff] %v4409_v27  ;;  %v4412_v28 = vld [vmem:[%s4012_s28 + $0xe0] sm:$0xff] }
  0xba   : > { %6189 = vst [vmem:[#allocation33_spill] sm:$0xff] %v4412_v28 }
  0xbb   : > { %1349 = vmatpush.xpose.msrb.mxu2 %v1306_v17 }
  0xbc   : > { %1959 = vmatpush.xpose.msrb.mxu0 %v4195_v29  ;;  %1462 = vmatpush.xpose.msrb.mxu3 %v1322_v18  ;;  %v4419_v29 = vld [vmem:[%s4012_s28 + $0x68] sm:$0xff] }
  0xbd   : > { %2072 = vmatpush.xpose.msrb.mxu1 %v4198_v30  ;;  %6190 = vst [vmem:[#allocation34_spill] sm:$0xff] %v4419_v29  ;;  %v4422_v30 = vld [vmem:[%s4012_s28 + $0xe8] sm:$0xff] }
  0xbe   : > { %689 = vmatmul.f32.gmra.mxu0 %v4343_v7  ;;  %737 = vmatmul.f32.gmra.mxu2 %v4346_v8  ;;  %6191 = vst [vmem:[#allocation35_spill] sm:$0xff] %v4422_v30 }
  0xbf   : > { %802 = vmatmul.f32.gmra.mxu1 %v4343_v7  ;;  %1350 = vmatpush.xpose.msrb.mxu2 %v1305_v21 }
  0xc0   : > { %1960 = vmatpush.xpose.msrb.mxu0 %v4205_v31  ;;  %1463 = vmatpush.xpose.msrb.mxu3 %v1321_v22  ;;  %v4429_v31 = vld [vmem:[%s4012_s28 + $0x70] sm:$0xff] }
  0xc1   : > { %850 = vmatmul.f32.gmra.mxu3 %v4346_v8  ;;  %2073 = vmatpush.xpose.msrb.mxu1 %v4208_v32  ;;  %6192 = vst [vmem:[#allocation36_spill] sm:$0xff] %v4429_v31  ;;  %v4432_v32 = vld [vmem:[%s4012_s28 + $0xf0] sm:$0xff] }
  0xc2   : > { %6193 = vst [vmem:[#allocation37_spill] sm:$0xff] %v4432_v32 }
  0xc3   : > { %1351 = vmatpush.xpose.msrb.mxu2 %v1304_v25 }
  0xc4   : > { %1961 = vmatpush.xpose.msrb.mxu0 %v4215_v33  ;;  %1464 = vmatpush.xpose.msrb.mxu3 %v1320_v26  ;;  %v5939_v33 = vlaneseq }
  0xc5   : > { %2074 = vmatpush.xpose.msrb.mxu1 %v4218_v34 }
  0xc6   : > { %692 = vmatmul.f32.gmra.mxu0 %v4359_v11  ;;  %740 = vmatmul.f32.gmra.mxu2 %v4362_v12  ;;  %v417_v34 = vand.u32 127, %v5939_v33  ;;  %v4456_v42 = vshrl.u32 %v5939_v33, 7  ;;  %v4532_v33 = vld [vmem:[%s4017_s5 + $0x10] sm:$0xff] }
  0xc7   : > { %805 = vmatmul.f32.gmra.mxu1 %v4359_v11  ;;  %6206 = vst [vmem:[#allocation50_spill] sm:$0xff] %v4532_v33 }
  0xc8   : > { %v4451_v41 = vadd.s32 128, %v417_v34  ;;  %v420_v45 = vadd.s32 %v419_v39, %v417_v34  ;;  %v4460_v46 = vadd.s32 %v4449_v40, %v4456_v42  ;;  %v334_v52 = vadd.s32 128, %v4456_v42  ;;  %v4494_v34 = vld [vmem:[%s4017_s5 + $0x8] sm:$0xff] }
  0xc9   : > { %853 = vmatmul.f32.gmra.mxu3 %v4362_v12  ;;  %v335_v57 = vadd.s32 136, %v4456_v42  ;;  %v319_v61 = vadd.s32 8, %v4456_v42  ;;  %v320_v22 = vadd.s32 16, %v4456_v42  ;;  %6202 = vst [vmem:[#allocation46_spill] sm:$0xff] %v4494_v34  ;;  %v323_v38 = vadd.s32 40, %v4456_v42 }
  0xca   : > { %6196 = vst [vmem:[#allocation40_spill] sm:$0xff] %v4451_v41  ;;  %v421_v47 = vadd.s32 %v419_v39, %v4451_v41  ;;  %vm422_vm2 = vcmp.lt.s32.totalorder %v420_v45, 500  ;;  %vm383_vm3 = vcmp.lt.s32.totalorder %v4460_v46, 500  ;;  %v4475_v2 = vadd.s32 %v4449_v40, %v334_v52 }
  0xcb   : > { %6197 = vst [vmem:[#allocation41_spill] sm:$0xff] %v4460_v46  ;;  %v4478_v6 = vsel %vm422_vm2, 1.0, %v5940_v5  ;;  %v3238_v9 = vsel %vm383_vm3, 1.0, %v5940_v5  ;;  %v4484_v10 = vadd.s32 %v4449_v40, %v335_v57  ;;  %v4490_v17 = vadd.s32 %v4449_v40, %v319_v61 }
  0xcc   : > { %vm423_vm4 = vcmp.lt.s32.totalorder %v421_v47, 500  ;;  %6199 = vst [vmem:[#allocation43_spill] sm:$0xff] %v4475_v2  ;;  %vm6088_vm5 = vcmp.lt.s32.totalorder %v4475_v2, 500  ;;  %v4498_v39 = vmul.f32 %v4478_v6, %v3238_v9 }
  0xcd   : > { %6200 = vst [vmem:[#allocation44_spill] sm:$0xff] %v4484_v10  ;;  %v4487_v14 = vsel %vm423_vm4, 1.0, %v5940_v5  ;;  %vm6072_vm6 = vcmp.lt.s32.totalorder %v4484_v10, 500  ;;  %vm384_vm7 = vcmp.lt.s32.totalorder %v4490_v17, 500  ;;  %v3254_v61 = vsel %vm6088_vm5, 1.0, %v5940_v5 }
  0xce   : > { %695 = vmatmul.f32.gmra.mxu0 %v4373_v15  ;;  %743 = vmatmul.f32.gmra.mxu2 %v4376_v16  ;;  %6201 = vst [vmem:[#allocation45_spill] sm:$0xff] %v4490_v17  ;;  %v4501_v52 = vmul.f32 %v4487_v14, %v3238_v9 }
  0xcf   : > { %808 = vmatmul.f32.gmra.mxu1 %v4373_v15 }
  0xd1   : > { %856 = vmatmul.f32.gmra.mxu3 %v4376_v16  ;;  %v4575_v16 = vld [vmem:[%s4017_s5 + $0x18] sm:$0xff] }
  0xd2   : > { %6212 = vst [vmem:[#allocation55_spill] sm:$0xff] %v4575_v16 }
  0xd6   : > { %698 = vmatmul.f32.gmra.mxu0 %v4385_v19  ;;  %746 = vmatmul.f32.gmra.mxu2 %v4388_v20 }
  0xd7   : > { %811 = vmatmul.f32.gmra.mxu1 %v4385_v19 }
  0xd9   : > { %859 = vmatmul.f32.gmra.mxu3 %v4388_v20 }
  0xde   : > { %701 = vmatmul.f32.gmra.mxu0 %v4397_v23  ;;  %749 = vmatmul.f32.gmra.mxu2 %v4400_v24 }
  0xdf   : > { %814 = vmatmul.f32.gmra.mxu1 %v4397_v23  ;;  %v4669_v23 = vld [vmem:[%s4017_s5 + $0x28] sm:$0xff] }
  0xe0   : > { %6224 = vst [vmem:[#allocation67_spill] sm:$0xff] %v4669_v23 }
  0xe1   : > { %862 = vmatmul.f32.gmra.mxu3 %v4400_v24  ;;  %v322_v24 = vadd.s32 32, %v4456_v42 }
  0xe6   : > { %704 = vmatmul.f32.gmra.mxu0 %v4409_v27  ;;  %752 = vmatmul.f32.gmra.mxu2 %v4412_v28 }
  0xe7   : > { %817 = vmatmul.f32.gmra.mxu1 %v4409_v27 }
  0xe9   : > { %865 = vmatmul.f32.gmra.mxu3 %v4412_v28 }
  0xee   : > { %707 = vmatmul.f32.gmra.mxu0 %v4419_v29  ;;  %755 = vmatmul.f32.gmra.mxu2 %v4422_v30 }
  0xef   : > { %820 = vmatmul.f32.gmra.mxu1 %v4419_v29 }
  0xf1   : > { %868 = vmatmul.f32.gmra.mxu3 %v4422_v30 }
  0xf6   : > { %710 = vmatmul.f32.gmra.mxu0 %v4429_v31  ;;  %758 = vmatmul.f32.gmra.mxu2 %v4432_v32 }
  0xf7   : > { %823 = vmatmul.f32.gmra.mxu1 %v4429_v31 }
  0xf9   : > { %871 = vmatmul.f32.gmra.mxu3 %v4432_v32 }
  0xfe   : > { %713 = vmatmul.f32.gmra.mxu0 %v4441_v35  ;;  %761 = vmatmul.f32.gmra.mxu2 %v4444_v36 }
  0xff   : > { %826 = vmatmul.f32.gmra.mxu1 %v4441_v35 }
 0x101   : > { %874 = vmatmul.f32.gmra.mxu3 %v4444_v36 }
 0x103   : > { %v669_v48 = vpop.f32.mrf.mxu0 }
 0x104   : > { %v878_v53 = vmul.f32 2.0, %v669_v48  ;;  %v782_v54 = vpop.f32.mrf.mxu1 }
 0x105   : > { %v879_v58 = vmul.f32 2.0, %v782_v54 }
 0x106   : > { %v942_v62 = vmul.f32 1.442695, %v878_v53  ;;  %1352 = vmatmul.f32.vlgmr.msrb.gmra.mxu2 %v4225_v37  ;;  %1962 = vmatmul.f32.vlgmr.msrb.gmra.mxu0 %v4464_v51 }
 0x107   : > { %v944_v1 = vmul.f32 1.442695, %v879_v58  ;;  %2075 = vmatmul.f32.vlgmr.msrb.gmra.mxu1 %v4464_v51 }
 0x108   : > { %3404 = vpow2.f32 %v942_v62  ;;  %v4511_v62 = vadd.s32 %v4449_v40, %v320_v22  ;;  %v3239_v22 = vsel %vm384_vm7, 1.0, %v5940_v5 }
 0x109   : > { %1465 = vmatmul.f32.vlgmr.msrb.gmra.mxu3 %v4225_v37  ;;  %3406 = vpow2.f32 %v944_v1  ;;  %v717_v13 = vpop.f32.mrf.mxu2  ;;  %v4541_v41 = vmul.f32 %v4487_v14, %v3239_v22 }
 0x10a   : > { %v910_v18 = vmul.f32 2.0, %v717_v13  ;;  %6203 = vst [vmem:[#allocation47_spill] sm:$0xff] %v4511_v62  ;;  %vm385_vm8 = vcmp.lt.s32.totalorder %v4511_v62, 500 }
 0x10b   : > { %v672_v26 = vpop.f32.mrf.mxu0 }
 0x10c   : > { %v830_v21 = vpop.f32.mrf.mxu3  ;;  %v1006_v45 = vmul.f32 1.442695, %v910_v18  ;;  %v880_v47 = vmul.f32 2.0, %v672_v26  ;;  %v785_v48 = vpop.f32.mrf.mxu1  ;;  %v3255_v18 = vsel %vm6072_vm6, 1.0, %v5940_v5 }
 0x10d   : > { %v911_v25 = vmul.f32 2.0, %v830_v21  ;;  %v881_v54 = vmul.f32 2.0, %v785_v48  ;;  %v4535_v5 = vmul.f32 %v4478_v6, %v3255_v18 }
 0x10e   : > { %v3405_v57 = vpop.eup %3404  ;;  %3408 = vpow2.f32 %v1006_v45  ;;  %v946_v58 = vmul.f32 1.442695, %v880_v47  ;;  %1355 = vmatmul.f32.gmra.mxu2 %v4243_v43  ;;  %1965 = vmatmul.f32.gmra.mxu0 %v4494_v34  ;;  %v4525_v45 = vmul.f32 %v4478_v6, %v3254_v61  ;;  %v321_v47 = vadd.s32 24, %v4456_v42 }
 0x10f   : > { %v1008_v53 = vmul.f32 1.442695, %v911_v25  ;;  %v3407_v1 = vpop.eup %3406  ;;  %v948_v9 = vmul.f32 1.442695, %v881_v54  ;;  %2078 = vmatmul.f32.gmra.mxu1 %v4494_v34  ;;  %v1070_v13 = vmul.f32 %v3405_v57, %v4498_v39  ;;  %v336_v25 = vadd.s32 144, %v4456_v42  ;;  %6207 = vst [vmem:[#allocation51_spill] sm:$0xff] %v4535_v5 }
 0x110   : > { %v1071_v21 = vmul.f32 %v3407_v1, %v4501_v52  ;;  %6204 = vst [vmem:[#allocation48_spill] sm:$0xff] %v4525_v45  ;;  %v4529_v54 = vmul.f32 %v4487_v14, %v3254_v61  ;;  %v4551_v30 = vadd.s32 %v4449_v40, %v321_v47 }
 0x111   : > { %3410 = vpow2.f32 %v1008_v53  ;;  %1468 = vmatmul.f32.gmra.mxu3 %v4243_v43  ;;  %v720_v26 = vpop.f32.mrf.mxu2  ;;  %v4545_v61 = vadd.s32 %v4449_v40, %v336_v25  ;;  %v4559_v25 = vmul.f32 %v4487_v14, %v3255_v18  ;;  %v6211_v18 = vmov 0.0   ;;  %v4712_v43 = vld [vmem:[%s4017_s5 + $0x30] sm:$0xff] }
 0x112   : > { %3412 = vpow2.f32 %v946_v58  ;;  %v912_v48 = vmul.f32 2.0, %v720_v26  ;;  %6205 = vst [vmem:[#allocation49_spill] sm:$0xff] %v4529_v54  ;;  %v1134_v57 = vadd.f32 %v1071_v21, %v1070_v13  ;;  %vm386_vm10 = vcmp.lt.s32.totalorder %v4551_v30, 500 }
 0x113   : > { %3414 = vpow2.f32 %v948_v9  ;;  %v675_v1 = vpop.f32.mrf.mxu0  ;;  %v4538_v9 = vmul.f32 %v4478_v6, %v3239_v22  ;;  %6208 = vst [vmem:[#allocation52_spill] sm:$0xff] %v4545_v61  ;;  %vm6071_vm9 = vcmp.lt.s32.totalorder %v4545_v61, 500 }
 0x114   : > { %v833_v53 = vpop.f32.mrf.mxu3  ;;  %v3409_v10 = vpop.eup %3408  ;;  %v1010_v26 = vmul.f32 1.442695, %v912_v48  ;;  %v882_v2 = vmul.f32 2.0, %v675_v1  ;;  %1135 = vadd.xlane.f32.xlu0 %v1134_v57  ;;  %6209 = vst [vmem:[#allocation53_spill] sm:$0xff] %v4551_v30 }
 0x115   : > { %v913_v58 = vmul.f32 2.0, %v833_v53  ;;  %v788_v17 = vpop.f32.mrf.mxu1  ;;  %v4548_v32 = vmul.f32 %v3409_v10, %v4525_v45  ;;  %6210 = vst [vmem:[#allocation54_spill] sm:$0xff] %v4559_v25 }
 0x116   : > { %v883_v36 = vmul.f32 2.0, %v788_v17  ;;  %3416 = vpow2.f32 %v1010_v26  ;;  %v950_v48 = vmul.f32 1.442695, %v882_v2  ;;  %1358 = vmatmul.f32.gmra.mxu2 %v4261_v49  ;;  %1968 = vmatmul.f32.gmra.mxu0 %v4532_v33  ;;  %v337_v2 = vadd.s32 152, %v4456_v42  ;;  %6230 = vst [vmem:[#allocation73_spill] sm:$0xff] %v4712_v43 }
 0x117   : > { %v3411_v53 = vpop.eup %3410  ;;  %v1012_v46 = vmul.f32 1.442695, %v913_v58  ;;  %2081 = vmatmul.f32.gmra.mxu1 %v4532_v33 }
 0x118   : > { %v3413_v22 = vpop.eup %3412  ;;  %v4556_v57 = vmul.f32 %v3411_v53, %v4529_v54  ;;  %v952_v10 = vmul.f32 1.442695, %v883_v36 }
 0x119   : > { %v3415_v17 = vpop.eup %3414  ;;  %3418 = vpow2.f32 %v1012_v46  ;;  %1471 = vmatmul.f32.gmra.mxu3 %v4261_v49  ;;  %v1072_v47 = vmul.f32 %v3413_v22, %v4538_v9  ;;  %v3240_v46 = vsel %vm385_vm8, 1.0, %v6211_v18  ;;  %v723_v36 = vpop.f32.mrf.mxu2 }
 0x11a   : > { %3420 = vpow2.f32 %v950_v48  ;;  %v1182_v58 = vadd.f32 %v4556_v57, %v4548_v32  ;;  %v1073_v1 = vmul.f32 %v3415_v17, %v4541_v41  ;;  %v914_v53 = vmul.f32 2.0, %v723_v36 }
 0x11b   : > { %3422 = vpow2.f32 %v952_v10  ;;  %v1230_v26 = vadd.f32 %v1072_v47, %v1070_v13  ;;  %v678_v17 = vpop.f32.mrf.mxu0  ;;  %v4578_v62 = vmul.f32 %v4478_v6, %v3240_v46  ;;  %v4581_v13 = vmul.f32 %v4487_v14, %v3240_v46 }
 0x11c   : > { %v836_v22 = vpop.f32.mrf.mxu3  ;;  %1183 = vadd.xlane.f32.xlu1 %v1182_v58  ;;  %v1137_v48 = vadd.f32 %v1073_v1, %v1072_v47  ;;  %v1267_v28 = vadd.f32 %v1073_v1, %v1071_v21  ;;  %v4584_v10 = vadd.s32 %v4449_v40, %v337_v2  ;;  %v3417_v36 = vpop.eup %3416  ;;  %v1014_v12 = vmul.f32 1.442695, %v914_v53 }
 0x11d   : > { %v915_v20 = vmul.f32 2.0, %v836_v22  ;;  %v884_v58 = vmul.f32 2.0, %v678_v17  ;;  %v791_v47 = vpop.f32.mrf.mxu1  ;;  %v3256_v21 = vsel %vm6071_vm9, 1.0, %v6211_v18  ;;  %v338_v1 = vadd.s32 160, %v4456_v42 }
 0x11e   : > { %6213 = vst [vmem:[#allocation56_spill] sm:$0xff] %v4584_v10  ;;  %1138 = vadd.xlane.f32.xlu0 %v1137_v48  ;;  %v885_v4 = vmul.f32 2.0, %v791_v47  ;;  %v4591_v46 = vmul.f32 %v3417_v36, %v4535_v5  ;;  %v3241_v2 = vsel %vm386_vm10, 1.0, %v6211_v18  ;;  %3424 = vpow2.f32 %v1014_v12  ;;  %1361 = vmatmul.f32.gmra.mxu2 %v4279_v55 }
 0x11f   : > { %v3419_v22 = vpop.eup %3418  ;;  %v1016_v8 = vmul.f32 1.442695, %v915_v20  ;;  %v954_v17 = vmul.f32 1.442695, %v884_v58  ;;  %1971 = vmatmul.f32.gmra.mxu0 %v4575_v16  ;;  %v4602_v20 = vadd.s32 %v4449_v40, %v322_v24  ;;  %2084 = vmatmul.f32.gmra.mxu1 %v4575_v16  ;;  %vm6038_vm11 = vcmp.lt.s32.totalorder %v4584_v10, 500 }
 0x120   : > { %v3421_v53 = vpop.eup %3420  ;;  %v4599_v48 = vmul.f32 %v3419_v22, %v4559_v25  ;;  %v956_v36 = vmul.f32 1.442695, %v885_v4  ;;  %v4612_v24 = vadd.s32 %v4449_v40, %v338_v1  ;;  %v4615_v61 = vmul.f32 %v4478_v6, %v3256_v21 }
 0x121   : > { %6214 = vst [vmem:[#allocation57_spill] sm:$0xff] %v4602_v20  ;;  %v3423_v47 = vpop.eup %3422  ;;  %3426 = vpow2.f32 %v1016_v8  ;;  %1474 = vmatmul.f32.gmra.mxu3 %v4279_v55  ;;  %v1074_v12 = vmul.f32 %v3421_v53, %v4578_v62  ;;  %v726_v4 = vpop.f32.mrf.mxu2  ;;  %v4618_v53 = vmul.f32 %v4487_v14, %v3256_v21  ;;  %v4621_v56 = vmul.f32 %v4478_v6, %v3241_v2 }
 0x122   : > { %3428 = vpow2.f32 %v954_v17  ;;  %v1185_v58 = vadd.f32 %v4599_v48, %v4591_v46  ;;  %v1075_v22 = vmul.f32 %v3423_v47, %v4581_v13  ;;  %6215 = vst [vmem:[#allocation58_spill] sm:$0xff] %v4612_v24  ;;  %v916_v30 = vmul.f32 2.0, %v726_v4 }
 0x123   : > { %3430 = vpow2.f32 %v956_v36  ;;  %v1231_v8 = vadd.f32 %v1230_v26, %v1074_v12  ;;  %6216 = vst [vmem:[#allocation59_spill] sm:$0xff] %v4615_v61  ;;  %v681_v1 = vpop.f32.mrf.mxu0  ;;  %v4627_v26 = vmul.f32 %v4487_v14, %v3241_v2  ;;  %vm387_vm12 = vcmp.lt.s32.totalorder %v4602_v20, 500 }
 0x124   : > { %6217 = vst [vmem:[#allocation60_spill] sm:$0xff] %v4618_v53  ;;  %v839_v17 = vpop.f32.mrf.mxu3  ;;  %1186 = vadd.xlane.f32.xlu2 %v1185_v58  ;;  %v1140_v0 = vadd.f32 %v1075_v22, %v1074_v12  ;;  %v1268_v60 = vadd.f32 %v1267_v28, %v1075_v22  ;;  %v3257_v21 = vsel %vm6038_vm11, 1.0, %v6211_v18  ;;  %v3425_v36 = vpop.eup %3424  ;;  %v1018_v58 = vmul.f32 1.442695, %v916_v30 }
 0x125   : > { %v917_v47 = vmul.f32 2.0, %v839_v17  ;;  %6219 = vst [vmem:[#allocation62_spill] sm:$0xff] %v4627_v26  ;;  %v886_v12 = vmul.f32 2.0, %v681_v1  ;;  %v794_v28 = vpop.f32.mrf.mxu1  ;;  %vm6022_vm13 = vcmp.lt.s32.totalorder %v4612_v24, 500  ;;  %v339_v22 = vadd.s32 168, %v4456_v42 }
 0x126   : > { %1141 = vadd.xlane.f32.xlu1 %v1140_v0  ;;  %v887_v44 = vmul.f32 2.0, %v794_v28  ;;  %v4636_v2 = vmul.f32 %v3425_v36, %v4615_v61  ;;  %3432 = vpow2.f32 %v1018_v58  ;;  %1364 = vmatmul.f32.gmra.mxu2 %v4295_v59  ;;  %v3242_v30 = vsel %vm387_vm12, 1.0, %v6211_v18 }
 0x127   : > { %v3427_v4 = vpop.eup %3426  ;;  %v1020_v17 = vmul.f32 1.442695, %v917_v47  ;;  %v958_v10 = vmul.f32 1.442695, %v886_v12  ;;  %1974 = vmatmul.f32.gmra.mxu0 %v4624_v50  ;;  %2087 = vmatmul.f32.gmra.mxu1 %v4624_v50  ;;  %v3258_v58 = vsel %vm6022_vm13, 1.0, %v6211_v18  ;;  %v4660_v20 = vmul.f32 %v4478_v6, %v3257_v21 }
 0x128   : > { %v3429_v35 = vpop.eup %3428  ;;  %v4642_v0 = vmul.f32 %v3427_v4, %v4618_v53  ;;  %v960_v1 = vmul.f32 1.442695, %v887_v44  ;;  %v4657_v4 = vadd.s32 %v4449_v40, %v339_v22  ;;  %v4666_v27 = vmul.f32 %v4487_v14, %v3257_v21 }
 0x129   : > { %v3431_v47 = vpop.eup %3430  ;;  %3434 = vpow2.f32 %v1020_v17  ;;  %1477 = vmatmul.f32.gmra.mxu3 %v4295_v59  ;;  %v1076_v36 = vmul.f32 %v3429_v35, %v4621_v56  ;;  %v729_v44 = vpop.f32.mrf.mxu2  ;;  %6221 = vst [vmem:[#allocation64_spill] sm:$0xff] %v4660_v20  ;;  %v4663_v35 = vadd.s32 %v4449_v40, %v323_v38  ;;  %v4678_v38 = vmul.f32 %v4478_v6, %v3258_v58 }
 0x12a   : > { %3436 = vpow2.f32 %v958_v10  ;;  %v1188_v12 = vadd.f32 %v4642_v0, %v4636_v2  ;;  %v1077_v28 = vmul.f32 %v3431_v47, %v4627_v26  ;;  %6220 = vst [vmem:[#allocation63_spill] sm:$0xff] %v4657_v4  ;;  %v918_v24 = vmul.f32 2.0, %v729_v44  ;;  %v3792_v26 = vld [vmem:[%s4012_s28 + $0x70] sm:$0xff] }
 0x12b   : > { %3438 = vpow2.f32 %v960_v1  ;;  %v1232_v17 = vadd.f32 %v1231_v8, %v1076_v36  ;;  %6222 = vst [vmem:[#allocation65_spill] sm:$0xff] %v4663_v35  ;;  %v684_v22 = vpop.f32.mrf.mxu0  ;;  %v4672_v8 = vmul.f32 %v4478_v6, %v3242_v30  ;;  %v4675_v1 = vmul.f32 %v4487_v14, %v3242_v30 }
 0x12c   : > { %v842_v10 = vpop.f32.mrf.mxu3  ;;  %1189 = vadd.xlane.f32.xlu0 %v1188_v12  ;;  %v1143_v31 = vadd.f32 %v1077_v28, %v1076_v36  ;;  %v1269_v29 = vadd.f32 %v1268_v60, %v1077_v28  ;;  %6223 = vst [vmem:[#allocation66_spill] sm:$0xff] %v4666_v27  ;;  %v3433_v44 = vpop.eup %3432  ;;  %v1022_v12 = vmul.f32 1.442695, %v918_v24  ;;  %v888_v36 = vmul.f32 2.0, %v684_v22 }
 0x12d   : > { %v919_v47 = vmul.f32 2.0, %v842_v10  ;;  %6225 = vst [vmem:[#allocation68_spill] sm:$0xff] %v4672_v8  ;;  %v797_v60 = vpop.f32.mrf.mxu1  ;;  %v4681_v21 = vmul.f32 %v4487_v14, %v3258_v58  ;;  %vm6021_vm14 = vcmp.lt.s32.totalorder %v4657_v4, 500  ;;  %vm388_vm15 = vcmp.lt.s32.totalorder %v4663_v35, 500 }
 0x12e   : > { %6226 = vst [vmem:[#allocation69_spill] sm:$0xff] %v4675_v1  ;;  %1144 = vadd.xlane.f32.xlu1 %v1143_v31  ;;  %v889_v19 = vmul.f32 2.0, %v797_v60  ;;  %v324_v30 = vadd.s32 48, %v4456_v42  ;;  %3440 = vpow2.f32 %v1022_v12  ;;  %v962_v55 = vmul.f32 1.442695, %v888_v36  ;;  %1367 = vmatmul.f32.gmra.mxu2 %v4311_v63 }
 0x12f   : > { %6227 = vst [vmem:[#allocation70_spill] sm:$0xff] %v4678_v38  ;;  %v3435_v28 = vpop.eup %3434  ;;  %v1024_v10 = vmul.f32 1.442695, %v919_v47  ;;  %1977 = vmatmul.f32.gmra.mxu0 %v4669_v23  ;;  %v4689_v31 = vmul.f32 %v3433_v44, %v4660_v20  ;;  %2090 = vmatmul.f32.gmra.mxu1 %v4669_v23  ;;  %v3259_v12 = vsel %vm6021_vm14, 1.0, %v6211_v18  ;;  %v3243_v36 = vsel %vm388_vm15, 1.0, %v6211_v18 }
 0x130   : > { %6228 = vst [vmem:[#allocation71_spill] sm:$0xff] %v4681_v21  ;;  %v3437_v16 = vpop.eup %3436  ;;  %v4692_v24 = vmul.f32 %v3435_v28, %v4666_v27  ;;  %v964_v47 = vmul.f32 1.442695, %v889_v19  ;;  %v340_v19 = vadd.s32 176, %v4456_v42 }
 0x131   : > { %v3439_v58 = vpop.eup %3438  ;;  %3442 = vpow2.f32 %v1024_v10  ;;  %1480 = vmatmul.f32.gmra.mxu3 %v4311_v63  ;;  %v1078_v22 = vmul.f32 %v3437_v16, %v4672_v8  ;;  %v732_v60 = vpop.f32.mrf.mxu2  ;;  %v4706_v10 = vadd.s32 %v4449_v40, %v324_v30  ;;  %v325_v16 = vadd.s32 56, %v4456_v42 }
 0x132   : > { %3444 = vpow2.f32 %v962_v55  ;;  %v1079_v44 = vmul.f32 %v3439_v58, %v4675_v1  ;;  %v920_v4 = vmul.f32 2.0, %v732_v60  ;;  %v1191_v58 = vadd.f32 %v4692_v24, %v4689_v31 }
 0x133   : > { %3446 = vpow2.f32 %v964_v47  ;;  %v1233_v28 = vadd.f32 %v1232_v17, %v1078_v22  ;;  %6229 = vst [vmem:[#allocation72_spill] sm:$0xff] %v4706_v10  ;;  %v687_v35 = vpop.f32.mrf.mxu0  ;;  %v4715_v47 = vmul.f32 %v4478_v6, %v3259_v12  ;;  %v4718_v17 = vmul.f32 %v4478_v6, %v3243_v36 }
 0x134   : > { %v845_v23 = vpop.f32.mrf.mxu3  ;;  %v1146_v55 = vadd.f32 %v1079_v44, %v1078_v22  ;;  %v1270_v63 = vadd.f32 %v1269_v29, %v1079_v44  ;;  %v341_v30 = vadd.s32 184, %v4456_v42  ;;  %v3441_v50 = vpop.eup %3440  ;;  %v1026_v60 = vmul.f32 1.442695, %v920_v4 }
 0x135   : > { %v921_v34 = vmul.f32 2.0, %v845_v23  ;;  %6231 = vst [vmem:[#allocation74_spill] sm:$0xff] %v4715_v47  ;;  %v890_v59 = vmul.f32 2.0, %v687_v35  ;;  %v800_v22 = vpop.f32.mrf.mxu1  ;;  %v4722_v29 = vmul.f32 %v4487_v14, %v3243_v36  ;;  %v4725_v23 = vadd.s32 %v4449_v40, %v340_v19 }
 0x136   : > { %6232 = vst [vmem:[#allocation75_spill] sm:$0xff] %v4718_v17  ;;  %1147 = vadd.xlane.f32.xlu2 %v1146_v55  ;;  %1192 = vadd.xlane.f32.xlu1 %v1191_v58  ;;  %v891_v49 = vmul.f32 2.0, %v800_v22  ;;  %vm389_vm0 = vcmp.lt.s32.totalorder %v4706_v10, 500  ;;  %v4729_v51 = vadd.s32 %v4449_v40, %v325_v16  ;;  %3448 = vpow2.f32 %v1026_v60  ;;  %v4758_v10 = vld [vmem:[%s4017_s5 + $0x38] sm:$0xff] }
 0x137   : > { %6233 = vst [vmem:[#allocation76_spill] sm:$0xff] %v4722_v29  ;;  %v3443_v44 = vpop.eup %3442  ;;  %v1028_v33 = vmul.f32 1.442695, %v921_v34  ;;  %v966_v4 = vmul.f32 1.442695, %v890_v59  ;;  %1370 = vmatmul.f32.gmra.mxu2 %v4327_v3  ;;  %1980 = vmatmul.f32.gmra.mxu0 %v4712_v43  ;;  %v4734_v35 = vmul.f32 %v3441_v50, %v4678_v38  ;;  %v4743_v59 = vadd.s32 %v4449_v40, %v341_v30 }
 0x138   : > { %6234 = vst [vmem:[#allocation77_spill] sm:$0xff] %v4725_v23  ;;  %v3445_v37 = vpop.eup %3444  ;;  %v4737_v36 = vmul.f32 %v3443_v44, %v4681_v21  ;;  %v968_v19 = vmul.f32 1.442695, %v891_v49  ;;  %2093 = vmatmul.f32.gmra.mxu1 %v4712_v43  ;;  %vm6006_vm1 = vcmp.lt.s32.totalorder %v4725_v23, 500  ;;  %v4751_v55 = vmul.f32 %v4487_v14, %v3259_v12 }
 0x139   : > { %6235 = vst [vmem:[#allocation78_spill] sm:$0xff] %v4729_v51  ;;  %v3447_v34 = vpop.eup %3446  ;;  %3450 = vpow2.f32 %v1028_v33  ;;  %1483 = vmatmul.f32.gmra.mxu3 %v4327_v3  ;;  %v1080_v16 = vmul.f32 %v3445_v37, %v4718_v17  ;;  %v3244_v33 = vsel %vm389_vm0, 1.0, %v6211_v18  ;;  %v735_v49 = vpop.f32.mrf.mxu2  ;;  %v342_v37 = vadd.s32 192, %v4456_v42  ;;  %v3790_v17 = vld [vmem:[%s4012_s28 + $0x60] sm:$0xff] }
 0x13a   : > { %6236 = vst [vmem:[#allocation79_spill] sm:$0xff] %v4743_v59  ;;  %3452 = vpow2.f32 %v966_v4  ;;  %v1081_v50 = vmul.f32 %v3447_v34, %v4722_v29  ;;  %v922_v30 = vmul.f32 2.0, %v735_v49  ;;  %v1194_v22 = vadd.f32 %v4737_v36, %v4734_v35 }
 0x13b   : > { %3454 = vpow2.f32 %v968_v19  ;;  %6237 = vst [vmem:[#allocation80_spill] sm:$0xff] %v4751_v55  ;;  %v1234_v58 = vadd.f32 %v1233_v28, %v1080_v16  ;;  %vm390_vm2 = vcmp.lt.s32.totalorder %v4729_v51, 500  ;;  %v690_v34 = vpop.f32.mrf.mxu0  ;;  %v3260_v12 = vsel %vm6006_vm1, 1.0, %v6211_v18 }
 0x13c   : > { %v848_v60 = vpop.f32.mrf.mxu3  ;;  %v1271_v44 = vadd.f32 %v1270_v63, %v1081_v50  ;;  %6238 = vst [vmem:[#allocation81_spill] sm:$0xff] %v4758_v10  ;;  %vm6009_vm4 = vcmp.lt.s32.totalorder %v4743_v59, 500  ;;  %v4765_v28 = vmul.f32 %v4478_v6, %v3244_v33  ;;  %v3449_v19 = vpop.eup %3448  ;;  %v1030_v49 = vmul.f32 1.442695, %v922_v30 }
 0x13d   : > { %v923_v4 = vmul.f32 2.0, %v848_v60  ;;  %v892_v43 = vmul.f32 2.0, %v690_v34  ;;  %v803_v3 = vpop.f32.mrf.mxu1  ;;  %v4768_v63 = vmul.f32 %v4487_v14, %v3244_v33  ;;  %v326_v60 = vadd.s32 64, %v4456_v42 }
 0x13e   : > { %6239 = vst [vmem:[#allocation82_spill] sm:$0xff] %v4765_v28  ;;  %1195 = vadd.xlane.f32.xlu2 %v1194_v22  ;;  %v893_v27 = vmul.f32 2.0, %v803_v3  ;;  %v4772_v23 = vmul.f32 %v3449_v19, %v4715_v47  ;;  %v3245_v20 = vsel %vm390_vm2, 1.0, %v6211_v18  ;;  %3456 = vpow2.f32 %v1030_v49 }
 0x13f   : > { %6240 = vst [vmem:[#allocation83_spill] sm:$0xff] %v4768_v63  ;;  %v3451_v21 = vpop.eup %3450  ;;  %v1032_v38 = vmul.f32 1.442695, %v923_v4  ;;  %v970_v30 = vmul.f32 1.442695, %v892_v43  ;;  %1373 = vmatmul.f32.gmra.mxu2 %v4343_v7  ;;  %1983 = vmatmul.f32.gmra.mxu0 %v4758_v10  ;;  %v4783_v22 = vadd.s32 %v4449_v40, %v342_v37  ;;  %v1149_v34 = vadd.f32 %v1081_v50, %v1080_v16 }
 0x140   : > { %v3453_v53 = vpop.eup %3452  ;;  %v4780_v33 = vmul.f32 %v3451_v21, %v4751_v55  ;;  %v972_v4 = vmul.f32 1.442695, %v893_v27  ;;  %2096 = vmatmul.f32.gmra.mxu1 %v4758_v10  ;;  %v4792_v37 = vadd.s32 %v4449_v40, %v326_v60  ;;  %v4795_v27 = vmul.f32 %v4478_v6, %v3260_v12  ;;  %v4805_v10 = vld [vmem:[%s4017_s5 + $0x40] sm:$0xff] }
 0x141   : > { %6241 = vst [vmem:[#allocation84_spill] sm:$0xff] %v4783_v22  ;;  %v3455_v3 = vpop.eup %3454  ;;  %3458 = vpow2.f32 %v1032_v38  ;;  %1486 = vmatmul.f32.gmra.mxu3 %v4343_v7  ;;  %v1082_v43 = vmul.f32 %v3453_v53, %v4765_v28  ;;  %v738_v38 = vpop.f32.mrf.mxu2  ;;  %v343_v16 = vadd.s32 200, %v4456_v42  ;;  %v4808_v7 = vmul.f32 %v4478_v6, %v3245_v20  ;;  %v3789_v28 = vld [vmem:[%s4012_s28 + $0x58] sm:$0xff] }
 0x142   : > { %3460 = vpow2.f32 %v970_v30  ;;  %v1197_v19 = vadd.f32 %v4780_v33, %v4772_v23  ;;  %v1083_v21 = vmul.f32 %v3455_v3, %v4768_v63  ;;  %6242 = vst [vmem:[#allocation85_spill] sm:$0xff] %v4792_v37  ;;  %v924_v50 = vmul.f32 2.0, %v738_v38 }
 0x143   : > { %3462 = vpow2.f32 %v972_v4  ;;  %6243 = vst [vmem:[#allocation86_spill] sm:$0xff] %v4795_v27  ;;  %v1235_v49 = vadd.f32 %v1234_v58, %v1082_v43  ;;  %v4799_v30 = vmul.f32 %v4487_v14, %v3260_v12  ;;  %v3261_v3 = vsel %vm6009_vm4, 1.0, %v6211_v18  ;;  %v693_v4 = vpop.f32.mrf.mxu0 }
 0x144   : > { %v851_v53 = vpop.f32.mrf.mxu3  ;;  %1198 = vadd.xlane.f32.xlu0 %v1197_v19  ;;  %v1272_v60 = vadd.f32 %v1271_v44, %v1083_v21  ;;  %6245 = vst [vmem:[#allocation88_spill] sm:$0xff] %v4805_v10  ;;  %v4811_v58 = vmul.f32 %v4487_v14, %v3245_v20  ;;  %vm6037_vm1 = vcmp.lt.s32.totalorder %v4783_v22, 500  ;;  %v3457_v19 = vpop.eup %3456  ;;  %v1034_v12 = vmul.f32 1.442695, %v924_v50 }
 0x145   : > { %6244 = vst [vmem:[#allocation87_spill] sm:$0xff] %v4799_v30  ;;  %v925_v51 = vmul.f32 2.0, %v851_v53  ;;  %v894_v38 = vmul.f32 2.0, %v693_v4  ;;  %v806_v55 = vpop.f32.mrf.mxu1  ;;  %vm391_vm4 = vcmp.lt.s32.totalorder %v4792_v37, 500  ;;  %v327_v44 = vadd.s32 72, %v4456_v42 }
 0x146   : > { %6246 = vst [vmem:[#allocation89_spill] sm:$0xff] %v4808_v7  ;;  %1150 = vadd.xlane.f32.xlu2 %v1149_v34  ;;  %v895_v47 = vmul.f32 2.0, %v806_v55  ;;  %v4817_v61 = vmul.f32 %v3457_v19, %v4795_v27  ;;  %v4820_v20 = vadd.s32 %v4449_v40, %v343_v16  ;;  %3464 = vpow2.f32 %v1034_v12 }
 0x147   : > { %6247 = vst [vmem:[#allocation90_spill] sm:$0xff] %v4811_v58  ;;  %v3459_v53 = vpop.eup %3458  ;;  %v1036_v59 = vmul.f32 1.442695, %v925_v51  ;;  %v974_v5 = vmul.f32 1.442695, %v894_v38  ;;  %1376 = vmatmul.f32.gmra.mxu2 %v4359_v11  ;;  %1986 = vmatmul.f32.gmra.mxu0 %v4805_v10  ;;  %v1152_v50 = vadd.f32 %v1083_v21, %v1082_v43  ;;  %v3246_v16 = vsel %vm391_vm4, 1.0, %v6211_v18 }
 0x148   : > { %6248 = vst [vmem:[#allocation91_spill] sm:$0xff] %v4820_v20  ;;  %v3461_v25 = vpop.eup %3460  ;;  %v4825_v34 = vmul.f32 %v3459_v53, %v4799_v30  ;;  %v976_v51 = vmul.f32 1.442695, %v895_v47  ;;  %2099 = vmatmul.f32.gmra.mxu1 %v4805_v10  ;;  %v4840_v43 = vmul.f32 %v4478_v6, %v3261_v3  ;;  %v344_v21 = vadd.s32 208, %v4456_v42  ;;  %v4850_v10 = vld [vmem:[%s4017_s5 + $0x48] sm:$0xff] }
 0x149   : > { %v3463_v4 = vpop.eup %3462  ;;  %3466 = vpow2.f32 %v1036_v59  ;;  %1489 = vmatmul.f32.gmra.mxu3 %v4359_v11  ;;  %v1084_v55 = vmul.f32 %v3461_v25, %v4808_v7  ;;  %v4837_v59 = vadd.s32 %v4449_v40, %v327_v44  ;;  %v741_v47 = vpop.f32.mrf.mxu2  ;;  %v3262_v44 = vsel %vm6037_vm1, 1.0, %v6211_v18  ;;  %6252 = vst [vmem:[#allocation95_spill] sm:$0xff] %v4850_v10  ;;  %v3788_v7 = vld [vmem:[%s4012_s28 + $0x50] sm:$0xff] }
 0x14a   : > { %3468 = vpow2.f32 %v974_v5  ;;  %v1200_v19 = vadd.f32 %v4825_v34, %v4817_v61  ;;  %v1085_v12 = vmul.f32 %v3463_v4, %v4811_v58  ;;  %6250 = vst [vmem:[#allocation93_spill] sm:$0xff] %v4840_v43  ;;  %v926_v38 = vmul.f32 2.0, %v741_v47 }
 0x14b   : > { %6249 = vst [vmem:[#allocation92_spill] sm:$0xff] %v4837_v59  ;;  %3470 = vpow2.f32 %v976_v51  ;;  %v1236_v25 = vadd.f32 %v1235_v49, %v1084_v55  ;;  %v4844_v5 = vmul.f32 %v4487_v14, %v3261_v3  ;;  %v696_v37 = vpop.f32.mrf.mxu0  ;;  %v4853_v49 = vmul.f32 %v4478_v6, %v3246_v16 }
 0x14c   : > { %v854_v53 = vpop.f32.mrf.mxu3  ;;  %1201 = vadd.xlane.f32.xlu1 %v1200_v19  ;;  %1153 = vadd.xlane.f32.xlu0 %v1152_v50  ;;  %v1273_v4 = vadd.f32 %v1272_v60, %v1085_v12  ;;  %v4856_v47 = vmul.f32 %v4487_v14, %v3246_v16  ;;  %vm6054_vm14 = vcmp.lt.s32.totalorder %v4820_v20, 500  ;;  %v3465_v3 = vpop.eup %3464  ;;  %v1038_v19 = vmul.f32 1.442695, %v926_v38 }
 0x14d   : > { %6251 = vst [vmem:[#allocation94_spill] sm:$0xff] %v4844_v5  ;;  %v927_v51 = vmul.f32 2.0, %v854_v53  ;;  %v896_v50 = vmul.f32 2.0, %v696_v37  ;;  %v809_v60 = vpop.f32.mrf.mxu1  ;;  %vm392_vm13 = vcmp.lt.s32.totalorder %v4837_v59, 500  ;;  %v328_v22 = vadd.s32 80, %v4456_v42 }
 0x14e   : > { %6253 = vst [vmem:[#allocation96_spill] sm:$0xff] %v4853_v49  ;;  %v897_v30 = vmul.f32 2.0, %v809_v60  ;;  %v4862_v27 = vmul.f32 %v3465_v3, %v4840_v43  ;;  %v4865_v54 = vadd.s32 %v4449_v40, %v344_v21  ;;  %3472 = vpow2.f32 %v1038_v19 }
 0x14f   : > { %6254 = vst [vmem:[#allocation97_spill] sm:$0xff] %v4856_v47  ;;  %v3467_v53 = vpop.eup %3466  ;;  %v1040_v11 = vmul.f32 1.442695, %v927_v51  ;;  %v978_v45 = vmul.f32 1.442695, %v896_v50  ;;  %1379 = vmatmul.f32.gmra.mxu2 %v4373_v15  ;;  %1989 = vmatmul.f32.gmra.mxu0 %v4850_v10  ;;  %v1155_v38 = vadd.f32 %v1085_v12, %v1084_v55  ;;  %v3247_v3 = vsel %vm392_vm13, 1.0, %v6211_v18 }
 0x150   : > { %6255 = vst [vmem:[#allocation98_spill] sm:$0xff] %v4865_v54  ;;  %v3469_v16 = vpop.eup %3468  ;;  %v4870_v37 = vmul.f32 %v3467_v53, %v4844_v5  ;;  %v980_v51 = vmul.f32 1.442695, %v897_v30  ;;  %2102 = vmatmul.f32.gmra.mxu1 %v4850_v10  ;;  %v4885_v55 = vmul.f32 %v4478_v6, %v3262_v44  ;;  %v345_v60 = vadd.s32 216, %v4456_v42  ;;  %v4895_v10 = vld [vmem:[%s4017_s5 + $0x50] sm:$0xff] }
 0x151   : > { %v3471_v58 = vpop.eup %3470  ;;  %3474 = vpow2.f32 %v1040_v11  ;;  %1492 = vmatmul.f32.gmra.mxu3 %v4373_v15  ;;  %v1086_v21 = vmul.f32 %v3469_v16, %v4853_v49  ;;  %v4882_v11 = vadd.s32 %v4449_v40, %v328_v22  ;;  %v744_v30 = vpop.f32.mrf.mxu2  ;;  %v3263_v22 = vsel %vm6054_vm14, 1.0, %v6211_v18  ;;  %6259 = vst [vmem:[#allocation102_spill] sm:$0xff] %v4895_v10 }
 0x152   : > { %3476 = vpow2.f32 %v978_v45  ;;  %v1203_v19 = vadd.f32 %v4870_v37, %v4862_v27  ;;  %v1087_v50 = vmul.f32 %v3471_v58, %v4856_v47  ;;  %6257 = vst [vmem:[#allocation100_spill] sm:$0xff] %v4885_v55  ;;  %v928_v53 = vmul.f32 2.0, %v744_v30 }
 0x153   : > { %6256 = vst [vmem:[#allocation99_spill] sm:$0xff] %v4882_v11  ;;  %3478 = vpow2.f32 %v980_v51  ;;  %v1237_v12 = vadd.f32 %v1236_v25, %v1086_v21  ;;  %v4889_v45 = vmul.f32 %v4487_v14, %v3262_v44  ;;  %v699_v59 = vpop.f32.mrf.mxu0  ;;  %vm6056_vm1 = vcmp.lt.s32.totalorder %v4865_v54, 500 }
 0x154   : > { %v857_v16 = vpop.f32.mrf.mxu3  ;;  %1204 = vadd.xlane.f32.xlu2 %v1203_v19  ;;  %1156 = vadd.xlane.f32.xlu1 %v1155_v38  ;;  %v1274_v58 = vadd.f32 %v1273_v4, %v1087_v50  ;;  %v4899_v25 = vmul.f32 %v4478_v6, %v3247_v3  ;;  %v4902_v38 = vmul.f32 %v4487_v14, %v3247_v3  ;;  %v3473_v44 = vpop.eup %3472  ;;  %v1042_v19 = vmul.f32 1.442695, %v928_v53 }
 0x155   : > { %6258 = vst [vmem:[#allocation101_spill] sm:$0xff] %v4889_v45  ;;  %v929_v51 = vmul.f32 2.0, %v857_v16  ;;  %v898_v4 = vmul.f32 2.0, %v699_v59  ;;  %v812_v30 = vpop.f32.mrf.mxu1  ;;  %vm393_vm11 = vcmp.lt.s32.totalorder %v4882_v11, 500  ;;  %v329_v16 = vadd.s32 88, %v4456_v42  ;;  %v4939_v11 = vld [vmem:[%s4017_s5 + $0x58] sm:$0xff] }
 0x156   : > { %6260 = vst [vmem:[#allocation103_spill] sm:$0xff] %v4899_v25  ;;  %v899_v5 = vmul.f32 2.0, %v812_v30  ;;  %v4907_v43 = vmul.f32 %v3473_v44, %v4885_v55  ;;  %v4910_v47 = vadd.s32 %v4449_v40, %v345_v60  ;;  %3480 = vpow2.f32 %v1042_v19 }
 0x157   : > { %6261 = vst [vmem:[#allocation104_spill] sm:$0xff] %v4902_v38  ;;  %v3475_v20 = vpop.eup %3474  ;;  %v1044_v15 = vmul.f32 1.442695, %v929_v51  ;;  %v982_v3 = vmul.f32 1.442695, %v898_v4  ;;  %1382 = vmatmul.f32.gmra.mxu2 %v3788_v7  ;;  %1992 = vmatmul.f32.gmra.mxu0 %v4895_v10  ;;  %v1158_v53 = vadd.f32 %v1087_v50, %v1086_v21  ;;  %v3248_v44 = vsel %vm393_vm11, 1.0, %v6211_v18 }
 0x158   : > { %6262 = vst [vmem:[#allocation105_spill] sm:$0xff] %v4910_v47  ;;  %v3477_v49 = vpop.eup %3476  ;;  %v4915_v59 = vmul.f32 %v3475_v20, %v4889_v45  ;;  %v984_v51 = vmul.f32 1.442695, %v899_v5  ;;  %2105 = vmatmul.f32.gmra.mxu1 %v4895_v10  ;;  %v4926_v21 = vadd.s32 %v4449_v40, %v329_v16  ;;  %v4933_v30 = vmul.f32 %v4487_v14, %v3263_v22 }
 0x159   : > { %v3479_v63 = vpop.eup %3478  ;;  %3482 = vpow2.f32 %v1044_v15  ;;  %1495 = vmatmul.f32.gmra.mxu3 %v3788_v7  ;;  %v1088_v60 = vmul.f32 %v3477_v49, %v4899_v25  ;;  %v747_v7 = vpop.f32.mrf.mxu2  ;;  %v4929_v15 = vmul.f32 %v4478_v6, %v3263_v22  ;;  %v346_v49 = vadd.s32 224, %v4456_v42  ;;  %6266 = vst [vmem:[#allocation109_spill] sm:$0xff] %v4939_v11 }
 0x15a   : > { %3484 = vpow2.f32 %v982_v3  ;;  %v1206_v19 = vadd.f32 %v4915_v59, %v4907_v43  ;;  %v1089_v20 = vmul.f32 %v3479_v63, %v4902_v38  ;;  %6263 = vst [vmem:[#allocation106_spill] sm:$0xff] %v4926_v21  ;;  %v930_v50 = vmul.f32 2.0, %v747_v7 }
 0x15b   : > { %3486 = vpow2.f32 %v984_v51  ;;  %6264 = vst [vmem:[#allocation107_spill] sm:$0xff] %v4929_v15  ;;  %v1238_v5 = vadd.f32 %v1237_v12, %v1088_v60  ;;  %v3264_v63 = vsel %vm6056_vm1, 1.0, %v6211_v18  ;;  %v702_v51 = vpop.f32.mrf.mxu0  ;;  %v4942_v12 = vmul.f32 %v4478_v6, %v3248_v44 }
 0x15c   : > { %v860_v4 = vpop.f32.mrf.mxu3  ;;  %1207 = vadd.xlane.f32.xlu0 %v1206_v19  ;;  %1159 = vadd.xlane.f32.xlu2 %v1158_v53  ;;  %6265 = vst [vmem:[#allocation108_spill] sm:$0xff] %v4933_v30  ;;  %v1275_v16 = vadd.f32 %v1274_v58, %v1089_v20  ;;  %v4945_v7 = vmul.f32 %v4487_v14, %v3248_v44  ;;  %vm6087_vm14 = vcmp.lt.s32.totalorder %v4910_v47, 500  ;;  %v3481_v22 = vpop.eup %3480  ;;  %v1046_v53 = vmul.f32 1.442695, %v930_v50 }
 0x15d   : > { %v931_v3 = vmul.f32 2.0, %v860_v4  ;;  %6267 = vst [vmem:[#allocation110_spill] sm:$0xff] %v4942_v12  ;;  %v900_v19 = vmul.f32 2.0, %v702_v51  ;;  %v815_v10 = vpop.f32.mrf.mxu1  ;;  %vm394_vm1 = vcmp.lt.s32.totalorder %v4926_v21, 500  ;;  %v330_v58 = vadd.s32 96, %v4456_v42  ;;  %v4983_v21 = vld [vmem:[%s4017_s5 + $0x60] sm:$0xff] }
 0x15e   : > { %6268 = vst [vmem:[#allocation111_spill] sm:$0xff] %v4945_v7  ;;  %v901_v45 = vmul.f32 2.0, %v815_v10  ;;  %v4951_v55 = vmul.f32 %v3481_v22, %v4929_v15  ;;  %v4954_v44 = vadd.s32 %v4449_v40, %v346_v49  ;;  %3488 = vpow2.f32 %v1046_v53 }
 0x15f   : > { %v3483_v4 = vpop.eup %3482  ;;  %v1048_v54 = vmul.f32 1.442695, %v931_v3  ;;  %v986_v25 = vmul.f32 1.442695, %v900_v19  ;;  %1385 = vmatmul.f32.gmra.mxu2 %v3789_v28  ;;  %1995 = vmatmul.f32.gmra.mxu0 %v4939_v11  ;;  %v1161_v51 = vadd.f32 %v1089_v20, %v1088_v60  ;;  %v3249_v3 = vsel %vm394_vm1, 1.0, %v6211_v18  ;;  %6273 = vst [vmem:[#allocation116_spill] sm:$0xff] %v4983_v21 }
 0x160   : > { %6269 = vst [vmem:[#allocation112_spill] sm:$0xff] %v4954_v44  ;;  %v3485_v38 = vpop.eup %3484  ;;  %v4959_v50 = vmul.f32 %v3483_v4, %v4933_v30  ;;  %v988_v10 = vmul.f32 1.442695, %v901_v45  ;;  %2108 = vmatmul.f32.gmra.mxu1 %v4939_v11  ;;  %v4970_v60 = vadd.s32 %v4449_v40, %v330_v58  ;;  %v3265_v58 = vsel %vm6087_vm14, 1.0, %v6211_v18 }
 0x161   : > { %v3487_v29 = vpop.eup %3486  ;;  %3490 = vpow2.f32 %v1048_v54  ;;  %1498 = vmatmul.f32.gmra.mxu3 %v3789_v28  ;;  %v1090_v49 = vmul.f32 %v3485_v38, %v4942_v12  ;;  %v750_v54 = vpop.f32.mrf.mxu2  ;;  %v4973_v28 = vmul.f32 %v4478_v6, %v3264_v63  ;;  %v347_v38 = vadd.s32 232, %v4456_v42 }
 0x162   : > { %3492 = vpow2.f32 %v986_v25  ;;  %v1209_v22 = vadd.f32 %v4959_v50, %v4951_v55  ;;  %v1091_v53 = vmul.f32 %v3487_v29, %v4945_v7  ;;  %6270 = vst [vmem:[#allocation113_spill] sm:$0xff] %v4970_v60  ;;  %v932_v20 = vmul.f32 2.0, %v750_v54 }
 0x163   : > { %3494 = vpow2.f32 %v988_v10  ;;  %6271 = vst [vmem:[#allocation114_spill] sm:$0xff] %v4973_v28  ;;  %v1239_v45 = vadd.f32 %v1238_v5, %v1090_v49  ;;  %v4977_v25 = vmul.f32 %v4487_v14, %v3264_v63  ;;  %v705_v10 = vpop.f32.mrf.mxu0  ;;  %v4986_v5 = vmul.f32 %v4478_v6, %v3249_v3 }
 0x164   : > { %v863_v19 = vpop.f32.mrf.mxu3  ;;  %1210 = vadd.xlane.f32.xlu1 %v1209_v22  ;;  %1162 = vadd.xlane.f32.xlu0 %v1161_v51  ;;  %v1276_v29 = vadd.f32 %v1275_v16, %v1091_v53  ;;  %v4989_v54 = vmul.f32 %v4487_v14, %v3249_v3  ;;  %vm6104_vm9 = vcmp.lt.s32.totalorder %v4954_v44, 500  ;;  %v3489_v63 = vpop.eup %3488  ;;  %v1050_v51 = vmul.f32 1.442695, %v932_v20 }
 0x165   : > { %6272 = vst [vmem:[#allocation115_spill] sm:$0xff] %v4977_v25  ;;  %v933_v4 = vmul.f32 2.0, %v863_v19  ;;  %v902_v16 = vmul.f32 2.0, %v705_v10  ;;  %v818_v22 = vpop.f32.mrf.mxu1  ;;  %vm6163_vm6 = vcmp.lt.s32.totalorder %v4970_v60, 500  ;;  %v331_v19 = vadd.s32 104, %v4456_v42 }
 0x166   : > { %6274 = vst [vmem:[#allocation117_spill] sm:$0xff] %v4986_v5  ;;  %v903_v30 = vmul.f32 2.0, %v818_v22  ;;  %v4995_v15 = vmul.f32 %v3489_v63, %v4973_v28  ;;  %v4998_v3 = vadd.s32 %v4449_v40, %v347_v38  ;;  %3496 = vpow2.f32 %v1050_v51 }
 0x167   : > { %6275 = vst [vmem:[#allocation118_spill] sm:$0xff] %v4989_v54  ;;  %v3491_v47 = vpop.eup %3490  ;;  %v1052_v11 = vmul.f32 1.442695, %v933_v4  ;;  %v990_v12 = vmul.f32 1.442695, %v902_v16  ;;  %1388 = vmatmul.f32.gmra.mxu2 %v3790_v17  ;;  %1998 = vmatmul.f32.gmra.mxu0 %v4983_v21  ;;  %v1164_v10 = vadd.f32 %v1091_v53, %v1090_v49  ;;  %v3250_v63 = vsel %vm6163_vm6, 1.0, %v6211_v18 }
 0x168   : > { %6276 = vst [vmem:[#allocation119_spill] sm:$0xff] %v4998_v3  ;;  %v3493_v7 = vpop.eup %3492  ;;  %v5003_v20 = vmul.f32 %v3491_v47, %v4977_v25  ;;  %v992_v4 = vmul.f32 1.442695, %v903_v30  ;;  %2111 = vmatmul.f32.gmra.mxu1 %v4983_v21  ;;  %v5014_v49 = vadd.s32 %v4449_v40, %v331_v19  ;;  %vm6116_vm14 = vcmp.lt.s32.totalorder %v4998_v3, 500 }
 0x169   : > { %v3495_v1 = vpop.eup %3494  ;;  %3498 = vpow2.f32 %v1052_v11  ;;  %1501 = vmatmul.f32.gmra.mxu3 %v3790_v17  ;;  %v1092_v38 = vmul.f32 %v3493_v7, %v4986_v5  ;;  %v753_v17 = vpop.f32.mrf.mxu2  ;;  %v5017_v11 = vmul.f32 %v4478_v6, %v3265_v58  ;;  %v348_v28 = vadd.s32 240, %v4456_v42  ;;  %v3791_v5 = vld [vmem:[%s4012_s28 + $0x68] sm:$0xff] }
 0x16a   : > { %3500 = vpow2.f32 %v990_v12  ;;  %v1212_v51 = vadd.f32 %v5003_v20, %v4995_v15  ;;  %v1093_v47 = vmul.f32 %v3495_v1, %v4989_v54  ;;  %6277 = vst [vmem:[#allocation120_spill] sm:$0xff] %v5014_v49  ;;  %v934_v7 = vmul.f32 2.0, %v753_v17 }
 0x16b   : > { %3502 = vpow2.f32 %v992_v4  ;;  %6278 = vst [vmem:[#allocation121_spill] sm:$0xff] %v5017_v11  ;;  %v1240_v30 = vadd.f32 %v1239_v45, %v1092_v38  ;;  %v5020_v12 = vmul.f32 %v4487_v14, %v3265_v58  ;;  %v3266_v1 = vsel %vm6104_vm9, 1.0, %v6211_v18  ;;  %v708_v19 = vpop.f32.mrf.mxu0  ;;  %v5026_v4 = vld [vmem:[%s4017_s5 + $0x68] sm:$0xff] }
 0x16c   : > { %v866_v53 = vpop.f32.mrf.mxu3  ;;  %1213 = vadd.xlane.f32.xlu2 %v1212_v51  ;;  %1165 = vadd.xlane.f32.xlu1 %v1164_v10  ;;  %v1277_v16 = vadd.f32 %v1276_v29, %v1093_v47  ;;  %6280 = vst [vmem:[#allocation123_spill] sm:$0xff] %v5026_v4  ;;  %v5030_v45 = vmul.f32 %v4478_v6, %v3250_v63  ;;  %v3497_v58 = vpop.eup %3496  ;;  %v1054_v51 = vmul.f32 1.442695, %v934_v7  ;;  %v904_v29 = vmul.f32 2.0, %v708_v19 }
 0x16d   : > { %6279 = vst [vmem:[#allocation122_spill] sm:$0xff] %v5020_v12  ;;  %v935_v22 = vmul.f32 2.0, %v866_v53  ;;  %v5033_v10 = vmul.f32 %v4487_v14, %v3250_v63  ;;  %v821_v17 = vpop.f32.mrf.mxu1  ;;  %vm6161_vm5 = vcmp.lt.s32.totalorder %v5014_v49, 500  ;;  %v332_v53 = vadd.s32 112, %v4456_v42 }
 0x16e   : > { %6281 = vst [vmem:[#allocation124_spill] sm:$0xff] %v5030_v45  ;;  %v905_v21 = vmul.f32 2.0, %v821_v17  ;;  %v5038_v25 = vmul.f32 %v3497_v58, %v5017_v11  ;;  %3504 = vpow2.f32 %v1054_v51  ;;  %v994_v63 = vmul.f32 1.442695, %v904_v29 }
 0x16f   : > { %6282 = vst [vmem:[#allocation125_spill] sm:$0xff] %v5033_v10  ;;  %v3499_v44 = vpop.eup %3498  ;;  %v1056_v60 = vmul.f32 1.442695, %v935_v22  ;;  %1391 = vmatmul.f32.gmra.mxu2 %v3791_v5  ;;  %2001 = vmatmul.f32.gmra.mxu0 %v5026_v4  ;;  %v1167_v19 = vadd.f32 %v1093_v47, %v1092_v38  ;;  %v3251_v51 = vsel %vm6161_vm5, 1.0, %v6211_v18  ;;  %v5055_v38 = vadd.s32 %v4449_v40, %v332_v53 }
 0x170   : > { %v3501_v54 = vpop.eup %3500  ;;  %v5044_v7 = vmul.f32 %v3499_v44, %v5020_v12  ;;  %v996_v22 = vmul.f32 1.442695, %v905_v21  ;;  %2114 = vmatmul.f32.gmra.mxu1 %v5026_v4  ;;  %v5061_v17 = vmul.f32 %v4487_v14, %v3266_v1  ;;  %v3267_v53 = vsel %vm6116_vm14, 1.0, %v6211_v18 }
 0x171   : > { %v3503_v8 = vpop.eup %3502  ;;  %3506 = vpow2.f32 %v1056_v60  ;;  %1504 = vmatmul.f32.gmra.mxu3 %v3791_v5  ;;  %v1094_v58 = vmul.f32 %v3501_v54, %v5030_v45  ;;  %6283 = vst [vmem:[#allocation126_spill] sm:$0xff] %v5055_v38  ;;  %v756_v21 = vpop.f32.mrf.mxu2  ;;  %v5058_v60 = vmul.f32 %v4478_v6, %v3266_v1  ;;  %vm6125_vm9 = vcmp.lt.s32.totalorder %v5055_v38, 500  ;;  %v5107_v38 = vld [vmem:[%s4017_s5 + $0x78] sm:$0xff] }
 0x172   : > { %3508 = vpow2.f32 %v994_v63  ;;  %v1215_v29 = vadd.f32 %v5044_v7, %v5038_v25  ;;  %v1095_v44 = vmul.f32 %v3503_v8, %v5033_v10  ;;  %v936_v54 = vmul.f32 2.0, %v756_v21  ;;  %6285 = vst [vmem:[#allocation128_spill] sm:$0xff] %v5061_v17  ;;  %v5064_v8 = vld [vmem:[%s4017_s5 + $0x70] sm:$0xff] }
 0x173   : > { %3510 = vpow2.f32 %v996_v22  ;;  %6284 = vst [vmem:[#allocation127_spill] sm:$0xff] %v5058_v60  ;;  %v1241_v5 = vadd.f32 %v1240_v30, %v1094_v58  ;;  %v711_v4 = vpop.f32.mrf.mxu0  ;;  %v5070_v22 = vmul.f32 %v4478_v6, %v3251_v51  ;;  %v5073_v30 = vadd.s32 %v4449_v40, %v348_v28 }
 0x174   : > { %v869_v47 = vpop.f32.mrf.mxu3  ;;  %1216 = vadd.xlane.f32.xlu0 %v1215_v29  ;;  %1168 = vadd.xlane.f32.xlu2 %v1167_v19  ;;  %v1278_v63 = vadd.f32 %v1277_v16, %v1095_v44  ;;  %6286 = vst [vmem:[#allocation129_spill] sm:$0xff] %v5064_v8  ;;  %v3505_v19 = vpop.eup %3504  ;;  %v1058_v29 = vmul.f32 1.442695, %v936_v54  ;;  %v906_v1 = vmul.f32 2.0, %v711_v4  ;;  %v5076_v16 = vmul.f32 %v4487_v14, %v3251_v51 }
 0x175   : > { %v937_v49 = vmul.f32 2.0, %v869_v47  ;;  %6287 = vst [vmem:[#allocation130_spill] sm:$0xff] %v5070_v22  ;;  %v824_v21 = vpop.f32.mrf.mxu1  ;;  %v5080_v11 = vmul.f32 %v3505_v19, %v5058_v60  ;;  %v333_v10 = vadd.s32 120, %v4456_v42  ;;  %v1170_v51 = vadd.f32 %v1095_v44, %v1094_v58 }
 0x176   : > { %6288 = vst [vmem:[#allocation131_spill] sm:$0xff] %v5073_v30  ;;  %v907_v3 = vmul.f32 2.0, %v824_v21  ;;  %3512 = vpow2.f32 %v1058_v29  ;;  %v998_v28 = vmul.f32 1.442695, %v906_v1  ;;  %v5090_v19 = vmul.f32 %v4478_v6, %v3267_v53 }
 0x177   : > { %6289 = vst [vmem:[#allocation132_spill] sm:$0xff] %v5076_v16  ;;  %v3507_v47 = vpop.eup %3506  ;;  %v1060_v12 = vmul.f32 1.442695, %v937_v49  ;;  %1394 = vmatmul.f32.gmra.mxu2 %v3792_v26  ;;  %2004 = vmatmul.f32.gmra.mxu0 %v5064_v8  ;;  %vm6129_vm14 = vcmp.lt.s32.totalorder %v5073_v30, 500  ;;  %v5101_v58 = vadd.s32 %v4449_v40, %v333_v10 }
 0x178   : > { %v3509_v45 = vpop.eup %3508  ;;  %v5086_v4 = vmul.f32 %v3507_v47, %v5061_v17  ;;  %v1000_v49 = vmul.f32 1.442695, %v907_v3  ;;  %2117 = vmatmul.f32.gmra.mxu1 %v5064_v8  ;;  %6290 = vst [vmem:[#allocation133_spill] sm:$0xff] %v5090_v19  ;;  %v5104_v47 = vmul.f32 %v4487_v14, %v3267_v53  ;;  %v3268_v53 = vsel %vm6129_vm14, 1.0, %v6211_v18 }
 0x179   : > { %v3511_v54 = vpop.eup %3510  ;;  %3514 = vpow2.f32 %v1060_v12  ;;  %1507 = vmatmul.f32.gmra.mxu3 %v3792_v26  ;;  %v1096_v29 = vmul.f32 %v3509_v45, %v5070_v22  ;;  %v3252_v12 = vsel %vm6125_vm9, 1.0, %v6211_v18  ;;  %v759_v26 = vpop.f32.mrf.mxu2  ;;  %6291 = vst [vmem:[#allocation134_spill] sm:$0xff] %v5101_v58  ;;  %vm6160_vm9 = vcmp.lt.s32.totalorder %v5101_v58, 500 }
 0x17a   : > { %3516 = vpow2.f32 %v998_v28  ;;  %v1218_v1 = vadd.f32 %v5086_v4, %v5080_v11  ;;  %v1097_v21 = vmul.f32 %v3511_v54, %v5076_v16  ;;  %v938_v45 = vmul.f32 2.0, %v759_v26  ;;  %6292 = vst [vmem:[#allocation135_spill] sm:$0xff] %v5104_v47 }
 0x17b   : > { %3518 = vpow2.f32 %v1000_v49  ;;  %v1242_v3 = vadd.f32 %v1241_v5, %v1096_v29  ;;  %v714_v8 = vpop.f32.mrf.mxu0  ;;  %6293 = vst [vmem:[#allocation136_spill] sm:$0xff] %v5107_v38  ;;  %v5110_v49 = vmul.f32 %v4478_v6, %v3252_v12  ;;  %v349_v5 = vadd.s32 248, %v4456_v42 }
 0x17c   : > { %v872_v44 = vpop.f32.mrf.mxu3  ;;  %1219 = vadd.xlane.f32.xlu1 %v1218_v1  ;;  %1171 = vadd.xlane.f32.xlu0 %v1170_v51  ;;  %v1279_v28 = vadd.f32 %v1278_v63, %v1097_v21  ;;  %v3513_v10 = vpop.eup %3512  ;;  %v1062_v17 = vmul.f32 1.442695, %v938_v45  ;;  %v908_v26 = vmul.f32 2.0, %v714_v8  ;;  %v5117_v63 = vmul.f32 %v4487_v14, %v3252_v12  ;;  %v3793_v8 = vld [vmem:[%s4012_s28 + $0x78] sm:$0xff] }
 0x17d   : > { %v939_v54 = vmul.f32 2.0, %v872_v44  ;;  %v827_v60 = vpop.f32.mrf.mxu1  ;;  %v5120_v16 = vmul.f32 %v3513_v10, %v5090_v19  ;;  %v1173_v12 = vadd.f32 %v1097_v21, %v1096_v29  ;;  %v5131_v10 = vadd.s32 %v4449_v40, %v349_v5 }
 0x17e   : > { %v909_v44 = vmul.f32 2.0, %v827_v60  ;;  %3520 = vpow2.f32 %v1062_v17  ;;  %v1002_v45 = vmul.f32 1.442695, %v908_v26  ;;  %v3253_v29 = vsel %vm6160_vm9, 1.0, %v6211_v18 }
 0x17f   : > { %v3515_v51 = vpop.eup %3514  ;;  %v1064_v1 = vmul.f32 1.442695, %v939_v54  ;;  %1397 = vmatmul.f32.gmra.mxu2 %v3793_v8  ;;  %2007 = vmatmul.f32.gmra.mxu0 %v5107_v38  ;;  %6294 = vst [vmem:[#allocation137_spill] sm:$0xff] %v5131_v10  ;;  %v5143_v5 = vmul.f32 %v4487_v14, %v3268_v53  ;;  %vm6154_vm14 = vcmp.lt.s32.totalorder %v5131_v10, 500  ;;  %vm6162_vm9 = vcmask 1040384  }
 0x180   : > { %v3517_v42 = vpop.eup %3516  ;;  %v5126_v30 = vmul.f32 %v3515_v51, %v5104_v47  ;;  %v1004_v54 = vmul.f32 1.442695, %v909_v44  ;;  %2120 = vmatmul.f32.gmra.mxu1 %v5107_v38  ;;  %v5140_v51 = vmul.f32 %v4478_v6, %v3268_v53  ;;  %v3794_v38 = vld [vmem:[%s4012_s28 + $0x80] sm:$0xff] }
 0x181   : > { %v3519_v22 = vpop.eup %3518  ;;  %3522 = vpow2.f32 %v1064_v1  ;;  %1510 = vmatmul.f32.gmra.mxu3 %v3793_v8  ;;  %v1098_v60 = vmul.f32 %v3517_v42, %v5110_v49  ;;  %v762_v21 = vpop.f32.mrf.mxu2  ;;  %6296 = vst [vmem:[#allocation139_spill] sm:$0xff] %v5143_v5  ;;  %v5148_v8 = vld [vmem:[%s4017_s5 + $0x80] sm:$0xff] }
 0x182   : > { %3524 = vpow2.f32 %v1002_v45  ;;  %v1221_v17 = vadd.f32 %v5126_v30, %v5120_v16  ;;  %v1099_v26 = vmul.f32 %v3519_v22, %v5117_v63  ;;  %6295 = vst [vmem:[#allocation138_spill] sm:$0xff] %v5140_v51  ;;  %v940_v44 = vmul.f32 2.0, %v762_v21 }
 0x183   : > { %3526 = vpow2.f32 %v1004_v54  ;;  %v1243_v1 = vadd.f32 %v1242_v3, %v1098_v60  ;;  %v5145_v45 = vpop.f32.mrf.mxu0  ;;  %6297 = vst [vmem:[#allocation140_spill] sm:$0xff] %v5148_v8  ;;  %v5152_v54 = vmul.f32 %v4478_v6, %v3253_v29 }
 0x184   : > { %v875_v40 = vpop.f32.mrf.mxu3  ;;  %1222 = vadd.xlane.f32.xlu2 %v1221_v17  ;;  %1174 = vadd.xlane.f32.xlu1 %v1173_v12  ;;  %v1280_v42 = vadd.f32 %v1279_v28, %v1099_v26  ;;  %v3521_v3 = vpop.eup %3520  ;;  %v1066_v21 = vmul.f32 1.442695, %v940_v44  ;;  %v5157_v12 = vmul.f32 %v4487_v14, %v3253_v29  ;;  %v1176_v44 = vadd.f32 %v1099_v26, %v1098_v60 }
 0x185   : > { %v941_v22 = vmul.f32 2.0, %v875_v40  ;;  %v5154_v58 = vpop.f32.mrf.mxu1  ;;  %v5160_v28 = vmul.f32 %v3521_v3, %v5140_v51  ;;  %v3269_v29 = vsel %vm6154_vm14, 1.0, %v6211_v18  ;;  %vm2568_vm14 = vcmask 7168  }
 0x186   : > { %6298 = vst [vmem:[#allocation141_spill] sm:$0xff] %v5157_v12  ;;  %3528 = vpow2.f32 %v1066_v21  ;;  %v5176_v60 = vmul.f32 %v4478_v6, %v3269_v29 }
 0x187   : > { %v3523_v53 = vpop.eup %3522  ;;  %v1068_v17 = vmul.f32 1.442695, %v941_v22  ;;  %1400 = vmatmul.f32.gmra.mxu2 %v3794_v38  ;;  %2010 = vmatmul.f32.gmra.mxu0 %v5148_v8 }
 0x188   : > { %v3525_v40 = vpop.eup %3524  ;;  %v5165_v47 = vmul.f32 %v3523_v53, %v5143_v5  ;;  %2123 = vmatmul.f32.gmra.mxu1 %v5148_v8  ;;  %v5184_v5 = vld [vmem:[%s4017_s5 + $0x88] sm:$0xff] }
 0x189   : > { %v3527_v19 = vpop.eup %3526  ;;  %3530 = vpow2.f32 %v1068_v17  ;;  %1513 = vmatmul.f32.gmra.mxu3 %v3794_v38  ;;  %v1100_v22 = vmul.f32 %v3525_v40, %v5152_v54  ;;  %v1353_v53 = vpop.f32.mrf.mxu2  ;;  %v5179_v38 = vmul.f32 %v4487_v14, %v3269_v29  ;;  %6299 = vst [vmem:[#allocation142_spill] sm:$0xff] %v5184_v5 }
 0x18a   : > { %v1224_v3 = vadd.f32 %v5165_v47, %v5160_v28  ;;  %v1101_v21 = vmul.f32 %v3527_v19, %v5157_v12  ;;  %v1562_v10 = vmul.f32 2.0, %v1353_v53 }
 0x18b   : > { %v1244_v26 = vadd.f32 %v1243_v1, %v1100_v22  ;;  %v5181_v8 = vpop.f32.mrf.mxu0 }
 0x18c   : > { %v1466_v18 = vpop.f32.mrf.mxu3  ;;  %1225 = vadd.xlane.f32.xlu0 %v1224_v3  ;;  %1177 = vadd.xlane.f32.xlu2 %v1176_v44  ;;  %v1281_v17 = vadd.f32 %v1280_v42, %v1101_v21  ;;  %v3529_v51 = vpop.eup %3528  ;;  %v1626_v6 = vmul.f32 1.442695, %v1562_v10  ;;  %v3795_v42 = vld [vmem:[%s4012_s28 + $0x88] sm:$0xff]  ;;  %v1179_v10 = vadd.f32 %v1101_v21, %v1100_v22 }
 0x18d   : > { %v1563_v40 = vmul.f32 2.0, %v1466_v18  ;;  %v1245_v19 = vadd.f32 %v1244_v26, %v4548_v32  ;;  %v5187_v12 = vpop.f32.mrf.mxu1  ;;  %v5191_v53 = vmul.f32 %v3529_v51, %v5176_v60 }
 0x18e   : > { %v1282_v1 = vadd.f32 %v1281_v17, %v4556_v57  ;;  %3532 = vpow2.f32 %v1626_v6 }
 0x18f   : > { %v3531_v3 = vpop.eup %3530  ;;  %v1628_v44 = vmul.f32 1.442695, %v1563_v40  ;;  %v1246_v14 = vadd.f32 %v1245_v19, %v4591_v46  ;;  %1403 = vmatmul.f32.gmra.mxu2 %v3795_v42  ;;  %2013 = vmatmul.f32.gmra.mxu0 %v5184_v5  ;;  %v5210_v19 = vld [vmem:[%s4017_s5 + $0x90] sm:$0xff] }
 0x190   : > { %v5197_v32 = vmul.f32 %v3531_v3, %v5179_v38  ;;  %v1283_v29 = vadd.f32 %v1282_v1, %v4599_v48  ;;  %2126 = vmatmul.f32.gmra.mxu1 %v5184_v5  ;;  %6300 = vst [vmem:[#allocation143_spill] sm:$0xff] %v5210_v19 }
 0x191   : > { %3534 = vpow2.f32 %v1628_v44  ;;  %1516 = vmatmul.f32.gmra.mxu3 %v3795_v42  ;;  %v1247_v57 = vadd.f32 %v1246_v14, %v4636_v2  ;;  %v1356_v26 = vpop.f32.mrf.mxu2  ;;  %v3796_v42 = vld [vmem:[%s4012_s28 + $0x90] sm:$0xff] }
 0x192   : > { %v1227_v46 = vadd.f32 %v5197_v32, %v5191_v53  ;;  %v1284_v51 = vadd.f32 %v1283_v29, %v4642_v0  ;;  %v1564_v17 = vmul.f32 2.0, %v1356_v26 }
 0x193   : > { %v1248_v18 = vadd.f32 %v1247_v57, %v4689_v31  ;;  %v5207_v21 = vpop.f32.mrf.mxu0 }
 0x194   : > { %v1469_v40 = vpop.f32.mrf.mxu3  ;;  %1228 = vadd.xlane.f32.xlu1 %v1227_v46  ;;  %v1285_v48 = vadd.f32 %v1284_v51, %v4692_v24  ;;  %1180 = vadd.xlane.f32.xlu0 %v1179_v10  ;;  %v3533_v6 = vpop.eup %3532  ;;  %v1630_v1 = vmul.f32 1.442695, %v1564_v17 }
 0x195   : > { %v1565_v22 = vmul.f32 2.0, %v1469_v40  ;;  %v1249_v2 = vadd.f32 %v1248_v18, %v4734_v35  ;;  %v5213_v0 = vpop.f32.mrf.mxu1  ;;  %v1754_v14 = vmul.f32 %v3533_v6, %v4498_v39 }
 0x196   : > { %v1286_v31 = vadd.f32 %v1285_v48, %v4737_v36  ;;  %3536 = vpow2.f32 %v1630_v1 }
 0x197   : > { %v3535_v3 = vpop.eup %3534  ;;  %v1632_v44 = vmul.f32 1.442695, %v1565_v22  ;;  %v1250_v24 = vadd.f32 %v1249_v2, %v4772_v23  ;;  %1406 = vmatmul.f32.gmra.mxu2 %v3796_v42  ;;  %2016 = vmatmul.f32.gmra.mxu0 %v5210_v19 }
 0x198   : > { %v1755_v10 = vmul.f32 %v3535_v3, %v4501_v52  ;;  %v1287_v35 = vadd.f32 %v1286_v31, %v4780_v33  ;;  %2129 = vmatmul.f32.gmra.mxu1 %v5210_v19  ;;  %v2172_v33 = vmul.f32 2.0, %v5145_v45  ;;  %v3797_v3 = vld [vmem:[%s4012_s28 + $0x98] sm:$0xff] }
 0x199   : > { %3538 = vpow2.f32 %v1632_v44  ;;  %1519 = vmatmul.f32.gmra.mxu3 %v3796_v42  ;;  %v1251_v36 = vadd.f32 %v1250_v24, %v4817_v61  ;;  %v1359_v23 = vpop.f32.mrf.mxu2  ;;  %v5232_v61 = vld [vmem:[%s4017_s5 + $0x98] sm:$0xff] }
 0x19a   : > { %v1818_v29 = vadd.f32 %v1755_v10, %v1754_v14  ;;  %v1288_v57 = vadd.f32 %v1287_v35, %v4825_v34  ;;  %v1566_v51 = vmul.f32 2.0, %v1359_v23  ;;  %6301 = vst [vmem:[#allocation144_spill] sm:$0xff] %v5232_v61  ;;  %v2174_v34 = vmul.f32 2.0, %v5181_v8 }
 0x19b   : > { %v1252_v46 = vadd.f32 %v1251_v36, %v4862_v27  ;;  %v2236_v44 = vmul.f32 1.442695, %v2172_v33  ;;  %v2175_v35 = vmul.f32 2.0, %v5187_v12  ;;  %v2177_v33 = vmul.f32 2.0, %v5213_v0 }
 0x19c   : > { %v1472_v26 = vpop.f32.mrf.mxu3  ;;  %1819 = vadd.xlane.f32.xlu2 %v1818_v29  ;;  %v1289_v18 = vadd.f32 %v1288_v57, %v4870_v37  ;;  %v5229_v48 = vpop.f32.mrf.mxu0  ;;  %v1634_v2 = vmul.f32 1.442695, %v1566_v51  ;;  %v5253_v51 = vld [vmem:[%s4017_s5 + $0xa0] sm:$0xff] }
 0x19d   : > { %v1567_v17 = vmul.f32 2.0, %v1472_v26  ;;  %v1253_v40 = vadd.f32 %v1252_v46, %v4907_v43  ;;  %v3537_v22 = vpop.eup %3536  ;;  %v5236_v6 = vpop.f32.mrf.mxu1  ;;  %6302 = vst [vmem:[#allocation145_spill] sm:$0xff] %v5253_v51 }
 0x19e   : > { %v1290_v27 = vadd.f32 %v1289_v18, %v4915_v59  ;;  %v1756_v31 = vmul.f32 %v3537_v22, %v4538_v9  ;;  %3540 = vpow2.f32 %v1634_v2  ;;  %v2173_v59 = vmul.f32 2.0, %v5154_v58  ;;  %v3798_v2 = vld [vmem:[%s4012_s28 + $0xa0] sm:$0xff] }
 0x19f   : > { %v3539_v1 = vpop.eup %3538  ;;  %v1636_v37 = vmul.f32 1.442695, %v1567_v17  ;;  %v1254_v45 = vadd.f32 %v1253_v40, %v4951_v55  ;;  %1409 = vmatmul.f32.gmra.mxu2 %v3797_v3  ;;  %2019 = vmatmul.f32.gmra.mxu0 %v5232_v61  ;;  %v2240_v55 = vmul.f32 1.442695, %v2174_v34  ;;  %v2242_v22 = vmul.f32 1.442695, %v2175_v35 }
 0x1a0   : > { %v1291_v43 = vadd.f32 %v1290_v27, %v4959_v50  ;;  %v1757_v8 = vmul.f32 %v3539_v1, %v4541_v41  ;;  %2132 = vmatmul.f32.gmra.mxu1 %v5232_v61 }
 0x1a1   : > { %3542 = vpow2.f32 %v1636_v37  ;;  %v1255_v14 = vadd.f32 %v1254_v45, %v4995_v15  ;;  %1522 = vmatmul.f32.gmra.mxu3 %v3797_v3  ;;  %v1362_v10 = vpop.f32.mrf.mxu2  ;;  %v2238_v15 = vmul.f32 1.442695, %v2173_v59  ;;  %v2178_v45 = vmul.f32 2.0, %v5229_v48 }
 0x1a2   : > { %v1292_v24 = vadd.f32 %v1291_v43, %v5003_v20  ;;  %v1821_v50 = vadd.f32 %v1757_v8, %v1756_v31  ;;  %v1568_v29 = vmul.f32 2.0, %v1362_v10  ;;  %3544 = vpow2.f32 %v2236_v44 }
 0x1a3   : > { %v1256_v42 = vadd.f32 %v1255_v14, %v5038_v25  ;;  %3546 = vpow2.f32 %v2240_v55  ;;  %v2176_v25 = vmul.f32 2.0, %v5207_v21  ;;  %v2179_v3 = vmul.f32 2.0, %v5236_v6  ;;  %v5276_v55 = vld [vmem:[%s4017_s5 + $0xa8] sm:$0xff] }
 0x1a4   : > { %v1293_v36 = vadd.f32 %v1292_v24, %v5044_v7  ;;  %v1475_v58 = vpop.f32.mrf.mxu3  ;;  %1822 = vadd.xlane.f32.xlu0 %v1821_v50  ;;  %v1975_v46 = vpop.f32.mrf.mxu0  ;;  %v1638_v26 = vmul.f32 1.442695, %v1568_v29  ;;  %6303 = vst [vmem:[#allocation146_spill] sm:$0xff] %v5276_v55  ;;  %v6304_v29 = vld [vmem:[#allocation62_spill] sm:$0xff] }
 0x1a5   : > { %v1257_v57 = vadd.f32 %v1256_v42, %v5080_v11  ;;  %v1569_v23 = vmul.f32 2.0, %v1475_v58  ;;  %v3541_v20 = vpop.eup %3540  ;;  %v2088_v7 = vpop.f32.mrf.mxu1  ;;  %v2180_v44 = vmul.f32 2.0, %v1975_v46  ;;  %v2250_v35 = vmul.f32 1.442695, %v2179_v3  ;;  %v6306_v3 = vld [vmem:[#allocation68_spill] sm:$0xff] }
 0x1a6   : > { %v1294_v12 = vadd.f32 %v1293_v36, %v5086_v4  ;;  %v1758_v11 = vmul.f32 %v3541_v20, %v4578_v62  ;;  %3548 = vpow2.f32 %v1638_v26  ;;  %v2181_v48 = vmul.f32 2.0, %v2088_v7  ;;  %v3799_v36 = vld [vmem:[%s4012_s28 + $0xa8] sm:$0xff] }
 0x1a7   : > { %v3543_v18 = vpop.eup %3542  ;;  %v1258_v17 = vadd.f32 %v1257_v57, %v5120_v16  ;;  %v1640_v40 = vmul.f32 1.442695, %v1569_v23  ;;  %1412 = vmatmul.f32.gmra.mxu2 %v3798_v2  ;;  %2022 = vmatmul.f32.gmra.mxu0 %v5253_v51  ;;  %v2244_v16 = vmul.f32 1.442695, %v2176_v25  ;;  %v2252_v57 = vmul.f32 1.442695, %v2180_v44  ;;  %v5285_v25 = vpop.xlane.xlu0 %1135 }
 0x1a8   : > { %v1295_v34 = vadd.f32 %v1294_v12, %v5126_v30  ;;  %v1759_v4 = vmul.f32 %v3543_v18, %v4581_v13  ;;  %2135 = vmatmul.f32.gmra.mxu1 %v5253_v51  ;;  %v3545_v1 = vpop.eup %3544  ;;  %v2246_v30 = vmul.f32 1.442695, %v2177_v33  ;;  %v2254_v12 = vmul.f32 1.442695, %v2181_v48  ;;  %v3800_v44 = vld [vmem:[%s4012_s28 + $0xb0] sm:$0xff] }
 0x1a9   : > { %v1259_v21 = vadd.f32 %v1258_v17, %v5160_v28  ;;  %3550 = vpow2.f32 %v1640_v40  ;;  %1525 = vmatmul.f32.gmra.mxu3 %v3798_v2  ;;  %v1365_v31 = vpop.f32.mrf.mxu2  ;;  %v3547_v43 = vpop.eup %3546  ;;  %v2364_v46 = vmul.f32 %v3545_v1, %v4498_v39 }
 0x1aa   : > { %v1296_v0 = vadd.f32 %v1295_v34, %v5165_v47  ;;  %v1824_v27 = vadd.f32 %v1759_v4, %v1758_v11  ;;  %3552 = vpow2.f32 %v2238_v15  ;;  %v1570_v8 = vmul.f32 2.0, %v1365_v31 }
 0x1ab   : > { %v5268_v37 = vadd.f32 %v1259_v21, %v5191_v53  ;;  %3554 = vpow2.f32 %v2242_v22  ;;  %v2366_v20 = vmul.f32 %v3547_v43, %v4538_v9  ;;  %v5289_v9 = vpop.xlane.xlu2 %1186  ;;  %v5292_v21 = vld [vmem:[%s4017_s5 + $0xb0] sm:$0xff] }
 0x1ac   : > { %v5272_v28 = vadd.f32 %v1296_v0, %v5197_v32  ;;  %v1478_v47 = vpop.f32.mrf.mxu3  ;;  %1825 = vadd.xlane.f32.xlu1 %v1824_v27  ;;  %v1978_v14 = vpop.f32.mrf.mxu0  ;;  %3556 = vpow2.f32 %v2244_v16  ;;  %v1642_v24 = vmul.f32 1.442695, %v1570_v8  ;;  %v2248_v32 = vmul.f32 1.442695, %v2178_v45  ;;  %6305 = vst [vmem:[#allocation62_spill] sm:$0xff] %v5292_v21 }
 0x1ad   : > { %v1571_v59 = vmul.f32 2.0, %v1478_v47  ;;  %v3549_v53 = vpop.eup %3548  ;;  %v2091_v50 = vpop.f32.mrf.mxu1  ;;  %3558 = vpow2.f32 %v2246_v30  ;;  %v2182_v7 = vmul.f32 2.0, %v1978_v14  ;;  %v2428_v0 = vadd.f32 %v2366_v20, %v2364_v46 }
 0x1ae   : > { %v1760_v6 = vmul.f32 %v3549_v53, %v4621_v56  ;;  %3560 = vpow2.f32 %v1642_v24  ;;  %v2183_v17 = vmul.f32 2.0, %v2091_v50 }
 0x1af   : > { %v3551_v42 = vpop.eup %3550  ;;  %v1644_v10 = vmul.f32 1.442695, %v1571_v59  ;;  %1415 = vmatmul.f32.gmra.mxu2 %v3799_v36  ;;  %2025 = vmatmul.f32.gmra.mxu0 %v5276_v55  ;;  %v2256_v31 = vmul.f32 1.442695, %v2182_v7  ;;  %v6307_v59 = vld [vmem:[#allocation69_spill] sm:$0xff] }
 0x1b0   : > { %v1761_v58 = vmul.f32 %v3551_v42, %v6304_v29  ;;  %v3553_v15 = vpop.eup %3552  ;;  %2138 = vmatmul.f32.gmra.mxu1 %v5276_v55  ;;  %v2258_v47 = vmul.f32 1.442695, %v2183_v17 }
 0x1b1   : > { %3562 = vpow2.f32 %v1644_v10  ;;  %1528 = vmatmul.f32.gmra.mxu3 %v3799_v36  ;;  %v3555_v23 = vpop.eup %3554  ;;  %v1368_v18 = vpop.f32.mrf.mxu2  ;;  %v2365_v34 = vmul.f32 %v3553_v15, %v4501_v52 }
 0x1b2   : > { %v1827_v26 = vadd.f32 %v1761_v58, %v1760_v6  ;;  %3564 = vpow2.f32 %v2248_v32  ;;  %v3557_v33 = vpop.eup %3556  ;;  %v1572_v40 = vmul.f32 2.0, %v1368_v18  ;;  %v2367_v39 = vmul.f32 %v3555_v23, %v4541_v41  ;;  %v5301_v10 = vpop.xlane.xlu1 %1183  ;;  %v5310_v18 = vld [vmem:[%s4017_s5 + $0xb8] sm:$0xff] }
 0x1b3   : > { %3566 = vpow2.f32 %v2250_v35  ;;  %v3559_v22 = vpop.eup %3558  ;;  %v2368_v8 = vmul.f32 %v3557_v33, %v4578_v62  ;;  %v5303_v15 = vpop.xlane.xlu0 %1138  ;;  %6308 = vst [vmem:[#allocation68_spill] sm:$0xff] %v5310_v18 }
 0x1b4   : > { %v1481_v11 = vpop.f32.mrf.mxu3  ;;  %1828 = vadd.xlane.f32.xlu2 %v1827_v26  ;;  %3568 = vpow2.f32 %v2252_v57  ;;  %v1981_v4 = vpop.f32.mrf.mxu0  ;;  %v1646_v27 = vmul.f32 1.442695, %v1572_v40  ;;  %v2465_v48 = vadd.f32 %v2367_v39, %v2365_v34  ;;  %v2369_v24 = vmul.f32 %v3559_v22, %v4581_v13  ;;  %v6309_v39 = vld [vmem:[#allocation75_spill] sm:$0xff] }
 0x1b5   : > { %v1573_v2 = vmul.f32 2.0, %v1481_v11  ;;  %v3561_v16 = vpop.eup %3560  ;;  %3570 = vpow2.f32 %v2254_v12  ;;  %v2184_v1 = vmul.f32 2.0, %v1981_v4  ;;  %v2094_v30 = vpop.f32.mrf.mxu1  ;;  %v2429_v58 = vadd.f32 %v2428_v0, %v2368_v8  ;;  %v6310_v0 = vld [vmem:[#allocation76_spill] sm:$0xff] }
 0x1b6   : > { %v2185_v52 = vmul.f32 2.0, %v2094_v30  ;;  %v1762_v41 = vmul.f32 %v3561_v16, %v6306_v3  ;;  %3572 = vpow2.f32 %v1646_v27  ;;  %v2466_v46 = vadd.f32 %v2465_v48, %v2369_v24  ;;  %v5307_v12 = vpop.xlane.xlu2 %1147  ;;  %v3801_v16 = vld [vmem:[%s4012_s28 + $0xb8] sm:$0xff] }
 0x1b7   : > { %v3563_v45 = vpop.eup %3562  ;;  %v1648_v43 = vmul.f32 1.442695, %v1573_v2  ;;  %1418 = vmatmul.f32.gmra.mxu2 %v3800_v44  ;;  %2028 = vmatmul.f32.gmra.mxu0 %v5292_v21  ;;  %v2260_v42 = vmul.f32 1.442695, %v2184_v1 }
 0x1b8   : > { %v1763_v14 = vmul.f32 %v3563_v45, %v6307_v59  ;;  %v3565_v53 = vpop.eup %3564  ;;  %2141 = vmatmul.f32.gmra.mxu1 %v5292_v21  ;;  %v2262_v6 = vmul.f32 1.442695, %v2185_v52 }
 0x1b9   : > { %3574 = vpow2.f32 %v1648_v43  ;;  %1531 = vmatmul.f32.gmra.mxu3 %v3800_v44  ;;  %v3567_v50 = vpop.eup %3566  ;;  %v2370_v13 = vmul.f32 %v3565_v53, %v4621_v56 }
 0x1ba   : > { %v1830_v32 = vadd.f32 %v1763_v14, %v1762_v41  ;;  %v3569_v62 = vpop.eup %3568  ;;  %3576 = vpow2.f32 %v2256_v31  ;;  %v1371_v35 = vpop.f32.mrf.mxu2  ;;  %v2371_v20 = vmul.f32 %v3567_v50, %v6304_v29 }
 0x1bb   : > { %v3571_v36 = vpop.eup %3570  ;;  %3578 = vpow2.f32 %v2258_v47  ;;  %v1574_v57 = vmul.f32 2.0, %v1371_v35  ;;  %v2430_v4 = vadd.f32 %v2429_v58, %v2370_v13  ;;  %v2372_v29 = vmul.f32 %v3569_v62, %v6306_v3  ;;  %v5319_v3 = vpop.xlane.xlu1 %1141  ;;  %v5324_v62 = vld [vmem:[%s4017_s5 + $0xc0] sm:$0xff] }
 0x1bc   : > { %v1484_v23 = vpop.f32.mrf.mxu3  ;;  %1831 = vadd.xlane.f32.xlu0 %v1830_v32  ;;  %v1984_v7 = vpop.f32.mrf.mxu0  ;;  %3580 = vpow2.f32 %v2260_v42  ;;  %v2467_v30 = vadd.f32 %v2466_v46, %v2371_v20  ;;  %v2373_v45 = vmul.f32 %v3571_v36, %v6307_v59  ;;  %6311 = vst [vmem:[#allocation69_spill] sm:$0xff] %v5324_v62 }
 0x1bd   : > { %v1575_v26 = vmul.f32 2.0, %v1484_v23  ;;  %v3573_v33 = vpop.eup %3572  ;;  %v1650_v17 = vmul.f32 1.442695, %v1574_v57  ;;  %v2186_v40 = vmul.f32 2.0, %v1984_v7  ;;  %v2097_v11 = vpop.f32.mrf.mxu1  ;;  %3582 = vpow2.f32 %v2262_v6 }
 0x1be   : > { %v2187_v34 = vmul.f32 2.0, %v2097_v11  ;;  %v1764_v2 = vmul.f32 %v3573_v33, %v6309_v39  ;;  %v2431_v44 = vadd.f32 %v2430_v4, %v2372_v29  ;;  %v2468_v24 = vadd.f32 %v2467_v30, %v2373_v45  ;;  %v5326_v35 = vpop.xlane.xlu0 %1189  ;;  %v5328_v23 = vpop.xlane.xlu2 %1195 }
 0x1bf   : > { %v3575_v56 = vpop.eup %3574  ;;  %v1652_v22 = vmul.f32 1.442695, %v1575_v26  ;;  %3584 = vpow2.f32 %v1650_v17  ;;  %1421 = vmatmul.f32.gmra.mxu2 %v3801_v16  ;;  %2031 = vmatmul.f32.gmra.mxu0 %v5310_v18  ;;  %v2264_v43 = vmul.f32 1.442695, %v2186_v40  ;;  %v6312_v26 = vld [vmem:[#allocation82_spill] sm:$0xff]  ;;  %v3802_v17 = vld [vmem:[%s4012_s28 + $0xc0] sm:$0xff] }
 0x1c0   : > { %v1765_v27 = vmul.f32 %v3575_v56, %v6310_v0  ;;  %v3577_v1 = vpop.eup %3576  ;;  %2144 = vmatmul.f32.gmra.mxu1 %v5310_v18  ;;  %v2266_v41 = vmul.f32 1.442695, %v2187_v34  ;;  %v6313_v40 = vld [vmem:[#allocation83_spill] sm:$0xff] }
 0x1c1   : > { %3586 = vpow2.f32 %v1652_v22  ;;  %1534 = vmatmul.f32.gmra.mxu3 %v3801_v16  ;;  %v3579_v31 = vpop.eup %3578  ;;  %v2374_v59 = vmul.f32 %v3577_v1, %v6309_v39 }
 0x1c2   : > { %v1833_v52 = vadd.f32 %v1765_v27, %v1764_v2  ;;  %v1374_v8 = vpop.f32.mrf.mxu2  ;;  %v3581_v47 = vpop.eup %3580  ;;  %v2375_v50 = vmul.f32 %v3579_v31, %v6310_v0  ;;  %3588 = vpow2.f32 %v2264_v43  ;;  %v5340_v43 = vld [vmem:[%s4017_s5 + $0xc8] sm:$0xff] }
 0x1c3   : > { %v1576_v14 = vmul.f32 2.0, %v1374_v8  ;;  %v3583_v48 = vpop.eup %3582  ;;  %3590 = vpow2.f32 %v2266_v41  ;;  %v2432_v56 = vadd.f32 %v2431_v44, %v2374_v59  ;;  %v2376_v39 = vmul.f32 %v3581_v47, %v6312_v26  ;;  %v5337_v30 = vpop.xlane.xlu1 %1144  ;;  %6314 = vst [vmem:[#allocation75_spill] sm:$0xff] %v5340_v43 }
 0x1c4   : > { %v1487_v53 = vpop.f32.mrf.mxu3  ;;  %1834 = vadd.xlane.f32.xlu1 %v1833_v52  ;;  %v1987_v32 = vpop.f32.mrf.mxu0  ;;  %v2469_v22 = vadd.f32 %v2468_v24, %v2375_v50  ;;  %v2377_v2 = vmul.f32 %v3583_v48, %v6313_v40  ;;  %v6315_v24 = vld [vmem:[#allocation89_spill] sm:$0xff] }
 0x1c5   : > { %v1577_v42 = vmul.f32 2.0, %v1487_v53  ;;  %v3585_v6 = vpop.eup %3584  ;;  %v1654_v36 = vmul.f32 1.442695, %v1576_v14  ;;  %v2188_v58 = vmul.f32 2.0, %v1987_v32  ;;  %v2100_v13 = vpop.f32.mrf.mxu1  ;;  %v2433_v41 = vadd.f32 %v2432_v56, %v2376_v39 }
 0x1c6   : > { %v2189_v20 = vmul.f32 2.0, %v2100_v13  ;;  %v1766_v7 = vmul.f32 %v3585_v6, %v6312_v26  ;;  %v2470_v8 = vadd.f32 %v2469_v22, %v2377_v2  ;;  %v5342_v47 = vpop.xlane.xlu0 %1198  ;;  %v5345_v50 = vpop.xlane.xlu2 %1150 }
 0x1c7   : > { %v3587_v57 = vpop.eup %3586  ;;  %v1656_v46 = vmul.f32 1.442695, %v1577_v42  ;;  %3592 = vpow2.f32 %v1654_v36  ;;  %v2268_v33 = vmul.f32 1.442695, %v2188_v58  ;;  %1424 = vmatmul.f32.gmra.mxu2 %v3802_v17  ;;  %2034 = vmatmul.f32.gmra.mxu0 %v5324_v62  ;;  %v6316_v58 = vld [vmem:[#allocation90_spill] sm:$0xff] }
 0x1c8   : > { %v1767_v11 = vmul.f32 %v3587_v57, %v6313_v40  ;;  %v2270_v34 = vmul.f32 1.442695, %v2189_v20  ;;  %2147 = vmatmul.f32.gmra.mxu1 %v5324_v62  ;;  %v3589_v16 = vpop.eup %3588  ;;  %v6317_v40 = vld [vmem:[#allocation96_spill] sm:$0xff] }
 0x1c9   : > { %3594 = vpow2.f32 %v1656_v46  ;;  %1537 = vmatmul.f32.gmra.mxu3 %v3802_v17  ;;  %v3591_v1 = vpop.eup %3590  ;;  %v2378_v59 = vmul.f32 %v3589_v16, %v6315_v24  ;;  %v3803_v46 = vld [vmem:[%s4012_s28 + $0xc8] sm:$0xff] }
 0x1ca   : > { %3596 = vpow2.f32 %v2268_v33  ;;  %v1836_v4 = vadd.f32 %v1767_v11, %v1766_v7  ;;  %v1377_v29 = vpop.f32.mrf.mxu2  ;;  %v2379_v13 = vmul.f32 %v3591_v1, %v6316_v58 }
 0x1cb   : > { %3598 = vpow2.f32 %v2270_v34  ;;  %v1578_v0 = vmul.f32 2.0, %v1377_v29  ;;  %v2434_v17 = vadd.f32 %v2433_v41, %v2378_v59  ;;  %v6318_v34 = vld [vmem:[#allocation97_spill] sm:$0xff] }
 0x1cc   : > { %v1490_v27 = vpop.f32.mrf.mxu3  ;;  %1837 = vadd.xlane.f32.xlu2 %v1836_v4  ;;  %v1990_v31 = vpop.f32.mrf.mxu0  ;;  %v2471_v22 = vadd.f32 %v2470_v8, %v2379_v13  ;;  %v6320_v13 = vld [vmem:[#allocation103_spill] sm:$0xff] }
 0x1cd   : > { %v1579_v45 = vmul.f32 2.0, %v1490_v27  ;;  %v3593_v52 = vpop.eup %3592  ;;  %v1658_v44 = vmul.f32 1.442695, %v1578_v0  ;;  %v2190_v14 = vmul.f32 2.0, %v1990_v31  ;;  %v2103_v53 = vpop.f32.mrf.mxu1  ;;  %v5356_v0 = vld [vmem:[%s4017_s5 + $0xd0] sm:$0xff] }
 0x1ce   : > { %v2191_v32 = vmul.f32 2.0, %v2103_v53  ;;  %v1768_v6 = vmul.f32 %v3593_v52, %v6315_v24  ;;  %6319 = vst [vmem:[#allocation76_spill] sm:$0xff] %v5356_v0  ;;  %v5358_v1 = vpop.xlane.xlu0 %1153 }
 0x1cf   : > { %v3595_v48 = vpop.eup %3594  ;;  %v1660_v42 = vmul.f32 1.442695, %v1579_v45  ;;  %3600 = vpow2.f32 %v1658_v44  ;;  %v2272_v57 = vmul.f32 1.442695, %v2190_v14  ;;  %1427 = vmatmul.f32.gmra.mxu2 %v3803_v46  ;;  %2037 = vmatmul.f32.gmra.mxu0 %v5340_v43  ;;  %v5360_v44 = vpop.xlane.xlu1 %1192 }
 0x1d0   : > { %v3597_v36 = vpop.eup %3596  ;;  %v1769_v20 = vmul.f32 %v3595_v48, %v6316_v58  ;;  %v2274_v7 = vmul.f32 1.442695, %v2191_v32  ;;  %2150 = vmatmul.f32.gmra.mxu1 %v5340_v43  ;;  %v3804_v32 = vld [vmem:[%s4012_s28 + $0xd0] sm:$0xff]  ;;  %v5366_v58 = vpop.xlane.xlu2 %1204 }
 0x1d1   : > { %v3599_v26 = vpop.eup %3598  ;;  %3602 = vpow2.f32 %v1660_v42  ;;  %1540 = vmatmul.f32.gmra.mxu3 %v3803_v46  ;;  %v2380_v11 = vmul.f32 %v3597_v36, %v6317_v40 }
 0x1d2   : > { %3604 = vpow2.f32 %v2272_v57  ;;  %v1839_v33 = vadd.f32 %v1769_v20, %v1768_v6  ;;  %v1380_v56 = vpop.f32.mrf.mxu2  ;;  %v2381_v39 = vmul.f32 %v3599_v26, %v6318_v34  ;;  %v6321_v20 = vld [vmem:[#allocation104_spill] sm:$0xff] }
 0x1d3   : > { %3606 = vpow2.f32 %v2274_v7  ;;  %v1580_v2 = vmul.f32 2.0, %v1380_v56  ;;  %v2435_v8 = vadd.f32 %v2434_v17, %v2380_v11 }
 0x1d4   : > { %v1493_v4 = vpop.f32.mrf.mxu3  ;;  %1840 = vadd.xlane.f32.xlu0 %v1839_v33  ;;  %v1993_v16 = vpop.f32.mrf.mxu0  ;;  %v2472_v59 = vadd.f32 %v2471_v22, %v2381_v39  ;;  %v5372_v39 = vld [vmem:[%s4017_s5 + $0xd8] sm:$0xff] }
 0x1d5   : > { %v1581_v29 = vmul.f32 2.0, %v1493_v4  ;;  %v3601_v27 = vpop.eup %3600  ;;  %v1662_v45 = vmul.f32 1.442695, %v1580_v2  ;;  %v2192_v31 = vmul.f32 2.0, %v1993_v16  ;;  %v2106_v52 = vpop.f32.mrf.mxu1  ;;  %6322 = vst [vmem:[#allocation82_spill] sm:$0xff] %v5372_v39 }
 0x1d6   : > { %v2193_v53 = vmul.f32 2.0, %v2106_v52  ;;  %v1770_v48 = vmul.f32 %v3601_v27, %v6317_v40 }
 0x1d7   : > { %v3603_v41 = vpop.eup %3602  ;;  %v1664_v14 = vmul.f32 1.442695, %v1581_v29  ;;  %3608 = vpow2.f32 %v1662_v45  ;;  %v2276_v42 = vmul.f32 1.442695, %v2192_v31  ;;  %1430 = vmatmul.f32.gmra.mxu2 %v3804_v32  ;;  %2040 = vmatmul.f32.gmra.mxu0 %v5356_v0  ;;  %v5374_v45 = vpop.xlane.xlu1 %1201 }
 0x1d8   : > { %v3605_v24 = vpop.eup %3604  ;;  %v1771_v6 = vmul.f32 %v3603_v41, %v6318_v34  ;;  %v2278_v46 = vmul.f32 1.442695, %v2193_v53  ;;  %2153 = vmatmul.f32.gmra.mxu1 %v5356_v0 }
 0x1d9   : > { %v3607_v36 = vpop.eup %3606  ;;  %v2382_v57 = vmul.f32 %v3605_v24, %v6320_v13  ;;  %3610 = vpow2.f32 %v1664_v14  ;;  %1543 = vmatmul.f32.gmra.mxu3 %v3804_v32  ;;  %v5377_v14 = vpop.xlane.xlu0 %1207 }
 0x1da   : > { %v2383_v26 = vmul.f32 %v3607_v36, %v6321_v20  ;;  %3612 = vpow2.f32 %v2276_v42  ;;  %v1842_v7 = vadd.f32 %v1771_v6, %v1770_v48  ;;  %v1383_v17 = vpop.f32.mrf.mxu2  ;;  %v3805_v48 = vld [vmem:[%s4012_s28 + $0xd8] sm:$0xff]  ;;  %v5383_v6 = vpop.xlane.xlu2 %1159 }
 0x1db   : > { %v2436_v33 = vadd.f32 %v2435_v8, %v2382_v57  ;;  %3614 = vpow2.f32 %v2278_v46  ;;  %v1582_v11 = vmul.f32 2.0, %v1383_v17  ;;  %v6323_v42 = vld [vmem:[#allocation110_spill] sm:$0xff] }
 0x1dc   : > { %v2473_v40 = vadd.f32 %v2472_v59, %v2383_v26  ;;  %v1496_v56 = vpop.f32.mrf.mxu3  ;;  %1843 = vadd.xlane.f32.xlu1 %v1842_v7  ;;  %v1996_v34 = vpop.f32.mrf.mxu0 }
 0x1dd   : > { %v1583_v22 = vmul.f32 2.0, %v1496_v56  ;;  %v3609_v2 = vpop.eup %3608  ;;  %v1666_v4 = vmul.f32 1.442695, %v1582_v11  ;;  %v2194_v29 = vmul.f32 2.0, %v1996_v34  ;;  %v2109_v16 = vpop.f32.mrf.mxu1  ;;  %v5388_v34 = vld [vmem:[%s4017_s5 + $0xe0] sm:$0xff] }
 0x1de   : > { %v2195_v52 = vmul.f32 2.0, %v2109_v16  ;;  %v1772_v41 = vmul.f32 %v3609_v2, %v6320_v13  ;;  %v6324_v13 = vld [vmem:[#allocation111_spill] sm:$0xff]  ;;  %6325 = vst [vmem:[#allocation83_spill] sm:$0xff] %v5388_v34 }
 0x1df   : > { %v3611_v27 = vpop.eup %3610  ;;  %v1668_v31 = vmul.f32 1.442695, %v1583_v22  ;;  %3616 = vpow2.f32 %v1666_v4  ;;  %v2280_v53 = vmul.f32 1.442695, %v2194_v29  ;;  %1433 = vmatmul.f32.gmra.mxu2 %v3805_v48  ;;  %2043 = vmatmul.f32.gmra.mxu0 %v5372_v39 }
 0x1e0   : > { %v3613_v8 = vpop.eup %3612  ;;  %v1773_v24 = vmul.f32 %v3611_v27, %v6321_v20  ;;  %v2282_v36 = vmul.f32 1.442695, %v2195_v52  ;;  %2156 = vmatmul.f32.gmra.mxu1 %v5372_v39 }
 0x1e1   : > { %v3615_v59 = vpop.eup %3614  ;;  %v2384_v32 = vmul.f32 %v3613_v8, %v6323_v42  ;;  %3618 = vpow2.f32 %v1668_v31  ;;  %1546 = vmatmul.f32.gmra.mxu3 %v3805_v48  ;;  %v5390_v31 = vpop.xlane.xlu1 %1156  ;;  %v3806_v48 = vld [vmem:[%s4012_s28 + $0xe0] sm:$0xff] }
 0x1e2   : > { %v2385_v57 = vmul.f32 %v3615_v59, %v6324_v13  ;;  %3620 = vpow2.f32 %v2280_v53  ;;  %v1845_v46 = vadd.f32 %v1773_v24, %v1772_v41  ;;  %v1386_v7 = vpop.f32.mrf.mxu2  ;;  %v5393_v8 = vpop.xlane.xlu0 %1162 }
 0x1e3   : > { %v2437_v26 = vadd.f32 %v2436_v33, %v2384_v32  ;;  %3622 = vpow2.f32 %v2282_v36  ;;  %v1584_v20 = vmul.f32 2.0, %v1386_v7  ;;  %v6326_v32 = vld [vmem:[#allocation117_spill] sm:$0xff] }
 0x1e4   : > { %v2474_v17 = vadd.f32 %v2473_v40, %v2385_v57  ;;  %v1499_v11 = vpop.f32.mrf.mxu3  ;;  %1846 = vadd.xlane.f32.xlu2 %v1845_v46  ;;  %v1999_v22 = vpop.f32.mrf.mxu0 }
 0x1e5   : > { %v1585_v56 = vmul.f32 2.0, %v1499_v11  ;;  %v3617_v2 = vpop.eup %3616  ;;  %v1670_v4 = vmul.f32 1.442695, %v1584_v20  ;;  %v2196_v29 = vmul.f32 2.0, %v1999_v22  ;;  %v2112_v16 = vpop.f32.mrf.mxu1 }
 0x1e6   : > { %v2197_v33 = vmul.f32 2.0, %v2112_v16  ;;  %v1774_v41 = vmul.f32 %v3617_v2, %v6323_v42  ;;  %v6327_v42 = vld [vmem:[#allocation118_spill] sm:$0xff]  ;;  %v5401_v11 = vpop.xlane.xlu2 %1213  ;;  %v5404_v16 = vld [vmem:[%s4017_s5 + $0xe8] sm:$0xff] }
 0x1e7   : > { %v3619_v27 = vpop.eup %3618  ;;  %v1672_v52 = vmul.f32 1.442695, %v1585_v56  ;;  %3624 = vpow2.f32 %v1670_v4  ;;  %v2284_v53 = vmul.f32 1.442695, %v2196_v29  ;;  %1436 = vmatmul.f32.gmra.mxu2 %v3806_v48  ;;  %2046 = vmatmul.f32.gmra.mxu0 %v5388_v34  ;;  %6328 = vst [vmem:[#allocation89_spill] sm:$0xff] %v5404_v16 }
 0x1e8   : > { %v3621_v40 = vpop.eup %3620  ;;  %v1775_v24 = vmul.f32 %v3619_v27, %v6324_v13  ;;  %v2286_v57 = vmul.f32 1.442695, %v2197_v33  ;;  %2159 = vmatmul.f32.gmra.mxu1 %v5388_v34 }
 0x1e9   : > { %v3623_v59 = vpop.eup %3622  ;;  %v2386_v36 = vmul.f32 %v3621_v40, %v6326_v32  ;;  %3626 = vpow2.f32 %v1672_v52  ;;  %1549 = vmatmul.f32.gmra.mxu3 %v3806_v48 }
 0x1ea   : > { %v2387_v46 = vmul.f32 %v3623_v59, %v6327_v42  ;;  %3628 = vpow2.f32 %v2284_v53  ;;  %v1848_v7 = vadd.f32 %v1775_v24, %v1774_v41  ;;  %v1389_v56 = vpop.f32.mrf.mxu2  ;;  %v3807_v59 = vld [vmem:[%s4012_s28 + $0xe8] sm:$0xff] }
 0x1eb   : > { %v2438_v20 = vadd.f32 %v2437_v26, %v2386_v36  ;;  %3630 = vpow2.f32 %v2286_v57  ;;  %v1586_v13 = vmul.f32 2.0, %v1389_v56 }
 0x1ec   : > { %v2475_v22 = vadd.f32 %v2474_v17, %v2387_v46  ;;  %v1502_v2 = vpop.f32.mrf.mxu3  ;;  %1849 = vadd.xlane.f32.xlu0 %v1848_v7  ;;  %v2002_v29 = vpop.f32.mrf.mxu0  ;;  %v6329_v7 = vld [vmem:[#allocation124_spill] sm:$0xff] }
 0x1ed   : > { %v1587_v4 = vmul.f32 2.0, %v1502_v2  ;;  %v3625_v27 = vpop.eup %3624  ;;  %v1674_v52 = vmul.f32 1.442695, %v1586_v13  ;;  %v2198_v33 = vmul.f32 2.0, %v2002_v29  ;;  %v2115_v40 = vpop.f32.mrf.mxu1 }
 0x1ee   : > { %v2199_v26 = vmul.f32 2.0, %v2115_v40  ;;  %v1776_v48 = vmul.f32 %v3625_v27, %v6326_v32  ;;  %v5410_v46 = vpop.xlane.xlu1 %1210  ;;  %v6330_v32 = vld [vmem:[#allocation125_spill] sm:$0xff] }
 0x1ef   : > { %v3627_v53 = vpop.eup %3626  ;;  %v1676_v41 = vmul.f32 1.442695, %v1587_v4  ;;  %3632 = vpow2.f32 %v1674_v52  ;;  %v2288_v17 = vmul.f32 1.442695, %v2198_v33  ;;  %1439 = vmatmul.f32.gmra.mxu2 %v3807_v59  ;;  %2049 = vmatmul.f32.gmra.mxu0 %v5404_v16  ;;  %v5415_v4 = vpop.xlane.xlu0 %1216 }
 0x1f0   : > { %v3629_v24 = vpop.eup %3628  ;;  %v1777_v36 = vmul.f32 %v3627_v53, %v6327_v42  ;;  %v2290_v13 = vmul.f32 1.442695, %v2199_v26  ;;  %2162 = vmatmul.f32.gmra.mxu1 %v5404_v16  ;;  %v5417_v42 = vpop.xlane.xlu2 %1168 }
 0x1f1   : > { %v3631_v57 = vpop.eup %3630  ;;  %v2388_v56 = vmul.f32 %v3629_v24, %v6329_v7  ;;  %3634 = vpow2.f32 %v1676_v41  ;;  %1552 = vmatmul.f32.gmra.mxu3 %v3807_v59  ;;  %v5420_v24 = vld [vmem:[%s4017_s5 + $0xf0] sm:$0xff] }
 0x1f2   : > { %v2389_v2 = vmul.f32 %v3631_v57, %v6330_v32  ;;  %3636 = vpow2.f32 %v2288_v17  ;;  %v1851_v29 = vadd.f32 %v1777_v36, %v1776_v48  ;;  %v1392_v52 = vpop.f32.mrf.mxu2  ;;  %6331 = vst [vmem:[#allocation90_spill] sm:$0xff] %v5420_v24 }
 0x1f3   : > { %v2439_v27 = vadd.f32 %v2438_v20, %v2388_v56  ;;  %3638 = vpow2.f32 %v2290_v13  ;;  %v1588_v40 = vmul.f32 2.0, %v1392_v52  ;;  %v3808_v13 = vld [vmem:[%s4012_s28 + $0xf0] sm:$0xff] }
 0x1f4   : > { %v2476_v33 = vadd.f32 %v2475_v22, %v2389_v2  ;;  %v1505_v53 = vpop.f32.mrf.mxu3  ;;  %1852 = vadd.xlane.f32.xlu1 %v1851_v29  ;;  %v2005_v26 = vpop.f32.mrf.mxu0 }
 0x1f5   : > { %v1589_v41 = vmul.f32 2.0, %v1505_v53  ;;  %v3633_v59 = vpop.eup %3632  ;;  %v1678_v57 = vmul.f32 1.442695, %v1588_v40  ;;  %v2200_v16 = vmul.f32 2.0, %v2005_v26  ;;  %v2118_v34 = vpop.f32.mrf.mxu1  ;;  %v6332_v40 = vld [vmem:[#allocation130_spill] sm:$0xff] }
 0x1f6   : > { %v2201_v20 = vmul.f32 2.0, %v2118_v34  ;;  %v1778_v36 = vmul.f32 %v3633_v59, %v6329_v7  ;;  %v5426_v52 = vpop.xlane.xlu1 %1165  ;;  %v6333_v34 = vld [vmem:[#allocation132_spill] sm:$0xff] }
 0x1f7   : > { %v3635_v17 = vpop.eup %3634  ;;  %v1680_v48 = vmul.f32 1.442695, %v1589_v41  ;;  %3640 = vpow2.f32 %v1678_v57  ;;  %v2292_v22 = vmul.f32 1.442695, %v2200_v16  ;;  %1442 = vmatmul.f32.gmra.mxu2 %v3808_v13  ;;  %2052 = vmatmul.f32.gmra.mxu0 %v5420_v24  ;;  %v5431_v16 = vpop.xlane.xlu0 %1171 }
 0x1f8   : > { %v3637_v56 = vpop.eup %3636  ;;  %v1779_v2 = vmul.f32 %v3635_v17, %v6330_v32  ;;  %v2294_v26 = vmul.f32 1.442695, %v2201_v20  ;;  %2165 = vmatmul.f32.gmra.mxu1 %v5420_v24 }
 0x1f9   : > { %v3639_v29 = vpop.eup %3638  ;;  %v2390_v53 = vmul.f32 %v3637_v56, %v6332_v40  ;;  %3642 = vpow2.f32 %v1680_v48  ;;  %1555 = vmatmul.f32.gmra.mxu3 %v3808_v13  ;;  %v5433_v48 = vpop.xlane.xlu2 %1222  ;;  %v5436_v13 = vld [vmem:[%s4017_s5 + $0xf8] sm:$0xff] }
 0x1fa   : > { %v2391_v7 = vmul.f32 %v3639_v29, %v6333_v34  ;;  %3644 = vpow2.f32 %v2292_v22  ;;  %v1854_v41 = vadd.f32 %v1779_v2, %v1778_v36  ;;  %v1395_v32 = vpop.f32.mrf.mxu2  ;;  %6334 = vst [vmem:[#allocation96_spill] sm:$0xff] %v5433_v48 }
 0x1fb   : > { %v2440_v59 = vadd.f32 %v2439_v27, %v2390_v53  ;;  %3646 = vpow2.f32 %v2294_v26  ;;  %v1590_v17 = vmul.f32 2.0, %v1395_v32  ;;  %6335 = vst [vmem:[#allocation97_spill] sm:$0xff] %v5436_v13  ;;  %v3809_v26 = vld [vmem:[%s4012_s28 + $0xf8] sm:$0xff] }
 0x1fc   : > { %v2477_v57 = vadd.f32 %v2476_v33, %v2391_v7  ;;  %v1508_v39 = vpop.f32.mrf.mxu3  ;;  %1855 = vadd.xlane.f32.xlu2 %v1854_v41  ;;  %v2008_v56 = vpop.f32.mrf.mxu0 }
 0x1fd   : > { %v1591_v20 = vmul.f32 2.0, %v1508_v39  ;;  %v3641_v24 = vpop.eup %3640  ;;  %v1682_v29 = vmul.f32 1.442695, %v1590_v17  ;;  %v2202_v22 = vmul.f32 2.0, %v2008_v56  ;;  %v2121_v0 = vpop.f32.mrf.mxu1 }
 0x1fe   : > { %v2203_v27 = vmul.f32 2.0, %v2121_v0  ;;  %v1780_v2 = vmul.f32 %v3641_v24, %v6332_v40  ;;  %v5445_v40 = vpop.xlane.xlu1 %1219 }
 0x1ff   : > { %v3643_v43 = vpop.eup %3642  ;;  %v1684_v36 = vmul.f32 1.442695, %v1591_v20  ;;  %3648 = vpow2.f32 %v1682_v29  ;;  %v2296_v53 = vmul.f32 1.442695, %v2202_v22  ;;  %1445 = vmatmul.f32.gmra.mxu2 %v3809_v26  ;;  %2055 = vmatmul.f32.gmra.mxu0 %v5436_v13  ;;  %6336 = vst [vmem:[#allocation103_spill] sm:$0xff] %v5445_v40  ;;  %v5447_v29 = vpop.xlane.xlu0 %1225 }
 0x200   : > { %v3645_v33 = vpop.eup %3644  ;;  %v1781_v39 = vmul.f32 %v3643_v43, %v6333_v34  ;;  %v2298_v32 = vmul.f32 1.442695, %v2203_v27  ;;  %2168 = vmatmul.f32.gmra.mxu1 %v5436_v13  ;;  %6337 = vst [vmem:[#allocation104_spill] sm:$0xff] %v5447_v29 }
 0x201   : > { %v3647_v7 = vpop.eup %3646  ;;  %v2392_v41 = vmul.f32 %v3645_v33, %v5110_v49  ;;  %3650 = vpow2.f32 %v1684_v36  ;;  %1558 = vmatmul.f32.gmra.mxu3 %v3809_v26  ;;  %v5449_v27 = vpop.xlane.xlu2 %1177 }
 0x202   : > { %v2393_v0 = vmul.f32 %v3647_v7, %v5117_v63  ;;  %3652 = vpow2.f32 %v2296_v53  ;;  %v1857_v24 = vadd.f32 %v1781_v39, %v1780_v2  ;;  %v1398_v20 = vpop.f32.mrf.mxu2 }
 0x203   : > { %v2441_v17 = vadd.f32 %v2440_v59, %v2392_v41  ;;  %3654 = vpow2.f32 %v2298_v32  ;;  %v1592_v43 = vmul.f32 2.0, %v1398_v20 }
 0x204   : > { %v2478_v56 = vadd.f32 %v2477_v57, %v2393_v0  ;;  %v1511_v34 = vpop.f32.mrf.mxu3  ;;  %1858 = vadd.xlane.f32.xlu0 %v1857_v24  ;;  %v2011_v36 = vpop.f32.mrf.mxu0 }
 0x205   : > { %v1593_v22 = vmul.f32 2.0, %v1511_v34  ;;  %v3649_v33 = vpop.eup %3648  ;;  %v1686_v26 = vmul.f32 1.442695, %v1592_v43  ;;  %v2204_v7 = vmul.f32 2.0, %v2011_v36  ;;  %v2124_v53 = vpop.f32.mrf.mxu1  ;;  %v6338_v34 = vld [vmem:[#allocation141_spill] sm:$0xff] }
 0x206   : > { %v2205_v13 = vmul.f32 2.0, %v2124_v53  ;;  %v1782_v59 = vmul.f32 %v3649_v33, %v5110_v49  ;;  %v5455_v18 = vpop.xlane.xlu1 %1174 }
 0x207   : > { %v3651_v2 = vpop.eup %3650  ;;  %v1688_v39 = vmul.f32 1.442695, %v1593_v22  ;;  %3656 = vpow2.f32 %v1686_v26  ;;  %v2300_v57 = vmul.f32 1.442695, %v2204_v7  ;;  %v5457_v7 = vpop.xlane.xlu0 %1180 }
 0x208   : > { %v3653_v41 = vpop.eup %3652  ;;  %v1783_v32 = vmul.f32 %v3651_v2, %v5117_v63  ;;  %v2302_v20 = vmul.f32 1.442695, %v2205_v13 }
 0x209   : > { %v3655_v0 = vpop.eup %3654  ;;  %v2394_v24 = vmul.f32 %v3653_v41, %v5152_v54  ;;  %3658 = vpow2.f32 %v1688_v39 }
 0x20a   : > { %v2395_v62 = vmul.f32 %v3655_v0, %v6338_v34  ;;  %3660 = vpow2.f32 %v2300_v57  ;;  %v1860_v43 = vadd.f32 %v1783_v32, %v1782_v59  ;;  %v1401_v22 = vpop.f32.mrf.mxu2 }
 0x20b   : > { %v2442_v36 = vadd.f32 %v2441_v17, %v2394_v24  ;;  %3662 = vpow2.f32 %v2302_v20  ;;  %v1594_v49 = vmul.f32 2.0, %v1401_v22  ;;  %v2504_v17 = vld [vmem:[#allocation2] sm:$0xff] }
 0x20c   : > { %v2479_v53 = vadd.f32 %v2478_v56, %v2395_v62  ;;  %v1514_v33 = vpop.f32.mrf.mxu3  ;;  %1861 = vadd.xlane.f32.xlu1 %v1860_v43  ;;  %v2014_v63 = vpop.f32.mrf.mxu0 }
 0x20d   : > { %v1595_v26 = vmul.f32 2.0, %v1514_v33  ;;  %v3657_v2 = vpop.eup %3656  ;;  %v1690_v39 = vmul.f32 1.442695, %v1594_v49  ;;  %v2206_v13 = vmul.f32 2.0, %v2014_v63  ;;  %v2127_v41 = vpop.f32.mrf.mxu1  ;;  %v6339_v33 = vld [vmem:[#allocation48_spill] sm:$0xff]  ;;  %v6340_v63 = vld [vmem:[#allocation49_spill] sm:$0xff] }
 0x20e   : > { %v2207_v59 = vmul.f32 2.0, %v2127_v41  ;;  %v1784_v62 = vmul.f32 %v3657_v2, %v5152_v54 }
 0x20f   : > { %v3659_v0 = vpop.eup %3658  ;;  %v1692_v57 = vmul.f32 1.442695, %v1595_v26  ;;  %v1820_v32 = vpop.xlane.xlu2 %1819  ;;  %3664 = vpow2.f32 %v1690_v39  ;;  %v2304_v24 = vmul.f32 1.442695, %v2206_v13 }
 0x210   : > { %v3661_v56 = vpop.eup %3660  ;;  %v1914_v20 = vadd.f32 %v1820_v32, %v5285_v25  ;;  %v1785_v43 = vmul.f32 %v3659_v0, %v6338_v34  ;;  %v2306_v49 = vmul.f32 1.442695, %v2207_v59 }
 0x211   : > { %v3663_v22 = vpop.eup %3662  ;;  %v2396_v21 = vmul.f32 %v3661_v56, %v6339_v33  ;;  %3666 = vpow2.f32 %v1692_v57 }
 0x212   : > { %v2397_v26 = vmul.f32 %v3663_v22, %v6340_v63  ;;  %3668 = vpow2.f32 %v2304_v24  ;;  %v2536_v41 = vadd.f32 %v2504_v17, %v1914_v20  ;;  %v1863_v55 = vadd.f32 %v1785_v43, %v1784_v62  ;;  %v1404_v54 = vpop.f32.mrf.mxu2  ;;  %v5465_v22 = vpop.xlane.xlu1 %1228 }
 0x213   : > { %v2443_v51 = vadd.f32 %v2442_v36, %v2396_v21  ;;  %3670 = vpow2.f32 %v2306_v49  ;;  %v1596_v25 = vmul.f32 2.0, %v1404_v54  ;;  %6341 = vst [vmem:[#allocation110_spill] sm:$0xff] %v5465_v22  ;;  %v2505_v21 = vld [vmem:[#allocation2 + $0x8] sm:$0xff] }
 0x214   : > { %v2480_v2 = vadd.f32 %v2479_v53, %v2397_v26  ;;  %2569 = vst.msk [vmem:[#allocation2] sm:$0xff] %vm2568_vm14, %v2536_v41  ;;  %v1517_v39 = vpop.f32.mrf.mxu3  ;;  %1864 = vadd.xlane.f32.xlu2 %v1863_v55  ;;  %v2017_v13 = vpop.f32.mrf.mxu0  ;;  %v6342_v26 = vld [vmem:[#allocation51_spill] sm:$0xff] }
 0x215   : > { %v1597_v34 = vmul.f32 2.0, %v1517_v39  ;;  %v3665_v0 = vpop.eup %3664  ;;  %v1694_v57 = vmul.f32 1.442695, %v1596_v25  ;;  %v2208_v59 = vmul.f32 2.0, %v2017_v13  ;;  %v2130_v32 = vpop.f32.mrf.mxu1  ;;  %v6343_v25 = vld [vmem:[#allocation54_spill] sm:$0xff] }
 0x216   : > { %v2209_v62 = vmul.f32 2.0, %v2130_v32  ;;  %v1786_v53 = vmul.f32 %v3665_v0, %v6339_v33 }
 0x217   : > { %v3667_v56 = vpop.eup %3666  ;;  %v1696_v17 = vmul.f32 1.442695, %v1597_v34  ;;  %v1823_v36 = vpop.xlane.xlu0 %1822  ;;  %3672 = vpow2.f32 %v1694_v57  ;;  %v2308_v20 = vmul.f32 1.442695, %v2208_v59 }
 0x218   : > { %v3669_v24 = vpop.eup %3668  ;;  %v1915_v55 = vadd.f32 %v1823_v36, %v5303_v15  ;;  %v1787_v43 = vmul.f32 %v3667_v56, %v6340_v63  ;;  %v2310_v54 = vmul.f32 1.442695, %v2209_v62 }
 0x219   : > { %v3671_v49 = vpop.eup %3670  ;;  %v2398_v41 = vmul.f32 %v3669_v24, %v6342_v26  ;;  %3674 = vpow2.f32 %v1696_v17 }
 0x21a   : > { %v2399_v39 = vmul.f32 %v3671_v49, %v6343_v25  ;;  %3676 = vpow2.f32 %v2308_v20  ;;  %v2537_v34 = vadd.f32 %v2505_v21, %v1915_v55  ;;  %v1866_v13 = vadd.f32 %v1787_v43, %v1786_v53  ;;  %v1407_v33 = vpop.f32.mrf.mxu2  ;;  %v2506_v21 = vld [vmem:[#allocation2 + $0x10] sm:$0xff] }
 0x21b   : > { %v2444_v32 = vadd.f32 %v2443_v51, %v2398_v41  ;;  %3678 = vpow2.f32 %v2310_v54  ;;  %v1598_v57 = vmul.f32 2.0, %v1407_v33  ;;  %v6345_v33 = vld [vmem:[#allocation60_spill] sm:$0xff] }
 0x21c   : > { %v2481_v0 = vadd.f32 %v2480_v2, %v2399_v39  ;;  %2570 = vst.msk [vmem:[#allocation2 + $0x8] sm:$0xff] %vm2568_vm14, %v2537_v34  ;;  %v1520_v15 = vpop.f32.mrf.mxu3  ;;  %1867 = vadd.xlane.f32.xlu0 %v1866_v13  ;;  %v2020_v59 = vpop.f32.mrf.mxu0  ;;  %v6344_v39 = vld [vmem:[#allocation59_spill] sm:$0xff] }
 0x21d   : > { %v1599_v63 = vmul.f32 2.0, %v1520_v15  ;;  %v3673_v56 = vpop.eup %3672  ;;  %v1698_v36 = vmul.f32 1.442695, %v1598_v57  ;;  %v2210_v17 = vmul.f32 2.0, %v2020_v59  ;;  %v2133_v62 = vpop.f32.mrf.mxu1 }
 0x21e   : > { %v2211_v20 = vmul.f32 2.0, %v2133_v62  ;;  %v1788_v51 = vmul.f32 %v3673_v56, %v6342_v26 }
 0x21f   : > { %v3675_v24 = vpop.eup %3674  ;;  %v1700_v49 = vmul.f32 1.442695, %v1599_v63  ;;  %v1826_v53 = vpop.xlane.xlu1 %1825  ;;  %3680 = vpow2.f32 %v1698_v36  ;;  %v2312_v2 = vmul.f32 1.442695, %v2210_v17 }
 0x220   : > { %v3677_v55 = vpop.eup %3676  ;;  %v1916_v43 = vadd.f32 %v1826_v53, %v5319_v3  ;;  %v1789_v41 = vmul.f32 %v3675_v24, %v6343_v25  ;;  %v2314_v13 = vmul.f32 1.442695, %v2211_v20 }
 0x221   : > { %v3679_v54 = vpop.eup %3678  ;;  %v2400_v34 = vmul.f32 %v3677_v55, %v6344_v39  ;;  %3682 = vpow2.f32 %v1700_v49 }
 0x222   : > { %v2401_v57 = vmul.f32 %v3679_v54, %v6345_v33  ;;  %3684 = vpow2.f32 %v2312_v2  ;;  %v2538_v15 = vadd.f32 %v2506_v21, %v1916_v43  ;;  %v1869_v63 = vadd.f32 %v1789_v41, %v1788_v51  ;;  %v1410_v26 = vpop.f32.mrf.mxu2  ;;  %v2507_v21 = vld [vmem:[#allocation2 + $0x18] sm:$0xff] }
 0x223   : > { %v2445_v59 = vadd.f32 %v2444_v32, %v2400_v34  ;;  %3686 = vpow2.f32 %v2314_v13  ;;  %v1600_v36 = vmul.f32 2.0, %v1410_v26  ;;  %v6346_v13 = vld [vmem:[#allocation64_spill] sm:$0xff] }
 0x224   : > { %v2482_v56 = vadd.f32 %v2481_v0, %v2401_v57  ;;  %2571 = vst.msk [vmem:[#allocation2 + $0x10] sm:$0xff] %vm2568_vm14, %v2538_v15  ;;  %v1523_v3 = vpop.f32.mrf.mxu3  ;;  %1870 = vadd.xlane.f32.xlu1 %v1869_v63  ;;  %v2023_v17 = vpop.f32.mrf.mxu0  ;;  %v6347_v63 = vld [vmem:[#allocation66_spill] sm:$0xff] }
 0x225   : > { %v1601_v25 = vmul.f32 2.0, %v1523_v3  ;;  %v3681_v62 = vpop.eup %3680  ;;  %v1702_v24 = vmul.f32 1.442695, %v1600_v36  ;;  %v2212_v49 = vmul.f32 2.0, %v2023_v17  ;;  %v2136_v20 = vpop.f32.mrf.mxu1 }
 0x226   : > { %v2213_v2 = vmul.f32 2.0, %v2136_v20  ;;  %v1790_v32 = vmul.f32 %v3681_v62, %v6344_v39 }
 0x227   : > { %v3683_v53 = vpop.eup %3682  ;;  %v1704_v55 = vmul.f32 1.442695, %v1601_v25  ;;  %v1829_v51 = vpop.xlane.xlu2 %1828  ;;  %3688 = vpow2.f32 %v1702_v24  ;;  %v2316_v0 = vmul.f32 1.442695, %v2212_v49 }
 0x228   : > { %v3685_v43 = vpop.eup %3684  ;;  %v1917_v41 = vadd.f32 %v1829_v51, %v5337_v30  ;;  %v1791_v54 = vmul.f32 %v3683_v53, %v6345_v33  ;;  %v2318_v15 = vmul.f32 1.442695, %v2213_v2 }
 0x229   : > { %v3687_v34 = vpop.eup %3686  ;;  %v2402_v57 = vmul.f32 %v3685_v43, %v6346_v13  ;;  %3690 = vpow2.f32 %v1704_v55 }
 0x22a   : > { %v2403_v26 = vmul.f32 %v3687_v34, %v6347_v63  ;;  %3692 = vpow2.f32 %v2316_v0  ;;  %v2539_v36 = vadd.f32 %v2507_v21, %v1917_v41  ;;  %v1872_v3 = vadd.f32 %v1791_v54, %v1790_v32  ;;  %v1413_v39 = vpop.f32.mrf.mxu2  ;;  %v2508_v21 = vld [vmem:[#allocation2 + $0x20] sm:$0xff]  ;;  %v6348_v41 = vld [vmem:[#allocation70_spill] sm:$0xff] }
 0x22b   : > { %v2446_v25 = vadd.f32 %v2445_v59, %v2402_v57  ;;  %3694 = vpow2.f32 %v2318_v15  ;;  %v1602_v62 = vmul.f32 2.0, %v1413_v39  ;;  %v6349_v34 = vld [vmem:[#allocation71_spill] sm:$0xff] }
 0x22c   : > { %v2483_v17 = vadd.f32 %v2482_v56, %v2403_v26  ;;  %2572 = vst.msk [vmem:[#allocation2 + $0x18] sm:$0xff] %vm2568_vm14, %v2539_v36  ;;  %v1526_v30 = vpop.f32.mrf.mxu3  ;;  %1873 = vadd.xlane.f32.xlu2 %v1872_v3  ;;  %v5485_v24 = vpop.f32.mrf.mxu0 }
 0x22d   : > { %v1603_v33 = vmul.f32 2.0, %v1526_v30  ;;  %v3689_v49 = vpop.eup %3688  ;;  %v1706_v20 = vmul.f32 1.442695, %v1602_v62  ;;  %v5487_v53 = vpop.f32.mrf.mxu1 }
 0x22e   : > { %v1792_v59 = vmul.f32 %v3689_v49, %v6346_v13 }
 0x22f   : > { %v3691_v55 = vpop.eup %3690  ;;  %v1708_v2 = vmul.f32 1.442695, %v1603_v33  ;;  %v1832_v51 = vpop.xlane.xlu0 %1831  ;;  %3696 = vpow2.f32 %v1706_v20 }
 0x230   : > { %v3693_v32 = vpop.eup %3692  ;;  %v1918_v56 = vadd.f32 %v1832_v51, %v5307_v12  ;;  %v1793_v43 = vmul.f32 %v3691_v55, %v6347_v63 }
 0x231   : > { %v3695_v0 = vpop.eup %3694  ;;  %v2404_v54 = vmul.f32 %v3693_v32, %v6348_v41  ;;  %3698 = vpow2.f32 %v1708_v2  ;;  %v2509_v2 = vld [vmem:[#allocation2 + $0x28] sm:$0xff] }
 0x232   : > { %v2405_v57 = vmul.f32 %v3695_v0, %v6349_v34  ;;  %v2540_v15 = vadd.f32 %v2508_v21, %v1918_v56  ;;  %v1875_v26 = vadd.f32 %v1793_v43, %v1792_v59  ;;  %v1416_v3 = vpop.f32.mrf.mxu2 }
 0x233   : > { %v5494_v36 = vadd.f32 %v2446_v25, %v2404_v54  ;;  %v1604_v13 = vmul.f32 2.0, %v1416_v3 }
 0x234   : > { %v5496_v39 = vadd.f32 %v2483_v17, %v2405_v57  ;;  %2573 = vst.msk [vmem:[#allocation2 + $0x20] sm:$0xff] %vm2568_vm14, %v2540_v15  ;;  %v1529_v62 = vpop.f32.mrf.mxu3  ;;  %1876 = vadd.xlane.f32.xlu0 %v1875_v26  ;;  %v5499_v63 = vpop.f32.mrf.mxu0 }
 0x235   : > { %v1605_v12 = vmul.f32 2.0, %v1529_v62  ;;  %v3697_v30 = vpop.eup %3696  ;;  %v1710_v33 = vmul.f32 1.442695, %v1604_v13  ;;  %v5501_v49 = vpop.f32.mrf.mxu1  ;;  %v2510_v13 = vld [vmem:[#allocation2 + $0x30] sm:$0xff] }
 0x236   : > { %v1794_v21 = vmul.f32 %v3697_v30, %v6348_v41  ;;  %v6350_v62 = vld [vmem:[#allocation74_spill] sm:$0xff]  ;;  %v2217_v22 = vmul.f32 2.0, %v5501_v49 }
 0x237   : > { %v3699_v20 = vpop.eup %3698  ;;  %v1712_v55 = vmul.f32 1.442695, %v1605_v12  ;;  %v1835_v25 = vpop.xlane.xlu1 %1834  ;;  %3700 = vpow2.f32 %v1710_v33  ;;  %v6351_v33 = vld [vmem:[#allocation80_spill] sm:$0xff] }
 0x238   : > { %v1919_v17 = vadd.f32 %v1835_v25, %v5345_v50  ;;  %v1795_v51 = vmul.f32 %v3699_v20, %v6349_v34 }
 0x239   : > { %3702 = vpow2.f32 %v1712_v55 }
 0x23a   : > { %v2541_v59 = vadd.f32 %v2509_v2, %v1919_v17  ;;  %v1878_v32 = vadd.f32 %v1795_v51, %v1794_v21  ;;  %v1419_v56 = vpop.f32.mrf.mxu2 }
 0x23b   : > { %v1606_v43 = vmul.f32 2.0, %v1419_v56 }
 0x23c   : > { %2574 = vst.msk [vmem:[#allocation2 + $0x28] sm:$0xff] %vm2568_vm14, %v2541_v59  ;;  %v1532_v0 = vpop.f32.mrf.mxu3  ;;  %1879 = vadd.xlane.f32.xlu1 %v1878_v32  ;;  %v5507_v57 = vpop.f32.mrf.mxu0 }
 0x23d   : > { %v1607_v54 = vmul.f32 2.0, %v1532_v0  ;;  %v3701_v15 = vpop.eup %3700  ;;  %v1714_v26 = vmul.f32 1.442695, %v1606_v43  ;;  %v5509_v41 = vpop.f32.mrf.mxu1 }
 0x23e   : > { %v1796_v12 = vmul.f32 %v3701_v15, %v6350_v62 }
 0x23f   : > { %v3703_v3 = vpop.eup %3702  ;;  %v1716_v50 = vmul.f32 1.442695, %v1607_v54  ;;  %v1838_v34 = vpop.xlane.xlu2 %1837  ;;  %3704 = vpow2.f32 %v1714_v26  ;;  %v2511_v54 = vld [vmem:[#allocation2 + $0x38] sm:$0xff] }
 0x240   : > { %v1920_v30 = vadd.f32 %v1838_v34, %v5358_v1  ;;  %v1797_v20 = vmul.f32 %v3703_v3, %v6351_v33  ;;  %v6352_v26 = vld [vmem:[#allocation86_spill] sm:$0xff] }
 0x241   : > { %3706 = vpow2.f32 %v1716_v50 }
 0x242   : > { %v2542_v55 = vadd.f32 %v2510_v13, %v1920_v30  ;;  %v1881_v2 = vadd.f32 %v1797_v20, %v1796_v12  ;;  %v1422_v25 = vpop.f32.mrf.mxu2  ;;  %v6353_v13 = vld [vmem:[#allocation87_spill] sm:$0xff] }
 0x243   : > { %v1608_v21 = vmul.f32 2.0, %v1422_v25 }
 0x244   : > { %2575 = vst.msk [vmem:[#allocation2 + $0x30] sm:$0xff] %vm2568_vm14, %v2542_v55  ;;  %v1535_v17 = vpop.f32.mrf.mxu3  ;;  %1882 = vadd.xlane.f32.xlu2 %v1881_v2  ;;  %v5515_v59 = vpop.f32.mrf.mxu0 }
 0x245   : > { %v1609_v51 = vmul.f32 2.0, %v1535_v17  ;;  %v3705_v32 = vpop.eup %3704  ;;  %v1718_v56 = vmul.f32 1.442695, %v1608_v21  ;;  %v5517_v43 = vpop.f32.mrf.mxu1 }
 0x246   : > { %v1798_v3 = vmul.f32 %v3705_v32, %v6352_v26 }
 0x247   : > { %v3707_v0 = vpop.eup %3706  ;;  %v1720_v1 = vmul.f32 1.442695, %v1609_v51  ;;  %v1841_v15 = vpop.xlane.xlu0 %1840  ;;  %3708 = vpow2.f32 %v1718_v56 }
 0x248   : > { %v1921_v50 = vadd.f32 %v1841_v15, %v5390_v31  ;;  %v1799_v34 = vmul.f32 %v3707_v0, %v6353_v13  ;;  %v2512_v15 = vld [vmem:[#allocation2 + $0x40] sm:$0xff] }
 0x249   : > { %3710 = vpow2.f32 %v1720_v1  ;;  %v6354_v1 = vld [vmem:[#allocation93_spill] sm:$0xff] }
 0x24a   : > { %v2543_v12 = vadd.f32 %v2511_v54, %v1921_v50  ;;  %v1884_v30 = vadd.f32 %v1799_v34, %v1798_v3  ;;  %v1425_v20 = vpop.f32.mrf.mxu2  ;;  %v6355_v50 = vld [vmem:[#allocation94_spill] sm:$0xff] }
 0x24b   : > { %v1610_v55 = vmul.f32 2.0, %v1425_v20  ;;  %v2214_v20 = vmul.f32 2.0, %v5485_v24 }
 0x24c   : > { %2576 = vst.msk [vmem:[#allocation2 + $0x38] sm:$0xff] %vm2568_vm14, %v2543_v12  ;;  %v1538_v2 = vpop.f32.mrf.mxu3  ;;  %1885 = vadd.xlane.f32.xlu0 %v1884_v30  ;;  %v5523_v21 = vpop.f32.mrf.mxu0 }
 0x24d   : > { %v1611_v25 = vmul.f32 2.0, %v1538_v2  ;;  %v3709_v17 = vpop.eup %3708  ;;  %v1722_v51 = vmul.f32 1.442695, %v1610_v55  ;;  %v5525_v32 = vpop.f32.mrf.mxu1  ;;  %v2215_v55 = vmul.f32 2.0, %v5487_v53 }
 0x24e   : > { %v1800_v54 = vmul.f32 %v3709_v17, %v6354_v1 }
 0x24f   : > { %v3711_v56 = vpop.eup %3710  ;;  %v1724_v31 = vmul.f32 1.442695, %v1611_v25  ;;  %v1844_v0 = vpop.xlane.xlu1 %1843  ;;  %3712 = vpow2.f32 %v1722_v51  ;;  %v2322_v53 = vmul.f32 1.442695, %v2215_v55 }
 0x250   : > { %v1922_v3 = vadd.f32 %v1844_v0, %v5383_v6  ;;  %v1801_v34 = vmul.f32 %v3711_v56, %v6355_v50 }
 0x251   : > { %3714 = vpow2.f32 %v1724_v31  ;;  %v2320_v31 = vmul.f32 1.442695, %v2214_v20 }
 0x252   : > { %v2544_v12 = vadd.f32 %v2512_v15, %v1922_v3  ;;  %v1887_v30 = vadd.f32 %v1801_v34, %v1800_v54  ;;  %v1428_v2 = vpop.f32.mrf.mxu2  ;;  %v2513_v54 = vld [vmem:[#allocation2 + $0x48] sm:$0xff] }
 0x253   : > { %v1612_v25 = vmul.f32 2.0, %v1428_v2  ;;  %v6356_v3 = vld [vmem:[#allocation100_spill] sm:$0xff]  ;;  %v6357_v2 = vld [vmem:[#allocation101_spill] sm:$0xff] }
 0x254   : > { %2577 = vst.msk [vmem:[#allocation2 + $0x40] sm:$0xff] %vm2568_vm14, %v2544_v12  ;;  %v1541_v61 = vpop.f32.mrf.mxu3  ;;  %1888 = vadd.xlane.f32.xlu1 %v1887_v30  ;;  %v5533_v17 = vpop.f32.mrf.mxu0 }
 0x255   : > { %v1613_v19 = vmul.f32 2.0, %v1541_v61  ;;  %v3713_v51 = vpop.eup %3712  ;;  %v1726_v6 = vmul.f32 1.442695, %v1612_v25  ;;  %v5535_v0 = vpop.f32.mrf.mxu1  ;;  %v2216_v61 = vmul.f32 2.0, %v5499_v63 }
 0x256   : > { %v1802_v34 = vmul.f32 %v3713_v51, %v6356_v3 }
 0x257   : > { %v3715_v56 = vpop.eup %3714  ;;  %v1728_v15 = vmul.f32 1.442695, %v1613_v19  ;;  %v1847_v24 = vpop.xlane.xlu2 %1846  ;;  %3716 = vpow2.f32 %v1726_v6  ;;  %v2218_v19 = vmul.f32 2.0, %v5507_v57 }
 0x258   : > { %v1923_v12 = vadd.f32 %v1847_v24, %v5393_v8  ;;  %v1803_v30 = vmul.f32 %v3715_v56, %v6357_v2  ;;  %v2219_v8 = vmul.f32 2.0, %v5509_v41  ;;  %v2326_v24 = vmul.f32 1.442695, %v2217_v22  ;;  %v6359_v41 = vld [vmem:[#allocation108_spill] sm:$0xff] }
 0x259   : > { %3718 = vpow2.f32 %v1728_v15  ;;  %v2324_v15 = vmul.f32 1.442695, %v2216_v61 }
 0x25a   : > { %v2545_v5 = vadd.f32 %v2513_v54, %v1923_v12  ;;  %v1890_v25 = vadd.f32 %v1803_v30, %v1802_v34  ;;  %3720 = vpow2.f32 %v2320_v31  ;;  %v1431_v20 = vpop.f32.mrf.mxu2  ;;  %v6358_v12 = vld [vmem:[#allocation107_spill] sm:$0xff]  ;;  %v2328_v30 = vmul.f32 1.442695, %v2218_v19 }
 0x25b   : > { %3722 = vpow2.f32 %v2322_v53  ;;  %v1614_v55 = vmul.f32 2.0, %v1431_v20  ;;  %v2514_v53 = vld [vmem:[#allocation2 + $0x50] sm:$0xff]  ;;  %v2330_v29 = vmul.f32 1.442695, %v2219_v8 }
 0x25c   : > { %2578 = vst.msk [vmem:[#allocation2 + $0x48] sm:$0xff] %vm2568_vm14, %v2545_v5  ;;  %v1544_v51 = vpop.f32.mrf.mxu3  ;;  %1891 = vadd.xlane.f32.xlu2 %v1890_v25  ;;  %v5545_v56 = vpop.f32.mrf.mxu0 }
 0x25d   : > { %v1615_v6 = vmul.f32 2.0, %v1544_v51  ;;  %v3717_v63 = vpop.eup %3716  ;;  %v1730_v54 = vmul.f32 1.442695, %v1614_v55  ;;  %v5547_v31 = vpop.f32.mrf.mxu1  ;;  %v2220_v55 = vmul.f32 2.0, %v5515_v59  ;;  %v2223_v59 = vmul.f32 2.0, %v5525_v32 }
 0x25e   : > { %v1804_v5 = vmul.f32 %v3717_v63, %v6358_v12 }
 0x25f   : > { %v3719_v49 = vpop.eup %3718  ;;  %v1732_v34 = vmul.f32 1.442695, %v1615_v6  ;;  %v1850_v57 = vpop.xlane.xlu0 %1849  ;;  %3724 = vpow2.f32 %v1730_v54  ;;  %v2221_v6 = vmul.f32 2.0, %v5517_v43  ;;  %v2332_v43 = vmul.f32 1.442695, %v2220_v55 }
 0x260   : > { %v1924_v25 = vadd.f32 %v1850_v57, %v5426_v52  ;;  %v1805_v20 = vmul.f32 %v3719_v49, %v6359_v41  ;;  %v3721_v51 = vpop.eup %3720  ;;  %v2222_v52 = vmul.f32 2.0, %v5523_v21 }
 0x261   : > { %3726 = vpow2.f32 %v1732_v34  ;;  %v3723_v61 = vpop.eup %3722  ;;  %v2406_v19 = vmul.f32 %v3721_v51, %v6350_v62  ;;  %v2224_v34 = vmul.f32 2.0, %v5533_v17  ;;  %v2334_v21 = vmul.f32 1.442695, %v2221_v6  ;;  %v6361_v51 = vld [vmem:[#allocation115_spill] sm:$0xff] }
 0x262   : > { %3728 = vpow2.f32 %v2324_v15  ;;  %v2546_v48 = vadd.f32 %v2514_v53, %v1924_v25  ;;  %v1893_v22 = vadd.f32 %v1805_v20, %v1804_v5  ;;  %v1434_v40 = vpop.f32.mrf.mxu2  ;;  %v2407_v15 = vmul.f32 %v3723_v61, %v6351_v33  ;;  %v2515_v5 = vld [vmem:[#allocation2 + $0x58] sm:$0xff] }
 0x263   : > { %3730 = vpow2.f32 %v2326_v24  ;;  %v1616_v63 = vmul.f32 2.0, %v1434_v40  ;;  %v6360_v25 = vld [vmem:[#allocation114_spill] sm:$0xff]  ;;  %v2336_v20 = vmul.f32 1.442695, %v2222_v52  ;;  %v2448_v17 = vadd.f32 %v5494_v36, %v2406_v19 }
 0x264   : > { %3732 = vpow2.f32 %v2328_v30  ;;  %2579 = vst.msk [vmem:[#allocation2 + $0x50] sm:$0xff] %vm2568_vm14, %v2546_v48  ;;  %v1547_v8 = vpop.f32.mrf.mxu3  ;;  %1894 = vadd.xlane.f32.xlu0 %v1893_v22  ;;  %v2047_v49 = vpop.f32.mrf.mxu0  ;;  %v2225_v48 = vmul.f32 2.0, %v5535_v0  ;;  %v2485_v22 = vadd.f32 %v5496_v39, %v2407_v15  ;;  %v2338_v6 = vmul.f32 1.442695, %v2223_v59 }
 0x265   : > { %3734 = vpow2.f32 %v2330_v29  ;;  %v1617_v54 = vmul.f32 2.0, %v1547_v8  ;;  %v3725_v24 = vpop.eup %3724  ;;  %v1734_v62 = vmul.f32 1.442695, %v1616_v63  ;;  %v2160_v53 = vpop.f32.mrf.mxu1  ;;  %v2340_v63 = vmul.f32 1.442695, %v2224_v34 }
 0x266   : > { %v1806_v33 = vmul.f32 %v3725_v24, %v6360_v25  ;;  %v2227_v36 = vmul.f32 2.0, %v5547_v31  ;;  %v2228_v59 = vmul.f32 2.0, %v2047_v49 }
 0x267   : > { %v3727_v57 = vpop.eup %3726  ;;  %v1736_v40 = vmul.f32 1.442695, %v1617_v54  ;;  %v1853_v30 = vpop.xlane.xlu1 %1852  ;;  %3736 = vpow2.f32 %v1734_v62  ;;  %v2342_v62 = vmul.f32 1.442695, %v2225_v48 }
 0x268   : > { %v3729_v29 = vpop.eup %3728  ;;  %v1925_v32 = vadd.f32 %v1853_v30, %v5417_v42  ;;  %v1807_v61 = vmul.f32 %v3727_v57, %v6361_v51  ;;  %v2226_v42 = vmul.f32 2.0, %v5545_v56 }
 0x269   : > { %v3731_v55 = vpop.eup %3730  ;;  %3738 = vpow2.f32 %v1736_v40  ;;  %v2408_v52 = vmul.f32 %v3729_v29, %v6352_v26 }
 0x26a   : > { %v3733_v0 = vpop.eup %3732  ;;  %3740 = vpow2.f32 %v2332_v43  ;;  %v2547_v8 = vadd.f32 %v2515_v5, %v1925_v32  ;;  %v1896_v54 = vadd.f32 %v1807_v61, %v1806_v33  ;;  %v1437_v57 = vpop.f32.mrf.mxu2  ;;  %v2409_v30 = vmul.f32 %v3731_v55, %v6353_v13  ;;  %v2516_v33 = vld [vmem:[#allocation2 + $0x60] sm:$0xff]  ;;  %v6363_v55 = vld [vmem:[#allocation122_spill] sm:$0xff] }
 0x26b   : > { %v3735_v24 = vpop.eup %3734  ;;  %3742 = vpow2.f32 %v2334_v21  ;;  %v1618_v39 = vmul.f32 2.0, %v1437_v57  ;;  %v2410_v15 = vmul.f32 %v3733_v0, %v6354_v1  ;;  %v2229_v21 = vmul.f32 2.0, %v2160_v53 }
 0x26c   : > { %3744 = vpow2.f32 %v2336_v20  ;;  %2580 = vst.msk [vmem:[#allocation2 + $0x58] sm:$0xff] %vm2568_vm14, %v2547_v8  ;;  %v1550_v19 = vpop.f32.mrf.mxu3  ;;  %1897 = vadd.xlane.f32.xlu1 %v1896_v54  ;;  %v2050_v43 = vpop.f32.mrf.mxu0  ;;  %v2411_v56 = vmul.f32 %v3735_v24, %v6355_v50  ;;  %v2344_v31 = vmul.f32 1.442695, %v2226_v42  ;;  %v6362_v20 = vld [vmem:[#allocation121_spill] sm:$0xff]  ;;  %v2346_v61 = vmul.f32 1.442695, %v2227_v36 }
 0x26d   : > { %3746 = vpow2.f32 %v2338_v6  ;;  %v1619_v26 = vmul.f32 2.0, %v1550_v19  ;;  %v3737_v34 = vpop.eup %3736  ;;  %v1738_v13 = vmul.f32 1.442695, %v1618_v39  ;;  %v2163_v48 = vpop.f32.mrf.mxu1  ;;  %v2449_v0 = vadd.f32 %v2448_v17, %v2408_v52 }
 0x26e   : > { %3748 = vpow2.f32 %v2340_v63  ;;  %v1808_v32 = vmul.f32 %v3737_v34, %v6362_v20  ;;  %v2486_v53 = vadd.f32 %v2485_v22, %v2409_v30  ;;  %v2348_v63 = vmul.f32 1.442695, %v2228_v59 }
 0x26f   : > { %v3739_v40 = vpop.eup %3738  ;;  %3750 = vpow2.f32 %v2342_v62  ;;  %v1740_v5 = vmul.f32 1.442695, %v1619_v26  ;;  %v1856_v29 = vpop.xlane.xlu2 %1855  ;;  %v2350_v54 = vmul.f32 1.442695, %v2229_v21  ;;  %v2230_v24 = vmul.f32 2.0, %v2050_v43 }
 0x270   : > { %v3741_v1 = vpop.eup %3740  ;;  %3752 = vpow2.f32 %v1738_v13  ;;  %v1926_v49 = vadd.f32 %v1856_v29, %v5431_v16  ;;  %v1809_v6 = vmul.f32 %v3739_v40, %v6363_v55  ;;  %v2450_v39 = vadd.f32 %v2449_v0, %v2410_v15  ;;  %v2517_v29 = vld [vmem:[#allocation2 + $0x68] sm:$0xff] }
 0x271   : > { %v3743_v50 = vpop.eup %3742  ;;  %3754 = vpow2.f32 %v1740_v5  ;;  %v2231_v19 = vmul.f32 2.0, %v2163_v48  ;;  %v2487_v34 = vadd.f32 %v2486_v53, %v2411_v56  ;;  %v2412_v16 = vmul.f32 %v3741_v1, %v6356_v3  ;;  %v6364_v1 = vld [vmem:[#allocation127_spill] sm:$0xff] }
 0x272   : > { %v3745_v8 = vpop.eup %3744  ;;  %v2548_v62 = vadd.f32 %v2516_v33, %v1926_v49  ;;  %v1899_v42 = vadd.f32 %v1809_v6, %v1808_v32  ;;  %3756 = vpow2.f32 %v2344_v31  ;;  %v1440_v36 = vpop.f32.mrf.mxu2  ;;  %v2413_v30 = vmul.f32 %v3743_v50, %v6357_v2  ;;  %v6365_v49 = vld [vmem:[#allocation128_spill] sm:$0xff] }
 0x273   : > { %v3747_v57 = vpop.eup %3746  ;;  %3758 = vpow2.f32 %v2346_v61  ;;  %v1620_v17 = vmul.f32 2.0, %v1440_v36  ;;  %v2414_v59 = vmul.f32 %v3745_v8, %v6358_v12  ;;  %v2352_v13 = vmul.f32 1.442695, %v2230_v24 }
 0x274   : > { %v3749_v26 = vpop.eup %3748  ;;  %2581 = vst.msk [vmem:[#allocation2 + $0x60] sm:$0xff] %vm2568_vm14, %v2548_v62  ;;  %v1553_v22 = vpop.f32.mrf.mxu3  ;;  %1900 = vadd.xlane.f32.xlu2 %v1899_v42  ;;  %3760 = vpow2.f32 %v2348_v63  ;;  %v2354_v31 = vmul.f32 1.442695, %v2231_v19  ;;  %v2451_v0 = vadd.f32 %v2450_v39, %v2412_v16  ;;  %v2415_v53 = vmul.f32 %v3747_v57, %v6359_v41 }
 0x275   : > { %v3751_v52 = vpop.eup %3750  ;;  %v1621_v15 = vmul.f32 2.0, %v1553_v22  ;;  %v2053_v43 = vpop.f32.mrf.mxu0  ;;  %3762 = vpow2.f32 %v2350_v54  ;;  %v1742_v56 = vmul.f32 1.442695, %v1620_v17  ;;  %v2416_v54 = vmul.f32 %v3749_v26, %v6360_v25 }
 0x276   : > { %v3753_v21 = vpop.eup %3752  ;;  %v2232_v48 = vmul.f32 2.0, %v2053_v43  ;;  %v2166_v3 = vpop.f32.mrf.mxu1  ;;  %v2488_v19 = vadd.f32 %v2487_v34, %v2413_v30  ;;  %v2452_v22 = vadd.f32 %v2451_v0, %v2414_v59  ;;  %v2417_v25 = vmul.f32 %v3751_v52, %v6361_v51 }
 0x277   : > { %v3755_v40 = vpop.eup %3754  ;;  %v1744_v5 = vmul.f32 1.442695, %v1621_v15  ;;  %v2233_v33 = vmul.f32 2.0, %v2166_v3  ;;  %v1859_v32 = vpop.xlane.xlu0 %1858  ;;  %v1810_v61 = vmul.f32 %v3753_v21, %v6364_v1  ;;  %3764 = vpow2.f32 %v1742_v56 }
 0x278   : > { %v2356_v2 = vmul.f32 1.442695, %v2232_v48  ;;  %v1927_v12 = vadd.f32 %v1859_v32, %v5455_v18  ;;  %v1811_v6 = vmul.f32 %v3755_v40, %v6365_v49  ;;  %v3757_v50 = vpop.eup %3756  ;;  %v1261_v18 = vrot.slane %v5268_v37, 4  ;;  %v2518_v40 = vld [vmem:[#allocation2 + $0x70] sm:$0xff]  ;;  %v6367_v32 = vld [vmem:[#allocation135_spill] sm:$0xff] }
 0x279   : > { %3766 = vpow2.f32 %v1744_v5  ;;  %v2358_v63 = vmul.f32 1.442695, %v2233_v33  ;;  %v3759_v8 = vpop.eup %3758  ;;  %v2489_v39 = vadd.f32 %v2488_v19, %v2415_v53  ;;  %v2453_v34 = vadd.f32 %v2452_v22, %v2416_v54  ;;  %v6366_v5 = vld [vmem:[#allocation133_spill] sm:$0xff] }
 0x27a   : > { %3768 = vpow2.f32 %v2352_v13  ;;  %v2549_v24 = vadd.f32 %v2517_v29, %v1927_v12  ;;  %v1902_v62 = vadd.f32 %v1811_v6, %v1810_v61  ;;  %v3761_v42 = vpop.eup %3760  ;;  %v1443_v36 = vpop.f32.mrf.mxu2  ;;  %v2418_v30 = vmul.f32 %v3757_v50, %v6362_v20 }
 0x27b   : > { %3770 = vpow2.f32 %v2354_v31  ;;  %v3763_v17 = vpop.eup %3762  ;;  %v1622_v41 = vmul.f32 2.0, %v1443_v36  ;;  %v2419_v56 = vmul.f32 %v3759_v8, %v6363_v55  ;;  %v2420_v12 = vmul.f32 %v3761_v42, %v6364_v1  ;;  %v6368_v36 = vld [vmem:[#allocation138_spill] sm:$0xff] }
 0x27c   : > { %3772 = vpow2.f32 %v2356_v2  ;;  %2582 = vst.msk [vmem:[#allocation2 + $0x68] sm:$0xff] %vm2568_vm14, %v2549_v24  ;;  %v1556_v57 = vpop.f32.mrf.mxu3  ;;  %1903 = vadd.xlane.f32.xlu0 %v1902_v62  ;;  %v2490_v2 = vadd.f32 %v2489_v39, %v2417_v25  ;;  %v2421_v50 = vmul.f32 %v3763_v17, %v6365_v49  ;;  %v1298_v8 = vrot.slane %v5272_v28, 4  ;;  %v6369_v25 = vld [vmem:[#allocation139_spill] sm:$0xff] }
 0x27d   : > { %3774 = vpow2.f32 %v2358_v63  ;;  %v1623_v26 = vmul.f32 2.0, %v1556_v57  ;;  %v2056_v16 = vpop.f32.mrf.mxu0  ;;  %v3765_v15 = vpop.eup %3764  ;;  %v1746_v43 = vmul.f32 1.442695, %v1622_v41  ;;  %v2454_v54 = vadd.f32 %v2453_v34, %v2418_v30 }
 0x27e   : > { %v2234_v21 = vmul.f32 2.0, %v2056_v16  ;;  %v2169_v13 = vpop.f32.mrf.mxu1  ;;  %v1812_v33 = vmul.f32 %v3765_v15, %v6366_v5  ;;  %v2491_v62 = vadd.f32 %v2490_v2, %v2419_v56  ;;  %v1262_v57 = vadd.f32 %v1261_v18, %v5268_v37 }
 0x27f   : > { %v3767_v59 = vpop.eup %3766  ;;  %v1748_v48 = vmul.f32 1.442695, %v1623_v26  ;;  %v2235_v3 = vmul.f32 2.0, %v2169_v13  ;;  %v1862_v31 = vpop.xlane.xlu1 %1861  ;;  %3776 = vpow2.f32 %v1746_v43  ;;  %v2455_v49 = vadd.f32 %v2454_v54, %v2420_v12 }
 0x280   : > { %v3769_v51 = vpop.eup %3768  ;;  %v2360_v52 = vmul.f32 1.442695, %v2234_v21  ;;  %v1928_v29 = vadd.f32 %v1862_v31, %v5449_v27  ;;  %v1813_v61 = vmul.f32 %v3767_v59, %v6367_v32  ;;  %v2492_v39 = vadd.f32 %v2491_v62, %v2421_v50  ;;  %v2519_v21 = vld [vmem:[#allocation2 + $0x78] sm:$0xff]  ;;  %v2520_v50 = vld [vmem:[#allocation2 + $0x80] sm:$0xff] }
 0x281   : > { %v3771_v20 = vpop.eup %3770  ;;  %3778 = vpow2.f32 %v1748_v48  ;;  %v2362_v6 = vmul.f32 1.442695, %v2235_v3  ;;  %v2422_v27 = vmul.f32 %v3769_v51, %v6366_v5  ;;  %v1299_v34 = vadd.f32 %v1298_v8, %v5272_v28 }
 0x282   : > { %v3773_v55 = vpop.eup %3772  ;;  %3780 = vpow2.f32 %v2360_v52  ;;  %v2550_v0 = vadd.f32 %v2518_v40, %v1928_v29  ;;  %v1905_v53 = vadd.f32 %v1813_v61, %v1812_v33  ;;  %v1446_v24 = vpop.f32.mrf.mxu2  ;;  %v2423_v19 = vmul.f32 %v3771_v20, %v6367_v32 }
 0x283   : > { %v3775_v63 = vpop.eup %3774  ;;  %3782 = vpow2.f32 %v2362_v6  ;;  %v1624_v1 = vmul.f32 2.0, %v1446_v24  ;;  %v2424_v17 = vmul.f32 %v3773_v55, %v6368_v36  ;;  %v2456_v30 = vadd.f32 %v2455_v49, %v2422_v27 }
 0x284   : > { %2583 = vst.msk [vmem:[#allocation2 + $0x70] sm:$0xff] %vm2568_vm14, %v2550_v0  ;;  %v1559_v42 = vpop.f32.mrf.mxu3  ;;  %1906 = vadd.xlane.f32.xlu1 %v1905_v53  ;;  %v2425_v26 = vmul.f32 %v3775_v63, %v6369_v25  ;;  %v2493_v48 = vadd.f32 %v2492_v39, %v2423_v19  ;;  %v1263_v52 = vrot.slane %v1262_v57, 2  ;;  %v1300_v32 = vrot.slane %v1299_v34, 2  ;;  %v2521_v39 = vld [vmem:[#allocation2 + $0x88] sm:$0xff] }
 0x285   : > { %v1625_v22 = vmul.f32 2.0, %v1559_v42  ;;  %v3777_v41 = vpop.eup %3776  ;;  %v1750_v16 = vmul.f32 1.442695, %v1624_v1  ;;  %v2457_v40 = vadd.f32 %v2456_v30, %v2424_v17  ;;  %v2603_v30 = vld [vmem:[%s2602_s25] sm:$0x3] }
 0x286   : > { %v1814_v59 = vmul.f32 %v3777_v41, %v6368_v36  ;;  %v2494_v5 = vadd.f32 %v2493_v48, %v2425_v26  ;;  %v1264_v6 = vadd.f32 %v1263_v52, %v1262_v57  ;;  %v1301_v63 = vadd.f32 %v1300_v32, %v1299_v34  ;;  %v2525_v52 = vld [vmem:[#allocation2 + $0xa8] sm:$0xff] }
 0x287   : > { %v3779_v15 = vpop.eup %3778  ;;  %v1752_v43 = vmul.f32 1.442695, %v1625_v22  ;;  %v1865_v13 = vpop.xlane.xlu2 %1864  ;;  %3784 = vpow2.f32 %v1750_v16 }
 0x288   : > { %v3781_v56 = vpop.eup %3780  ;;  %v1929_v3 = vadd.f32 %v1865_v13, %v5457_v7  ;;  %v1815_v37 = vmul.f32 %v3779_v15, %v6369_v25  ;;  %v1265_v42 = vrot.slane %v1264_v6, 1  ;;  %v1302_v36 = vrot.slane %v1301_v63, 1 }
 0x289   : > { %v3783_v18 = vpop.eup %3782  ;;  %v2426_v31 = vmul.f32 %v3781_v56, %v5176_v60  ;;  %3786 = vpow2.f32 %v1752_v43  ;;  %v6370_v13 = vlaneseq  ;;  %v2522_v56 = vld [vmem:[#allocation2 + $0x90] sm:$0xff] }
 0x28a   : > { %v2427_v28 = vmul.f32 %v3783_v18, %v5179_v38  ;;  %v2551_v33 = vadd.f32 %v2519_v21, %v1929_v3  ;;  %v1908_v51 = vadd.f32 %v1815_v37, %v1814_v59  ;;  %v1266_v41 = vadd.f32 %v1265_v42, %v1264_v6  ;;  %v2523_v37 = vld [vmem:[#allocation2 + $0x98] sm:$0xff]  ;;  %v2532_v42 = vld [vmem:[#allocation2 + $0xe0] sm:$0xff] }
 0x28b   : > { %v2458_v29 = vadd.f32 %v2457_v40, %v2426_v31  ;;  %v1303_v25 = vadd.f32 %v1302_v36, %v1301_v63  ;;  %vm2613_vm5 = vcmp.lt.s32.totalorder %v6370_v13, 256 }
 0x28c   : > { %v2495_v61 = vadd.f32 %v2494_v5, %v2427_v28  ;;  %2584 = vst.msk [vmem:[#allocation2 + $0x78] sm:$0xff] %vm2568_vm14, %v2551_v33  ;;  %1909 = vadd.xlane.f32.xlu2 %v1908_v51  ;;  %v2524_v5 = vld [vmem:[#allocation2 + $0xa0] sm:$0xff] }
 0x28d   : > { %v2459_v7 = vrot.slane %v2458_v29, 4  ;;  %v3785_v20 = vpop.eup %3784 }
 0x28e   : > { %v2496_v2 = vrot.slane %v2495_v61, 4  ;;  %v1816_v53 = vmul.f32 %v3785_v20, %v5176_v60 }
 0x28f   : > { %v3787_v12 = vpop.eup %3786  ;;  %v2460_v55 = vadd.f32 %v2459_v7, %v2458_v29  ;;  %v1868_v0 = vpop.xlane.xlu0 %1867 }
 0x290   : > { %v2497_v8 = vadd.f32 %v2496_v2, %v2495_v61  ;;  %v1930_v54 = vadd.f32 %v1868_v0, %v5301_v10  ;;  %v1817_v27 = vmul.f32 %v3787_v12, %v5179_v38  ;;  %v2526_v61 = vld [vmem:[#allocation2 + $0xb0] sm:$0xff]  ;;  %v2527_v2 = vld [vmem:[#allocation2 + $0xb8] sm:$0xff] }
 0x291   : > { %v2461_v24 = vrot.slane %v2460_v55, 2 }
 0x292   : > { %v2498_v62 = vrot.slane %v2497_v8, 2  ;;  %v2552_v19 = vadd.f32 %v2520_v50, %v1930_v54  ;;  %v1911_v1 = vadd.f32 %v1817_v27, %v1816_v53  ;;  %v2529_v53 = vld [vmem:[#allocation2 + $0xc8] sm:$0xff]  ;;  %v2530_v54 = vld [vmem:[#allocation2 + $0xd0] sm:$0xff] }
 0x293   : > { %v2462_v49 = vadd.f32 %v2461_v24, %v2460_v55  ;;  %v2528_v55 = vld [vmem:[#allocation2 + $0xc0] sm:$0xff] }
 0x294   : > { %v2499_v17 = vadd.f32 %v2498_v62, %v2497_v8  ;;  %2585 = vst.msk [vmem:[#allocation2 + $0x80] sm:$0xff] %vm2568_vm14, %v2552_v19  ;;  %1912 = vadd.xlane.f32.xlu0 %v1911_v1  ;;  %v2531_v62 = vld [vmem:[#allocation2 + $0xd8] sm:$0xff] }
 0x295   : > { %v2463_v22 = vrot.slane %v2462_v49, 1 }
 0x296   : > { %v2500_v60 = vrot.slane %v2499_v17, 1 }
 0x297   : > { %v2464_v57 = vadd.f32 %v2463_v22, %v2462_v49  ;;  %v1871_v10 = vpop.xlane.xlu1 %1870  ;;  %v2533_v22 = vld [vmem:[#allocation2 + $0xe8] sm:$0xff] }
 0x298   : > { %v2501_v38 = vadd.f32 %v2500_v60, %v2499_v17  ;;  %v1931_v26 = vadd.f32 %v1871_v10, %v5289_v9 }
 0x299   : > { %v2502_v16 = vadd.f32 %v2464_v57, %v1266_v41 }
 0x29a   : > { %v2503_v15 = vadd.f32 %v2501_v38, %v1303_v25  ;;  %v2553_v34 = vadd.f32 %v2521_v39, %v1931_v26  ;;  %v2534_v39 = vld [vmem:[#allocation2 + $0xf0] sm:$0xff]  ;;  %v2535_v26 = vld [vmem:[#allocation2 + $0xf8] sm:$0xff] }
 0x29c   : > { %v2606_v43 = vrot.slane %v2503_v15, 7  ;;  %2586 = vst.msk [vmem:[#allocation2 + $0x88] sm:$0xff] %vm2568_vm14, %v2553_v34  ;;  %v6374_v15 = vld [vmem:[#allocation110_spill] sm:$0xff] }
 0x29e   : > { %v2608_v21 = vsel %vm6162_vm9, %v2502_v16, %v2606_v43 }
 0x29f   : > { %v2610_v59 = vadd.f32 %v2608_v21, %v2603_v30  ;;  %v1874_v48 = vpop.xlane.xlu2 %1873 }
 0x2a0   : > { %v1932_v3 = vadd.f32 %v1874_v48, %v5326_v35 }
 0x2a1   : > { %2615 = vst.msk [vmem:[%s2602_s25] sm:$0x3] %vm2613_vm5, %v2610_v59 }
 0x2a2   : > { %v2554_v9 = vadd.f32 %v2522_v56, %v1932_v3 }
 0x2a4   : > { %2587 = vst.msk [vmem:[#allocation2 + $0x90] sm:$0xff] %vm2568_vm14, %v2554_v9 }
 0x2a7   : > { %v1877_v18 = vpop.xlane.xlu0 %1876 }
 0x2a8   : > { %v1933_v40 = vadd.f32 %v1877_v18, %v5360_v44 }
 0x2aa   : > { %v2555_v31 = vadd.f32 %v2523_v37, %v1933_v40 }
 0x2ac   : > { %2588 = vst.msk [vmem:[#allocation2 + $0x98] sm:$0xff] %vm2568_vm14, %v2555_v31 }
 0x2af   : > { %v1880_v28 = vpop.xlane.xlu1 %1879 }
 0x2b0   : > { %v1934_v33 = vadd.f32 %v1880_v28, %v5328_v23 }
 0x2b2   : > { %v2556_v51 = vadd.f32 %v2524_v5, %v1934_v33 }
 0x2b4   : > { %2589 = vst.msk [vmem:[#allocation2 + $0xa0] sm:$0xff] %vm2568_vm14, %v2556_v51 }
 0x2b7   : > { %v1883_v35 = vpop.xlane.xlu2 %1882 }
 0x2b8   : > { %v1935_v29 = vadd.f32 %v1883_v35, %v5342_v47 }
 0x2ba   : > { %v2557_v32 = vadd.f32 %v2525_v52, %v1935_v29 }
 0x2bc   : > { %2590 = vst.msk [vmem:[#allocation2 + $0xa8] sm:$0xff] %vm2568_vm14, %v2557_v32 }
 0x2bf   : > { %v1886_v7 = vpop.xlane.xlu0 %1885 }
 0x2c0   : > { %v1936_v44 = vadd.f32 %v1886_v7, %v5374_v45 }
 0x2c2   : > { %v2558_v20 = vadd.f32 %v2526_v61, %v1936_v44 }
 0x2c4   : > { %2591 = vst.msk [vmem:[#allocation2 + $0xb0] sm:$0xff] %vm2568_vm14, %v2558_v20 }
 0x2c7   : > { %v1889_v12 = vpop.xlane.xlu1 %1888 }
 0x2c8   : > { %v1937_v23 = vadd.f32 %v1889_v12, %v5366_v58 }
 0x2ca   : > { %v2559_v6 = vadd.f32 %v2527_v2, %v1937_v23 }
 0x2cc   : > { %2592 = vst.msk [vmem:[#allocation2 + $0xb8] sm:$0xff] %vm2568_vm14, %v2559_v6 }
 0x2cf   : > { %v1892_v50 = vpop.xlane.xlu2 %1891 }
 0x2d0   : > { %v1938_v47 = vadd.f32 %v1892_v50, %v5377_v14 }
 0x2d2   : > { %v2560_v0 = vadd.f32 %v2528_v55, %v1938_v47 }
 0x2d4   : > { %2593 = vst.msk [vmem:[#allocation2 + $0xc0] sm:$0xff] %vm2568_vm14, %v2560_v0 }
 0x2d7   : > { %v1895_v63 = vpop.xlane.xlu0 %1894 }
 0x2d8   : > { %v1939_v45 = vadd.f32 %v1895_v63, %v5410_v46  ;;  %v6371_v46 = vld [vmem:[#allocation103_spill] sm:$0xff] }
 0x2da   : > { %v2561_v8 = vadd.f32 %v2529_v53, %v1939_v45 }
 0x2dc   : > { %2594 = vst.msk [vmem:[#allocation2 + $0xc8] sm:$0xff] %vm2568_vm14, %v2561_v8 }
 0x2df   : > { %v1898_v27 = vpop.xlane.xlu1 %1897 }
 0x2e0   : > { %v1940_v58 = vadd.f32 %v1898_v27, %v5401_v11  ;;  %v6372_v11 = vld [vmem:[#allocation96_spill] sm:$0xff] }
 0x2e2   : > { %v2562_v24 = vadd.f32 %v2530_v54, %v1940_v58 }
 0x2e4   : > { %2595 = vst.msk [vmem:[#allocation2 + $0xd0] sm:$0xff] %vm2568_vm14, %v2562_v24 }
 0x2e7   : > { %v1901_v19 = vpop.xlane.xlu2 %1900 }
 0x2e8   : > { %v1941_v14 = vadd.f32 %v1901_v19, %v5415_v4  ;;  %v6373_v4 = vld [vmem:[#allocation104_spill] sm:$0xff] }
 0x2ea   : > { %v2563_v1 = vadd.f32 %v2531_v62, %v1941_v14 }
 0x2ec   : > { %2596 = vst.msk [vmem:[#allocation2 + $0xd8] sm:$0xff] %vm2568_vm14, %v2563_v1 }
 0x2ef   : > { %v1904_v49 = vpop.xlane.xlu0 %1903 }
 0x2f0   : > { %v1942_v36 = vadd.f32 %v1904_v49, %v6371_v46 }
 0x2f2   : > { %v2564_v17 = vadd.f32 %v2532_v42, %v1942_v36 }
 0x2f4   : > { %2597 = vst.msk [vmem:[#allocation2 + $0xe0] sm:$0xff] %vm2568_vm14, %v2564_v17 }
 0x2f7   : > { %v1907_v60 = vpop.xlane.xlu1 %1906 }
 0x2f8   : > { %v1943_v41 = vadd.f32 %v1907_v60, %v6372_v11 }
 0x2fa   : > { %v2565_v57 = vadd.f32 %v2533_v22, %v1943_v41 }
 0x2fc   : > { %2598 = vst.msk [vmem:[#allocation2 + $0xe8] sm:$0xff] %vm2568_vm14, %v2565_v57 }
 0x2ff   : > { %v1910_v10 = vpop.xlane.xlu2 %1909 }
 0x300   : > { %v1944_v25 = vadd.f32 %v1910_v10, %v6373_v4 }
 0x302   : > { %v2566_v38 = vadd.f32 %v2534_v39, %v1944_v25 }
 0x304   : > { %2599 = vst.msk [vmem:[#allocation2 + $0xf0] sm:$0xff] %vm2568_vm14, %v2566_v38 }
 0x307   : > { %v1913_v16 = vpop.xlane.xlu0 %1912 }
 0x308   : > { %v1945_v34 = vadd.f32 %v1913_v16, %v6374_v15  ;;  %2618 = sbr.rel (%p3235_p10) target bundleno = 1169 (0x491), region = 48 }
 0x30a   : > { %v2567_v30 = vadd.f32 %v2535_v26, %v1945_v34 }
 0x30c   : > { %2600 = vst.msk [vmem:[#allocation2 + $0xf8] sm:$0xff] %vm2568_vm14, %v2567_v30 }
 0x30d   : > { %v6375_v43 = vld [vmem:[#allocation8_spill] sm:$0xff]  ;;  %v6376_v21 = vld [vmem:[#allocation42_spill] sm:$0xff]  ;;  %v6380_v9 = vld [vmem:[#allocation61_spill] sm:$0xff] }
 0x30e   : > { %v2619_v13 = vmul.f32 %v6376_v21, %v6375_v43  ;;  %v6377_v59 = vld [vmem:[#allocation12_spill] sm:$0xff]  ;;  %v6378_v56 = vld [vmem:[#allocation50_spill] sm:$0xff]  ;;  %v6384_v28 = vld [vmem:[#allocation55_spill] sm:$0xff] }
 0x30f   : > { %v2621_v48 = vmul.f32 %v6378_v56, %v6377_v59  ;;  %v6379_v3 = vld [vmem:[#allocation16_spill] sm:$0xff]  ;;  %v6381_v18 = vld [vmem:[#allocation10_spill] sm:$0xff]  ;;  %v6386_v52 = vld [vmem:[#allocation67_spill] sm:$0xff] }
 0x310   : > { %v2623_v37 = vmul.f32 %v6380_v9, %v6379_v3  ;;  %2651 = vadd.xlane.f32.xlu0 %v2619_v13  ;;  %v6382_v40 = vld [vmem:[#allocation46_spill] sm:$0xff]  ;;  %v6387_v29 = vld [vmem:[#allocation20_spill] sm:$0xff]  ;;  %v6388_v32 = vld [vmem:[#allocation73_spill] sm:$0xff] }
 0x311   : > { %2655 = vadd.xlane.f32.xlu1 %v2621_v48  ;;  %v2620_v31 = vmul.f32 %v6382_v40, %v6381_v18  ;;  %v6383_v5 = vld [vmem:[#allocation14_spill] sm:$0xff]  ;;  %v2625_v61 = vmul.f32 %v6388_v32, %v6387_v29  ;;  %v6390_v44 = vld [vmem:[#allocation81_spill] sm:$0xff]  ;;  %v6391_v2 = vld [vmem:[#allocation24_spill] sm:$0xff] }
 0x312   : > { %2659 = vadd.xlane.f32.xlu2 %v2623_v37  ;;  %v2622_v33 = vmul.f32 %v6384_v28, %v6383_v5  ;;  %v6385_v51 = vld [vmem:[#allocation18_spill] sm:$0xff]  ;;  %v6392_v12 = vld [vmem:[#allocation88_spill] sm:$0xff]  ;;  %v6394_v55 = vld [vmem:[#allocation95_spill] sm:$0xff] }
 0x313   : > { %v2624_v35 = vmul.f32 %v6386_v52, %v6385_v51  ;;  %v6389_v7 = vld [vmem:[#allocation22_spill] sm:$0xff]  ;;  %v2627_v23 = vmul.f32 %v6392_v12, %v6391_v2  ;;  %v6395_v47 = vld [vmem:[#allocation28_spill] sm:$0xff]  ;;  %v6398_v45 = vld [vmem:[#allocation109_spill] sm:$0xff] }
 0x314   : > { %v2626_v20 = vmul.f32 %v6390_v44, %v6389_v7  ;;  %v6393_v6 = vld [vmem:[#allocation26_spill] sm:$0xff]  ;;  %v6399_v54 = vld [vmem:[#allocation32_spill] sm:$0xff]  ;;  %v6402_v62 = vld [vmem:[#allocation123_spill] sm:$0xff] }
 0x315   : > { %v2628_v50 = vmul.f32 %v6394_v55, %v6393_v6  ;;  %v6396_v0 = vld [vmem:[#allocation102_spill] sm:$0xff]  ;;  %v6400_v27 = vld [vmem:[#allocation116_spill] sm:$0xff]  ;;  %v6404_v1 = vld [vmem:[#allocation129_spill] sm:$0xff] }
 0x316   : > { %v2629_v53 = vmul.f32 %v6396_v0, %v6395_v47  ;;  %v6397_v63 = vld [vmem:[#allocation30_spill] sm:$0xff]  ;;  %v2631_v58 = vmul.f32 %v6400_v27, %v6399_v54  ;;  %v6403_v14 = vld [vmem:[#allocation36_spill] sm:$0xff]  ;;  %v6407_v17 = vld [vmem:[#allocation9_spill] sm:$0xff] }
 0x317   : > { %v2630_v8 = vmul.f32 %v6398_v45, %v6397_v63  ;;  %v6401_v24 = vld [vmem:[#allocation34_spill] sm:$0xff]  ;;  %v2633_v42 = vmul.f32 %v6404_v1, %v6403_v14  ;;  %v6406_v46 = vld [vmem:[#allocation136_spill] sm:$0xff]  ;;  %v6409_v11 = vld [vmem:[#allocation11_spill] sm:$0xff] }
 0x318   : > { %2653 = vadd.xlane.f32.xlu0 %v2620_v31  ;;  %v2632_v19 = vmul.f32 %v6402_v62, %v6401_v24  ;;  %v6405_v49 = vld [vmem:[#allocation38_spill] sm:$0xff]  ;;  %v6408_v22 = vld [vmem:[#allocation140_spill] sm:$0xff]  ;;  %v6411_v39 = vld [vmem:[#allocation13_spill] sm:$0xff] }
 0x319   : > { %2657 = vadd.xlane.f32.xlu1 %v2622_v33  ;;  %v2634_v36 = vmul.f32 %v6406_v46, %v6405_v49  ;;  %v2635_v60 = vmul.f32 %v6408_v22, %v6407_v17  ;;  %v6410_v41 = vld [vmem:[#allocation142_spill] sm:$0xff]  ;;  %v6412_v10 = vld [vmem:[#allocation143_spill] sm:$0xff]  ;;  %v6414_v38 = vld [vmem:[#allocation144_spill] sm:$0xff] }
 0x31a   : > { %2661 = vadd.xlane.f32.xlu2 %v2624_v35  ;;  %v2636_v57 = vmul.f32 %v6410_v41, %v6409_v11  ;;  %v2637_v4 = vmul.f32 %v6412_v10, %v6411_v39  ;;  %v6413_v25 = vld [vmem:[#allocation15_spill] sm:$0xff]  ;;  %v6415_v16 = vld [vmem:[#allocation17_spill] sm:$0xff]  ;;  %v6418_v43 = vld [vmem:[#allocation146_spill] sm:$0xff] }
 0x31b   : > { %v2638_v26 = vmul.f32 %v6414_v38, %v6413_v25  ;;  %v6416_v15 = vld [vmem:[#allocation145_spill] sm:$0xff]  ;;  %v6417_v30 = vld [vmem:[#allocation19_spill] sm:$0xff]  ;;  %v6420_v59 = vld [vmem:[#allocation62_spill] sm:$0xff] }
 0x31c   : > { %v2639_v34 = vmul.f32 %v6416_v15, %v6415_v16  ;;  %v2640_v21 = vmul.f32 %v6418_v43, %v6417_v30  ;;  %v6419_v13 = vld [vmem:[#allocation21_spill] sm:$0xff]  ;;  %v6421_v48 = vld [vmem:[#allocation23_spill] sm:$0xff]  ;;  %v6422_v3 = vld [vmem:[#allocation68_spill] sm:$0xff] }
 0x31d   : > { %v2641_v56 = vmul.f32 %v6420_v59, %v6419_v13  ;;  %v2642_v9 = vmul.f32 %v6422_v3, %v6421_v48  ;;  %v6423_v37 = vld [vmem:[#allocation25_spill] sm:$0xff]  ;;  %v6425_v31 = vld [vmem:[#allocation27_spill] sm:$0xff]  ;;  %v6428_v51 = vld [vmem:[#allocation76_spill] sm:$0xff] }
 0x31e   : > { %v6424_v18 = vld [vmem:[#allocation69_spill] sm:$0xff]  ;;  %v6426_v5 = vld [vmem:[#allocation75_spill] sm:$0xff]  ;;  %v6430_v29 = vld [vmem:[#allocation82_spill] sm:$0xff] }
 0x31f   : > { %v2643_v40 = vmul.f32 %v6424_v18, %v6423_v37  ;;  %v2644_v28 = vmul.f32 %v6426_v5, %v6425_v31  ;;  %v6427_v33 = vld [vmem:[#allocation29_spill] sm:$0xff]  ;;  %v6429_v35 = vld [vmem:[#allocation31_spill] sm:$0xff]  ;;  %v6436_v6 = vld [vmem:[#allocation90_spill] sm:$0xff] }
 0x320   : > { %2663 = vadd.xlane.f32.xlu0 %v2625_v61  ;;  %v2645_v52 = vmul.f32 %v6428_v51, %v6427_v33  ;;  %v2646_v32 = vmul.f32 %v6430_v29, %v6429_v35  ;;  %v6431_v61 = vld [vmem:[#allocation33_spill] sm:$0xff]  ;;  %v6432_v7 = vld [vmem:[#allocation83_spill] sm:$0xff]  ;;  %v6464_v15 = vld [vmem:[#allocation56_spill] sm:$0xff] }
 0x321   : > { %2665 = vadd.xlane.f32.xlu1 %v2626_v20  ;;  %v2647_v44 = vmul.f32 %v6432_v7, %v6431_v61  ;;  %v6433_v20 = vld [vmem:[#allocation35_spill] sm:$0xff]  ;;  %v6434_v2 = vld [vmem:[#allocation89_spill] sm:$0xff] }
 0x322   : > { %2667 = vadd.xlane.f32.xlu2 %v2627_v23  ;;  %v2648_v12 = vmul.f32 %v6434_v2, %v6433_v20  ;;  %v6435_v23 = vld [vmem:[#allocation37_spill] sm:$0xff] }
 0x323   : > { %v2649_v55 = vmul.f32 %v6436_v6, %v6435_v23  ;;  %v6438_v47 = vld [vmem:[#allocation97_spill] sm:$0xff] }
 0x328   : > { %2669 = vadd.xlane.f32.xlu0 %v2628_v50  ;;  %v6437_v50 = vld [vmem:[#allocation39_spill] sm:$0xff] }
 0x329   : > { %2671 = vadd.xlane.f32.xlu1 %v2629_v53  ;;  %v2650_v0 = vmul.f32 %v6438_v47, %v6437_v50 }
 0x32a   : > { %2673 = vadd.xlane.f32.xlu2 %v2630_v8 }
 0x330   : > { %2675 = vadd.xlane.f32.xlu0 %v2631_v58 }
 0x331   : > { %2677 = vadd.xlane.f32.xlu1 %v2632_v19 }
 0x332   : > { %2679 = vadd.xlane.f32.xlu2 %v2633_v42 }
 0x338   : > { %2681 = vadd.xlane.f32.xlu0 %v2634_v36 }
 0x339   : > { %2683 = vadd.xlane.f32.xlu1 %v2635_v60 }
 0x33a   : > { %2685 = vadd.xlane.f32.xlu2 %v2636_v57 }
 0x340   : > { %2687 = vadd.xlane.f32.xlu0 %v2637_v4 }
 0x341   : > { %2689 = vadd.xlane.f32.xlu1 %v2638_v26 }
 0x342   : > { %2691 = vadd.xlane.f32.xlu2 %v2639_v34 }
 0x348   : > { %2693 = vadd.xlane.f32.xlu0 %v2640_v21 }
 0x349   : > { %2695 = vadd.xlane.f32.xlu1 %v2641_v56 }
 0x34a   : > { %2697 = vadd.xlane.f32.xlu2 %v2642_v9 }
 0x350   : > { %2699 = vadd.xlane.f32.xlu0 %v2643_v40 }
 0x351   : > { %2701 = vadd.xlane.f32.xlu1 %v2644_v28 }
 0x352   : > { %2703 = vadd.xlane.f32.xlu2 %v2645_v52 }
 0x358   : > { %2705 = vadd.xlane.f32.xlu0 %v2646_v32 }
 0x359   : > { %2707 = vadd.xlane.f32.xlu1 %v2647_v44 }
 0x35a   : > { %2709 = vadd.xlane.f32.xlu2 %v2648_v12 }
 0x360   : > { %2711 = vadd.xlane.f32.xlu0 %v2649_v55 }
 0x361   : > { %2713 = vadd.xlane.f32.xlu1 %v2650_v0  ;;  %v6452_v0 = vld [vmem:[#allocation120_spill] sm:$0xff] }
 0x362   : > { %vm6453_vm5 = vcmp.lt.s32.totalorder %v6452_v0, 500 }
 0x383   : > { %v2652_v53 = vpop.xlane.xlu0 %2651 }
 0x384   : > { %v2656_v63 = vpop.xlane.xlu1 %2655  ;;  %v2716_v54 = vsel %vm383_vm3, %v2652_v53, 0.0 }
 0x385   : > { %v2660_v45 = vpop.xlane.xlu2 %2659  ;;  %v2718_v62 = vsel %vm385_vm8, %v2656_v63, 0.0  ;;  %v2748_v42 = vsel %vm2568_vm14, %v2716_v54, 0.0 }
 0x386   : > { %v2751_v22 = vsel %vm2568_vm14, %v2718_v62, 0.0  ;;  %v2720_v11 = vsel %vm387_vm12, %v2660_v45, 0.0 }
 0x387   : > { %v2755_v25 = vsel %vm2568_vm14, %v2720_v11, 0.0 }
 0x38b   : > { %v2654_v27 = vpop.xlane.xlu0 %2653 }
 0x38c   : > { %v2658_v58 = vpop.xlane.xlu1 %2657  ;;  %v2717_v14 = vsel %vm384_vm7, %v2654_v27, 0.0  ;;  %v6454_v27 = vld [vmem:[#allocation126_spill] sm:$0xff] }
 0x38d   : > { %v2662_v1 = vpop.xlane.xlu2 %2661  ;;  %v2749_v49 = vsel %vm2568_vm14, %v2717_v14, 0.0  ;;  %v2719_v17 = vsel %vm386_vm10, %v2658_v58, 0.0  ;;  %vm6455_vm9 = vcmp.lt.s32.totalorder %v6454_v27, 500 }
 0x38e   : > { %v2750_v46 = vadd.f32 %v2749_v49, %v2748_v42  ;;  %v2753_v57 = vsel %vm2568_vm14, %v2719_v17, 0.0  ;;  %v2721_v4 = vsel %vm388_vm15, %v2662_v1, 0.0  ;;  %v6456_v42 = vld [vmem:[#allocation134_spill] sm:$0xff] }
 0x38f   : > { %v2757_v43 = vsel %vm2568_vm14, %v2721_v4, 0.0 }
 0x390   : > { %v2752_v41 = vadd.f32 %v2751_v22, %v2750_v46  ;;  %v6458_v46 = vld [vmem:[#allocation43_spill] sm:$0xff] }
 0x392   : > { %v2754_v39 = vadd.f32 %v2753_v57, %v2752_v41  ;;  %v6460_v41 = vld [vmem:[#allocation44_spill] sm:$0xff] }
 0x393   : > { %v2664_v38 = vpop.xlane.xlu0 %2663 }
 0x394   : > { %v2666_v26 = vpop.xlane.xlu1 %2665  ;;  %v2756_v16 = vadd.f32 %v2755_v25, %v2754_v39  ;;  %v2722_v34 = vsel %vm389_vm0, %v2664_v38, 0.0 }
 0x395   : > { %v2668_v30 = vpop.xlane.xlu2 %2667  ;;  %v2723_v59 = vsel %vm390_vm2, %v2666_v26, 0.0  ;;  %v2759_v3 = vsel %vm2568_vm14, %v2722_v34, 0.0  ;;  %v6462_v26 = vld [vmem:[#allocation52_spill] sm:$0xff] }
 0x396   : > { %v2758_v21 = vadd.f32 %v2757_v43, %v2756_v16  ;;  %v2724_v48 = vsel %vm391_vm4, %v2668_v30, 0.0  ;;  %v2761_v37 = vsel %vm2568_vm14, %v2723_v59, 0.0  ;;  %v6466_v59 = vld [vmem:[#allocation58_spill] sm:$0xff] }
 0x397   : > { %v2763_v18 = vsel %vm2568_vm14, %v2724_v48, 0.0 }
 0x398   : > { %v2760_v9 = vadd.f32 %v2759_v3, %v2758_v21 }
 0x39a   : > { %v2762_v40 = vadd.f32 %v2761_v37, %v2760_v9 }
 0x39b   : > { %v2670_v31 = vpop.xlane.xlu0 %2669 }
 0x39c   : > { %v2672_v5 = vpop.xlane.xlu1 %2671  ;;  %v2764_v28 = vadd.f32 %v2763_v18, %v2762_v40  ;;  %v2725_v51 = vsel %vm392_vm13, %v2670_v31, 0.0  ;;  %v6468_v40 = vld [vmem:[#allocation63_spill] sm:$0xff] }
 0x39d   : > { %v2726_v35 = vsel %vm393_vm11, %v2672_v5, 0.0  ;;  %v2674_v29 = vpop.xlane.xlu2 %2673  ;;  %v2765_v32 = vsel %vm2568_vm14, %v2725_v51, 0.0  ;;  %v6470_v5 = vld [vmem:[#allocation77_spill] sm:$0xff] }
 0x39e   : > { %v2767_v61 = vsel %vm2568_vm14, %v2726_v35, 0.0  ;;  %v2766_v7 = vadd.f32 %v2765_v32, %v2764_v28  ;;  %v2727_v20 = vsel %vm394_vm1, %v2674_v29, 0.0  ;;  %v6472_v29 = vld [vmem:[#allocation79_spill] sm:$0xff] }
 0x39f   : > { %v2769_v12 = vsel %vm2568_vm14, %v2727_v20, 0.0 }
 0x3a0   : > { %v2768_v2 = vadd.f32 %v2767_v61, %v2766_v7 }
 0x3a2   : > { %v2770_v55 = vadd.f32 %v2769_v12, %v2768_v2  ;;  %v6474_v12 = vld [vmem:[#allocation84_spill] sm:$0xff] }
 0x3a3   : > { %v2676_v23 = vpop.xlane.xlu0 %2675 }
 0x3a4   : > { %v2678_v6 = vpop.xlane.xlu1 %2677  ;;  %v2728_v47 = vsel %vm6163_vm6, %v2676_v23, 0.0  ;;  %vm6457_vm6 = vcmp.lt.s32.totalorder %v6456_v42, 500 }
 0x3a5   : > { %v2729_v53 = vsel %vm6453_vm5, %v2678_v6, 0.0  ;;  %v2680_v63 = vpop.xlane.xlu2 %2679  ;;  %v2771_v45 = vsel %vm2568_vm14, %v2728_v47, 0.0  ;;  %vm6459_vm5 = vcmp.lt.s32.totalorder %v6458_v46, 500  ;;  %v6476_v6 = vld [vmem:[#allocation91_spill] sm:$0xff] }
 0x3a6   : > { %v2773_v8 = vsel %vm2568_vm14, %v2729_v53, 0.0  ;;  %v2772_v54 = vadd.f32 %v2771_v45, %v2770_v55  ;;  %v2730_v58 = vsel %vm6455_vm9, %v2680_v63, 0.0  ;;  %vm6461_vm9 = vcmp.lt.s32.totalorder %v6460_v41, 500  ;;  %v6478_v63 = vld [vmem:[#allocation98_spill] sm:$0xff] }
 0x3a7   : > { %v2775_v62 = vsel %vm2568_vm14, %v2730_v58, 0.0 }
 0x3a8   : > { %v2774_v24 = vadd.f32 %v2773_v8, %v2772_v54 }
 0x3aa   : > { %v2776_v1 = vadd.f32 %v2775_v62, %v2774_v24  ;;  %v6480_v62 = vld [vmem:[#allocation105_spill] sm:$0xff] }
 0x3ab   : > { %v2682_v19 = vpop.xlane.xlu0 %2681 }
 0x3ac   : > { %v2684_v14 = vpop.xlane.xlu1 %2683  ;;  %v2731_v49 = vsel %vm6457_vm6, %v2682_v19, 0.0  ;;  %vm6463_vm6 = vcmp.lt.s32.totalorder %v6462_v26, 500 }
 0x3ad   : > { %v2732_v36 = vsel %vm6459_vm5, %v2684_v14, 0.0  ;;  %v2686_v17 = vpop.xlane.xlu2 %2685  ;;  %v2777_v22 = vsel %vm2568_vm14, %v2731_v49, 0.0  ;;  %vm6465_vm5 = vcmp.lt.s32.totalorder %v6464_v15, 500  ;;  %v6482_v14 = vld [vmem:[#allocation112_spill] sm:$0xff] }
 0x3ae   : > { %v2779_v60 = vsel %vm2568_vm14, %v2732_v36, 0.0  ;;  %v2778_v11 = vadd.f32 %v2777_v22, %v2776_v1  ;;  %v2733_v57 = vsel %vm6461_vm9, %v2686_v17, 0.0  ;;  %vm6467_vm9 = vcmp.lt.s32.totalorder %v6466_v59, 500  ;;  %v6484_v17 = vld [vmem:[#allocation119_spill] sm:$0xff] }
 0x3af   : > { %v2781_v10 = vsel %vm2568_vm14, %v2733_v57, 0.0 }
 0x3b0   : > { %v2780_v39 = vadd.f32 %v2779_v60, %v2778_v11 }
 0x3b2   : > { %v2782_v38 = vadd.f32 %v2781_v10, %v2780_v39  ;;  %v6486_v10 = vld [vmem:[#allocation131_spill] sm:$0xff] }
 0x3b3   : > { %v2688_v4 = vpop.xlane.xlu0 %2687 }
 0x3b4   : > { %v2690_v25 = vpop.xlane.xlu1 %2689  ;;  %v2734_v16 = vsel %vm6463_vm6, %v2688_v4, 0.0  ;;  %vm6469_vm6 = vcmp.lt.s32.totalorder %v6468_v40, 500 }
 0x3b5   : > { %v2735_v34 = vsel %vm6465_vm5, %v2690_v25, 0.0  ;;  %v2692_v30 = vpop.xlane.xlu2 %2691  ;;  %v2783_v43 = vsel %vm2568_vm14, %v2734_v16, 0.0  ;;  %vm6471_vm5 = vcmp.lt.s32.totalorder %v6470_v5, 500  ;;  %v6488_v25 = vld [vmem:[#allocation137_spill] sm:$0xff] }
 0x3b6   : > { %v2785_v21 = vsel %vm2568_vm14, %v2735_v34, 0.0  ;;  %v2784_v13 = vadd.f32 %v2783_v43, %v2782_v38  ;;  %v2736_v56 = vsel %vm6467_vm9, %v2692_v30, 0.0  ;;  %vm6473_vm9 = vcmp.lt.s32.totalorder %v6472_v29, 500 }
 0x3b7   : > { %v2787_v3 = vsel %vm2568_vm14, %v2736_v56, 0.0 }
 0x3b8   : > { %v2786_v48 = vadd.f32 %v2785_v21, %v2784_v13 }
 0x3ba   : > { %v2788_v18 = vadd.f32 %v2787_v3, %v2786_v48 }
 0x3bb   : > { %v2694_v9 = vpop.xlane.xlu0 %2693 }
 0x3bc   : > { %v2696_v37 = vpop.xlane.xlu1 %2695  ;;  %v2737_v31 = vsel %vm6469_vm6, %v2694_v9, 0.0  ;;  %vm6475_vm6 = vcmp.lt.s32.totalorder %v6474_v12, 500 }
 0x3bd   : > { %v2738_v28 = vsel %vm6471_vm5, %v2696_v37, 0.0  ;;  %v2698_v33 = vpop.xlane.xlu2 %2697  ;;  %v2789_v51 = vsel %vm2568_vm14, %v2737_v31, 0.0  ;;  %vm6477_vm5 = vcmp.lt.s32.totalorder %v6476_v6, 500 }
 0x3be   : > { %v2791_v52 = vsel %vm2568_vm14, %v2738_v28, 0.0  ;;  %v2790_v35 = vadd.f32 %v2789_v51, %v2788_v18  ;;  %v2739_v32 = vsel %vm6473_vm9, %v2698_v33, 0.0  ;;  %vm6479_vm9 = vcmp.lt.s32.totalorder %v6478_v63, 500 }
 0x3bf   : > { %v2793_v7 = vsel %vm2568_vm14, %v2739_v32, 0.0 }
 0x3c0   : > { %v2792_v61 = vadd.f32 %v2791_v52, %v2790_v35 }
 0x3c2   : > { %v2794_v2 = vadd.f32 %v2793_v7, %v2792_v61 }
 0x3c3   : > { %v2700_v44 = vpop.xlane.xlu0 %2699 }
 0x3c4   : > { %v2702_v20 = vpop.xlane.xlu1 %2701  ;;  %v2740_v23 = vsel %vm6475_vm6, %v2700_v44, 0.0  ;;  %vm6481_vm6 = vcmp.lt.s32.totalorder %v6480_v62, 500 }
 0x3c5   : > { %v2741_v55 = vsel %vm6477_vm5, %v2702_v20, 0.0  ;;  %v2704_v50 = vpop.xlane.xlu2 %2703  ;;  %v2795_v47 = vsel %vm2568_vm14, %v2740_v23, 0.0  ;;  %vm6483_vm5 = vcmp.lt.s32.totalorder %v6482_v14, 500 }
 0x3c6   : > { %v2797_v0 = vsel %vm2568_vm14, %v2741_v55, 0.0  ;;  %v2796_v53 = vadd.f32 %v2795_v47, %v2794_v2  ;;  %v2742_v45 = vsel %vm6479_vm9, %v2704_v50, 0.0  ;;  %vm6485_vm9 = vcmp.lt.s32.totalorder %v6484_v17, 500 }
 0x3c7   : > { %v2799_v54 = vsel %vm2568_vm14, %v2742_v45, 0.0 }
 0x3c8   : > { %v2798_v8 = vadd.f32 %v2797_v0, %v2796_v53 }
 0x3ca   : > { %v2800_v24 = vadd.f32 %v2799_v54, %v2798_v8 }
 0x3cb   : > { %v2706_v27 = vpop.xlane.xlu0 %2705 }
 0x3cc   : > { %v2708_v58 = vpop.xlane.xlu1 %2707  ;;  %v2743_v19 = vsel %vm6481_vm6, %v2706_v27, 0.0  ;;  %vm6487_vm6 = vcmp.lt.s32.totalorder %v6486_v10, 500 }
 0x3cd   : > { %v2744_v1 = vsel %vm6483_vm5, %v2708_v58, 0.0  ;;  %v2710_v42 = vpop.xlane.xlu2 %2709  ;;  %v2801_v49 = vsel %vm2568_vm14, %v2743_v19, 0.0  ;;  %vm6489_vm5 = vcmp.lt.s32.totalorder %v6488_v25, 500 }
 0x3ce   : > { %v2803_v46 = vsel %vm2568_vm14, %v2744_v1, 0.0  ;;  %v2802_v36 = vadd.f32 %v2801_v49, %v2800_v24  ;;  %v2745_v22 = vsel %vm6485_vm9, %v2710_v42, 0.0 }
 0x3cf   : > { %v2805_v11 = vsel %vm2568_vm14, %v2745_v22, 0.0 }
 0x3d0   : > { %v2804_v60 = vadd.f32 %v2803_v46, %v2802_v36 }
 0x3d2   : > { %v2806_v39 = vadd.f32 %v2805_v11, %v2804_v60 }
 0x3d3   : > { %v2712_v41 = vpop.xlane.xlu0 %2711 }
 0x3d4   : > { %v2714_v57 = vpop.xlane.xlu1 %2713  ;;  %v2746_v4 = vsel %vm6487_vm6, %v2712_v41, 0.0 }
 0x3d5   : > { %v2747_v38 = vsel %vm6489_vm5, %v2714_v57, 0.0  ;;  %v2807_v26 = vsel %vm2568_vm14, %v2746_v4, 0.0 }
 0x3d6   : > { %v2809_v16 = vsel %vm2568_vm14, %v2747_v38, 0.0  ;;  %v2808_v15 = vadd.f32 %v2807_v26, %v2806_v39 }
 0x3d8   : > { %v2810_v34 = vadd.f32 %v2809_v16, %v2808_v15 }
 0x3da   : > { %2811 = vadd.xlane.f32.xlu2 %v2810_v34 }
 0x44d   : > { %v2812_v30 = vpop.xlane.xlu2 %2811 }
 0x44e   : > { %v2813_v43 = vrot.slane %v2812_v30, 4 }
 0x450   : > { %v2814_v21 = vadd.f32 %v2813_v43, %v2812_v30 }
 0x452   : > { %v2815_v13 = vrot.slane %v2814_v21, 2 }
 0x454   : > { %v2816_v59 = vadd.f32 %v2815_v13, %v2814_v21 }
 0x456   : > { %v2817_v56 = vrot.slane %v2816_v59, 1 }
 0x458   : > { %v2818_v48 = vadd.f32 %v2817_v56, %v2816_v59 }
 0x45a   : > { %3347 = vpush %v2818_v48 }
 0x48b   : > { %s3348_s27 = spop %3347 }
 0x48c   : > { %s2820_s28 = smul.f32 2.0, %s3348_s27 }
 0x48e   : > { %s2821_s29 = sadd.f32 %s3274_s26, %s2820_s28 }
 0x490   : > { %2823 = sst [smem:[#allocation4 + $0x1]] %s2821_s29 }
 0x491 PF: > { %p2824_p11 = scmp.eq.s32.totalorder %s3922_s15, 1  ;;  %p3275_p12 = scmp.ne.s32.totalorder %s3922_s15, 1 }
 0x492   : > { %s2892_s30 = sld [smem:[#allocation4]] (!%p3275_p12) }
 0x493   : > { %2827 = sbr.rel (%p3275_p12) target bundleno = 1434 (0x59a), region = 52 }
 0x498   : > { %v2828_v3 = vld [vmem:[#allocation2] sm:$0xff]  ;;  %v2829_v9 = vld [vmem:[#allocation2 + $0x8] sm:$0xff]  ;;  %v2830_v37 = vld [vmem:[#allocation2 + $0x10] sm:$0xff] }
 0x499   : > { %v2831_v18 = vld [vmem:[#allocation2 + $0x18] sm:$0xff]  ;;  %v3276_v40 = vadd.f32 -7.389056, %v2828_v3  ;;  %v3277_v31 = vadd.f32 -7.389056, %v2829_v9  ;;  %v2832_v5 = vld [vmem:[#allocation2 + $0x20] sm:$0xff] }
 0x49a   : > { %v3278_v28 = vadd.f32 -7.389056, %v2830_v37  ;;  %v3279_v33 = vadd.f32 -7.389056, %v2831_v18  ;;  %v2833_v51 = vld [vmem:[#allocation2 + $0x28] sm:$0xff]  ;;  %v2834_v7 = vld [vmem:[#allocation2 + $0x30] sm:$0xff] }
 0x49b   : > { %v2893_v35 = vsel %vm383_vm3, %v3276_v40, 1.0  ;;  %v3280_v29 = vadd.f32 -7.389056, %v2832_v5  ;;  %v2894_v61 = vsel %vm384_vm7, %v3277_v31, 1.0  ;;  %v3281_v2 = vadd.f32 -7.389056, %v2833_v51 }
 0x49c   : > { %v2895_v20 = vsel %vm385_vm8, %v3278_v28, 1.0  ;;  %v2896_v23 = vsel %vm386_vm10, %v3279_v33, 1.0  ;;  %3810 = vlog2.f32 %v2893_v35  ;;  %v2835_v6 = vld [vmem:[#allocation2 + $0x38] sm:$0xff]  ;;  %v3282_v55 = vadd.f32 -7.389056, %v2834_v7  ;;  %v2836_v0 = vld [vmem:[#allocation2 + $0x40] sm:$0xff] }
 0x49d   : > { %3812 = vlog2.f32 %v2894_v61  ;;  %v2897_v47 = vsel %vm387_vm12, %v3280_v29, 1.0  ;;  %v3283_v53 = vadd.f32 -7.389056, %v2835_v6  ;;  %v2898_v45 = vsel %vm388_vm15, %v3281_v2, 1.0  ;;  %v2837_v8 = vld [vmem:[#allocation2 + $0x48] sm:$0xff]  ;;  %v2838_v19 = vld [vmem:[#allocation2 + $0x50] sm:$0xff] }
 0x49e   : > { %3814 = vlog2.f32 %v2895_v20  ;;  %v3284_v27 = vadd.f32 -7.389056, %v2836_v0  ;;  %v2899_v24 = vsel %vm389_vm0, %v3282_v55, 1.0  ;;  %v2839_v1 = vld [vmem:[#allocation2 + $0x58] sm:$0xff]  ;;  %v3285_v42 = vadd.f32 -7.389056, %v2837_v8 }
 0x49f   : > { %3816 = vlog2.f32 %v2896_v23  ;;  %v2900_v46 = vsel %vm390_vm2, %v3283_v53, 1.0  ;;  %v2840_v17 = vld [vmem:[#allocation2 + $0x60] sm:$0xff]  ;;  %v3286_v22 = vadd.f32 -7.389056, %v2838_v19  ;;  %v3287_v57 = vadd.f32 -7.389056, %v2839_v1 }
 0x4a0   : > { %3818 = vlog2.f32 %v2897_v47  ;;  %v2901_v11 = vsel %vm391_vm4, %v3284_v27, 1.0  ;;  %v2902_v25 = vsel %vm392_vm13, %v3285_v42, 1.0  ;;  %v2841_v15 = vld [vmem:[#allocation2 + $0x68] sm:$0xff]  ;;  %v3288_v34 = vadd.f32 -7.389056, %v2840_v17  ;;  %v2842_v3 = vld [vmem:[#allocation2 + $0x70] sm:$0xff] }
 0x4a1   : > { %3820 = vlog2.f32 %v2898_v45  ;;  %v2903_v21 = vsel %vm393_vm11, %v3286_v22, 1.0  ;;  %v3289_v37 = vadd.f32 -7.389056, %v2841_v15  ;;  %v2904_v40 = vsel %vm394_vm1, %v3287_v57, 1.0  ;;  %v2843_v33 = vld [vmem:[#allocation2 + $0x78] sm:$0xff]  ;;  %v6502_v35 = vld [vmem:[#allocation113_spill] sm:$0xff] }
 0x4a2   : > { %v3811_v54 = vpop.eup %3810  ;;  %3822 = vlog2.f32 %v2899_v24  ;;  %v3290_v52 = vadd.f32 -7.389056, %v2842_v3  ;;  %vm6503_vm3 = vcmp.lt.s32.totalorder %v6502_v35, 500  ;;  %v2844_v44 = vld [vmem:[#allocation2 + $0x80] sm:$0xff]  ;;  %v3291_v2 = vadd.f32 -7.389056, %v2843_v33 }
 0x4a3   : > { %v3813_v62 = vpop.eup %3812  ;;  %v2926_v39 = vmul.f32 0.6931472, %v3811_v54  ;;  %3824 = vlog2.f32 %v2900_v46  ;;  %v2905_v29 = vsel %vm6503_vm3, %v3288_v34, 1.0  ;;  %v6504_v12 = vld [vmem:[#allocation120_spill] sm:$0xff]  ;;  %v3292_v53 = vadd.f32 -7.389056, %v2844_v44 }
 0x4a4   : > { %v3815_v14 = vpop.eup %3814  ;;  %v2928_v10 = vmul.f32 0.6931472, %v3813_v62  ;;  %3826 = vlog2.f32 %v2901_v11  ;;  %vm6505_vm7 = vcmp.lt.s32.totalorder %v6504_v12, 500  ;;  %v2845_v47 = vld [vmem:[#allocation2 + $0x88] sm:$0xff]  ;;  %v6506_v63 = vld [vmem:[#allocation126_spill] sm:$0xff]  ;;  %v6510_v22 = vld [vmem:[#allocation43_spill] sm:$0xff] }
 0x4a5   : > { %v3817_v36 = vpop.eup %3816  ;;  %v2930_v38 = vmul.f32 0.6931472, %v3815_v14  ;;  %v2989_v30 = vsel %vm2568_vm14, %v2926_v39, 0.0  ;;  %3828 = vlog2.f32 %v2902_v25  ;;  %v2906_v23 = vsel %vm6505_vm7, %v3289_v37, 1.0  ;;  %v2846_v58 = vld [vmem:[#allocation2 + $0x90] sm:$0xff]  ;;  %v2847_v46 = vld [vmem:[#allocation2 + $0x98] sm:$0xff] }
 0x4a6   : > { %v3819_v41 = vpop.eup %3818  ;;  %v2932_v26 = vmul.f32 0.6931472, %v3817_v36  ;;  %v2990_v59 = vsel %vm2568_vm14, %v2928_v10, 0.0  ;;  %3830 = vlog2.f32 %v2903_v21  ;;  %vm6507_vm8 = vcmp.lt.s32.totalorder %v6506_v63, 500  ;;  %v6508_v19 = vld [vmem:[#allocation134_spill] sm:$0xff]  ;;  %v2848_v39 = vld [vmem:[#allocation2 + $0xa0] sm:$0xff] }
 0x4a7   : > { %v3821_v16 = vpop.eup %3820  ;;  %v2934_v13 = vmul.f32 0.6931472, %v3819_v41  ;;  %v2992_v56 = vsel %vm2568_vm14, %v2930_v38, 0.0  ;;  %v2991_v9 = vadd.f32 %v2990_v59, %v2989_v30  ;;  %3832 = vlog2.f32 %v2904_v40  ;;  %v6512_v25 = vld [vmem:[#allocation44_spill] sm:$0xff]  ;;  %v2850_v3 = vld [vmem:[#allocation2 + $0xb0] sm:$0xff]  ;;  %v2851_v33 = vld [vmem:[#allocation2 + $0xb8] sm:$0xff] }
 0x4a8   : > { %v3823_v48 = vpop.eup %3822  ;;  %v2936_v31 = vmul.f32 0.6931472, %v3821_v16  ;;  %v2994_v5 = vsel %vm2568_vm14, %v2932_v26, 0.0  ;;  %3834 = vlog2.f32 %v2905_v29  ;;  %v2907_v45 = vsel %vm6507_vm8, %v3290_v52, 1.0  ;;  %v2849_v34 = vld [vmem:[#allocation2 + $0xa8] sm:$0xff]  ;;  %v6518_v35 = vld [vmem:[#allocation58_spill] sm:$0xff] }
 0x4a9   : > { %v3825_v28 = vpop.eup %3824  ;;  %v2993_v51 = vadd.f32 %v2992_v56, %v2991_v9  ;;  %v2938_v32 = vmul.f32 0.6931472, %v3823_v48  ;;  %v2996_v61 = vsel %vm2568_vm14, %v2934_v13, 0.0  ;;  %3836 = vlog2.f32 %v2906_v23  ;;  %v6514_v21 = vld [vmem:[#allocation52_spill] sm:$0xff]  ;;  %v6520_v12 = vld [vmem:[#allocation63_spill] sm:$0xff]  ;;  %v6522_v63 = vld [vmem:[#allocation77_spill] sm:$0xff] }
 0x4aa   : > { %v3827_v7 = vpop.eup %3826  ;;  %v2940_v6 = vmul.f32 0.6931472, %v3825_v28  ;;  %v2998_v55 = vsel %vm2568_vm14, %v2936_v31, 0.0  ;;  %v3293_v62 = vadd.f32 -7.389056, %v2845_v47  ;;  %vm6509_vm10 = vcmp.lt.s32.totalorder %v6508_v19, 500 }
 0x4ab   : > { %v2995_v20 = vadd.f32 %v2994_v5, %v2993_v51  ;;  %v3829_v50 = vpop.eup %3828  ;;  %v2942_v8 = vmul.f32 0.6931472, %v3827_v7  ;;  %v3000_v54 = vsel %vm2568_vm14, %v2938_v32, 0.0  ;;  %v2908_v14 = vsel %vm6509_vm10, %v3291_v2, 1.0  ;;  %v6516_v18 = vld [vmem:[#allocation56_spill] sm:$0xff]  ;;  %v6524_v19 = vld [vmem:[#allocation79_spill] sm:$0xff] }
 0x4ac   : > { %v3831_v27 = vpop.eup %3830  ;;  %v2944_v1 = vmul.f32 0.6931472, %v3829_v50  ;;  %v3002_v42 = vsel %vm2568_vm14, %v2940_v6, 0.0  ;;  %3838 = vlog2.f32 %v2907_v45  ;;  %v3294_v17 = vadd.f32 -7.389056, %v2846_v58  ;;  %v2852_v44 = vld [vmem:[#allocation2 + $0xc0] sm:$0xff] }
 0x4ad   : > { %v2997_v0 = vadd.f32 %v2996_v61, %v2995_v20  ;;  %v3833_v49 = vpop.eup %3832  ;;  %vm6511_vm11 = vcmp.lt.s32.totalorder %v6510_v22, 500  ;;  %v2946_v11 = vmul.f32 0.6931472, %v3831_v27  ;;  %v3004_v41 = vsel %vm2568_vm14, %v2942_v8, 0.0  ;;  %v2853_v47 = vld [vmem:[#allocation2 + $0xc8] sm:$0xff]  ;;  %v2854_v58 = vld [vmem:[#allocation2 + $0xd0] sm:$0xff] }
 0x4ae   : > { %v2909_v60 = vsel %vm6511_vm11, %v3292_v53, 1.0  ;;  %v3835_v57 = vpop.eup %3834  ;;  %3840 = vlog2.f32 %v2908_v14  ;;  %v3295_v4 = vadd.f32 -7.389056, %v2847_v46  ;;  %vm6513_vm12 = vcmp.lt.s32.totalorder %v6512_v25, 500  ;;  %v2855_v46 = vld [vmem:[#allocation2 + $0xd8] sm:$0xff]  ;;  %v6526_v22 = vld [vmem:[#allocation84_spill] sm:$0xff] }
 0x4af   : > { %v2999_v24 = vadd.f32 %v2998_v55, %v2997_v0  ;;  %v2910_v38 = vsel %vm6513_vm12, %v3293_v62, 1.0  ;;  %v2948_v26 = vmul.f32 0.6931472, %v3833_v49  ;;  %v3006_v16 = vsel %vm2568_vm14, %v2944_v1, 0.0  ;;  %v3837_v15 = vpop.eup %3836  ;;  %v6528_v25 = vld [vmem:[#allocation91_spill] sm:$0xff] }
 0x4b0   : > { %3842 = vlog2.f32 %v2909_v60  ;;  %v3296_v43 = vadd.f32 -7.389056, %v2848_v39  ;;  %vm6515_vm13 = vcmp.lt.s32.totalorder %v6514_v21, 500  ;;  %v2950_v59 = vmul.f32 0.6931472, %v3835_v57  ;;  %v2856_v39 = vld [vmem:[#allocation2 + $0xe0] sm:$0xff] }
 0x4b1   : > { %v3001_v36 = vadd.f32 %v3000_v54, %v2999_v24  ;;  %v2911_v13 = vsel %vm6515_vm13, %v3294_v17, 1.0  ;;  %v3008_v56 = vsel %vm2568_vm14, %v2946_v11, 0.0  ;;  %3844 = vlog2.f32 %v2910_v38  ;;  %v6530_v21 = vld [vmem:[#allocation98_spill] sm:$0xff] }
 0x4b2   : > { %v3839_v48 = vpop.eup %3838  ;;  %v3297_v37 = vadd.f32 -7.389056, %v2849_v34  ;;  %vm6517_vm15 = vcmp.lt.s32.totalorder %v6516_v18, 500  ;;  %v2952_v31 = vmul.f32 0.6931472, %v3837_v15  ;;  %v3010_v5 = vsel %vm2568_vm14, %v2948_v26, 0.0 }
 0x4b3   : > { %v3003_v10 = vadd.f32 %v3002_v42, %v3001_v36  ;;  %v2912_v40 = vsel %vm6517_vm15, %v3295_v4, 1.0  ;;  %3846 = vlog2.f32 %v2911_v13  ;;  %v3298_v52 = vadd.f32 -7.389056, %v2850_v3  ;;  %v2857_v34 = vld [vmem:[#allocation2 + $0xe8] sm:$0xff]  ;;  %v2858_v3 = vld [vmem:[#allocation2 + $0xf0] sm:$0xff] }
 0x4b4   : > { %v3841_v28 = vpop.eup %3840  ;;  %vm6519_vm0 = vcmp.lt.s32.totalorder %v6518_v35, 500  ;;  %v2954_v32 = vmul.f32 0.6931472, %v3839_v48  ;;  %v3012_v61 = vsel %vm2568_vm14, %v2950_v59, 0.0  ;;  %3848 = vlog2.f32 %v2912_v40  ;;  %v6532_v18 = vld [vmem:[#allocation105_spill] sm:$0xff]  ;;  %v6534_v35 = vld [vmem:[#allocation112_spill] sm:$0xff] }
 0x4b5   : > { %v3005_v30 = vadd.f32 %v3004_v41, %v3003_v10  ;;  %v2913_v29 = vsel %vm6519_vm0, %v3296_v43, 1.0  ;;  %v3299_v2 = vadd.f32 -7.389056, %v2851_v33  ;;  %vm6521_vm1 = vcmp.lt.s32.totalorder %v6520_v12, 500  ;;  %v2859_v33 = vld [vmem:[#allocation2 + $0xf8] sm:$0xff] }
 0x4b6   : > { %v3843_v7 = vpop.eup %3842  ;;  %v2914_v23 = vsel %vm6521_vm1, %v3297_v37, 1.0  ;;  %v2956_v6 = vmul.f32 0.6931472, %v3841_v28  ;;  %v3014_v55 = vsel %vm2568_vm14, %v2952_v31, 0.0  ;;  %3850 = vlog2.f32 %v2913_v29 }
 0x4b7   : > { %v3007_v9 = vadd.f32 %v3006_v16, %v3005_v30  ;;  %v3845_v50 = vpop.eup %3844  ;;  %v3300_v53 = vadd.f32 -7.389056, %v2852_v44  ;;  %vm6523_vm2 = vcmp.lt.s32.totalorder %v6522_v63, 500  ;;  %v2958_v8 = vmul.f32 0.6931472, %v3843_v7 }
 0x4b8   : > { %v2915_v45 = vsel %vm6523_vm2, %v3298_v52, 1.0  ;;  %v3016_v54 = vsel %vm2568_vm14, %v2954_v32, 0.0  ;;  %3852 = vlog2.f32 %v2914_v23  ;;  %v3301_v62 = vadd.f32 -7.389056, %v2853_v47  ;;  %v6538_v47 = vld [vmem:[#allocation131_spill] sm:$0xff] }
 0x4b9   : > { %v3009_v51 = vadd.f32 %v3008_v56, %v3007_v9  ;;  %v3847_v27 = vpop.eup %3846  ;;  %vm6525_vm4 = vcmp.lt.s32.totalorder %v6524_v19, 500  ;;  %v2960_v1 = vmul.f32 0.6931472, %v3845_v50  ;;  %v3018_v42 = vsel %vm2568_vm14, %v2956_v6, 0.0 }
 0x4ba   : > { %v2916_v14 = vsel %vm6525_vm4, %v3299_v2, 1.0  ;;  %v3849_v49 = vpop.eup %3848  ;;  %3854 = vlog2.f32 %v2915_v45  ;;  %v3302_v17 = vadd.f32 -7.389056, %v2854_v58  ;;  %vm6527_vm9 = vcmp.lt.s32.totalorder %v6526_v22, 500  ;;  %v6536_v2 = vld [vmem:[#allocation119_spill] sm:$0xff] }
 0x4bb   : > { %v3011_v20 = vadd.f32 %v3010_v5, %v3009_v51  ;;  %v2917_v60 = vsel %vm6527_vm9, %v3300_v53, 1.0  ;;  %v2962_v11 = vmul.f32 0.6931472, %v3847_v27  ;;  %v3020_v41 = vsel %vm2568_vm14, %v2958_v8, 0.0 }
 0x4bc   : > { %v3851_v57 = vpop.eup %3850  ;;  %3856 = vlog2.f32 %v2916_v14  ;;  %v3303_v4 = vadd.f32 -7.389056, %v2855_v46  ;;  %vm6529_vm6 = vcmp.lt.s32.totalorder %v6528_v25, 500  ;;  %v2964_v26 = vmul.f32 0.6931472, %v3849_v49 }
 0x4bd   : > { %v3013_v0 = vadd.f32 %v3012_v61, %v3011_v20  ;;  %v2918_v38 = vsel %vm6529_vm6, %v3301_v62, 1.0  ;;  %v3022_v16 = vsel %vm2568_vm14, %v2960_v1, 0.0  ;;  %3858 = vlog2.f32 %v2917_v60 }
 0x4be   : > { %v3853_v15 = vpop.eup %3852  ;;  %v3304_v43 = vadd.f32 -7.389056, %v2856_v39  ;;  %vm6531_vm5 = vcmp.lt.s32.totalorder %v6530_v21, 500  ;;  %v2966_v59 = vmul.f32 0.6931472, %v3851_v57  ;;  %v3024_v56 = vsel %vm2568_vm14, %v2962_v11, 0.0 }
 0x4bf   : > { %v3015_v24 = vadd.f32 %v3014_v55, %v3013_v0  ;;  %v2919_v13 = vsel %vm6531_vm5, %v3302_v17, 1.0  ;;  %3860 = vlog2.f32 %v2918_v38  ;;  %v3305_v37 = vadd.f32 -7.389056, %v2857_v34 }
 0x4c0   : > { %v3855_v48 = vpop.eup %3854  ;;  %vm6533_vm3 = vcmp.lt.s32.totalorder %v6532_v18, 500  ;;  %v2968_v31 = vmul.f32 0.6931472, %v3853_v15  ;;  %v3026_v5 = vsel %vm2568_vm14, %v2964_v26, 0.0  ;;  %3862 = vlog2.f32 %v2919_v13 }
 0x4c1   : > { %v3017_v36 = vadd.f32 %v3016_v54, %v3015_v24  ;;  %v2920_v40 = vsel %vm6533_vm3, %v3303_v4, 1.0  ;;  %v3306_v52 = vadd.f32 -7.389056, %v2858_v3  ;;  %vm6535_vm7 = vcmp.lt.s32.totalorder %v6534_v35, 500  ;;  %v6540_v54 = vld [vmem:[#allocation137_spill] sm:$0xff] }
 0x4c2   : > { %v3857_v28 = vpop.eup %3856  ;;  %v2921_v29 = vsel %vm6535_vm7, %v3304_v43, 1.0  ;;  %v2970_v32 = vmul.f32 0.6931472, %v3855_v48  ;;  %v3028_v61 = vsel %vm2568_vm14, %v2966_v59, 0.0  ;;  %3864 = vlog2.f32 %v2920_v40 }
 0x4c3   : > { %v3019_v10 = vadd.f32 %v3018_v42, %v3017_v36  ;;  %v3859_v7 = vpop.eup %3858  ;;  %v3307_v20 = vadd.f32 -7.389056, %v2859_v33  ;;  %vm6537_vm8 = vcmp.lt.s32.totalorder %v6536_v2, 500  ;;  %v2972_v23 = vmul.f32 0.6931472, %v3857_v28 }
 0x4c4   : > { %v2922_v12 = vsel %vm6537_vm8, %v3305_v37, 1.0  ;;  %v3030_v6 = vsel %vm2568_vm14, %v2968_v31, 0.0  ;;  %3866 = vlog2.f32 %v2921_v29  ;;  %vm6539_vm10 = vcmp.lt.s32.totalorder %v6538_v47, 500 }
 0x4c5   : > { %v3021_v30 = vadd.f32 %v3020_v41, %v3019_v10  ;;  %v3861_v55 = vpop.eup %3860  ;;  %v2923_v0 = vsel %vm6539_vm10, %v3306_v52, 1.0  ;;  %v2974_v53 = vmul.f32 0.6931472, %v3859_v7  ;;  %v3032_v63 = vsel %vm2568_vm14, %v2970_v32, 0.0 }
 0x4c6   : > { %v3863_v45 = vpop.eup %3862  ;;  %3868 = vlog2.f32 %v2922_v12  ;;  %vm6541_vm11 = vcmp.lt.s32.totalorder %v6540_v54, 500  ;;  %v2976_v58 = vmul.f32 0.6931472, %v3861_v55  ;;  %v3034_v24 = vsel %vm2568_vm14, %v2972_v23, 0.0 }
 0x4c7   : > { %v3023_v9 = vadd.f32 %v3022_v16, %v3021_v30  ;;  %v2924_v27 = vsel %vm6541_vm11, %v3307_v20, 1.0  ;;  %3870 = vlog2.f32 %v2923_v0  ;;  %v2978_v14 = vmul.f32 0.6931472, %v3863_v45 }
 0x4c8   : > { %v3865_v62 = vpop.eup %3864  ;;  %v3036_v1 = vsel %vm2568_vm14, %v2974_v53, 0.0  ;;  %3872 = vlog2.f32 %v2924_v27  ;;  %v3038_v36 = vsel %vm2568_vm14, %v2976_v58, 0.0 }
 0x4c9   : > { %v3025_v51 = vadd.f32 %v3024_v56, %v3023_v9  ;;  %v2980_v46 = vmul.f32 0.6931472, %v3865_v62  ;;  %v3040_v11 = vsel %vm2568_vm14, %v2978_v14, 0.0 }
 0x4ca   : > { %v3867_v42 = vpop.eup %3866 }
 0x4cb   : > { %v3027_v44 = vadd.f32 %v3026_v5, %v3025_v51  ;;  %v2982_v60 = vmul.f32 0.6931472, %v3867_v42  ;;  %v3042_v10 = vsel %vm2568_vm14, %v2980_v46, 0.0 }
 0x4cc   : > { %v3869_v17 = vpop.eup %3868 }
 0x4cd   : > { %v3029_v50 = vadd.f32 %v3028_v61, %v3027_v44  ;;  %v3871_v41 = vpop.eup %3870  ;;  %v2984_v39 = vmul.f32 0.6931472, %v3869_v17  ;;  %v3044_v26 = vsel %vm2568_vm14, %v2982_v60, 0.0 }
 0x4ce   : > { %v3873_v4 = vpop.eup %3872  ;;  %v2986_v38 = vmul.f32 0.6931472, %v3871_v41 }
 0x4cf   : > { %v3031_v8 = vadd.f32 %v3030_v6, %v3029_v50  ;;  %v2988_v15 = vmul.f32 0.6931472, %v3873_v4  ;;  %v3046_v34 = vsel %vm2568_vm14, %v2984_v39, 0.0 }
 0x4d0   : > { %v3048_v43 = vsel %vm2568_vm14, %v2986_v38, 0.0 }
 0x4d1   : > { %v3033_v19 = vadd.f32 %v3032_v63, %v3031_v8  ;;  %v3050_v13 = vsel %vm2568_vm14, %v2988_v15, 0.0 }
 0x4d3   : > { %v3035_v49 = vadd.f32 %v3034_v24, %v3033_v19 }
 0x4d5   : > { %v3037_v22 = vadd.f32 %v3036_v1, %v3035_v49 }
 0x4d7   : > { %v3039_v57 = vadd.f32 %v3038_v36, %v3037_v22 }
 0x4d9   : > { %v3041_v25 = vadd.f32 %v3040_v11, %v3039_v57 }
 0x4db   : > { %v3043_v16 = vadd.f32 %v3042_v10, %v3041_v25 }
 0x4dd   : > { %v3045_v30 = vadd.f32 %v3044_v26, %v3043_v16 }
 0x4df   : > { %v3047_v21 = vadd.f32 %v3046_v34, %v3045_v30 }
 0x4e1   : > { %v3049_v59 = vadd.f32 %v3048_v43, %v3047_v21 }
 0x4e3   : > { %v3051_v56 = vadd.f32 %v3050_v13, %v3049_v59 }
 0x4e5   : > { %3052 = vadd.xlane.f32.xlu0 %v3051_v56 }
 0x558   : > { %v3053_v48 = vpop.xlane.xlu0 %3052 }
 0x559   : > { %v3054_v3 = vrot.slane %v3053_v48, 4 }
 0x55b   : > { %v3055_v9 = vadd.f32 %v3054_v3, %v3053_v48 }
 0x55d   : > { %v3056_v37 = vrot.slane %v3055_v9, 2 }
 0x55f   : > { %v3057_v18 = vadd.f32 %v3056_v37, %v3055_v9 }
 0x561   : > { %v3058_v40 = vrot.slane %v3057_v18, 1 }
 0x563   : > { %v3059_v31 = vadd.f32 %v3058_v40, %v3057_v18 }
 0x565   : > { %3349 = vpush %v3059_v31 }
 0x596   : > { %s3350_s5 = spop %3349 }
 0x597   : > { %s3061_s6 = sadd.f32 %s3350_s5, %s2892_s30 }
 0x599   : > { %3063 = sst [smem:[#allocation4]] %s3061_s6 }
 0x59a PF: > { %p3064_p13 = scmp.eq.s32.totalorder %s3926_s16, 1 }
 0x59c   : > { %p3065_p0 = pnand %p3064_p13, %p2824_p11 }
 0x59d   : > { %s3117_s15 = sld [smem:[#allocation4]] (!%p3065_p0) }
 0x59e   : > { %3068 = sbr.rel (%p3065_p0) target bundleno = 1650 (0x672), region = 56  ;;  %s3310_s16 = sld [smem:[#allocation4 + $0x1]] (!%p3065_p0) }
 0x5a3   : > { %v3069_v5 = vld [vmem:[#allocation3] sm:$0x3]  ;;  %v3070_v28 = vld [vmem:[#allocation3 + $0x2] sm:$0x3]  ;;  %v6542_v33 = vld [vmem:[#allocation40_spill] sm:$0xff]  ;;  %vm6543_vm12 = vcmask 1040384  }
 0x5a4   : > { %v3072_v51 = vadd.s32 256, %v6542_v33  ;;  %v3308_v52 = vadd.f32 -7.389056, %v3069_v5  ;;  %v3309_v35 = vadd.f32 -7.389056, %v3070_v28  ;;  %vm6544_vm13 = vmmov %vm6543_vm12  ;;  %s3119_s7 = ssub.f32 %s3117_s15, %s3310_s16 }
 0x5a5   : > { %vm6545_vm15 = vmmov %vm6543_vm12 }
 0x5a6   : > { %vm3076_vm14 = vcmp.lt.s32.totalorder %v3072_v51, 500  ;;  %v3081_v29 = vperm.slane %v3308_v52, 0  ;;  %v3082_v32 = vperm.slane %v3308_v52, 1  ;;  %v3083_v61 = vperm.slane %v3309_v35, 0  ;;  %vm6546_vm0 = vmmov %vm6543_vm12  ;;  %s3121_s10 = smul.f32 0.5, %s3119_s7 }
 0x5a7   : > { %v3084_v7 = vperm.slane %v3309_v35, 1 }
 0x5a8   : > { %3874 = vlog2.f32 %v3081_v29 }
 0x5a9   : > { %v3092_v44 = vsel %vm3076_vm14, %v3084_v7, 1.0  ;;  %3876 = vlog2.f32 %v3082_v32 }
 0x5aa   : > { %3878 = vlog2.f32 %v3083_v61 }
 0x5ab   : > { %3880 = vlog2.f32 %v3092_v44 }
 0x5ae   : > { %v3875_v20 = vpop.eup %3874 }
 0x5af   : > { %v3877_v2 = vpop.eup %3876  ;;  %v3094_v12 = vmul.f32 0.6931472, %v3875_v20 }
 0x5b0   : > { %v3879_v23 = vpop.eup %3878  ;;  %v3096_v6 = vmul.f32 0.6931472, %v3877_v2 }
 0x5b1   : > { %v3881_v55 = vpop.eup %3880  ;;  %v3098_v50 = vmul.f32 0.6931472, %v3879_v23  ;;  %v3101_v47 = vsel %vm6543_vm12, %v3094_v12, 0.0 }
 0x5b2   : > { %v3100_v0 = vmul.f32 0.6931472, %v3881_v55  ;;  %v3102_v53 = vsel %vm6544_vm13, %v3096_v6, 0.0 }
 0x5b3   : > { %v3103_v63 = vadd.f32 %v3102_v53, %v3101_v47  ;;  %v3104_v45 = vsel %vm6545_vm15, %v3098_v50, 0.0 }
 0x5b4   : > { %v3106_v8 = vsel %vm6546_vm0, %v3100_v0, 0.0 }
 0x5b5   : > { %v3105_v54 = vadd.f32 %v3104_v45, %v3103_v63 }
 0x5b7   : > { %v3107_v27 = vadd.f32 %v3106_v8, %v3105_v54 }
 0x5b9   : > { %3108 = vadd.xlane.f32.xlu0 %v3107_v27 }
 0x62c   : > { %v3109_v58 = vpop.xlane.xlu0 %3108 }
 0x62d   : > { %v3110_v24 = vrot.slane %v3109_v58, 4 }
 0x62f   : > { %v3111_v62 = vadd.f32 %v3110_v24, %v3109_v58 }
 0x631   : > { %v3112_v19 = vrot.slane %v3111_v62, 2 }
 0x633   : > { %v3113_v14 = vadd.f32 %v3112_v19, %v3111_v62 }
 0x635   : > { %v3114_v1 = vrot.slane %v3113_v14, 1 }
 0x637   : > { %v3115_v42 = vadd.f32 %v3114_v1, %v3113_v14 }
 0x639   : > { %3351 = vpush %v3115_v42 }
 0x66a   : > { %s3352_s8 = spop %3351 }
 0x66b   : > { %s3120_s9 = ssub.f32 %s3352_s8, %s3310_s16 }
 0x66d   : > { %s3122_s11 = smul.f32 0.5, %s3120_s9 }
 0x66f   : > { %s3123_s12 = sadd.f32 %s3122_s11, %s3121_s10 }
 0x671   : > { %3125 = sst [smem:[#allocation5]] %s3123_s12 }
 0x672 PF: > { %p3357_p1 = scmp.eq.s32.totalorder %s3223_s20, 3  ;;  %s3132_s23 = sshll.u32 %s5938_s4, 4  ;;  %s3133_s23 = int_to_ptr.hbm [resolvable:$true] %s3132_s23 }
 0x673   : > { %s3944_s24 = smov [#allocation5]  }
 0x674   : > { %3354 = dma.smem_to_hbm (%p3357_p1), %s3944_s24, 16, %s3133_s23, [#allocation6]  }
 0x675   : > { %3917 = dma.done.wait (%p3357_p1), [#allocation6], 16  }
 0x676   : > { %3919 = vsyncadd (%p3357_p1), [#allocation6], 4294967280 }
 0x677   : > { %3141 = sfence }
 0x678 PF: > { %s15_s19 = sadd.s32 1, %s3938_s19   ;;  %s6547_s15 = smov %s3930_s17 }
 0x679   : > { %p12_p2 = scmp.ge.s32.totalorder %s15_s19, 6   ;;  %s6548_s16 = smov %s3934_s18 }
 0x67a   : > { %s6549_s17 = smov %s6552_s21  ;;  %s6550_s18 = smov %s6556_s22 }
 0x67b   :  { %14 = sbr.rel (!%p12_p2) target bundleno = 3 (0x3), region = 98 }
 0x680   :  { %3147 = vsyncpa [#allocation6], 1 }
 0x681   :  { %3149 = vsyncpa [#allocation6 + $0x1], 1 }

</bundles_post_ra>
